<compile_context>
chip_gen: v6e
topology: v6e:2x2x1
jax: 0.10.0
libtpu: 0.0.40
codegen_flags: <defaults>
</compile_context>

<pallas_src>
import functools

import jax
import jax.numpy as jnp
from jax.experimental import pallas as pl
from jax.experimental.pallas import tpu as pltpu


# ----------------------------------------------------------------------------
# Kernel: one (non-final) LSTM layer over the full sequence, single grid step.
#   x_ref     : (S*B, D)   bf16   flattened sequence (row t*B+b == x[t, b])
#   wih_ref   : (D, 4H)    bf16
#   whh_ref   : (H, 4H)    bf16
#   b_ref     : (1, 4H)    f32    (b_ih + b_hh)
#   y_ref     : (S, B, H)  bf16   full hidden-state sequence (next layer input)
#   gates_scr : (S*B, 4H)  f32    precomputed input projection
#   h_scr/c_scr: (B, H)    f32    recurrent state
# ----------------------------------------------------------------------------
def _lstm_mid_kernel(x_ref, wih_ref, whh_ref, b_ref, y_ref,
                     gates_scr, h_scr, c_scr, *, seq_len, batch):
    H = whh_ref.shape[0]

    # Phase 1: input projection for ALL timesteps as one MXU-efficient matmul.
    gates_scr[...] = (
        jnp.dot(x_ref[...], wih_ref[...], preferred_element_type=jnp.float32)
        + b_ref[...]
    )

    h_scr[...] = jnp.zeros_like(h_scr)
    c_scr[...] = jnp.zeros_like(c_scr)
    whh = whh_ref[...]                                    # (H, 4H) bf16, resident

    # Phase 2: serial recurrence — only h @ W_hh + pointwise on the critical path.
    def step(t, carry):
        row = pl.multiple_of(t * batch, batch)
        h = h_scr[...]                                    # f32 (B, H)
        c = c_scr[...]
        g = gates_scr[pl.ds(row, batch), :] + jnp.dot(
            h.astype(whh.dtype), whh, preferred_element_type=jnp.float32)
        i_g = jax.nn.sigmoid(g[:, 0 * H:1 * H])
        f_g = jax.nn.sigmoid(g[:, 1 * H:2 * H])
        g_g = jnp.tanh(g[:, 2 * H:3 * H])
        o_g = jax.nn.sigmoid(g[:, 3 * H:4 * H])
        c_new = f_g * c + i_g * g_g
        h_new = o_g * jnp.tanh(c_new)
        h_scr[...] = h_new
        c_scr[...] = c_new
        y_ref[t] = h_new.astype(y_ref.dtype)              # VMEM store; HBM DMA once at end
        return carry

    jax.lax.fori_loop(0, seq_len, step, 0, unroll=True)


def lstm_mid_layer(x2, w_ih_t, w_hh_t, bias2d, *, seq_len, batch):
    """One stacked-LSTM layer: (S*B, D_in) -> (S, B, H) hidden sequence (bf16)."""
    SB, D = x2.shape
    H = w_hh_t.shape[0]
    kernel = functools.partial(_lstm_mid_kernel, seq_len=seq_len, batch=batch)
    return pl.pallas_call(
        kernel,
        out_shape=jax.ShapeDtypeStruct((seq_len, batch, H), jnp.bfloat16),
        in_specs=[pl.BlockSpec(memory_space=pltpu.MemorySpace.VMEM)] * 4,
        out_specs=pl.BlockSpec(memory_space=pltpu.MemorySpace.VMEM),
        scratch_shapes=[
            pltpu.VMEM((SB, 4 * H), jnp.float32),   # precomputed gates
            pltpu.VMEM((batch, H), jnp.float32),    # h state
            pltpu.VMEM((batch, H), jnp.float32),    # c state
        ],
    )(x2, w_ih_t, w_hh_t, bias2d)


# ----------------------------------------------------------------------------
# Kernel: final LSTM layer fused with the classifier MLP (Linear->ReLU->Linear).
# Never materializes the full hidden sequence; emits only (B, num_classes).
# ----------------------------------------------------------------------------
def _lstm_last_mlp_kernel(x_ref, wih_ref, whh_ref, b_ref,
                          w1_ref, b1_ref, w2_ref, b2_ref, out_ref,
                          gates_scr, h_scr, c_scr, *, seq_len, batch):
    H = whh_ref.shape[0]

    gates_scr[...] = (
        jnp.dot(x_ref[...], wih_ref[...], preferred_element_type=jnp.float32)
        + b_ref[...]
    )

    h_scr[...] = jnp.zeros_like(h_scr)
    c_scr[...] = jnp.zeros_like(c_scr)
    whh = whh_ref[...]

    def step(t, carry):
        row = pl.multiple_of(t * batch, batch)
        h = h_scr[...]
        c = c_scr[...]
        g = gates_scr[pl.ds(row, batch), :] + jnp.dot(
            h.astype(whh.dtype), whh, preferred_element_type=jnp.float32)
        i_g = jax.nn.sigmoid(g[:, 0 * H:1 * H])
        f_g = jax.nn.sigmoid(g[:, 1 * H:2 * H])
        g_g = jnp.tanh(g[:, 2 * H:3 * H])
        o_g = jax.nn.sigmoid(g[:, 3 * H:4 * H])
        c_new = f_g * c + i_g * g_g
        h_new = o_g * jnp.tanh(c_new)
        h_scr[...] = h_new
        c_scr[...] = c_new
        return carry

    jax.lax.fori_loop(0, seq_len, step, 0, unroll=True)

    # Fused classifier MLP on the final hidden state (== h_n[-1] in PyTorch).
    h_last = h_scr[...]
    z = jnp.dot(h_last.astype(w1_ref.dtype), w1_ref[...],
                preferred_element_type=jnp.float32) + b1_ref[...]
    z = jnp.maximum(z, 0.0)
    logits = jnp.dot(z.astype(w2_ref.dtype), w2_ref[...],
                     preferred_element_type=jnp.float32) + b2_ref[...]
    out_ref[...] = logits


def lstm_last_layer_with_mlp(x2, w_ih_t, w_hh_t, bias2d,
                             w1_t, b1_2d, w2_t, b2_2d, *, seq_len, batch):
    SB, D = x2.shape
    H = w_hh_t.shape[0]
    C = w2_t.shape[1]
    kernel = functools.partial(_lstm_last_mlp_kernel, seq_len=seq_len, batch=batch)
    return pl.pallas_call(
        kernel,
        out_shape=jax.ShapeDtypeStruct((batch, C), jnp.float32),
        in_specs=[pl.BlockSpec(memory_space=pltpu.MemorySpace.VMEM)] * 8,
        out_specs=pl.BlockSpec(memory_space=pltpu.MemorySpace.VMEM),
        scratch_shapes=[
            pltpu.VMEM((SB, 4 * H), jnp.float32),
            pltpu.VMEM((batch, H), jnp.float32),
            pltpu.VMEM((batch, H), jnp.float32),
        ],
    )(x2, w_ih_t, w_hh_t, bias2d, w1_t, b1_2d, w2_t, b2_2d)


# ----------------------------------------------------------------------------
# Full model forward
# ----------------------------------------------------------------------------
@functools.partial(jax.jit, static_argnames=("num_layers",))
def lstm_model_forward(x, params, num_layers):
    S, B, D = x.shape
    seq = x.astype(jnp.bfloat16).reshape(S * B, D)        # row t*B+b == x[t, b]
    for layer in range(num_layers - 1):
        p = params["lstm"][layer]
        y = lstm_mid_layer(seq, p["w_ih_t"], p["w_hh_t"], p["bias2d"],
                           seq_len=S, batch=B)            # (S, B, H) bf16
        seq = y.reshape(S * B, y.shape[-1])
    p = params["lstm"][num_layers - 1]
    m = params["mlp"]
    return lstm_last_layer_with_mlp(
        seq, p["w_ih_t"], p["w_hh_t"], p["bias2d"],
        m["w1_t"], m["b1_2d"], m["w2_t"], m["b2_2d"],
        seq_len=S, batch=B)


# ----------------------------------------------------------------------------
# Pure-JAX reference with the SAME precision policy (bf16 MXU inputs, f32
# accumulate / pointwise), so the tolerance can stay tight.
# ----------------------------------------------------------------------------
def lstm_model_reference(x, params, num_layers):
    S, B, _ = x.shape
    seq = x.astype(jnp.bfloat16)
    h_last = None
    for layer in range(num_layers):
        p = params["lstm"][layer]
        H = p["w_hh_t"].shape[0]
        gates_x = jnp.dot(seq.reshape(S * B, -1), p["w_ih_t"],
                          preferred_element_type=jnp.float32)
        gates_x = gates_x.reshape(S, B, 4 * H) + p["bias2d"]

        def step(carry, gx, p=p, H=H):
            h, c = carry
            g = gx + jnp.dot(h.astype(jnp.bfloat16), p["w_hh_t"],
                             preferred_element_type=jnp.float32)
            i = jax.nn.sigmoid(g[:, 0 * H:1 * H])
            f = jax.nn.sigmoid(g[:, 1 * H:2 * H])
            gg = jnp.tanh(g[:, 2 * H:3 * H])
            o = jax.nn.sigmoid(g[:, 3 * H:4 * H])
            c_new = f * c + i * gg
            h_new = o * jnp.tanh(c_new)
            return (h_new, c_new), h_new

        init = (jnp.zeros((B, H), jnp.float32), jnp.zeros((B, H), jnp.float32))
        (h_last, _), ys = jax.lax.scan(step, init, gates_x)
        seq = ys.astype(jnp.bfloat16)

    m = params["mlp"]
    z = jnp.dot(h_last.astype(jnp.bfloat16), m["w1_t"],
                preferred_element_type=jnp.float32) + m["b1_2d"]
    z = jnp.maximum(z, 0.0)
    return jnp.dot(z.astype(jnp.bfloat16), m["w2_t"],
                   preferred_element_type=jnp.float32) + m["b2_2d"]


# ----------------------------------------------------------------------------
# Deterministic parameter init (PyTorch-style uniform(-1/sqrt(H), 1/sqrt(H))).
# Weights stored pre-transposed, in bf16 (MXU inputs); biases stay f32.
# ----------------------------------------------------------------------------
def init_params(key, input_size, hidden_size, num_layers, mlp_hidden, num_classes):
    params = {"lstm": [], "mlp": {}}
    bound = 1.0 / jnp.sqrt(jnp.float32(hidden_size))
    for layer in range(num_layers):
        d_in = input_size if layer == 0 else hidden_size
        key, k1, k2, k3, k4 = jax.random.split(key, 5)
        w_ih = jax.random.uniform(k1, (4 * hidden_size, d_in), jnp.float32, -bound, bound)
        w_hh = jax.random.uniform(k2, (4 * hidden_size, hidden_size), jnp.float32, -bound, bound)
        b_ih = jax.random.uniform(k3, (4 * hidden_size,), jnp.float32, -bound, bound)
        b_hh = jax.random.uniform(k4, (4 * hidden_size,), jnp.float32, -bound, bound)
        params["lstm"].append({
            "w_ih_t": w_ih.T.astype(jnp.bfloat16),            # (d_in, 4H)
            "w_hh_t": w_hh.T.astype(jnp.bfloat16),            # (H, 4H)
            "bias2d": (b_ih + b_hh).reshape(1, 4 * hidden_size),
        })
    key, k1, k2, k3, k4 = jax.random.split(key, 5)
    b1 = 1.0 / jnp.sqrt(jnp.float32(hidden_size))
    b2 = 1.0 / jnp.sqrt(jnp.float32(mlp_hidden))
    params["mlp"] = {
        "w1_t": jax.random.uniform(k1, (hidden_size, mlp_hidden), jnp.float32,
                                   -b1, b1).astype(jnp.bfloat16),
        "b1_2d": jax.random.uniform(k2, (mlp_hidden,), jnp.float32, -b1, b1).reshape(1, -1),
        "w2_t": jax.random.uniform(k3, (mlp_hidden, num_classes), jnp.float32,
                                   -b2, b2).astype(jnp.bfloat16),
        "b2_2d": jax.random.uniform(k4, (num_classes,), jnp.float32, -b2, b2).reshape(1, -1),
    }
    return params


if __name__ == "__main__":
    # Small but vreg-aligned shapes: B=8 sublanes, H=128 lanes, 4H=512 (MXU-wide).
    SEQ, BATCH, INPUT_SIZE = 16, 8, 32
    HIDDEN, NUM_LAYERS = 128, 2
    MLP_HIDDEN, NUM_CLASSES = 128, 10

    key = jax.random.PRNGKey(0)
    key, kx = jax.random.split(key)
    x = jax.random.normal(kx, (SEQ, BATCH, INPUT_SIZE), jnp.float32)

    params = init_params(key, INPUT_SIZE, HIDDEN, NUM_LAYERS, MLP_HIDDEN, NUM_CLASSES)

    out = lstm_model_forward(x, params, NUM_LAYERS)
    out = jax.block_until_ready(out)

    ref = lstm_model_reference(x, params, NUM_LAYERS)
    assert out.shape == (BATCH, NUM_CLASSES), out.shape
    assert jnp.allclose(out, ref, atol=5e-3, rtol=5e-3), \
        f"max abs err {jnp.max(jnp.abs(out - ref))}"

    print("KERNEL_OK")
</pallas_src>

<mosaic_0001>
module attributes {stable_mosaic.version = 11 : i64} {
  func.func @_lstm_mid_kernel(%arg0: memref<128x32xbf16, #tpu.memory_space<vmem>>, %arg1: memref<32x512xbf16, #tpu.memory_space<vmem>>, %arg2: memref<128x512xbf16, #tpu.memory_space<vmem>>, %arg3: memref<1x512xf32, #tpu.memory_space<vmem>>, %arg4: memref<16x8x128xbf16, #tpu.memory_space<vmem>>, %arg5: memref<128x512xf32, #tpu.memory_space<vmem>>, %arg6: memref<8x128xf32, #tpu.memory_space<vmem>>, %arg7: memref<8x128xf32, #tpu.memory_space<vmem>>) attributes {dimension_semantics = [], scalar_prefetch = 0 : i64, scratch_operands = 3 : i64, tpu.core_type = #tpu.core_type<tc>} {
    %c0 = arith.constant 0 : index
    %c0_0 = arith.constant 0 : index
    %0 = vector.load %arg0[%c0, %c0_0] : memref<128x32xbf16, #tpu.memory_space<vmem>>, vector<128x32xbf16>
    %c0_1 = arith.constant 0 : index
    %c0_2 = arith.constant 0 : index
    %1 = vector.load %arg1[%c0_1, %c0_2] : memref<32x512xbf16, #tpu.memory_space<vmem>>, vector<32x512xbf16>
    %cst = arith.constant dense<0.000000e+00> : vector<128x512xf32>
    %2 = tpu.matmul %0, %1, %cst {dimension_numbers = #tpu.dot_dimension_numbers<[1], [0], [0], [1], [0, 0, 1, 1], [], []>} : vector<128x32xbf16>, vector<32x512xbf16>, vector<128x512xf32> -> vector<128x512xf32>
    %c0_3 = arith.constant 0 : index
    %c0_4 = arith.constant 0 : index
    %3 = vector.load %arg3[%c0_3, %c0_4] : memref<1x512xf32, #tpu.memory_space<vmem>>, vector<1x512xf32>
    %4 = vector.broadcast %3 : vector<1x512xf32> to vector<128x512xf32>
    %5 = arith.addf %2, %4 : vector<128x512xf32>
    %c0_5 = arith.constant 0 : index
    %c0_6 = arith.constant 0 : index
    %6 = vector.load %arg5[%c0_5, %c0_6] : memref<128x512xf32, #tpu.memory_space<vmem>>, vector<128x512xf32>
    tpu.vector_store %arg5[%c0_5, %c0_6], %5 {strides = array<i32>} : memref<128x512xf32, #tpu.memory_space<vmem>>, vector<128x512xf32>,
    %cst_7 = arith.constant 0.000000e+00 : f32
    %7 = vector.broadcast %cst_7 : f32 to vector<8x128xf32>
    %c0_8 = arith.constant 0 : index
    %c0_9 = arith.constant 0 : index
    %8 = vector.load %arg6[%c0_8, %c0_9] : memref<8x128xf32, #tpu.memory_space<vmem>>, vector<8x128xf32>
    tpu.vector_store %arg6[%c0_8, %c0_9], %7 {strides = array<i32>} : memref<8x128xf32, #tpu.memory_space<vmem>>, vector<8x128xf32>,
    %cst_10 = arith.constant 0.000000e+00 : f32
    %9 = vector.broadcast %cst_10 : f32 to vector<8x128xf32>
    %c0_11 = arith.constant 0 : index
    %c0_12 = arith.constant 0 : index
    %10 = vector.load %arg7[%c0_11, %c0_12] : memref<8x128xf32, #tpu.memory_space<vmem>>, vector<8x128xf32>
    tpu.vector_store %arg7[%c0_11, %c0_12], %9 {strides = array<i32>} : memref<8x128xf32, #tpu.memory_space<vmem>>, vector<8x128xf32>,
    %c0_13 = arith.constant 0 : index
    %c0_14 = arith.constant 0 : index
    %11 = vector.load %arg2[%c0_13, %c0_14] : memref<128x512xbf16, #tpu.memory_space<vmem>>, vector<128x512xbf16>
    %c0_i32 = arith.constant 0 : i32
    %c8_i32 = arith.constant 8 : i32
    %12 = arith.muli %c0_i32, %c8_i32 : i32
    %13 = tpu.assume_multiple %12, 8 : i32
    %c0_15 = arith.constant 0 : index
    %c0_16 = arith.constant 0 : index
    %14 = vector.load %arg6[%c0_15, %c0_16] : memref<8x128xf32, #tpu.memory_space<vmem>>, vector<8x128xf32>
    %c0_17 = arith.constant 0 : index
    %c0_18 = arith.constant 0 : index
    %15 = vector.load %arg7[%c0_17, %c0_18] : memref<8x128xf32, #tpu.memory_space<vmem>>, vector<8x128xf32>
    %16 = arith.index_cast %13 : i32 to index
    %c0_19 = arith.constant 0 : index
    %17 = vector.load %arg5[%16, %c0_19] : memref<128x512xf32, #tpu.memory_space<vmem>>, vector<8x512xf32>
    %18 = arith.truncf %14 : vector<8x128xf32> to vector<8x128xbf16>
    %cst_20 = arith.constant dense<0.000000e+00> : vector<8x512xf32>
    %19 = tpu.matmul %18, %11, %cst_20 {dimension_numbers = #tpu.dot_dimension_numbers<[1], [0], [0], [1], [0, 0, 1, 1], [], []>} : vector<8x128xbf16>, vector<128x512xbf16>, vector<8x512xf32> -> vector<8x512xf32>
    %20 = arith.addf %17, %19 : vector<8x512xf32>
    %21 = vector.extract_strided_slice %20 {offsets = [0, 0], sizes = [8, 128], strides = [1, 1]} : vector<8x512xf32> to vector<8x128xf32>
    %22 = arith.negf %21 : vector<8x128xf32>
    %23 = math.exp %22 : vector<8x128xf32>
    %cst_21 = arith.constant 1.000000e+00 : f32
    %24 = vector.broadcast %cst_21 : f32 to vector<8x128xf32>
    %25 = arith.addf %24, %23 : vector<8x128xf32>
    %26 = arith.divf %24, %25 : vector<8x128xf32>
    %27 = vector.extract_strided_slice %20 {offsets = [0, 128], sizes = [8, 128], strides = [1, 1]} : vector<8x512xf32> to vector<8x128xf32>
    %28 = arith.negf %27 : vector<8x128xf32>
    %29 = math.exp %28 : vector<8x128xf32>
    %cst_22 = arith.constant 1.000000e+00 : f32
    %30 = vector.broadcast %cst_22 : f32 to vector<8x128xf32>
    %31 = arith.addf %30, %29 : vector<8x128xf32>
    %32 = arith.divf %30, %31 : vector<8x128xf32>
    %33 = vector.extract_strided_slice %20 {offsets = [0, 256], sizes = [8, 128], strides = [1, 1]} : vector<8x512xf32> to vector<8x128xf32>
    %34 = math.tanh %33 : vector<8x128xf32>
    %35 = vector.extract_strided_slice %20 {offsets = [0, 384], sizes = [8, 128], strides = [1, 1]} : vector<8x512xf32> to vector<8x128xf32>
    %36 = arith.negf %35 : vector<8x128xf32>
    %37 = math.exp %36 : vector<8x128xf32>
    %cst_23 = arith.constant 1.000000e+00 : f32
    %38 = vector.broadcast %cst_23 : f32 to vector<8x128xf32>
    %39 = arith.addf %38, %37 : vector<8x128xf32>
    %40 = arith.divf %38, %39 : vector<8x128xf32>
    %41 = arith.mulf %32, %15 : vector<8x128xf32>
    %42 = arith.mulf %26, %34 : vector<8x128xf32>
    %43 = arith.addf %41, %42 : vector<8x128xf32>
    %44 = math.tanh %43 : vector<8x128xf32>
    %45 = arith.mulf %40, %44 : vector<8x128xf32>
    %c0_24 = arith.constant 0 : index
    %c0_25 = arith.constant 0 : index
    %46 = vector.load %arg6[%c0_24, %c0_25] : memref<8x128xf32, #tpu.memory_space<vmem>>, vector<8x128xf32>
    tpu.vector_store %arg6[%c0_24, %c0_25], %45 {strides = array<i32>} : memref<8x128xf32, #tpu.memory_space<vmem>>, vector<8x128xf32>,
    %c0_26 = arith.constant 0 : index
    %c0_27 = arith.constant 0 : index
    %47 = vector.load %arg7[%c0_26, %c0_27] : memref<8x128xf32, #tpu.memory_space<vmem>>, vector<8x128xf32>
    tpu.vector_store %arg7[%c0_26, %c0_27], %43 {strides = array<i32>} : memref<8x128xf32, #tpu.memory_space<vmem>>, vector<8x128xf32>,
    %48 = arith.truncf %45 : vector<8x128xf32> to vector<8x128xbf16>
    %49 = arith.index_cast %c0_i32 : i32 to index
    %c0_28 = arith.constant 0 : index
    %c0_29 = arith.constant 0 : index
    %50 = vector.load %arg4[%49, %c0_28, %c0_29] : memref<16x8x128xbf16, #tpu.memory_space<vmem>>, vector<1x8x128xbf16>
    %51 = vector.shape_cast %50 : vector<1x8x128xbf16> to vector<8x128xbf16>
    %52 = vector.shape_cast %48 : vector<8x128xbf16> to vector<1x8x128xbf16>
    tpu.vector_store %arg4[%49, %c0_28, %c0_29], %52 {strides = array<i32>} : memref<16x8x128xbf16, #tpu.memory_space<vmem>>, vector<1x8x128xbf16>,
    %c1_i32 = arith.constant 1 : i32
    %c8_i32_30 = arith.constant 8 : i32
    %53 = arith.muli %c1_i32, %c8_i32_30 : i32
    %54 = tpu.assume_multiple %53, 8 : i32
    %c0_31 = arith.constant 0 : index
    %c0_32 = arith.constant 0 : index
    %55 = vector.load %arg6[%c0_31, %c0_32] : memref<8x128xf32, #tpu.memory_space<vmem>>, vector<8x128xf32>
    %c0_33 = arith.constant 0 : index
    %c0_34 = arith.constant 0 : index
    %56 = vector.load %arg7[%c0_33, %c0_34] : memref<8x128xf32, #tpu.memory_space<vmem>>, vector<8x128xf32>
    %57 = arith.index_cast %54 : i32 to index
    %c0_35 = arith.constant 0 : index
    %58 = vector.load %arg5[%57, %c0_35] : memref<128x512xf32, #tpu.memory_space<vmem>>, vector<8x512xf32>
    %59 = arith.truncf %55 : vector<8x128xf32> to vector<8x128xbf16>
    %cst_36 = arith.constant dense<0.000000e+00> : vector<8x512xf32>
    %60 = tpu.matmul %59, %11, %cst_36 {dimension_numbers = #tpu.dot_dimension_numbers<[1], [0], [0], [1], [0, 0, 1, 1], [], []>} : vector<8x128xbf16>, vector<128x512xbf16>, vector<8x512xf32> -> vector<8x512xf32>
    %61 = arith.addf %58, %60 : vector<8x512xf32>
    %62 = vector.extract_strided_slice %61 {offsets = [0, 0], sizes = [8, 128], strides = [1, 1]} : vector<8x512xf32> to vector<8x128xf32>
    %63 = arith.negf %62 : vector<8x128xf32>
    %64 = math.exp %63 : vector<8x128xf32>
    %cst_37 = arith.constant 1.000000e+00 : f32
    %65 = vector.broadcast %cst_37 : f32 to vector<8x128xf32>
    %66 = arith.addf %65, %64 : vector<8x128xf32>
    %67 = arith.divf %65, %66 : vector<8x128xf32>
    %68 = vector.extract_strided_slice %61 {offsets = [0, 128], sizes = [8, 128], strides = [1, 1]} : vector<8x512xf32> to vector<8x128xf32>
    %69 = arith.negf %68 : vector<8x128xf32>
    %70 = math.exp %69 : vector<8x128xf32>
    %cst_38 = arith.constant 1.000000e+00 : f32
    %71 = vector.broadcast %cst_38 : f32 to vector<8x128xf32>
    %72 = arith.addf %71, %70 : vector<8x128xf32>
    %73 = arith.divf %71, %72 : vector<8x128xf32>
    %74 = vector.extract_strided_slice %61 {offsets = [0, 256], sizes = [8, 128], strides = [1, 1]} : vector<8x512xf32> to vector<8x128xf32>
    %75 = math.tanh %74 : vector<8x128xf32>
    %76 = vector.extract_strided_slice %61 {offsets = [0, 384], sizes = [8, 128], strides = [1, 1]} : vector<8x512xf32> to vector<8x128xf32>
    %77 = arith.negf %76 : vector<8x128xf32>
    %78 = math.exp %77 : vector<8x128xf32>
    %cst_39 = arith.constant 1.000000e+00 : f32
    %79 = vector.broadcast %cst_39 : f32 to vector<8x128xf32>
    %80 = arith.addf %79, %78 : vector<8x128xf32>
    %81 = arith.divf %79, %80 : vector<8x128xf32>
    %82 = arith.mulf %73, %56 : vector<8x128xf32>
    %83 = arith.mulf %67, %75 : vector<8x128xf32>
    %84 = arith.addf %82, %83 : vector<8x128xf32>
    %85 = math.tanh %84 : vector<8x128xf32>
    %86 = arith.mulf %81, %85 : vector<8x128xf32>
    %c0_40 = arith.constant 0 : index
    %c0_41 = arith.constant 0 : index
    %87 = vector.load %arg6[%c0_40, %c0_41] : memref<8x128xf32, #tpu.memory_space<vmem>>, vector<8x128xf32>
    tpu.vector_store %arg6[%c0_40, %c0_41], %86 {strides = array<i32>} : memref<8x128xf32, #tpu.memory_space<vmem>>, vector<8x128xf32>,
    %c0_42 = arith.constant 0 : index
    %c0_43 = arith.constant 0 : index
    %88 = vector.load %arg7[%c0_42, %c0_43] : memref<8x128xf32, #tpu.memory_space<vmem>>, vector<8x128xf32>
    tpu.vector_store %arg7[%c0_42, %c0_43], %84 {strides = array<i32>} : memref<8x128xf32, #tpu.memory_space<vmem>>, vector<8x128xf32>,
    %89 = arith.truncf %86 : vector<8x128xf32> to vector<8x128xbf16>
    %90 = arith.index_cast %c1_i32 : i32 to index
    %c0_44 = arith.constant 0 : index
    %c0_45 = arith.constant 0 : index
    %91 = vector.load %arg4[%90, %c0_44, %c0_45] : memref<16x8x128xbf16, #tpu.memory_space<vmem>>, vector<1x8x128xbf16>
    %92 = vector.shape_cast %91 : vector<1x8x128xbf16> to vector<8x128xbf16>
    %93 = vector.shape_cast %89 : vector<8x128xbf16> to vector<1x8x128xbf16>
    tpu.vector_store %arg4[%90, %c0_44, %c0_45], %93 {strides = array<i32>} : memref<16x8x128xbf16, #tpu.memory_space<vmem>>, vector<1x8x128xbf16>,
    %c2_i32 = arith.constant 2 : i32
    %c8_i32_46 = arith.constant 8 : i32
    %94 = arith.muli %c2_i32, %c8_i32_46 : i32
    %95 = tpu.assume_multiple %94, 8 : i32
    %c0_47 = arith.constant 0 : index
    %c0_48 = arith.constant 0 : index
    %96 = vector.load %arg6[%c0_47, %c0_48] : memref<8x128xf32, #tpu.memory_space<vmem>>, vector<8x128xf32>
    %c0_49 = arith.constant 0 : index
    %c0_50 = arith.constant 0 : index
    %97 = vector.load %arg7[%c0_49, %c0_50] : memref<8x128xf32, #tpu.memory_space<vmem>>, vector<8x128xf32>
    %98 = arith.index_cast %95 : i32 to index
    %c0_51 = arith.constant 0 : index
    %99 = vector.load %arg5[%98, %c0_51] : memref<128x512xf32, #tpu.memory_space<vmem>>, vector<8x512xf32>
    %100 = arith.truncf %96 : vector<8x128xf32> to vector<8x128xbf16>
    %cst_52 = arith.constant dense<0.000000e+00> : vector<8x512xf32>
    %101 = tpu.matmul %100, %11, %cst_52 {dimension_numbers = #tpu.dot_dimension_numbers<[1], [0], [0], [1], [0, 0, 1, 1], [], []>} : vector<8x128xbf16>, vector<128x512xbf16>, vector<8x512xf32> -> vector<8x512xf32>
    %102 = arith.addf %99, %101 : vector<8x512xf32>
    %103 = vector.extract_strided_slice %102 {offsets = [0, 0], sizes = [8, 128], strides = [1, 1]} : vector<8x512xf32> to vector<8x128xf32>
    %104 = arith.negf %103 : vector<8x128xf32>
    %105 = math.exp %104 : vector<8x128xf32>
    %cst_53 = arith.constant 1.000000e+00 : f32
    %106 = vector.broadcast %cst_53 : f32 to vector<8x128xf32>
    %107 = arith.addf %106, %105 : vector<8x128xf32>
    %108 = arith.divf %106, %107 : vector<8x128xf32>
    %109 = vector.extract_strided_slice %102 {offsets = [0, 128], sizes = [8, 128], strides = [1, 1]} : vector<8x512xf32> to vector<8x128xf32>
    %110 = arith.negf %109 : vector<8x128xf32>
    %111 = math.exp %110 : vector<8x128xf32>
    %cst_54 = arith.constant 1.000000e+00 : f32
    %112 = vector.broadcast %cst_54 : f32 to vector<8x128xf32>
    %113 = arith.addf %112, %111 : vector<8x128xf32>
    %114 = arith.divf %112, %113 : vector<8x128xf32>
    %115 = vector.extract_strided_slice %102 {offsets = [0, 256], sizes = [8, 128], strides = [1, 1]} : vector<8x512xf32> to vector<8x128xf32>
    %116 = math.tanh %115 : vector<8x128xf32>
    %117 = vector.extract_strided_slice %102 {offsets = [0, 384], sizes = [8, 128], strides = [1, 1]} : vector<8x512xf32> to vector<8x128xf32>
    %118 = arith.negf %117 : vector<8x128xf32>
    %119 = math.exp %118 : vector<8x128xf32>
    %cst_55 = arith.constant 1.000000e+00 : f32
    %120 = vector.broadcast %cst_55 : f32 to vector<8x128xf32>
    %121 = arith.addf %120, %119 : vector<8x128xf32>
    %122 = arith.divf %120, %121 : vector<8x128xf32>
    %123 = arith.mulf %114, %97 : vector<8x128xf32>
    %124 = arith.mulf %108, %116 : vector<8x128xf32>
    %125 = arith.addf %123, %124 : vector<8x128xf32>
    %126 = math.tanh %125 : vector<8x128xf32>
    %127 = arith.mulf %122, %126 : vector<8x128xf32>
    %c0_56 = arith.constant 0 : index
    %c0_57 = arith.constant 0 : index
    %128 = vector.load %arg6[%c0_56, %c0_57] : memref<8x128xf32, #tpu.memory_space<vmem>>, vector<8x128xf32>
    tpu.vector_store %arg6[%c0_56, %c0_57], %127 {strides = array<i32>} : memref<8x128xf32, #tpu.memory_space<vmem>>, vector<8x128xf32>,
    %c0_58 = arith.constant 0 : index
    %c0_59 = arith.constant 0 : index
    %129 = vector.load %arg7[%c0_58, %c0_59] : memref<8x128xf32, #tpu.memory_space<vmem>>, vector<8x128xf32>
    tpu.vector_store %arg7[%c0_58, %c0_59], %125 {strides = array<i32>} : memref<8x128xf32, #tpu.memory_space<vmem>>, vector<8x128xf32>,
    %130 = arith.truncf %127 : vector<8x128xf32> to vector<8x128xbf16>
    %131 = arith.index_cast %c2_i32 : i32 to index
    %c0_60 = arith.constant 0 : index
    %c0_61 = arith.constant 0 : index
    %132 = vector.load %arg4[%131, %c0_60, %c0_61] : memref<16x8x128xbf16, #tpu.memory_space<vmem>>, vector<1x8x128xbf16>
    %133 = vector.shape_cast %132 : vector<1x8x128xbf16> to vector<8x128xbf16>
    %134 = vector.shape_cast %130 : vector<8x128xbf16> to vector<1x8x128xbf16>
    tpu.vector_store %arg4[%131, %c0_60, %c0_61], %134 {strides = array<i32>} : memref<16x8x128xbf16, #tpu.memory_space<vmem>>, vector<1x8x128xbf16>,
    %c3_i32 = arith.constant 3 : i32
    %c8_i32_62 = arith.constant 8 : i32
    %135 = arith.muli %c3_i32, %c8_i32_62 : i32
    %136 = tpu.assume_multiple %135, 8 : i32
    %c0_63 = arith.constant 0 : index
    %c0_64 = arith.constant 0 : index
    %137 = vector.load %arg6[%c0_63, %c0_64] : memref<8x128xf32, #tpu.memory_space<vmem>>, vector<8x128xf32>
    %c0_65 = arith.constant 0 : index
    %c0_66 = arith.constant 0 : index
    %138 = vector.load %arg7[%c0_65, %c0_66] : memref<8x128xf32, #tpu.memory_space<vmem>>, vector<8x128xf32>
    %139 = arith.index_cast %136 : i32 to index
    %c0_67 = arith.constant 0 : index
    %140 = vector.load %arg5[%139, %c0_67] : memref<128x512xf32, #tpu.memory_space<vmem>>, vector<8x512xf32>
    %141 = arith.truncf %137 : vector<8x128xf32> to vector<8x128xbf16>
    %cst_68 = arith.constant dense<0.000000e+00> : vector<8x512xf32>
    %142 = tpu.matmul %141, %11, %cst_68 {dimension_numbers = #tpu.dot_dimension_numbers<[1], [0], [0], [1], [0, 0, 1, 1], [], []>} : vector<8x128xbf16>, vector<128x512xbf16>, vector<8x512xf32> -> vector<8x512xf32>
    %143 = arith.addf %140, %142 : vector<8x512xf32>
    %144 = vector.extract_strided_slice %143 {offsets = [0, 0], sizes = [8, 128], strides = [1, 1]} : vector<8x512xf32> to vector<8x128xf32>
    %145 = arith.negf %144 : vector<8x128xf32>
    %146 = math.exp %145 : vector<8x128xf32>
    %cst_69 = arith.constant 1.000000e+00 : f32
    %147 = vector.broadcast %cst_69 : f32 to vector<8x128xf32>
    %148 = arith.addf %147, %146 : vector<8x128xf32>
    %149 = arith.divf %147, %148 : vector<8x128xf32>
    %150 = vector.extract_strided_slice %143 {offsets = [0, 128], sizes = [8, 128], strides = [1, 1]} : vector<8x512xf32> to vector<8x128xf32>
    %151 = arith.negf %150 : vector<8x128xf32>
    %152 = math.exp %151 : vector<8x128xf32>
    %cst_70 = arith.constant 1.000000e+00 : f32
    %153 = vector.broadcast %cst_70 : f32 to vector<8x128xf32>
    %154 = arith.addf %153, %152 : vector<8x128xf32>
    %155 = arith.divf %153, %154 : vector<8x128xf32>
    %156 = vector.extract_strided_slice %143 {offsets = [0, 256], sizes = [8, 128], strides = [1, 1]} : vector<8x512xf32> to vector<8x128xf32>
    %157 = math.tanh %156 : vector<8x128xf32>
    %158 = vector.extract_strided_slice %143 {offsets = [0, 384], sizes = [8, 128], strides = [1, 1]} : vector<8x512xf32> to vector<8x128xf32>
    %159 = arith.negf %158 : vector<8x128xf32>
    %160 = math.exp %159 : vector<8x128xf32>
    %cst_71 = arith.constant 1.000000e+00 : f32
    %161 = vector.broadcast %cst_71 : f32 to vector<8x128xf32>
    %162 = arith.addf %161, %160 : vector<8x128xf32>
    %163 = arith.divf %161, %162 : vector<8x128xf32>
    %164 = arith.mulf %155, %138 : vector<8x128xf32>
    %165 = arith.mulf %149, %157 : vector<8x128xf32>
    %166 = arith.addf %164, %165 : vector<8x128xf32>
    %167 = math.tanh %166 : vector<8x128xf32>
    %168 = arith.mulf %163, %167 : vector<8x128xf32>
    %c0_72 = arith.constant 0 : index
    %c0_73 = arith.constant 0 : index
    %169 = vector.load %arg6[%c0_72, %c0_73] : memref<8x128xf32, #tpu.memory_space<vmem>>, vector<8x128xf32>
    tpu.vector_store %arg6[%c0_72, %c0_73], %168 {strides = array<i32>} : memref<8x128xf32, #tpu.memory_space<vmem>>, vector<8x128xf32>,
    %c0_74 = arith.constant 0 : index
    %c0_75 = arith.constant 0 : index
    %170 = vector.load %arg7[%c0_74, %c0_75] : memref<8x128xf32, #tpu.memory_space<vmem>>, vector<8x128xf32>
    tpu.vector_store %arg7[%c0_74, %c0_75], %166 {strides = array<i32>} : memref<8x128xf32, #tpu.memory_space<vmem>>, vector<8x128xf32>,
    %171 = arith.truncf %168 : vector<8x128xf32> to vector<8x128xbf16>
    %172 = arith.index_cast %c3_i32 : i32 to index
    %c0_76 = arith.constant 0 : index
    %c0_77 = arith.constant 0 : index
    %173 = vector.load %arg4[%172, %c0_76, %c0_77] : memref<16x8x128xbf16, #tpu.memory_space<vmem>>, vector<1x8x128xbf16>
    %174 = vector.shape_cast %173 : vector<1x8x128xbf16> to vector<8x128xbf16>
    %175 = vector.shape_cast %171 : vector<8x128xbf16> to vector<1x8x128xbf16>
    tpu.vector_store %arg4[%172, %c0_76, %c0_77], %175 {strides = array<i32>} : memref<16x8x128xbf16, #tpu.memory_space<vmem>>, vector<1x8x128xbf16>,
    %c4_i32 = arith.constant 4 : i32
    %c8_i32_78 = arith.constant 8 : i32
    %176 = arith.muli %c4_i32, %c8_i32_78 : i32
    %177 = tpu.assume_multiple %176, 8 : i32
    %c0_79 = arith.constant 0 : index
    %c0_80 = arith.constant 0 : index
    %178 = vector.load %arg6[%c0_79, %c0_80] : memref<8x128xf32, #tpu.memory_space<vmem>>, vector<8x128xf32>
    %c0_81 = arith.constant 0 : index
    %c0_82 = arith.constant 0 : index
    %179 = vector.load %arg7[%c0_81, %c0_82] : memref<8x128xf32, #tpu.memory_space<vmem>>, vector<8x128xf32>
    %180 = arith.index_cast %177 : i32 to index
    %c0_83 = arith.constant 0 : index
    %181 = vector.load %arg5[%180, %c0_83] : memref<128x512xf32, #tpu.memory_space<vmem>>, vector<8x512xf32>
    %182 = arith.truncf %178 : vector<8x128xf32> to vector<8x128xbf16>
    %cst_84 = arith.constant dense<0.000000e+00> : vector<8x512xf32>
    %183 = tpu.matmul %182, %11, %cst_84 {dimension_numbers = #tpu.dot_dimension_numbers<[1], [0], [0], [1], [0, 0, 1, 1], [], []>} : vector<8x128xbf16>, vector<128x512xbf16>, vector<8x512xf32> -> vector<8x512xf32>
    %184 = arith.addf %181, %183 : vector<8x512xf32>
    %185 = vector.extract_strided_slice %184 {offsets = [0, 0], sizes = [8, 128], strides = [1, 1]} : vector<8x512xf32> to vector<8x128xf32>
    %186 = arith.negf %185 : vector<8x128xf32>
    %187 = math.exp %186 : vector<8x128xf32>
    %cst_85 = arith.constant 1.000000e+00 : f32
    %188 = vector.broadcast %cst_85 : f32 to vector<8x128xf32>
    %189 = arith.addf %188, %187 : vector<8x128xf32>
    %190 = arith.divf %188, %189 : vector<8x128xf32>
    %191 = vector.extract_strided_slice %184 {offsets = [0, 128], sizes = [8, 128], strides = [1, 1]} : vector<8x512xf32> to vector<8x128xf32>
    %192 = arith.negf %191 : vector<8x128xf32>
    %193 = math.exp %192 : vector<8x128xf32>
    %cst_86 = arith.constant 1.000000e+00 : f32
    %194 = vector.broadcast %cst_86 : f32 to vector<8x128xf32>
    %195 = arith.addf %194, %193 : vector<8x128xf32>
    %196 = arith.divf %194, %195 : vector<8x128xf32>
    %197 = vector.extract_strided_slice %184 {offsets = [0, 256], sizes = [8, 128], strides = [1, 1]} : vector<8x512xf32> to vector<8x128xf32>
    %198 = math.tanh %197 : vector<8x128xf32>
    %199 = vector.extract_strided_slice %184 {offsets = [0, 384], sizes = [8, 128], strides = [1, 1]} : vector<8x512xf32> to vector<8x128xf32>
    %200 = arith.negf %199 : vector<8x128xf32>
    %201 = math.exp %200 : vector<8x128xf32>
    %cst_87 = arith.constant 1.000000e+00 : f32
    %202 = vector.broadcast %cst_87 : f32 to vector<8x128xf32>
    %203 = arith.addf %202, %201 : vector<8x128xf32>
    %204 = arith.divf %202, %203 : vector<8x128xf32>
    %205 = arith.mulf %196, %179 : vector<8x128xf32>
    %206 = arith.mulf %190, %198 : vector<8x128xf32>
    %207 = arith.addf %205, %206 : vector<8x128xf32>
    %208 = math.tanh %207 : vector<8x128xf32>
    %209 = arith.mulf %204, %208 : vector<8x128xf32>
    %c0_88 = arith.constant 0 : index
    %c0_89 = arith.constant 0 : index
    %210 = vector.load %arg6[%c0_88, %c0_89] : memref<8x128xf32, #tpu.memory_space<vmem>>, vector<8x128xf32>
    tpu.vector_store %arg6[%c0_88, %c0_89], %209 {strides = array<i32>} : memref<8x128xf32, #tpu.memory_space<vmem>>, vector<8x128xf32>,
    %c0_90 = arith.constant 0 : index
    %c0_91 = arith.constant 0 : index
    %211 = vector.load %arg7[%c0_90, %c0_91] : memref<8x128xf32, #tpu.memory_space<vmem>>, vector<8x128xf32>
    tpu.vector_store %arg7[%c0_90, %c0_91], %207 {strides = array<i32>} : memref<8x128xf32, #tpu.memory_space<vmem>>, vector<8x128xf32>,
    %212 = arith.truncf %209 : vector<8x128xf32> to vector<8x128xbf16>
    %213 = arith.index_cast %c4_i32 : i32 to index
    %c0_92 = arith.constant 0 : index
    %c0_93 = arith.constant 0 : index
    %214 = vector.load %arg4[%213, %c0_92, %c0_93] : memref<16x8x128xbf16, #tpu.memory_space<vmem>>, vector<1x8x128xbf16>
    %215 = vector.shape_cast %214 : vector<1x8x128xbf16> to vector<8x128xbf16>
    %216 = vector.shape_cast %212 : vector<8x128xbf16> to vector<1x8x128xbf16>
    tpu.vector_store %arg4[%213, %c0_92, %c0_93], %216 {strides = array<i32>} : memref<16x8x128xbf16, #tpu.memory_space<vmem>>, vector<1x8x128xbf16>,
    %c5_i32 = arith.constant 5 : i32
    %c8_i32_94 = arith.constant 8 : i32
    %217 = arith.muli %c5_i32, %c8_i32_94 : i32
    %218 = tpu.assume_multiple %217, 8 : i32
    %c0_95 = arith.constant 0 : index
    %c0_96 = arith.constant 0 : index
    %219 = vector.load %arg6[%c0_95, %c0_96] : memref<8x128xf32, #tpu.memory_space<vmem>>, vector<8x128xf32>
    %c0_97 = arith.constant 0 : index
    %c0_98 = arith.constant 0 : index
    %220 = vector.load %arg7[%c0_97, %c0_98] : memref<8x128xf32, #tpu.memory_space<vmem>>, vector<8x128xf32>
    %221 = arith.index_cast %218 : i32 to index
    %c0_99 = arith.constant 0 : index
    %222 = vector.load %arg5[%221, %c0_99] : memref<128x512xf32, #tpu.memory_space<vmem>>, vector<8x512xf32>
    %223 = arith.truncf %219 : vector<8x128xf32> to vector<8x128xbf16>
    %cst_100 = arith.constant dense<0.000000e+00> : vector<8x512xf32>
    %224 = tpu.matmul %223, %11, %cst_100 {dimension_numbers = #tpu.dot_dimension_numbers<[1], [0], [0], [1], [0, 0, 1, 1], [], []>} : vector<8x128xbf16>, vector<128x512xbf16>, vector<8x512xf32> -> vector<8x512xf32>
    %225 = arith.addf %222, %224 : vector<8x512xf32>
    %226 = vector.extract_strided_slice %225 {offsets = [0, 0], sizes = [8, 128], strides = [1, 1]} : vector<8x512xf32> to vector<8x128xf32>
    %227 = arith.negf %226 : vector<8x128xf32>
    %228 = math.exp %227 : vector<8x128xf32>
    %cst_101 = arith.constant 1.000000e+00 : f32
    %229 = vector.broadcast %cst_101 : f32 to vector<8x128xf32>
    %230 = arith.addf %229, %228 : vector<8x128xf32>
    %231 = arith.divf %229, %230 : vector<8x128xf32>
    %232 = vector.extract_strided_slice %225 {offsets = [0, 128], sizes = [8, 128], strides = [1, 1]} : vector<8x512xf32> to vector<8x128xf32>
    %233 = arith.negf %232 : vector<8x128xf32>
    %234 = math.exp %233 : vector<8x128xf32>
    %cst_102 = arith.constant 1.000000e+00 : f32
    %235 = vector.broadcast %cst_102 : f32 to vector<8x128xf32>
    %236 = arith.addf %235, %234 : vector<8x128xf32>
    %237 = arith.divf %235, %236 : vector<8x128xf32>
    %238 = vector.extract_strided_slice %225 {offsets = [0, 256], sizes = [8, 128], strides = [1, 1]} : vector<8x512xf32> to vector<8x128xf32>
    %239 = math.tanh %238 : vector<8x128xf32>
    %240 = vector.extract_strided_slice %225 {offsets = [0, 384], sizes = [8, 128], strides = [1, 1]} : vector<8x512xf32> to vector<8x128xf32>
    %241 = arith.negf %240 : vector<8x128xf32>
    %242 = math.exp %241 : vector<8x128xf32>
    %cst_103 = arith.constant 1.000000e+00 : f32
    %243 = vector.broadcast %cst_103 : f32 to vector<8x128xf32>
    %244 = arith.addf %243, %242 : vector<8x128xf32>
    %245 = arith.divf %243, %244 : vector<8x128xf32>
    %246 = arith.mulf %237, %220 : vector<8x128xf32>
    %247 = arith.mulf %231, %239 : vector<8x128xf32>
    %248 = arith.addf %246, %247 : vector<8x128xf32>
    %249 = math.tanh %248 : vector<8x128xf32>
    %250 = arith.mulf %245, %249 : vector<8x128xf32>
    %c0_104 = arith.constant 0 : index
    %c0_105 = arith.constant 0 : index
    %251 = vector.load %arg6[%c0_104, %c0_105] : memref<8x128xf32, #tpu.memory_space<vmem>>, vector<8x128xf32>
    tpu.vector_store %arg6[%c0_104, %c0_105], %250 {strides = array<i32>} : memref<8x128xf32, #tpu.memory_space<vmem>>, vector<8x128xf32>,
    %c0_106 = arith.constant 0 : index
    %c0_107 = arith.constant 0 : index
    %252 = vector.load %arg7[%c0_106, %c0_107] : memref<8x128xf32, #tpu.memory_space<vmem>>, vector<8x128xf32>
    tpu.vector_store %arg7[%c0_106, %c0_107], %248 {strides = array<i32>} : memref<8x128xf32, #tpu.memory_space<vmem>>, vector<8x128xf32>,
    %253 = arith.truncf %250 : vector<8x128xf32> to vector<8x128xbf16>
    %254 = arith.index_cast %c5_i32 : i32 to index
    %c0_108 = arith.constant 0 : index
    %c0_109 = arith.constant 0 : index
    %255 = vector.load %arg4[%254, %c0_108, %c0_109] : memref<16x8x128xbf16, #tpu.memory_space<vmem>>, vector<1x8x128xbf16>
    %256 = vector.shape_cast %255 : vector<1x8x128xbf16> to vector<8x128xbf16>
    %257 = vector.shape_cast %253 : vector<8x128xbf16> to vector<1x8x128xbf16>
    tpu.vector_store %arg4[%254, %c0_108, %c0_109], %257 {strides = array<i32>} : memref<16x8x128xbf16, #tpu.memory_space<vmem>>, vector<1x8x128xbf16>,
    %c6_i32 = arith.constant 6 : i32
    %c8_i32_110 = arith.constant 8 : i32
    %258 = arith.muli %c6_i32, %c8_i32_110 : i32
    %259 = tpu.assume_multiple %258, 8 : i32
    %c0_111 = arith.constant 0 : index
    %c0_112 = arith.constant 0 : index
    %260 = vector.load %arg6[%c0_111, %c0_112] : memref<8x128xf32, #tpu.memory_space<vmem>>, vector<8x128xf32>
    %c0_113 = arith.constant 0 : index
    %c0_114 = arith.constant 0 : index
    %261 = vector.load %arg7[%c0_113, %c0_114] : memref<8x128xf32, #tpu.memory_space<vmem>>, vector<8x128xf32>
    %262 = arith.index_cast %259 : i32 to index
    %c0_115 = arith.constant 0 : index
    %263 = vector.load %arg5[%262, %c0_115] : memref<128x512xf32, #tpu.memory_space<vmem>>, vector<8x512xf32>
    %264 = arith.truncf %260 : vector<8x128xf32> to vector<8x128xbf16>
    %cst_116 = arith.constant dense<0.000000e+00> : vector<8x512xf32>
    %265 = tpu.matmul %264, %11, %cst_116 {dimension_numbers = #tpu.dot_dimension_numbers<[1], [0], [0], [1], [0, 0, 1, 1], [], []>} : vector<8x128xbf16>, vector<128x512xbf16>, vector<8x512xf32> -> vector<8x512xf32>
    %266 = arith.addf %263, %265 : vector<8x512xf32>
    %267 = vector.extract_strided_slice %266 {offsets = [0, 0], sizes = [8, 128], strides = [1, 1]} : vector<8x512xf32> to vector<8x128xf32>
    %268 = arith.negf %267 : vector<8x128xf32>
    %269 = math.exp %268 : vector<8x128xf32>
    %cst_117 = arith.constant 1.000000e+00 : f32
    %270 = vector.broadcast %cst_117 : f32 to vector<8x128xf32>
    %271 = arith.addf %270, %269 : vector<8x128xf32>
    %272 = arith.divf %270, %271 : vector<8x128xf32>
    %273 = vector.extract_strided_slice %266 {offsets = [0, 128], sizes = [8, 128], strides = [1, 1]} : vector<8x512xf32> to vector<8x128xf32>
    %274 = arith.negf %273 : vector<8x128xf32>
    %275 = math.exp %274 : vector<8x128xf32>
    %cst_118 = arith.constant 1.000000e+00 : f32
    %276 = vector.broadcast %cst_118 : f32 to vector<8x128xf32>
    %277 = arith.addf %276, %275 : vector<8x128xf32>
    %278 = arith.divf %276, %277 : vector<8x128xf32>
    %279 = vector.extract_strided_slice %266 {offsets = [0, 256], sizes = [8, 128], strides = [1, 1]} : vector<8x512xf32> to vector<8x128xf32>
    %280 = math.tanh %279 : vector<8x128xf32>
    %281 = vector.extract_strided_slice %266 {offsets = [0, 384], sizes = [8, 128], strides = [1, 1]} : vector<8x512xf32> to vector<8x128xf32>
    %282 = arith.negf %281 : vector<8x128xf32>
    %283 = math.exp %282 : vector<8x128xf32>
    %cst_119 = arith.constant 1.000000e+00 : f32
    %284 = vector.broadcast %cst_119 : f32 to vector<8x128xf32>
    %285 = arith.addf %284, %283 : vector<8x128xf32>
    %286 = arith.divf %284, %285 : vector<8x128xf32>
    %287 = arith.mulf %278, %261 : vector<8x128xf32>
    %288 = arith.mulf %272, %280 : vector<8x128xf32>
    %289 = arith.addf %287, %288 : vector<8x128xf32>
    %290 = math.tanh %289 : vector<8x128xf32>
    %291 = arith.mulf %286, %290 : vector<8x128xf32>
    %c0_120 = arith.constant 0 : index
    %c0_121 = arith.constant 0 : index
    %292 = vector.load %arg6[%c0_120, %c0_121] : memref<8x128xf32, #tpu.memory_space<vmem>>, vector<8x128xf32>
    tpu.vector_store %arg6[%c0_120, %c0_121], %291 {strides = array<i32>} : memref<8x128xf32, #tpu.memory_space<vmem>>, vector<8x128xf32>,
    %c0_122 = arith.constant 0 : index
    %c0_123 = arith.constant 0 : index
    %293 = vector.load %arg7[%c0_122, %c0_123] : memref<8x128xf32, #tpu.memory_space<vmem>>, vector<8x128xf32>
    tpu.vector_store %arg7[%c0_122, %c0_123], %289 {strides = array<i32>} : memref<8x128xf32, #tpu.memory_space<vmem>>, vector<8x128xf32>,
    %294 = arith.truncf %291 : vector<8x128xf32> to vector<8x128xbf16>
    %295 = arith.index_cast %c6_i32 : i32 to index
    %c0_124 = arith.constant 0 : index
    %c0_125 = arith.constant 0 : index
    %296 = vector.load %arg4[%295, %c0_124, %c0_125] : memref<16x8x128xbf16, #tpu.memory_space<vmem>>, vector<1x8x128xbf16>
    %297 = vector.shape_cast %296 : vector<1x8x128xbf16> to vector<8x128xbf16>
    %298 = vector.shape_cast %294 : vector<8x128xbf16> to vector<1x8x128xbf16>
    tpu.vector_store %arg4[%295, %c0_124, %c0_125], %298 {strides = array<i32>} : memref<16x8x128xbf16, #tpu.memory_space<vmem>>, vector<1x8x128xbf16>,
    %c7_i32 = arith.constant 7 : i32
    %c8_i32_126 = arith.constant 8 : i32
    %299 = arith.muli %c7_i32, %c8_i32_126 : i32
    %300 = tpu.assume_multiple %299, 8 : i32
    %c0_127 = arith.constant 0 : index
    %c0_128 = arith.constant 0 : index
    %301 = vector.load %arg6[%c0_127, %c0_128] : memref<8x128xf32, #tpu.memory_space<vmem>>, vector<8x128xf32>
    %c0_129 = arith.constant 0 : index
    %c0_130 = arith.constant 0 : index
    %302 = vector.load %arg7[%c0_129, %c0_130] : memref<8x128xf32, #tpu.memory_space<vmem>>, vector<8x128xf32>
    %303 = arith.index_cast %300 : i32 to index
    %c0_131 = arith.constant 0 : index
    %304 = vector.load %arg5[%303, %c0_131] : memref<128x512xf32, #tpu.memory_space<vmem>>, vector<8x512xf32>
    %305 = arith.truncf %301 : vector<8x128xf32> to vector<8x128xbf16>
    %cst_132 = arith.constant dense<0.000000e+00> : vector<8x512xf32>
    %306 = tpu.matmul %305, %11, %cst_132 {dimension_numbers = #tpu.dot_dimension_numbers<[1], [0], [0], [1], [0, 0, 1, 1], [], []>} : vector<8x128xbf16>, vector<128x512xbf16>, vector<8x512xf32> -> vector<8x512xf32>
    %307 = arith.addf %304, %306 : vector<8x512xf32>
    %308 = vector.extract_strided_slice %307 {offsets = [0, 0], sizes = [8, 128], strides = [1, 1]} : vector<8x512xf32> to vector<8x128xf32>
    %309 = arith.negf %308 : vector<8x128xf32>
    %310 = math.exp %309 : vector<8x128xf32>
    %cst_133 = arith.constant 1.000000e+00 : f32
    %311 = vector.broadcast %cst_133 : f32 to vector<8x128xf32>
    %312 = arith.addf %311, %310 : vector<8x128xf32>
    %313 = arith.divf %311, %312 : vector<8x128xf32>
    %314 = vector.extract_strided_slice %307 {offsets = [0, 128], sizes = [8, 128], strides = [1, 1]} : vector<8x512xf32> to vector<8x128xf32>
    %315 = arith.negf %314 : vector<8x128xf32>
    %316 = math.exp %315 : vector<8x128xf32>
    %cst_134 = arith.constant 1.000000e+00 : f32
    %317 = vector.broadcast %cst_134 : f32 to vector<8x128xf32>
    %318 = arith.addf %317, %316 : vector<8x128xf32>
    %319 = arith.divf %317, %318 : vector<8x128xf32>
    %320 = vector.extract_strided_slice %307 {offsets = [0, 256], sizes = [8, 128], strides = [1, 1]} : vector<8x512xf32> to vector<8x128xf32>
    %321 = math.tanh %320 : vector<8x128xf32>
    %322 = vector.extract_strided_slice %307 {offsets = [0, 384], sizes = [8, 128], strides = [1, 1]} : vector<8x512xf32> to vector<8x128xf32>
    %323 = arith.negf %322 : vector<8x128xf32>
    %324 = math.exp %323 : vector<8x128xf32>
    %cst_135 = arith.constant 1.000000e+00 : f32
    %325 = vector.broadcast %cst_135 : f32 to vector<8x128xf32>
    %326 = arith.addf %325, %324 : vector<8x128xf32>
    %327 = arith.divf %325, %326 : vector<8x128xf32>
    %328 = arith.mulf %319, %302 : vector<8x128xf32>
    %329 = arith.mulf %313, %321 : vector<8x128xf32>
    %330 = arith.addf %328, %329 : vector<8x128xf32>
    %331 = math.tanh %330 : vector<8x128xf32>
    %332 = arith.mulf %327, %331 : vector<8x128xf32>
    %c0_136 = arith.constant 0 : index
    %c0_137 = arith.constant 0 : index
    %333 = vector.load %arg6[%c0_136, %c0_137] : memref<8x128xf32, #tpu.memory_space<vmem>>, vector<8x128xf32>
    tpu.vector_store %arg6[%c0_136, %c0_137], %332 {strides = array<i32>} : memref<8x128xf32, #tpu.memory_space<vmem>>, vector<8x128xf32>,
    %c0_138 = arith.constant 0 : index
    %c0_139 = arith.constant 0 : index
    %334 = vector.load %arg7[%c0_138, %c0_139] : memref<8x128xf32, #tpu.memory_space<vmem>>, vector<8x128xf32>
    tpu.vector_store %arg7[%c0_138, %c0_139], %330 {strides = array<i32>} : memref<8x128xf32, #tpu.memory_space<vmem>>, vector<8x128xf32>,
    %335 = arith.truncf %332 : vector<8x128xf32> to vector<8x128xbf16>
    %336 = arith.index_cast %c7_i32 : i32 to index
    %c0_140 = arith.constant 0 : index
    %c0_141 = arith.constant 0 : index
    %337 = vector.load %arg4[%336, %c0_140, %c0_141] : memref<16x8x128xbf16, #tpu.memory_space<vmem>>, vector<1x8x128xbf16>
    %338 = vector.shape_cast %337 : vector<1x8x128xbf16> to vector<8x128xbf16>
    %339 = vector.shape_cast %335 : vector<8x128xbf16> to vector<1x8x128xbf16>
    tpu.vector_store %arg4[%336, %c0_140, %c0_141], %339 {strides = array<i32>} : memref<16x8x128xbf16, #tpu.memory_space<vmem>>, vector<1x8x128xbf16>,
    %c8_i32_142 = arith.constant 8 : i32
    %c8_i32_143 = arith.constant 8 : i32
    %340 = arith.muli %c8_i32_142, %c8_i32_143 : i32
    %341 = tpu.assume_multiple %340, 8 : i32
    %c0_144 = arith.constant 0 : index
    %c0_145 = arith.constant 0 : index
    %342 = vector.load %arg6[%c0_144, %c0_145] : memref<8x128xf32, #tpu.memory_space<vmem>>, vector<8x128xf32>
    %c0_146 = arith.constant 0 : index
    %c0_147 = arith.constant 0 : index
    %343 = vector.load %arg7[%c0_146, %c0_147] : memref<8x128xf32, #tpu.memory_space<vmem>>, vector<8x128xf32>
    %344 = arith.index_cast %341 : i32 to index
    %c0_148 = arith.constant 0 : index
    %345 = vector.load %arg5[%344, %c0_148] : memref<128x512xf32, #tpu.memory_space<vmem>>, vector<8x512xf32>
    %346 = arith.truncf %342 : vector<8x128xf32> to vector<8x128xbf16>
    %cst_149 = arith.constant dense<0.000000e+00> : vector<8x512xf32>
    %347 = tpu.matmul %346, %11, %cst_149 {dimension_numbers = #tpu.dot_dimension_numbers<[1], [0], [0], [1], [0, 0, 1, 1], [], []>} : vector<8x128xbf16>, vector<128x512xbf16>, vector<8x512xf32> -> vector<8x512xf32>
    %348 = arith.addf %345, %347 : vector<8x512xf32>
    %349 = vector.extract_strided_slice %348 {offsets = [0, 0], sizes = [8, 128], strides = [1, 1]} : vector<8x512xf32> to vector<8x128xf32>
    %350 = arith.negf %349 : vector<8x128xf32>
    %351 = math.exp %350 : vector<8x128xf32>
    %cst_150 = arith.constant 1.000000e+00 : f32
    %352 = vector.broadcast %cst_150 : f32 to vector<8x128xf32>
    %353 = arith.addf %352, %351 : vector<8x128xf32>
    %354 = arith.divf %352, %353 : vector<8x128xf32>
    %355 = vector.extract_strided_slice %348 {offsets = [0, 128], sizes = [8, 128], strides = [1, 1]} : vector<8x512xf32> to vector<8x128xf32>
    %356 = arith.negf %355 : vector<8x128xf32>
    %357 = math.exp %356 : vector<8x128xf32>
    %cst_151 = arith.constant 1.000000e+00 : f32
    %358 = vector.broadcast %cst_151 : f32 to vector<8x128xf32>
    %359 = arith.addf %358, %357 : vector<8x128xf32>
    %360 = arith.divf %358, %359 : vector<8x128xf32>
    %361 = vector.extract_strided_slice %348 {offsets = [0, 256], sizes = [8, 128], strides = [1, 1]} : vector<8x512xf32> to vector<8x128xf32>
    %362 = math.tanh %361 : vector<8x128xf32>
    %363 = vector.extract_strided_slice %348 {offsets = [0, 384], sizes = [8, 128], strides = [1, 1]} : vector<8x512xf32> to vector<8x128xf32>
    %364 = arith.negf %363 : vector<8x128xf32>
    %365 = math.exp %364 : vector<8x128xf32>
    %cst_152 = arith.constant 1.000000e+00 : f32
    %366 = vector.broadcast %cst_152 : f32 to vector<8x128xf32>
    %367 = arith.addf %366, %365 : vector<8x128xf32>
    %368 = arith.divf %366, %367 : vector<8x128xf32>
    %369 = arith.mulf %360, %343 : vector<8x128xf32>
    %370 = arith.mulf %354, %362 : vector<8x128xf32>
    %371 = arith.addf %369, %370 : vector<8x128xf32>
    %372 = math.tanh %371 : vector<8x128xf32>
    %373 = arith.mulf %368, %372 : vector<8x128xf32>
    %c0_153 = arith.constant 0 : index
    %c0_154 = arith.constant 0 : index
    %374 = vector.load %arg6[%c0_153, %c0_154] : memref<8x128xf32, #tpu.memory_space<vmem>>, vector<8x128xf32>
    tpu.vector_store %arg6[%c0_153, %c0_154], %373 {strides = array<i32>} : memref<8x128xf32, #tpu.memory_space<vmem>>, vector<8x128xf32>,
    %c0_155 = arith.constant 0 : index
    %c0_156 = arith.constant 0 : index
    %375 = vector.load %arg7[%c0_155, %c0_156] : memref<8x128xf32, #tpu.memory_space<vmem>>, vector<8x128xf32>
    tpu.vector_store %arg7[%c0_155, %c0_156], %371 {strides = array<i32>} : memref<8x128xf32, #tpu.memory_space<vmem>>, vector<8x128xf32>,
    %376 = arith.truncf %373 : vector<8x128xf32> to vector<8x128xbf16>
    %377 = arith.index_cast %c8_i32_142 : i32 to index
    %c0_157 = arith.constant 0 : index
    %c0_158 = arith.constant 0 : index
    %378 = vector.load %arg4[%377, %c0_157, %c0_158] : memref<16x8x128xbf16, #tpu.memory_space<vmem>>, vector<1x8x128xbf16>
    %379 = vector.shape_cast %378 : vector<1x8x128xbf16> to vector<8x128xbf16>
    %380 = vector.shape_cast %376 : vector<8x128xbf16> to vector<1x8x128xbf16>
    tpu.vector_store %arg4[%377, %c0_157, %c0_158], %380 {strides = array<i32>} : memref<16x8x128xbf16, #tpu.memory_space<vmem>>, vector<1x8x128xbf16>,
    %c9_i32 = arith.constant 9 : i32
    %c8_i32_159 = arith.constant 8 : i32
    %381 = arith.muli %c9_i32, %c8_i32_159 : i32
    %382 = tpu.assume_multiple %381, 8 : i32
    %c0_160 = arith.constant 0 : index
    %c0_161 = arith.constant 0 : index
    %383 = vector.load %arg6[%c0_160, %c0_161] : memref<8x128xf32, #tpu.memory_space<vmem>>, vector<8x128xf32>
    %c0_162 = arith.constant 0 : index
    %c0_163 = arith.constant 0 : index
    %384 = vector.load %arg7[%c0_162, %c0_163] : memref<8x128xf32, #tpu.memory_space<vmem>>, vector<8x128xf32>
    %385 = arith.index_cast %382 : i32 to index
    %c0_164 = arith.constant 0 : index
    %386 = vector.load %arg5[%385, %c0_164] : memref<128x512xf32, #tpu.memory_space<vmem>>, vector<8x512xf32>
    %387 = arith.truncf %383 : vector<8x128xf32> to vector<8x128xbf16>
    %cst_165 = arith.constant dense<0.000000e+00> : vector<8x512xf32>
    %388 = tpu.matmul %387, %11, %cst_165 {dimension_numbers = #tpu.dot_dimension_numbers<[1], [0], [0], [1], [0, 0, 1, 1], [], []>} : vector<8x128xbf16>, vector<128x512xbf16>, vector<8x512xf32> -> vector<8x512xf32>
    %389 = arith.addf %386, %388 : vector<8x512xf32>
    %390 = vector.extract_strided_slice %389 {offsets = [0, 0], sizes = [8, 128], strides = [1, 1]} : vector<8x512xf32> to vector<8x128xf32>
    %391 = arith.negf %390 : vector<8x128xf32>
    %392 = math.exp %391 : vector<8x128xf32>
    %cst_166 = arith.constant 1.000000e+00 : f32
    %393 = vector.broadcast %cst_166 : f32 to vector<8x128xf32>
    %394 = arith.addf %393, %392 : vector<8x128xf32>
    %395 = arith.divf %393, %394 : vector<8x128xf32>
    %396 = vector.extract_strided_slice %389 {offsets = [0, 128], sizes = [8, 128], strides = [1, 1]} : vector<8x512xf32> to vector<8x128xf32>
    %397 = arith.negf %396 : vector<8x128xf32>
    %398 = math.exp %397 : vector<8x128xf32>
    %cst_167 = arith.constant 1.000000e+00 : f32
    %399 = vector.broadcast %cst_167 : f32 to vector<8x128xf32>
    %400 = arith.addf %399, %398 : vector<8x128xf32>
    %401 = arith.divf %399, %400 : vector<8x128xf32>
    %402 = vector.extract_strided_slice %389 {offsets = [0, 256], sizes = [8, 128], strides = [1, 1]} : vector<8x512xf32> to vector<8x128xf32>
    %403 = math.tanh %402 : vector<8x128xf32>
    %404 = vector.extract_strided_slice %389 {offsets = [0, 384], sizes = [8, 128], strides = [1, 1]} : vector<8x512xf32> to vector<8x128xf32>
    %405 = arith.negf %404 : vector<8x128xf32>
    %406 = math.exp %405 : vector<8x128xf32>
    %cst_168 = arith.constant 1.000000e+00 : f32
    %407 = vector.broadcast %cst_168 : f32 to vector<8x128xf32>
    %408 = arith.addf %407, %406 : vector<8x128xf32>
    %409 = arith.divf %407, %408 : vector<8x128xf32>
    %410 = arith.mulf %401, %384 : vector<8x128xf32>
    %411 = arith.mulf %395, %403 : vector<8x128xf32>
    %412 = arith.addf %410, %411 : vector<8x128xf32>
    %413 = math.tanh %412 : vector<8x128xf32>
    %414 = arith.mulf %409, %413 : vector<8x128xf32>
    %c0_169 = arith.constant 0 : index
    %c0_170 = arith.constant 0 : index
    %415 = vector.load %arg6[%c0_169, %c0_170] : memref<8x128xf32, #tpu.memory_space<vmem>>, vector<8x128xf32>
    tpu.vector_store %arg6[%c0_169, %c0_170], %414 {strides = array<i32>} : memref<8x128xf32, #tpu.memory_space<vmem>>, vector<8x128xf32>,
    %c0_171 = arith.constant 0 : index
    %c0_172 = arith.constant 0 : index
    %416 = vector.load %arg7[%c0_171, %c0_172] : memref<8x128xf32, #tpu.memory_space<vmem>>, vector<8x128xf32>
    tpu.vector_store %arg7[%c0_171, %c0_172], %412 {strides = array<i32>} : memref<8x128xf32, #tpu.memory_space<vmem>>, vector<8x128xf32>,
    %417 = arith.truncf %414 : vector<8x128xf32> to vector<8x128xbf16>
    %418 = arith.index_cast %c9_i32 : i32 to index
    %c0_173 = arith.constant 0 : index
    %c0_174 = arith.constant 0 : index
    %419 = vector.load %arg4[%418, %c0_173, %c0_174] : memref<16x8x128xbf16, #tpu.memory_space<vmem>>, vector<1x8x128xbf16>
    %420 = vector.shape_cast %419 : vector<1x8x128xbf16> to vector<8x128xbf16>
    %421 = vector.shape_cast %417 : vector<8x128xbf16> to vector<1x8x128xbf16>
    tpu.vector_store %arg4[%418, %c0_173, %c0_174], %421 {strides = array<i32>} : memref<16x8x128xbf16, #tpu.memory_space<vmem>>, vector<1x8x128xbf16>,
    %c10_i32 = arith.constant 10 : i32
    %c8_i32_175 = arith.constant 8 : i32
    %422 = arith.muli %c10_i32, %c8_i32_175 : i32
    %423 = tpu.assume_multiple %422, 8 : i32
    %c0_176 = arith.constant 0 : index
    %c0_177 = arith.constant 0 : index
    %424 = vector.load %arg6[%c0_176, %c0_177] : memref<8x128xf32, #tpu.memory_space<vmem>>, vector<8x128xf32>
    %c0_178 = arith.constant 0 : index
    %c0_179 = arith.constant 0 : index
    %425 = vector.load %arg7[%c0_178, %c0_179] : memref<8x128xf32, #tpu.memory_space<vmem>>, vector<8x128xf32>
    %426 = arith.index_cast %423 : i32 to index
    %c0_180 = arith.constant 0 : index
    %427 = vector.load %arg5[%426, %c0_180] : memref<128x512xf32, #tpu.memory_space<vmem>>, vector<8x512xf32>
    %428 = arith.truncf %424 : vector<8x128xf32> to vector<8x128xbf16>
    %cst_181 = arith.constant dense<0.000000e+00> : vector<8x512xf32>
    %429 = tpu.matmul %428, %11, %cst_181 {dimension_numbers = #tpu.dot_dimension_numbers<[1], [0], [0], [1], [0, 0, 1, 1], [], []>} : vector<8x128xbf16>, vector<128x512xbf16>, vector<8x512xf32> -> vector<8x512xf32>
    %430 = arith.addf %427, %429 : vector<8x512xf32>
    %431 = vector.extract_strided_slice %430 {offsets = [0, 0], sizes = [8, 128], strides = [1, 1]} : vector<8x512xf32> to vector<8x128xf32>
    %432 = arith.negf %431 : vector<8x128xf32>
    %433 = math.exp %432 : vector<8x128xf32>
    %cst_182 = arith.constant 1.000000e+00 : f32
    %434 = vector.broadcast %cst_182 : f32 to vector<8x128xf32>
    %435 = arith.addf %434, %433 : vector<8x128xf32>
    %436 = arith.divf %434, %435 : vector<8x128xf32>
    %437 = vector.extract_strided_slice %430 {offsets = [0, 128], sizes = [8, 128], strides = [1, 1]} : vector<8x512xf32> to vector<8x128xf32>
    %438 = arith.negf %437 : vector<8x128xf32>
    %439 = math.exp %438 : vector<8x128xf32>
    %cst_183 = arith.constant 1.000000e+00 : f32
    %440 = vector.broadcast %cst_183 : f32 to vector<8x128xf32>
    %441 = arith.addf %440, %439 : vector<8x128xf32>
    %442 = arith.divf %440, %441 : vector<8x128xf32>
    %443 = vector.extract_strided_slice %430 {offsets = [0, 256], sizes = [8, 128], strides = [1, 1]} : vector<8x512xf32> to vector<8x128xf32>
    %444 = math.tanh %443 : vector<8x128xf32>
    %445 = vector.extract_strided_slice %430 {offsets = [0, 384], sizes = [8, 128], strides = [1, 1]} : vector<8x512xf32> to vector<8x128xf32>
    %446 = arith.negf %445 : vector<8x128xf32>
    %447 = math.exp %446 : vector<8x128xf32>
    %cst_184 = arith.constant 1.000000e+00 : f32
    %448 = vector.broadcast %cst_184 : f32 to vector<8x128xf32>
    %449 = arith.addf %448, %447 : vector<8x128xf32>
    %450 = arith.divf %448, %449 : vector<8x128xf32>
    %451 = arith.mulf %442, %425 : vector<8x128xf32>
    %452 = arith.mulf %436, %444 : vector<8x128xf32>
    %453 = arith.addf %451, %452 : vector<8x128xf32>
    %454 = math.tanh %453 : vector<8x128xf32>
    %455 = arith.mulf %450, %454 : vector<8x128xf32>
    %c0_185 = arith.constant 0 : index
    %c0_186 = arith.constant 0 : index
    %456 = vector.load %arg6[%c0_185, %c0_186] : memref<8x128xf32, #tpu.memory_space<vmem>>, vector<8x128xf32>
    tpu.vector_store %arg6[%c0_185, %c0_186], %455 {strides = array<i32>} : memref<8x128xf32, #tpu.memory_space<vmem>>, vector<8x128xf32>,
    %c0_187 = arith.constant 0 : index
    %c0_188 = arith.constant 0 : index
    %457 = vector.load %arg7[%c0_187, %c0_188] : memref<8x128xf32, #tpu.memory_space<vmem>>, vector<8x128xf32>
    tpu.vector_store %arg7[%c0_187, %c0_188], %453 {strides = array<i32>} : memref<8x128xf32, #tpu.memory_space<vmem>>, vector<8x128xf32>,
    %458 = arith.truncf %455 : vector<8x128xf32> to vector<8x128xbf16>
    %459 = arith.index_cast %c10_i32 : i32 to index
    %c0_189 = arith.constant 0 : index
    %c0_190 = arith.constant 0 : index
    %460 = vector.load %arg4[%459, %c0_189, %c0_190] : memref<16x8x128xbf16, #tpu.memory_space<vmem>>, vector<1x8x128xbf16>
    %461 = vector.shape_cast %460 : vector<1x8x128xbf16> to vector<8x128xbf16>
    %462 = vector.shape_cast %458 : vector<8x128xbf16> to vector<1x8x128xbf16>
    tpu.vector_store %arg4[%459, %c0_189, %c0_190], %462 {strides = array<i32>} : memref<16x8x128xbf16, #tpu.memory_space<vmem>>, vector<1x8x128xbf16>,
    %c11_i32 = arith.constant 11 : i32
    %c8_i32_191 = arith.constant 8 : i32
    %463 = arith.muli %c11_i32, %c8_i32_191 : i32
    %464 = tpu.assume_multiple %463, 8 : i32
    %c0_192 = arith.constant 0 : index
    %c0_193 = arith.constant 0 : index
    %465 = vector.load %arg6[%c0_192, %c0_193] : memref<8x128xf32, #tpu.memory_space<vmem>>, vector<8x128xf32>
    %c0_194 = arith.constant 0 : index
    %c0_195 = arith.constant 0 : index
    %466 = vector.load %arg7[%c0_194, %c0_195] : memref<8x128xf32, #tpu.memory_space<vmem>>, vector<8x128xf32>
    %467 = arith.index_cast %464 : i32 to index
    %c0_196 = arith.constant 0 : index
    %468 = vector.load %arg5[%467, %c0_196] : memref<128x512xf32, #tpu.memory_space<vmem>>, vector<8x512xf32>
    %469 = arith.truncf %465 : vector<8x128xf32> to vector<8x128xbf16>
    %cst_197 = arith.constant dense<0.000000e+00> : vector<8x512xf32>
    %470 = tpu.matmul %469, %11, %cst_197 {dimension_numbers = #tpu.dot_dimension_numbers<[1], [0], [0], [1], [0, 0, 1, 1], [], []>} : vector<8x128xbf16>, vector<128x512xbf16>, vector<8x512xf32> -> vector<8x512xf32>
    %471 = arith.addf %468, %470 : vector<8x512xf32>
    %472 = vector.extract_strided_slice %471 {offsets = [0, 0], sizes = [8, 128], strides = [1, 1]} : vector<8x512xf32> to vector<8x128xf32>
    %473 = arith.negf %472 : vector<8x128xf32>
    %474 = math.exp %473 : vector<8x128xf32>
    %cst_198 = arith.constant 1.000000e+00 : f32
    %475 = vector.broadcast %cst_198 : f32 to vector<8x128xf32>
    %476 = arith.addf %475, %474 : vector<8x128xf32>
    %477 = arith.divf %475, %476 : vector<8x128xf32>
    %478 = vector.extract_strided_slice %471 {offsets = [0, 128], sizes = [8, 128], strides = [1, 1]} : vector<8x512xf32> to vector<8x128xf32>
    %479 = arith.negf %478 : vector<8x128xf32>
    %480 = math.exp %479 : vector<8x128xf32>
    %cst_199 = arith.constant 1.000000e+00 : f32
    %481 = vector.broadcast %cst_199 : f32 to vector<8x128xf32>
    %482 = arith.addf %481, %480 : vector<8x128xf32>
    %483 = arith.divf %481, %482 : vector<8x128xf32>
    %484 = vector.extract_strided_slice %471 {offsets = [0, 256], sizes = [8, 128], strides = [1, 1]} : vector<8x512xf32> to vector<8x128xf32>
    %485 = math.tanh %484 : vector<8x128xf32>
    %486 = vector.extract_strided_slice %471 {offsets = [0, 384], sizes = [8, 128], strides = [1, 1]} : vector<8x512xf32> to vector<8x128xf32>
    %487 = arith.negf %486 : vector<8x128xf32>
    %488 = math.exp %487 : vector<8x128xf32>
    %cst_200 = arith.constant 1.000000e+00 : f32
    %489 = vector.broadcast %cst_200 : f32 to vector<8x128xf32>
    %490 = arith.addf %489, %488 : vector<8x128xf32>
    %491 = arith.divf %489, %490 : vector<8x128xf32>
    %492 = arith.mulf %483, %466 : vector<8x128xf32>
    %493 = arith.mulf %477, %485 : vector<8x128xf32>
    %494 = arith.addf %492, %493 : vector<8x128xf32>
    %495 = math.tanh %494 : vector<8x128xf32>
    %496 = arith.mulf %491, %495 : vector<8x128xf32>
    %c0_201 = arith.constant 0 : index
    %c0_202 = arith.constant 0 : index
    %497 = vector.load %arg6[%c0_201, %c0_202] : memref<8x128xf32, #tpu.memory_space<vmem>>, vector<8x128xf32>
    tpu.vector_store %arg6[%c0_201, %c0_202], %496 {strides = array<i32>} : memref<8x128xf32, #tpu.memory_space<vmem>>, vector<8x128xf32>,
    %c0_203 = arith.constant 0 : index
    %c0_204 = arith.constant 0 : index
    %498 = vector.load %arg7[%c0_203, %c0_204] : memref<8x128xf32, #tpu.memory_space<vmem>>, vector<8x128xf32>
    tpu.vector_store %arg7[%c0_203, %c0_204], %494 {strides = array<i32>} : memref<8x128xf32, #tpu.memory_space<vmem>>, vector<8x128xf32>,
    %499 = arith.truncf %496 : vector<8x128xf32> to vector<8x128xbf16>
    %500 = arith.index_cast %c11_i32 : i32 to index
    %c0_205 = arith.constant 0 : index
    %c0_206 = arith.constant 0 : index
    %501 = vector.load %arg4[%500, %c0_205, %c0_206] : memref<16x8x128xbf16, #tpu.memory_space<vmem>>, vector<1x8x128xbf16>
    %502 = vector.shape_cast %501 : vector<1x8x128xbf16> to vector<8x128xbf16>
    %503 = vector.shape_cast %499 : vector<8x128xbf16> to vector<1x8x128xbf16>
    tpu.vector_store %arg4[%500, %c0_205, %c0_206], %503 {strides = array<i32>} : memref<16x8x128xbf16, #tpu.memory_space<vmem>>, vector<1x8x128xbf16>,
    %c12_i32 = arith.constant 12 : i32
    %c8_i32_207 = arith.constant 8 : i32
    %504 = arith.muli %c12_i32, %c8_i32_207 : i32
    %505 = tpu.assume_multiple %504, 8 : i32
    %c0_208 = arith.constant 0 : index
    %c0_209 = arith.constant 0 : index
    %506 = vector.load %arg6[%c0_208, %c0_209] : memref<8x128xf32, #tpu.memory_space<vmem>>, vector<8x128xf32>
    %c0_210 = arith.constant 0 : index
    %c0_211 = arith.constant 0 : index
    %507 = vector.load %arg7[%c0_210, %c0_211] : memref<8x128xf32, #tpu.memory_space<vmem>>, vector<8x128xf32>
    %508 = arith.index_cast %505 : i32 to index
    %c0_212 = arith.constant 0 : index
    %509 = vector.load %arg5[%508, %c0_212] : memref<128x512xf32, #tpu.memory_space<vmem>>, vector<8x512xf32>
    %510 = arith.truncf %506 : vector<8x128xf32> to vector<8x128xbf16>
    %cst_213 = arith.constant dense<0.000000e+00> : vector<8x512xf32>
    %511 = tpu.matmul %510, %11, %cst_213 {dimension_numbers = #tpu.dot_dimension_numbers<[1], [0], [0], [1], [0, 0, 1, 1], [], []>} : vector<8x128xbf16>, vector<128x512xbf16>, vector<8x512xf32> -> vector<8x512xf32>
    %512 = arith.addf %509, %511 : vector<8x512xf32>
    %513 = vector.extract_strided_slice %512 {offsets = [0, 0], sizes = [8, 128], strides = [1, 1]} : vector<8x512xf32> to vector<8x128xf32>
    %514 = arith.negf %513 : vector<8x128xf32>
    %515 = math.exp %514 : vector<8x128xf32>
    %cst_214 = arith.constant 1.000000e+00 : f32
    %516 = vector.broadcast %cst_214 : f32 to vector<8x128xf32>
    %517 = arith.addf %516, %515 : vector<8x128xf32>
    %518 = arith.divf %516, %517 : vector<8x128xf32>
    %519 = vector.extract_strided_slice %512 {offsets = [0, 128], sizes = [8, 128], strides = [1, 1]} : vector<8x512xf32> to vector<8x128xf32>
    %520 = arith.negf %519 : vector<8x128xf32>
    %521 = math.exp %520 : vector<8x128xf32>
    %cst_215 = arith.constant 1.000000e+00 : f32
    %522 = vector.broadcast %cst_215 : f32 to vector<8x128xf32>
    %523 = arith.addf %522, %521 : vector<8x128xf32>
    %524 = arith.divf %522, %523 : vector<8x128xf32>
    %525 = vector.extract_strided_slice %512 {offsets = [0, 256], sizes = [8, 128], strides = [1, 1]} : vector<8x512xf32> to vector<8x128xf32>
    %526 = math.tanh %525 : vector<8x128xf32>
    %527 = vector.extract_strided_slice %512 {offsets = [0, 384], sizes = [8, 128], strides = [1, 1]} : vector<8x512xf32> to vector<8x128xf32>
    %528 = arith.negf %527 : vector<8x128xf32>
    %529 = math.exp %528 : vector<8x128xf32>
    %cst_216 = arith.constant 1.000000e+00 : f32
    %530 = vector.broadcast %cst_216 : f32 to vector<8x128xf32>
    %531 = arith.addf %530, %529 : vector<8x128xf32>
    %532 = arith.divf %530, %531 : vector<8x128xf32>
    %533 = arith.mulf %524, %507 : vector<8x128xf32>
    %534 = arith.mulf %518, %526 : vector<8x128xf32>
    %535 = arith.addf %533, %534 : vector<8x128xf32>
    %536 = math.tanh %535 : vector<8x128xf32>
    %537 = arith.mulf %532, %536 : vector<8x128xf32>
    %c0_217 = arith.constant 0 : index
    %c0_218 = arith.constant 0 : index
    %538 = vector.load %arg6[%c0_217, %c0_218] : memref<8x128xf32, #tpu.memory_space<vmem>>, vector<8x128xf32>
    tpu.vector_store %arg6[%c0_217, %c0_218], %537 {strides = array<i32>} : memref<8x128xf32, #tpu.memory_space<vmem>>, vector<8x128xf32>,
    %c0_219 = arith.constant 0 : index
    %c0_220 = arith.constant 0 : index
    %539 = vector.load %arg7[%c0_219, %c0_220] : memref<8x128xf32, #tpu.memory_space<vmem>>, vector<8x128xf32>
    tpu.vector_store %arg7[%c0_219, %c0_220], %535 {strides = array<i32>} : memref<8x128xf32, #tpu.memory_space<vmem>>, vector<8x128xf32>,
    %540 = arith.truncf %537 : vector<8x128xf32> to vector<8x128xbf16>
    %541 = arith.index_cast %c12_i32 : i32 to index
    %c0_221 = arith.constant 0 : index
    %c0_222 = arith.constant 0 : index
    %542 = vector.load %arg4[%541, %c0_221, %c0_222] : memref<16x8x128xbf16, #tpu.memory_space<vmem>>, vector<1x8x128xbf16>
    %543 = vector.shape_cast %542 : vector<1x8x128xbf16> to vector<8x128xbf16>
    %544 = vector.shape_cast %540 : vector<8x128xbf16> to vector<1x8x128xbf16>
    tpu.vector_store %arg4[%541, %c0_221, %c0_222], %544 {strides = array<i32>} : memref<16x8x128xbf16, #tpu.memory_space<vmem>>, vector<1x8x128xbf16>,
    %c13_i32 = arith.constant 13 : i32
    %c8_i32_223 = arith.constant 8 : i32
    %545 = arith.muli %c13_i32, %c8_i32_223 : i32
    %546 = tpu.assume_multiple %545, 8 : i32
    %c0_224 = arith.constant 0 : index
    %c0_225 = arith.constant 0 : index
    %547 = vector.load %arg6[%c0_224, %c0_225] : memref<8x128xf32, #tpu.memory_space<vmem>>, vector<8x128xf32>
    %c0_226 = arith.constant 0 : index
    %c0_227 = arith.constant 0 : index
    %548 = vector.load %arg7[%c0_226, %c0_227] : memref<8x128xf32, #tpu.memory_space<vmem>>, vector<8x128xf32>
    %549 = arith.index_cast %546 : i32 to index
    %c0_228 = arith.constant 0 : index
    %550 = vector.load %arg5[%549, %c0_228] : memref<128x512xf32, #tpu.memory_space<vmem>>, vector<8x512xf32>
    %551 = arith.truncf %547 : vector<8x128xf32> to vector<8x128xbf16>
    %cst_229 = arith.constant dense<0.000000e+00> : vector<8x512xf32>
    %552 = tpu.matmul %551, %11, %cst_229 {dimension_numbers = #tpu.dot_dimension_numbers<[1], [0], [0], [1], [0, 0, 1, 1], [], []>} : vector<8x128xbf16>, vector<128x512xbf16>, vector<8x512xf32> -> vector<8x512xf32>
    %553 = arith.addf %550, %552 : vector<8x512xf32>
    %554 = vector.extract_strided_slice %553 {offsets = [0, 0], sizes = [8, 128], strides = [1, 1]} : vector<8x512xf32> to vector<8x128xf32>
    %555 = arith.negf %554 : vector<8x128xf32>
    %556 = math.exp %555 : vector<8x128xf32>
    %cst_230 = arith.constant 1.000000e+00 : f32
    %557 = vector.broadcast %cst_230 : f32 to vector<8x128xf32>
    %558 = arith.addf %557, %556 : vector<8x128xf32>
    %559 = arith.divf %557, %558 : vector<8x128xf32>
    %560 = vector.extract_strided_slice %553 {offsets = [0, 128], sizes = [8, 128], strides = [1, 1]} : vector<8x512xf32> to vector<8x128xf32>
    %561 = arith.negf %560 : vector<8x128xf32>
    %562 = math.exp %561 : vector<8x128xf32>
    %cst_231 = arith.constant 1.000000e+00 : f32
    %563 = vector.broadcast %cst_231 : f32 to vector<8x128xf32>
    %564 = arith.addf %563, %562 : vector<8x128xf32>
    %565 = arith.divf %563, %564 : vector<8x128xf32>
    %566 = vector.extract_strided_slice %553 {offsets = [0, 256], sizes = [8, 128], strides = [1, 1]} : vector<8x512xf32> to vector<8x128xf32>
    %567 = math.tanh %566 : vector<8x128xf32>
    %568 = vector.extract_strided_slice %553 {offsets = [0, 384], sizes = [8, 128], strides = [1, 1]} : vector<8x512xf32> to vector<8x128xf32>
    %569 = arith.negf %568 : vector<8x128xf32>
    %570 = math.exp %569 : vector<8x128xf32>
    %cst_232 = arith.constant 1.000000e+00 : f32
    %571 = vector.broadcast %cst_232 : f32 to vector<8x128xf32>
    %572 = arith.addf %571, %570 : vector<8x128xf32>
    %573 = arith.divf %571, %572 : vector<8x128xf32>
    %574 = arith.mulf %565, %548 : vector<8x128xf32>
    %575 = arith.mulf %559, %567 : vector<8x128xf32>
    %576 = arith.addf %574, %575 : vector<8x128xf32>
    %577 = math.tanh %576 : vector<8x128xf32>
    %578 = arith.mulf %573, %577 : vector<8x128xf32>
    %c0_233 = arith.constant 0 : index
    %c0_234 = arith.constant 0 : index
    %579 = vector.load %arg6[%c0_233, %c0_234] : memref<8x128xf32, #tpu.memory_space<vmem>>, vector<8x128xf32>
    tpu.vector_store %arg6[%c0_233, %c0_234], %578 {strides = array<i32>} : memref<8x128xf32, #tpu.memory_space<vmem>>, vector<8x128xf32>,
    %c0_235 = arith.constant 0 : index
    %c0_236 = arith.constant 0 : index
    %580 = vector.load %arg7[%c0_235, %c0_236] : memref<8x128xf32, #tpu.memory_space<vmem>>, vector<8x128xf32>
    tpu.vector_store %arg7[%c0_235, %c0_236], %576 {strides = array<i32>} : memref<8x128xf32, #tpu.memory_space<vmem>>, vector<8x128xf32>,
    %581 = arith.truncf %578 : vector<8x128xf32> to vector<8x128xbf16>
    %582 = arith.index_cast %c13_i32 : i32 to index
    %c0_237 = arith.constant 0 : index
    %c0_238 = arith.constant 0 : index
    %583 = vector.load %arg4[%582, %c0_237, %c0_238] : memref<16x8x128xbf16, #tpu.memory_space<vmem>>, vector<1x8x128xbf16>
    %584 = vector.shape_cast %583 : vector<1x8x128xbf16> to vector<8x128xbf16>
    %585 = vector.shape_cast %581 : vector<8x128xbf16> to vector<1x8x128xbf16>
    tpu.vector_store %arg4[%582, %c0_237, %c0_238], %585 {strides = array<i32>} : memref<16x8x128xbf16, #tpu.memory_space<vmem>>, vector<1x8x128xbf16>,
    %c14_i32 = arith.constant 14 : i32
    %c8_i32_239 = arith.constant 8 : i32
    %586 = arith.muli %c14_i32, %c8_i32_239 : i32
    %587 = tpu.assume_multiple %586, 8 : i32
    %c0_240 = arith.constant 0 : index
    %c0_241 = arith.constant 0 : index
    %588 = vector.load %arg6[%c0_240, %c0_241] : memref<8x128xf32, #tpu.memory_space<vmem>>, vector<8x128xf32>
    %c0_242 = arith.constant 0 : index
    %c0_243 = arith.constant 0 : index
    %589 = vector.load %arg7[%c0_242, %c0_243] : memref<8x128xf32, #tpu.memory_space<vmem>>, vector<8x128xf32>
    %590 = arith.index_cast %587 : i32 to index
    %c0_244 = arith.constant 0 : index
    %591 = vector.load %arg5[%590, %c0_244] : memref<128x512xf32, #tpu.memory_space<vmem>>, vector<8x512xf32>
    %592 = arith.truncf %588 : vector<8x128xf32> to vector<8x128xbf16>
    %cst_245 = arith.constant dense<0.000000e+00> : vector<8x512xf32>
    %593 = tpu.matmul %592, %11, %cst_245 {dimension_numbers = #tpu.dot_dimension_numbers<[1], [0], [0], [1], [0, 0, 1, 1], [], []>} : vector<8x128xbf16>, vector<128x512xbf16>, vector<8x512xf32> -> vector<8x512xf32>
    %594 = arith.addf %591, %593 : vector<8x512xf32>
    %595 = vector.extract_strided_slice %594 {offsets = [0, 0], sizes = [8, 128], strides = [1, 1]} : vector<8x512xf32> to vector<8x128xf32>
    %596 = arith.negf %595 : vector<8x128xf32>
    %597 = math.exp %596 : vector<8x128xf32>
    %cst_246 = arith.constant 1.000000e+00 : f32
    %598 = vector.broadcast %cst_246 : f32 to vector<8x128xf32>
    %599 = arith.addf %598, %597 : vector<8x128xf32>
    %600 = arith.divf %598, %599 : vector<8x128xf32>
    %601 = vector.extract_strided_slice %594 {offsets = [0, 128], sizes = [8, 128], strides = [1, 1]} : vector<8x512xf32> to vector<8x128xf32>
    %602 = arith.negf %601 : vector<8x128xf32>
    %603 = math.exp %602 : vector<8x128xf32>
    %cst_247 = arith.constant 1.000000e+00 : f32
    %604 = vector.broadcast %cst_247 : f32 to vector<8x128xf32>
    %605 = arith.addf %604, %603 : vector<8x128xf32>
    %606 = arith.divf %604, %605 : vector<8x128xf32>
    %607 = vector.extract_strided_slice %594 {offsets = [0, 256], sizes = [8, 128], strides = [1, 1]} : vector<8x512xf32> to vector<8x128xf32>
    %608 = math.tanh %607 : vector<8x128xf32>
    %609 = vector.extract_strided_slice %594 {offsets = [0, 384], sizes = [8, 128], strides = [1, 1]} : vector<8x512xf32> to vector<8x128xf32>
    %610 = arith.negf %609 : vector<8x128xf32>
    %611 = math.exp %610 : vector<8x128xf32>
    %cst_248 = arith.constant 1.000000e+00 : f32
    %612 = vector.broadcast %cst_248 : f32 to vector<8x128xf32>
    %613 = arith.addf %612, %611 : vector<8x128xf32>
    %614 = arith.divf %612, %613 : vector<8x128xf32>
    %615 = arith.mulf %606, %589 : vector<8x128xf32>
    %616 = arith.mulf %600, %608 : vector<8x128xf32>
    %617 = arith.addf %615, %616 : vector<8x128xf32>
    %618 = math.tanh %617 : vector<8x128xf32>
    %619 = arith.mulf %614, %618 : vector<8x128xf32>
    %c0_249 = arith.constant 0 : index
    %c0_250 = arith.constant 0 : index
    %620 = vector.load %arg6[%c0_249, %c0_250] : memref<8x128xf32, #tpu.memory_space<vmem>>, vector<8x128xf32>
    tpu.vector_store %arg6[%c0_249, %c0_250], %619 {strides = array<i32>} : memref<8x128xf32, #tpu.memory_space<vmem>>, vector<8x128xf32>,
    %c0_251 = arith.constant 0 : index
    %c0_252 = arith.constant 0 : index
    %621 = vector.load %arg7[%c0_251, %c0_252] : memref<8x128xf32, #tpu.memory_space<vmem>>, vector<8x128xf32>
    tpu.vector_store %arg7[%c0_251, %c0_252], %617 {strides = array<i32>} : memref<8x128xf32, #tpu.memory_space<vmem>>, vector<8x128xf32>,
    %622 = arith.truncf %619 : vector<8x128xf32> to vector<8x128xbf16>
    %623 = arith.index_cast %c14_i32 : i32 to index
    %c0_253 = arith.constant 0 : index
    %c0_254 = arith.constant 0 : index
    %624 = vector.load %arg4[%623, %c0_253, %c0_254] : memref<16x8x128xbf16, #tpu.memory_space<vmem>>, vector<1x8x128xbf16>
    %625 = vector.shape_cast %624 : vector<1x8x128xbf16> to vector<8x128xbf16>
    %626 = vector.shape_cast %622 : vector<8x128xbf16> to vector<1x8x128xbf16>
    tpu.vector_store %arg4[%623, %c0_253, %c0_254], %626 {strides = array<i32>} : memref<16x8x128xbf16, #tpu.memory_space<vmem>>, vector<1x8x128xbf16>,
    %c15_i32 = arith.constant 15 : i32
    %c8_i32_255 = arith.constant 8 : i32
    %627 = arith.muli %c15_i32, %c8_i32_255 : i32
    %628 = tpu.assume_multiple %627, 8 : i32
    %c0_256 = arith.constant 0 : index
    %c0_257 = arith.constant 0 : index
    %629 = vector.load %arg6[%c0_256, %c0_257] : memref<8x128xf32, #tpu.memory_space<vmem>>, vector<8x128xf32>
    %c0_258 = arith.constant 0 : index
    %c0_259 = arith.constant 0 : index
    %630 = vector.load %arg7[%c0_258, %c0_259] : memref<8x128xf32, #tpu.memory_space<vmem>>, vector<8x128xf32>
    %631 = arith.index_cast %628 : i32 to index
    %c0_260 = arith.constant 0 : index
    %632 = vector.load %arg5[%631, %c0_260] : memref<128x512xf32, #tpu.memory_space<vmem>>, vector<8x512xf32>
    %633 = arith.truncf %629 : vector<8x128xf32> to vector<8x128xbf16>
    %cst_261 = arith.constant dense<0.000000e+00> : vector<8x512xf32>
    %634 = tpu.matmul %633, %11, %cst_261 {dimension_numbers = #tpu.dot_dimension_numbers<[1], [0], [0], [1], [0, 0, 1, 1], [], []>} : vector<8x128xbf16>, vector<128x512xbf16>, vector<8x512xf32> -> vector<8x512xf32>
    %635 = arith.addf %632, %634 : vector<8x512xf32>
    %636 = vector.extract_strided_slice %635 {offsets = [0, 0], sizes = [8, 128], strides = [1, 1]} : vector<8x512xf32> to vector<8x128xf32>
    %637 = arith.negf %636 : vector<8x128xf32>
    %638 = math.exp %637 : vector<8x128xf32>
    %cst_262 = arith.constant 1.000000e+00 : f32
    %639 = vector.broadcast %cst_262 : f32 to vector<8x128xf32>
    %640 = arith.addf %639, %638 : vector<8x128xf32>
    %641 = arith.divf %639, %640 : vector<8x128xf32>
    %642 = vector.extract_strided_slice %635 {offsets = [0, 128], sizes = [8, 128], strides = [1, 1]} : vector<8x512xf32> to vector<8x128xf32>
    %643 = arith.negf %642 : vector<8x128xf32>
    %644 = math.exp %643 : vector<8x128xf32>
    %cst_263 = arith.constant 1.000000e+00 : f32
    %645 = vector.broadcast %cst_263 : f32 to vector<8x128xf32>
    %646 = arith.addf %645, %644 : vector<8x128xf32>
    %647 = arith.divf %645, %646 : vector<8x128xf32>
    %648 = vector.extract_strided_slice %635 {offsets = [0, 256], sizes = [8, 128], strides = [1, 1]} : vector<8x512xf32> to vector<8x128xf32>
    %649 = math.tanh %648 : vector<8x128xf32>
    %650 = vector.extract_strided_slice %635 {offsets = [0, 384], sizes = [8, 128], strides = [1, 1]} : vector<8x512xf32> to vector<8x128xf32>
    %651 = arith.negf %650 : vector<8x128xf32>
    %652 = math.exp %651 : vector<8x128xf32>
    %cst_264 = arith.constant 1.000000e+00 : f32
    %653 = vector.broadcast %cst_264 : f32 to vector<8x128xf32>
    %654 = arith.addf %653, %652 : vector<8x128xf32>
    %655 = arith.divf %653, %654 : vector<8x128xf32>
    %656 = arith.mulf %647, %630 : vector<8x128xf32>
    %657 = arith.mulf %641, %649 : vector<8x128xf32>
    %658 = arith.addf %656, %657 : vector<8x128xf32>
    %659 = math.tanh %658 : vector<8x128xf32>
    %660 = arith.mulf %655, %659 : vector<8x128xf32>
    %c0_265 = arith.constant 0 : index
    %c0_266 = arith.constant 0 : index
    %661 = vector.load %arg6[%c0_265, %c0_266] : memref<8x128xf32, #tpu.memory_space<vmem>>, vector<8x128xf32>
    tpu.vector_store %arg6[%c0_265, %c0_266], %660 {strides = array<i32>} : memref<8x128xf32, #tpu.memory_space<vmem>>, vector<8x128xf32>,
    %c0_267 = arith.constant 0 : index
    %c0_268 = arith.constant 0 : index
    %662 = vector.load %arg7[%c0_267, %c0_268] : memref<8x128xf32, #tpu.memory_space<vmem>>, vector<8x128xf32>
    tpu.vector_store %arg7[%c0_267, %c0_268], %658 {strides = array<i32>} : memref<8x128xf32, #tpu.memory_space<vmem>>, vector<8x128xf32>,
    %663 = arith.truncf %660 : vector<8x128xf32> to vector<8x128xbf16>
    %664 = arith.index_cast %c15_i32 : i32 to index
    %c0_269 = arith.constant 0 : index
    %c0_270 = arith.constant 0 : index
    %665 = vector.load %arg4[%664, %c0_269, %c0_270] : memref<16x8x128xbf16, #tpu.memory_space<vmem>>, vector<1x8x128xbf16>
    %666 = vector.shape_cast %665 : vector<1x8x128xbf16> to vector<8x128xbf16>
    %667 = vector.shape_cast %663 : vector<8x128xbf16> to vector<1x8x128xbf16>
    tpu.vector_store %arg4[%664, %c0_269, %c0_270], %667 {strides = array<i32>} : memref<16x8x128xbf16, #tpu.memory_space<vmem>>, vector<1x8x128xbf16>,
    %c16_i32 = arith.constant 16 : i32
    return
  }
}

module attributes {stable_mosaic.version = 11 : i64} {
  func.func @_lstm_last_mlp_kernel(%arg0: memref<128x128xbf16, #tpu.memory_space<vmem>>, %arg1: memref<128x512xbf16, #tpu.memory_space<vmem>>, %arg2: memref<128x512xbf16, #tpu.memory_space<vmem>>, %arg3: memref<1x512xf32, #tpu.memory_space<vmem>>, %arg4: memref<128x128xbf16, #tpu.memory_space<vmem>>, %arg5: memref<1x128xf32, #tpu.memory_space<vmem>>, %arg6: memref<128x10xbf16, #tpu.memory_space<vmem>>, %arg7: memref<1x10xf32, #tpu.memory_space<vmem>>, %arg8: memref<8x10xf32, #tpu.memory_space<vmem>>, %arg9: memref<128x512xf32, #tpu.memory_space<vmem>>, %arg10: memref<8x128xf32, #tpu.memory_space<vmem>>, %arg11: memref<8x128xf32, #tpu.memory_space<vmem>>) attributes {dimension_semantics = [], scalar_prefetch = 0 : i64, scratch_operands = 3 : i64, tpu.core_type = #tpu.core_type<tc>} {
    %c0 = arith.constant 0 : index
    %c0_0 = arith.constant 0 : index
    %0 = vector.load %arg0[%c0, %c0_0] : memref<128x128xbf16, #tpu.memory_space<vmem>>, vector<128x128xbf16>
    %c0_1 = arith.constant 0 : index
    %c0_2 = arith.constant 0 : index
    %1 = vector.load %arg1[%c0_1, %c0_2] : memref<128x512xbf16, #tpu.memory_space<vmem>>, vector<128x512xbf16>
    %cst = arith.constant dense<0.000000e+00> : vector<128x512xf32>
    %2 = tpu.matmul %0, %1, %cst {dimension_numbers = #tpu.dot_dimension_numbers<[1], [0], [0], [1], [0, 0, 1, 1], [], []>} : vector<128x128xbf16>, vector<128x512xbf16>, vector<128x512xf32> -> vector<128x512xf32>
    %c0_3 = arith.constant 0 : index
    %c0_4 = arith.constant 0 : index
    %3 = vector.load %arg3[%c0_3, %c0_4] : memref<1x512xf32, #tpu.memory_space<vmem>>, vector<1x512xf32>
    %4 = vector.broadcast %3 : vector<1x512xf32> to vector<128x512xf32>
    %5 = arith.addf %2, %4 : vector<128x512xf32>
    %c0_5 = arith.constant 0 : index
    %c0_6 = arith.constant 0 : index
    %6 = vector.load %arg9[%c0_5, %c0_6] : memref<128x512xf32, #tpu.memory_space<vmem>>, vector<128x512xf32>
    tpu.vector_store %arg9[%c0_5, %c0_6], %5 {strides = array<i32>} : memref<128x512xf32, #tpu.memory_space<vmem>>, vector<128x512xf32>,
    %cst_7 = arith.constant 0.000000e+00 : f32
    %7 = vector.broadcast %cst_7 : f32 to vector<8x128xf32>
    %c0_8 = arith.constant 0 : index
    %c0_9 = arith.constant 0 : index
    %8 = vector.load %arg10[%c0_8, %c0_9] : memref<8x128xf32, #tpu.memory_space<vmem>>, vector<8x128xf32>
    tpu.vector_store %arg10[%c0_8, %c0_9], %7 {strides = array<i32>} : memref<8x128xf32, #tpu.memory_space<vmem>>, vector<8x128xf32>,
    %cst_10 = arith.constant 0.000000e+00 : f32
    %9 = vector.broadcast %cst_10 : f32 to vector<8x128xf32>
    %c0_11 = arith.constant 0 : index
    %c0_12 = arith.constant 0 : index
    %10 = vector.load %arg11[%c0_11, %c0_12] : memref<8x128xf32, #tpu.memory_space<vmem>>, vector<8x128xf32>
    tpu.vector_store %arg11[%c0_11, %c0_12], %9 {strides = array<i32>} : memref<8x128xf32, #tpu.memory_space<vmem>>, vector<8x128xf32>,
    %c0_13 = arith.constant 0 : index
    %c0_14 = arith.constant 0 : index
    %11 = vector.load %arg2[%c0_13, %c0_14] : memref<128x512xbf16, #tpu.memory_space<vmem>>, vector<128x512xbf16>
    %c0_i32 = arith.constant 0 : i32
    %c8_i32 = arith.constant 8 : i32
    %12 = arith.muli %c0_i32, %c8_i32 : i32
    %13 = tpu.assume_multiple %12, 8 : i32
    %c0_15 = arith.constant 0 : index
    %c0_16 = arith.constant 0 : index
    %14 = vector.load %arg10[%c0_15, %c0_16] : memref<8x128xf32, #tpu.memory_space<vmem>>, vector<8x128xf32>
    %c0_17 = arith.constant 0 : index
    %c0_18 = arith.constant 0 : index
    %15 = vector.load %arg11[%c0_17, %c0_18] : memref<8x128xf32, #tpu.memory_space<vmem>>, vector<8x128xf32>
    %16 = arith.index_cast %13 : i32 to index
    %c0_19 = arith.constant 0 : index
    %17 = vector.load %arg9[%16, %c0_19] : memref<128x512xf32, #tpu.memory_space<vmem>>, vector<8x512xf32>
    %18 = arith.truncf %14 : vector<8x128xf32> to vector<8x128xbf16>
    %cst_20 = arith.constant dense<0.000000e+00> : vector<8x512xf32>
    %19 = tpu.matmul %18, %11, %cst_20 {dimension_numbers = #tpu.dot_dimension_numbers<[1], [0], [0], [1], [0, 0, 1, 1], [], []>} : vector<8x128xbf16>, vector<128x512xbf16>, vector<8x512xf32> -> vector<8x512xf32>
    %20 = arith.addf %17, %19 : vector<8x512xf32>
    %21 = vector.extract_strided_slice %20 {offsets = [0, 0], sizes = [8, 128], strides = [1, 1]} : vector<8x512xf32> to vector<8x128xf32>
    %22 = arith.negf %21 : vector<8x128xf32>
    %23 = math.exp %22 : vector<8x128xf32>
    %cst_21 = arith.constant 1.000000e+00 : f32
    %24 = vector.broadcast %cst_21 : f32 to vector<8x128xf32>
    %25 = arith.addf %24, %23 : vector<8x128xf32>
    %26 = arith.divf %24, %25 : vector<8x128xf32>
    %27 = vector.extract_strided_slice %20 {offsets = [0, 128], sizes = [8, 128], strides = [1, 1]} : vector<8x512xf32> to vector<8x128xf32>
    %28 = arith.negf %27 : vector<8x128xf32>
    %29 = math.exp %28 : vector<8x128xf32>
    %cst_22 = arith.constant 1.000000e+00 : f32
    %30 = vector.broadcast %cst_22 : f32 to vector<8x128xf32>
    %31 = arith.addf %30, %29 : vector<8x128xf32>
    %32 = arith.divf %30, %31 : vector<8x128xf32>
    %33 = vector.extract_strided_slice %20 {offsets = [0, 256], sizes = [8, 128], strides = [1, 1]} : vector<8x512xf32> to vector<8x128xf32>
    %34 = math.tanh %33 : vector<8x128xf32>
    %35 = vector.extract_strided_slice %20 {offsets = [0, 384], sizes = [8, 128], strides = [1, 1]} : vector<8x512xf32> to vector<8x128xf32>
    %36 = arith.negf %35 : vector<8x128xf32>
    %37 = math.exp %36 : vector<8x128xf32>
    %cst_23 = arith.constant 1.000000e+00 : f32
    %38 = vector.broadcast %cst_23 : f32 to vector<8x128xf32>
    %39 = arith.addf %38, %37 : vector<8x128xf32>
    %40 = arith.divf %38, %39 : vector<8x128xf32>
    %41 = arith.mulf %32, %15 : vector<8x128xf32>
    %42 = arith.mulf %26, %34 : vector<8x128xf32>
    %43 = arith.addf %41, %42 : vector<8x128xf32>
    %44 = math.tanh %43 : vector<8x128xf32>
    %45 = arith.mulf %40, %44 : vector<8x128xf32>
    %c0_24 = arith.constant 0 : index
    %c0_25 = arith.constant 0 : index
    %46 = vector.load %arg10[%c0_24, %c0_25] : memref<8x128xf32, #tpu.memory_space<vmem>>, vector<8x128xf32>
    tpu.vector_store %arg10[%c0_24, %c0_25], %45 {strides = array<i32>} : memref<8x128xf32, #tpu.memory_space<vmem>>, vector<8x128xf32>,
    %c0_26 = arith.constant 0 : index
    %c0_27 = arith.constant 0 : index
    %47 = vector.load %arg11[%c0_26, %c0_27] : memref<8x128xf32, #tpu.memory_space<vmem>>, vector<8x128xf32>
    tpu.vector_store %arg11[%c0_26, %c0_27], %43 {strides = array<i32>} : memref<8x128xf32, #tpu.memory_space<vmem>>, vector<8x128xf32>,
    %c1_i32 = arith.constant 1 : i32
    %c8_i32_28 = arith.constant 8 : i32
    %48 = arith.muli %c1_i32, %c8_i32_28 : i32
    %49 = tpu.assume_multiple %48, 8 : i32
    %c0_29 = arith.constant 0 : index
    %c0_30 = arith.constant 0 : index
    %50 = vector.load %arg10[%c0_29, %c0_30] : memref<8x128xf32, #tpu.memory_space<vmem>>, vector<8x128xf32>
    %c0_31 = arith.constant 0 : index
    %c0_32 = arith.constant 0 : index
    %51 = vector.load %arg11[%c0_31, %c0_32] : memref<8x128xf32, #tpu.memory_space<vmem>>, vector<8x128xf32>
    %52 = arith.index_cast %49 : i32 to index
    %c0_33 = arith.constant 0 : index
    %53 = vector.load %arg9[%52, %c0_33] : memref<128x512xf32, #tpu.memory_space<vmem>>, vector<8x512xf32>
    %54 = arith.truncf %50 : vector<8x128xf32> to vector<8x128xbf16>
    %cst_34 = arith.constant dense<0.000000e+00> : vector<8x512xf32>
    %55 = tpu.matmul %54, %11, %cst_34 {dimension_numbers = #tpu.dot_dimension_numbers<[1], [0], [0], [1], [0, 0, 1, 1], [], []>} : vector<8x128xbf16>, vector<128x512xbf16>, vector<8x512xf32> -> vector<8x512xf32>
    %56 = arith.addf %53, %55 : vector<8x512xf32>
    %57 = vector.extract_strided_slice %56 {offsets = [0, 0], sizes = [8, 128], strides = [1, 1]} : vector<8x512xf32> to vector<8x128xf32>
    %58 = arith.negf %57 : vector<8x128xf32>
    %59 = math.exp %58 : vector<8x128xf32>
    %cst_35 = arith.constant 1.000000e+00 : f32
    %60 = vector.broadcast %cst_35 : f32 to vector<8x128xf32>
    %61 = arith.addf %60, %59 : vector<8x128xf32>
    %62 = arith.divf %60, %61 : vector<8x128xf32>
    %63 = vector.extract_strided_slice %56 {offsets = [0, 128], sizes = [8, 128], strides = [1, 1]} : vector<8x512xf32> to vector<8x128xf32>
    %64 = arith.negf %63 : vector<8x128xf32>
    %65 = math.exp %64 : vector<8x128xf32>
    %cst_36 = arith.constant 1.000000e+00 : f32
    %66 = vector.broadcast %cst_36 : f32 to vector<8x128xf32>
    %67 = arith.addf %66, %65 : vector<8x128xf32>
    %68 = arith.divf %66, %67 : vector<8x128xf32>
    %69 = vector.extract_strided_slice %56 {offsets = [0, 256], sizes = [8, 128], strides = [1, 1]} : vector<8x512xf32> to vector<8x128xf32>
    %70 = math.tanh %69 : vector<8x128xf32>
    %71 = vector.extract_strided_slice %56 {offsets = [0, 384], sizes = [8, 128], strides = [1, 1]} : vector<8x512xf32> to vector<8x128xf32>
    %72 = arith.negf %71 : vector<8x128xf32>
    %73 = math.exp %72 : vector<8x128xf32>
    %cst_37 = arith.constant 1.000000e+00 : f32
    %74 = vector.broadcast %cst_37 : f32 to vector<8x128xf32>
    %75 = arith.addf %74, %73 : vector<8x128xf32>
    %76 = arith.divf %74, %75 : vector<8x128xf32>
    %77 = arith.mulf %68, %51 : vector<8x128xf32>
    %78 = arith.mulf %62, %70 : vector<8x128xf32>
    %79 = arith.addf %77, %78 : vector<8x128xf32>
    %80 = math.tanh %79 : vector<8x128xf32>
    %81 = arith.mulf %76, %80 : vector<8x128xf32>
    %c0_38 = arith.constant 0 : index
    %c0_39 = arith.constant 0 : index
    %82 = vector.load %arg10[%c0_38, %c0_39] : memref<8x128xf32, #tpu.memory_space<vmem>>, vector<8x128xf32>
    tpu.vector_store %arg10[%c0_38, %c0_39], %81 {strides = array<i32>} : memref<8x128xf32, #tpu.memory_space<vmem>>, vector<8x128xf32>,
    %c0_40 = arith.constant 0 : index
    %c0_41 = arith.constant 0 : index
    %83 = vector.load %arg11[%c0_40, %c0_41] : memref<8x128xf32, #tpu.memory_space<vmem>>, vector<8x128xf32>
    tpu.vector_store %arg11[%c0_40, %c0_41], %79 {strides = array<i32>} : memref<8x128xf32, #tpu.memory_space<vmem>>, vector<8x128xf32>,
    %c2_i32 = arith.constant 2 : i32
    %c8_i32_42 = arith.constant 8 : i32
    %84 = arith.muli %c2_i32, %c8_i32_42 : i32
    %85 = tpu.assume_multiple %84, 8 : i32
    %c0_43 = arith.constant 0 : index
    %c0_44 = arith.constant 0 : index
    %86 = vector.load %arg10[%c0_43, %c0_44] : memref<8x128xf32, #tpu.memory_space<vmem>>, vector<8x128xf32>
    %c0_45 = arith.constant 0 : index
    %c0_46 = arith.constant 0 : index
    %87 = vector.load %arg11[%c0_45, %c0_46] : memref<8x128xf32, #tpu.memory_space<vmem>>, vector<8x128xf32>
    %88 = arith.index_cast %85 : i32 to index
    %c0_47 = arith.constant 0 : index
    %89 = vector.load %arg9[%88, %c0_47] : memref<128x512xf32, #tpu.memory_space<vmem>>, vector<8x512xf32>
    %90 = arith.truncf %86 : vector<8x128xf32> to vector<8x128xbf16>
    %cst_48 = arith.constant dense<0.000000e+00> : vector<8x512xf32>
    %91 = tpu.matmul %90, %11, %cst_48 {dimension_numbers = #tpu.dot_dimension_numbers<[1], [0], [0], [1], [0, 0, 1, 1], [], []>} : vector<8x128xbf16>, vector<128x512xbf16>, vector<8x512xf32> -> vector<8x512xf32>
    %92 = arith.addf %89, %91 : vector<8x512xf32>
    %93 = vector.extract_strided_slice %92 {offsets = [0, 0], sizes = [8, 128], strides = [1, 1]} : vector<8x512xf32> to vector<8x128xf32>
    %94 = arith.negf %93 : vector<8x128xf32>
    %95 = math.exp %94 : vector<8x128xf32>
    %cst_49 = arith.constant 1.000000e+00 : f32
    %96 = vector.broadcast %cst_49 : f32 to vector<8x128xf32>
    %97 = arith.addf %96, %95 : vector<8x128xf32>
    %98 = arith.divf %96, %97 : vector<8x128xf32>
    %99 = vector.extract_strided_slice %92 {offsets = [0, 128], sizes = [8, 128], strides = [1, 1]} : vector<8x512xf32> to vector<8x128xf32>
    %100 = arith.negf %99 : vector<8x128xf32>
    %101 = math.exp %100 : vector<8x128xf32>
    %cst_50 = arith.constant 1.000000e+00 : f32
    %102 = vector.broadcast %cst_50 : f32 to vector<8x128xf32>
    %103 = arith.addf %102, %101 : vector<8x128xf32>
    %104 = arith.divf %102, %103 : vector<8x128xf32>
    %105 = vector.extract_strided_slice %92 {offsets = [0, 256], sizes = [8, 128], strides = [1, 1]} : vector<8x512xf32> to vector<8x128xf32>
    %106 = math.tanh %105 : vector<8x128xf32>
    %107 = vector.extract_strided_slice %92 {offsets = [0, 384], sizes = [8, 128], strides = [1, 1]} : vector<8x512xf32> to vector<8x128xf32>
    %108 = arith.negf %107 : vector<8x128xf32>
    %109 = math.exp %108 : vector<8x128xf32>
    %cst_51 = arith.constant 1.000000e+00 : f32
    %110 = vector.broadcast %cst_51 : f32 to vector<8x128xf32>
    %111 = arith.addf %110, %109 : vector<8x128xf32>
    %112 = arith.divf %110, %111 : vector<8x128xf32>
    %113 = arith.mulf %104, %87 : vector<8x128xf32>
    %114 = arith.mulf %98, %106 : vector<8x128xf32>
    %115 = arith.addf %113, %114 : vector<8x128xf32>
    %116 = math.tanh %115 : vector<8x128xf32>
    %117 = arith.mulf %112, %116 : vector<8x128xf32>
    %c0_52 = arith.constant 0 : index
    %c0_53 = arith.constant 0 : index
    %118 = vector.load %arg10[%c0_52, %c0_53] : memref<8x128xf32, #tpu.memory_space<vmem>>, vector<8x128xf32>
    tpu.vector_store %arg10[%c0_52, %c0_53], %117 {strides = array<i32>} : memref<8x128xf32, #tpu.memory_space<vmem>>, vector<8x128xf32>,
    %c0_54 = arith.constant 0 : index
    %c0_55 = arith.constant 0 : index
    %119 = vector.load %arg11[%c0_54, %c0_55] : memref<8x128xf32, #tpu.memory_space<vmem>>, vector<8x128xf32>
    tpu.vector_store %arg11[%c0_54, %c0_55], %115 {strides = array<i32>} : memref<8x128xf32, #tpu.memory_space<vmem>>, vector<8x128xf32>,
    %c3_i32 = arith.constant 3 : i32
    %c8_i32_56 = arith.constant 8 : i32
    %120 = arith.muli %c3_i32, %c8_i32_56 : i32
    %121 = tpu.assume_multiple %120, 8 : i32
    %c0_57 = arith.constant 0 : index
    %c0_58 = arith.constant 0 : index
    %122 = vector.load %arg10[%c0_57, %c0_58] : memref<8x128xf32, #tpu.memory_space<vmem>>, vector<8x128xf32>
    %c0_59 = arith.constant 0 : index
    %c0_60 = arith.constant 0 : index
    %123 = vector.load %arg11[%c0_59, %c0_60] : memref<8x128xf32, #tpu.memory_space<vmem>>, vector<8x128xf32>
    %124 = arith.index_cast %121 : i32 to index
    %c0_61 = arith.constant 0 : index
    %125 = vector.load %arg9[%124, %c0_61] : memref<128x512xf32, #tpu.memory_space<vmem>>, vector<8x512xf32>
    %126 = arith.truncf %122 : vector<8x128xf32> to vector<8x128xbf16>
    %cst_62 = arith.constant dense<0.000000e+00> : vector<8x512xf32>
    %127 = tpu.matmul %126, %11, %cst_62 {dimension_numbers = #tpu.dot_dimension_numbers<[1], [0], [0], [1], [0, 0, 1, 1], [], []>} : vector<8x128xbf16>, vector<128x512xbf16>, vector<8x512xf32> -> vector<8x512xf32>
    %128 = arith.addf %125, %127 : vector<8x512xf32>
    %129 = vector.extract_strided_slice %128 {offsets = [0, 0], sizes = [8, 128], strides = [1, 1]} : vector<8x512xf32> to vector<8x128xf32>
    %130 = arith.negf %129 : vector<8x128xf32>
    %131 = math.exp %130 : vector<8x128xf32>
    %cst_63 = arith.constant 1.000000e+00 : f32
    %132 = vector.broadcast %cst_63 : f32 to vector<8x128xf32>
    %133 = arith.addf %132, %131 : vector<8x128xf32>
    %134 = arith.divf %132, %133 : vector<8x128xf32>
    %135 = vector.extract_strided_slice %128 {offsets = [0, 128], sizes = [8, 128], strides = [1, 1]} : vector<8x512xf32> to vector<8x128xf32>
    %136 = arith.negf %135 : vector<8x128xf32>
    %137 = math.exp %136 : vector<8x128xf32>
    %cst_64 = arith.constant 1.000000e+00 : f32
    %138 = vector.broadcast %cst_64 : f32 to vector<8x128xf32>
    %139 = arith.addf %138, %137 : vector<8x128xf32>
    %140 = arith.divf %138, %139 : vector<8x128xf32>
    %141 = vector.extract_strided_slice %128 {offsets = [0, 256], sizes = [8, 128], strides = [1, 1]} : vector<8x512xf32> to vector<8x128xf32>
    %142 = math.tanh %141 : vector<8x128xf32>
    %143 = vector.extract_strided_slice %128 {offsets = [0, 384], sizes = [8, 128], strides = [1, 1]} : vector<8x512xf32> to vector<8x128xf32>
    %144 = arith.negf %143 : vector<8x128xf32>
    %145 = math.exp %144 : vector<8x128xf32>
    %cst_65 = arith.constant 1.000000e+00 : f32
    %146 = vector.broadcast %cst_65 : f32 to vector<8x128xf32>
    %147 = arith.addf %146, %145 : vector<8x128xf32>
    %148 = arith.divf %146, %147 : vector<8x128xf32>
    %149 = arith.mulf %140, %123 : vector<8x128xf32>
    %150 = arith.mulf %134, %142 : vector<8x128xf32>
    %151 = arith.addf %149, %150 : vector<8x128xf32>
    %152 = math.tanh %151 : vector<8x128xf32>
    %153 = arith.mulf %148, %152 : vector<8x128xf32>
    %c0_66 = arith.constant 0 : index
    %c0_67 = arith.constant 0 : index
    %154 = vector.load %arg10[%c0_66, %c0_67] : memref<8x128xf32, #tpu.memory_space<vmem>>, vector<8x128xf32>
    tpu.vector_store %arg10[%c0_66, %c0_67], %153 {strides = array<i32>} : memref<8x128xf32, #tpu.memory_space<vmem>>, vector<8x128xf32>,
    %c0_68 = arith.constant 0 : index
    %c0_69 = arith.constant 0 : index
    %155 = vector.load %arg11[%c0_68, %c0_69] : memref<8x128xf32, #tpu.memory_space<vmem>>, vector<8x128xf32>
    tpu.vector_store %arg11[%c0_68, %c0_69], %151 {strides = array<i32>} : memref<8x128xf32, #tpu.memory_space<vmem>>, vector<8x128xf32>,
    %c4_i32 = arith.constant 4 : i32
    %c8_i32_70 = arith.constant 8 : i32
    %156 = arith.muli %c4_i32, %c8_i32_70 : i32
    %157 = tpu.assume_multiple %156, 8 : i32
    %c0_71 = arith.constant 0 : index
    %c0_72 = arith.constant 0 : index
    %158 = vector.load %arg10[%c0_71, %c0_72] : memref<8x128xf32, #tpu.memory_space<vmem>>, vector<8x128xf32>
    %c0_73 = arith.constant 0 : index
    %c0_74 = arith.constant 0 : index
    %159 = vector.load %arg11[%c0_73, %c0_74] : memref<8x128xf32, #tpu.memory_space<vmem>>, vector<8x128xf32>
    %160 = arith.index_cast %157 : i32 to index
    %c0_75 = arith.constant 0 : index
    %161 = vector.load %arg9[%160, %c0_75] : memref<128x512xf32, #tpu.memory_space<vmem>>, vector<8x512xf32>
    %162 = arith.truncf %158 : vector<8x128xf32> to vector<8x128xbf16>
    %cst_76 = arith.constant dense<0.000000e+00> : vector<8x512xf32>
    %163 = tpu.matmul %162, %11, %cst_76 {dimension_numbers = #tpu.dot_dimension_numbers<[1], [0], [0], [1], [0, 0, 1, 1], [], []>} : vector<8x128xbf16>, vector<128x512xbf16>, vector<8x512xf32> -> vector<8x512xf32>
    %164 = arith.addf %161, %163 : vector<8x512xf32>
    %165 = vector.extract_strided_slice %164 {offsets = [0, 0], sizes = [8, 128], strides = [1, 1]} : vector<8x512xf32> to vector<8x128xf32>
    %166 = arith.negf %165 : vector<8x128xf32>
    %167 = math.exp %166 : vector<8x128xf32>
    %cst_77 = arith.constant 1.000000e+00 : f32
    %168 = vector.broadcast %cst_77 : f32 to vector<8x128xf32>
    %169 = arith.addf %168, %167 : vector<8x128xf32>
    %170 = arith.divf %168, %169 : vector<8x128xf32>
    %171 = vector.extract_strided_slice %164 {offsets = [0, 128], sizes = [8, 128], strides = [1, 1]} : vector<8x512xf32> to vector<8x128xf32>
    %172 = arith.negf %171 : vector<8x128xf32>
    %173 = math.exp %172 : vector<8x128xf32>
    %cst_78 = arith.constant 1.000000e+00 : f32
    %174 = vector.broadcast %cst_78 : f32 to vector<8x128xf32>
    %175 = arith.addf %174, %173 : vector<8x128xf32>
    %176 = arith.divf %174, %175 : vector<8x128xf32>
    %177 = vector.extract_strided_slice %164 {offsets = [0, 256], sizes = [8, 128], strides = [1, 1]} : vector<8x512xf32> to vector<8x128xf32>
    %178 = math.tanh %177 : vector<8x128xf32>
    %179 = vector.extract_strided_slice %164 {offsets = [0, 384], sizes = [8, 128], strides = [1, 1]} : vector<8x512xf32> to vector<8x128xf32>
    %180 = arith.negf %179 : vector<8x128xf32>
    %181 = math.exp %180 : vector<8x128xf32>
    %cst_79 = arith.constant 1.000000e+00 : f32
    %182 = vector.broadcast %cst_79 : f32 to vector<8x128xf32>
    %183 = arith.addf %182, %181 : vector<8x128xf32>
    %184 = arith.divf %182, %183 : vector<8x128xf32>
    %185 = arith.mulf %176, %159 : vector<8x128xf32>
    %186 = arith.mulf %170, %178 : vector<8x128xf32>
    %187 = arith.addf %185, %186 : vector<8x128xf32>
    %188 = math.tanh %187 : vector<8x128xf32>
    %189 = arith.mulf %184, %188 : vector<8x128xf32>
    %c0_80 = arith.constant 0 : index
    %c0_81 = arith.constant 0 : index
    %190 = vector.load %arg10[%c0_80, %c0_81] : memref<8x128xf32, #tpu.memory_space<vmem>>, vector<8x128xf32>
    tpu.vector_store %arg10[%c0_80, %c0_81], %189 {strides = array<i32>} : memref<8x128xf32, #tpu.memory_space<vmem>>, vector<8x128xf32>,
    %c0_82 = arith.constant 0 : index
    %c0_83 = arith.constant 0 : index
    %191 = vector.load %arg11[%c0_82, %c0_83] : memref<8x128xf32, #tpu.memory_space<vmem>>, vector<8x128xf32>
    tpu.vector_store %arg11[%c0_82, %c0_83], %187 {strides = array<i32>} : memref<8x128xf32, #tpu.memory_space<vmem>>, vector<8x128xf32>,
    %c5_i32 = arith.constant 5 : i32
    %c8_i32_84 = arith.constant 8 : i32
    %192 = arith.muli %c5_i32, %c8_i32_84 : i32
    %193 = tpu.assume_multiple %192, 8 : i32
    %c0_85 = arith.constant 0 : index
    %c0_86 = arith.constant 0 : index
    %194 = vector.load %arg10[%c0_85, %c0_86] : memref<8x128xf32, #tpu.memory_space<vmem>>, vector<8x128xf32>
    %c0_87 = arith.constant 0 : index
    %c0_88 = arith.constant 0 : index
    %195 = vector.load %arg11[%c0_87, %c0_88] : memref<8x128xf32, #tpu.memory_space<vmem>>, vector<8x128xf32>
    %196 = arith.index_cast %193 : i32 to index
    %c0_89 = arith.constant 0 : index
    %197 = vector.load %arg9[%196, %c0_89] : memref<128x512xf32, #tpu.memory_space<vmem>>, vector<8x512xf32>
    %198 = arith.truncf %194 : vector<8x128xf32> to vector<8x128xbf16>
    %cst_90 = arith.constant dense<0.000000e+00> : vector<8x512xf32>
    %199 = tpu.matmul %198, %11, %cst_90 {dimension_numbers = #tpu.dot_dimension_numbers<[1], [0], [0], [1], [0, 0, 1, 1], [], []>} : vector<8x128xbf16>, vector<128x512xbf16>, vector<8x512xf32> -> vector<8x512xf32>
    %200 = arith.addf %197, %199 : vector<8x512xf32>
    %201 = vector.extract_strided_slice %200 {offsets = [0, 0], sizes = [8, 128], strides = [1, 1]} : vector<8x512xf32> to vector<8x128xf32>
    %202 = arith.negf %201 : vector<8x128xf32>
    %203 = math.exp %202 : vector<8x128xf32>
    %cst_91 = arith.constant 1.000000e+00 : f32
    %204 = vector.broadcast %cst_91 : f32 to vector<8x128xf32>
    %205 = arith.addf %204, %203 : vector<8x128xf32>
    %206 = arith.divf %204, %205 : vector<8x128xf32>
    %207 = vector.extract_strided_slice %200 {offsets = [0, 128], sizes = [8, 128], strides = [1, 1]} : vector<8x512xf32> to vector<8x128xf32>
    %208 = arith.negf %207 : vector<8x128xf32>
    %209 = math.exp %208 : vector<8x128xf32>
    %cst_92 = arith.constant 1.000000e+00 : f32
    %210 = vector.broadcast %cst_92 : f32 to vector<8x128xf32>
    %211 = arith.addf %210, %209 : vector<8x128xf32>
    %212 = arith.divf %210, %211 : vector<8x128xf32>
    %213 = vector.extract_strided_slice %200 {offsets = [0, 256], sizes = [8, 128], strides = [1, 1]} : vector<8x512xf32> to vector<8x128xf32>
    %214 = math.tanh %213 : vector<8x128xf32>
    %215 = vector.extract_strided_slice %200 {offsets = [0, 384], sizes = [8, 128], strides = [1, 1]} : vector<8x512xf32> to vector<8x128xf32>
    %216 = arith.negf %215 : vector<8x128xf32>
    %217 = math.exp %216 : vector<8x128xf32>
    %cst_93 = arith.constant 1.000000e+00 : f32
    %218 = vector.broadcast %cst_93 : f32 to vector<8x128xf32>
    %219 = arith.addf %218, %217 : vector<8x128xf32>
    %220 = arith.divf %218, %219 : vector<8x128xf32>
    %221 = arith.mulf %212, %195 : vector<8x128xf32>
    %222 = arith.mulf %206, %214 : vector<8x128xf32>
    %223 = arith.addf %221, %222 : vector<8x128xf32>
    %224 = math.tanh %223 : vector<8x128xf32>
    %225 = arith.mulf %220, %224 : vector<8x128xf32>
    %c0_94 = arith.constant 0 : index
    %c0_95 = arith.constant 0 : index
    %226 = vector.load %arg10[%c0_94, %c0_95] : memref<8x128xf32, #tpu.memory_space<vmem>>, vector<8x128xf32>
    tpu.vector_store %arg10[%c0_94, %c0_95], %225 {strides = array<i32>} : memref<8x128xf32, #tpu.memory_space<vmem>>, vector<8x128xf32>,
    %c0_96 = arith.constant 0 : index
    %c0_97 = arith.constant 0 : index
    %227 = vector.load %arg11[%c0_96, %c0_97] : memref<8x128xf32, #tpu.memory_space<vmem>>, vector<8x128xf32>
    tpu.vector_store %arg11[%c0_96, %c0_97], %223 {strides = array<i32>} : memref<8x128xf32, #tpu.memory_space<vmem>>, vector<8x128xf32>,
    %c6_i32 = arith.constant 6 : i32
    %c8_i32_98 = arith.constant 8 : i32
    %228 = arith.muli %c6_i32, %c8_i32_98 : i32
    %229 = tpu.assume_multiple %228, 8 : i32
    %c0_99 = arith.constant 0 : index
    %c0_100 = arith.constant 0 : index
    %230 = vector.load %arg10[%c0_99, %c0_100] : memref<8x128xf32, #tpu.memory_space<vmem>>, vector<8x128xf32>
    %c0_101 = arith.constant 0 : index
    %c0_102 = arith.constant 0 : index
    %231 = vector.load %arg11[%c0_101, %c0_102] : memref<8x128xf32, #tpu.memory_space<vmem>>, vector<8x128xf32>
    %232 = arith.index_cast %229 : i32 to index
    %c0_103 = arith.constant 0 : index
    %233 = vector.load %arg9[%232, %c0_103] : memref<128x512xf32, #tpu.memory_space<vmem>>, vector<8x512xf32>
    %234 = arith.truncf %230 : vector<8x128xf32> to vector<8x128xbf16>
    %cst_104 = arith.constant dense<0.000000e+00> : vector<8x512xf32>
    %235 = tpu.matmul %234, %11, %cst_104 {dimension_numbers = #tpu.dot_dimension_numbers<[1], [0], [0], [1], [0, 0, 1, 1], [], []>} : vector<8x128xbf16>, vector<128x512xbf16>, vector<8x512xf32> -> vector<8x512xf32>
    %236 = arith.addf %233, %235 : vector<8x512xf32>
    %237 = vector.extract_strided_slice %236 {offsets = [0, 0], sizes = [8, 128], strides = [1, 1]} : vector<8x512xf32> to vector<8x128xf32>
    %238 = arith.negf %237 : vector<8x128xf32>
    %239 = math.exp %238 : vector<8x128xf32>
    %cst_105 = arith.constant 1.000000e+00 : f32
    %240 = vector.broadcast %cst_105 : f32 to vector<8x128xf32>
    %241 = arith.addf %240, %239 : vector<8x128xf32>
    %242 = arith.divf %240, %241 : vector<8x128xf32>
    %243 = vector.extract_strided_slice %236 {offsets = [0, 128], sizes = [8, 128], strides = [1, 1]} : vector<8x512xf32> to vector<8x128xf32>
    %244 = arith.negf %243 : vector<8x128xf32>
    %245 = math.exp %244 : vector<8x128xf32>
    %cst_106 = arith.constant 1.000000e+00 : f32
    %246 = vector.broadcast %cst_106 : f32 to vector<8x128xf32>
    %247 = arith.addf %246, %245 : vector<8x128xf32>
    %248 = arith.divf %246, %247 : vector<8x128xf32>
    %249 = vector.extract_strided_slice %236 {offsets = [0, 256], sizes = [8, 128], strides = [1, 1]} : vector<8x512xf32> to vector<8x128xf32>
    %250 = math.tanh %249 : vector<8x128xf32>
    %251 = vector.extract_strided_slice %236 {offsets = [0, 384], sizes = [8, 128], strides = [1, 1]} : vector<8x512xf32> to vector<8x128xf32>
    %252 = arith.negf %251 : vector<8x128xf32>
    %253 = math.exp %252 : vector<8x128xf32>
    %cst_107 = arith.constant 1.000000e+00 : f32
    %254 = vector.broadcast %cst_107 : f32 to vector<8x128xf32>
    %255 = arith.addf %254, %253 : vector<8x128xf32>
    %256 = arith.divf %254, %255 : vector<8x128xf32>
    %257 = arith.mulf %248, %231 : vector<8x128xf32>
    %258 = arith.mulf %242, %250 : vector<8x128xf32>
    %259 = arith.addf %257, %258 : vector<8x128xf32>
    %260 = math.tanh %259 : vector<8x128xf32>
    %261 = arith.mulf %256, %260 : vector<8x128xf32>
    %c0_108 = arith.constant 0 : index
    %c0_109 = arith.constant 0 : index
    %262 = vector.load %arg10[%c0_108, %c0_109] : memref<8x128xf32, #tpu.memory_space<vmem>>, vector<8x128xf32>
    tpu.vector_store %arg10[%c0_108, %c0_109], %261 {strides = array<i32>} : memref<8x128xf32, #tpu.memory_space<vmem>>, vector<8x128xf32>,
    %c0_110 = arith.constant 0 : index
    %c0_111 = arith.constant 0 : index
    %263 = vector.load %arg11[%c0_110, %c0_111] : memref<8x128xf32, #tpu.memory_space<vmem>>, vector<8x128xf32>
    tpu.vector_store %arg11[%c0_110, %c0_111], %259 {strides = array<i32>} : memref<8x128xf32, #tpu.memory_space<vmem>>, vector<8x128xf32>,
    %c7_i32 = arith.constant 7 : i32
    %c8_i32_112 = arith.constant 8 : i32
    %264 = arith.muli %c7_i32, %c8_i32_112 : i32
    %265 = tpu.assume_multiple %264, 8 : i32
    %c0_113 = arith.constant 0 : index
    %c0_114 = arith.constant 0 : index
    %266 = vector.load %arg10[%c0_113, %c0_114] : memref<8x128xf32, #tpu.memory_space<vmem>>, vector<8x128xf32>
    %c0_115 = arith.constant 0 : index
    %c0_116 = arith.constant 0 : index
    %267 = vector.load %arg11[%c0_115, %c0_116] : memref<8x128xf32, #tpu.memory_space<vmem>>, vector<8x128xf32>
    %268 = arith.index_cast %265 : i32 to index
    %c0_117 = arith.constant 0 : index
    %269 = vector.load %arg9[%268, %c0_117] : memref<128x512xf32, #tpu.memory_space<vmem>>, vector<8x512xf32>
    %270 = arith.truncf %266 : vector<8x128xf32> to vector<8x128xbf16>
    %cst_118 = arith.constant dense<0.000000e+00> : vector<8x512xf32>
    %271 = tpu.matmul %270, %11, %cst_118 {dimension_numbers = #tpu.dot_dimension_numbers<[1], [0], [0], [1], [0, 0, 1, 1], [], []>} : vector<8x128xbf16>, vector<128x512xbf16>, vector<8x512xf32> -> vector<8x512xf32>
    %272 = arith.addf %269, %271 : vector<8x512xf32>
    %273 = vector.extract_strided_slice %272 {offsets = [0, 0], sizes = [8, 128], strides = [1, 1]} : vector<8x512xf32> to vector<8x128xf32>
    %274 = arith.negf %273 : vector<8x128xf32>
    %275 = math.exp %274 : vector<8x128xf32>
    %cst_119 = arith.constant 1.000000e+00 : f32
    %276 = vector.broadcast %cst_119 : f32 to vector<8x128xf32>
    %277 = arith.addf %276, %275 : vector<8x128xf32>
    %278 = arith.divf %276, %277 : vector<8x128xf32>
    %279 = vector.extract_strided_slice %272 {offsets = [0, 128], sizes = [8, 128], strides = [1, 1]} : vector<8x512xf32> to vector<8x128xf32>
    %280 = arith.negf %279 : vector<8x128xf32>
    %281 = math.exp %280 : vector<8x128xf32>
    %cst_120 = arith.constant 1.000000e+00 : f32
    %282 = vector.broadcast %cst_120 : f32 to vector<8x128xf32>
    %283 = arith.addf %282, %281 : vector<8x128xf32>
    %284 = arith.divf %282, %283 : vector<8x128xf32>
    %285 = vector.extract_strided_slice %272 {offsets = [0, 256], sizes = [8, 128], strides = [1, 1]} : vector<8x512xf32> to vector<8x128xf32>
    %286 = math.tanh %285 : vector<8x128xf32>
    %287 = vector.extract_strided_slice %272 {offsets = [0, 384], sizes = [8, 128], strides = [1, 1]} : vector<8x512xf32> to vector<8x128xf32>
    %288 = arith.negf %287 : vector<8x128xf32>
    %289 = math.exp %288 : vector<8x128xf32>
    %cst_121 = arith.constant 1.000000e+00 : f32
    %290 = vector.broadcast %cst_121 : f32 to vector<8x128xf32>
    %291 = arith.addf %290, %289 : vector<8x128xf32>
    %292 = arith.divf %290, %291 : vector<8x128xf32>
    %293 = arith.mulf %284, %267 : vector<8x128xf32>
    %294 = arith.mulf %278, %286 : vector<8x128xf32>
    %295 = arith.addf %293, %294 : vector<8x128xf32>
    %296 = math.tanh %295 : vector<8x128xf32>
    %297 = arith.mulf %292, %296 : vector<8x128xf32>
    %c0_122 = arith.constant 0 : index
    %c0_123 = arith.constant 0 : index
    %298 = vector.load %arg10[%c0_122, %c0_123] : memref<8x128xf32, #tpu.memory_space<vmem>>, vector<8x128xf32>
    tpu.vector_store %arg10[%c0_122, %c0_123], %297 {strides = array<i32>} : memref<8x128xf32, #tpu.memory_space<vmem>>, vector<8x128xf32>,
    %c0_124 = arith.constant 0 : index
    %c0_125 = arith.constant 0 : index
    %299 = vector.load %arg11[%c0_124, %c0_125] : memref<8x128xf32, #tpu.memory_space<vmem>>, vector<8x128xf32>
    tpu.vector_store %arg11[%c0_124, %c0_125], %295 {strides = array<i32>} : memref<8x128xf32, #tpu.memory_space<vmem>>, vector<8x128xf32>,
    %c8_i32_126 = arith.constant 8 : i32
    %c8_i32_127 = arith.constant 8 : i32
    %300 = arith.muli %c8_i32_126, %c8_i32_127 : i32
    %301 = tpu.assume_multiple %300, 8 : i32
    %c0_128 = arith.constant 0 : index
    %c0_129 = arith.constant 0 : index
    %302 = vector.load %arg10[%c0_128, %c0_129] : memref<8x128xf32, #tpu.memory_space<vmem>>, vector<8x128xf32>
    %c0_130 = arith.constant 0 : index
    %c0_131 = arith.constant 0 : index
    %303 = vector.load %arg11[%c0_130, %c0_131] : memref<8x128xf32, #tpu.memory_space<vmem>>, vector<8x128xf32>
    %304 = arith.index_cast %301 : i32 to index
    %c0_132 = arith.constant 0 : index
    %305 = vector.load %arg9[%304, %c0_132] : memref<128x512xf32, #tpu.memory_space<vmem>>, vector<8x512xf32>
    %306 = arith.truncf %302 : vector<8x128xf32> to vector<8x128xbf16>
    %cst_133 = arith.constant dense<0.000000e+00> : vector<8x512xf32>
    %307 = tpu.matmul %306, %11, %cst_133 {dimension_numbers = #tpu.dot_dimension_numbers<[1], [0], [0], [1], [0, 0, 1, 1], [], []>} : vector<8x128xbf16>, vector<128x512xbf16>, vector<8x512xf32> -> vector<8x512xf32>
    %308 = arith.addf %305, %307 : vector<8x512xf32>
    %309 = vector.extract_strided_slice %308 {offsets = [0, 0], sizes = [8, 128], strides = [1, 1]} : vector<8x512xf32> to vector<8x128xf32>
    %310 = arith.negf %309 : vector<8x128xf32>
    %311 = math.exp %310 : vector<8x128xf32>
    %cst_134 = arith.constant 1.000000e+00 : f32
    %312 = vector.broadcast %cst_134 : f32 to vector<8x128xf32>
    %313 = arith.addf %312, %311 : vector<8x128xf32>
    %314 = arith.divf %312, %313 : vector<8x128xf32>
    %315 = vector.extract_strided_slice %308 {offsets = [0, 128], sizes = [8, 128], strides = [1, 1]} : vector<8x512xf32> to vector<8x128xf32>
    %316 = arith.negf %315 : vector<8x128xf32>
    %317 = math.exp %316 : vector<8x128xf32>
    %cst_135 = arith.constant 1.000000e+00 : f32
    %318 = vector.broadcast %cst_135 : f32 to vector<8x128xf32>
    %319 = arith.addf %318, %317 : vector<8x128xf32>
    %320 = arith.divf %318, %319 : vector<8x128xf32>
    %321 = vector.extract_strided_slice %308 {offsets = [0, 256], sizes = [8, 128], strides = [1, 1]} : vector<8x512xf32> to vector<8x128xf32>
    %322 = math.tanh %321 : vector<8x128xf32>
    %323 = vector.extract_strided_slice %308 {offsets = [0, 384], sizes = [8, 128], strides = [1, 1]} : vector<8x512xf32> to vector<8x128xf32>
    %324 = arith.negf %323 : vector<8x128xf32>
    %325 = math.exp %324 : vector<8x128xf32>
    %cst_136 = arith.constant 1.000000e+00 : f32
    %326 = vector.broadcast %cst_136 : f32 to vector<8x128xf32>
    %327 = arith.addf %326, %325 : vector<8x128xf32>
    %328 = arith.divf %326, %327 : vector<8x128xf32>
    %329 = arith.mulf %320, %303 : vector<8x128xf32>
    %330 = arith.mulf %314, %322 : vector<8x128xf32>
    %331 = arith.addf %329, %330 : vector<8x128xf32>
    %332 = math.tanh %331 : vector<8x128xf32>
    %333 = arith.mulf %328, %332 : vector<8x128xf32>
    %c0_137 = arith.constant 0 : index
    %c0_138 = arith.constant 0 : index
    %334 = vector.load %arg10[%c0_137, %c0_138] : memref<8x128xf32, #tpu.memory_space<vmem>>, vector<8x128xf32>
    tpu.vector_store %arg10[%c0_137, %c0_138], %333 {strides = array<i32>} : memref<8x128xf32, #tpu.memory_space<vmem>>, vector<8x128xf32>,
    %c0_139 = arith.constant 0 : index
    %c0_140 = arith.constant 0 : index
    %335 = vector.load %arg11[%c0_139, %c0_140] : memref<8x128xf32, #tpu.memory_space<vmem>>, vector<8x128xf32>
    tpu.vector_store %arg11[%c0_139, %c0_140], %331 {strides = array<i32>} : memref<8x128xf32, #tpu.memory_space<vmem>>, vector<8x128xf32>,
    %c9_i32 = arith.constant 9 : i32
    %c8_i32_141 = arith.constant 8 : i32
    %336 = arith.muli %c9_i32, %c8_i32_141 : i32
    %337 = tpu.assume_multiple %336, 8 : i32
    %c0_142 = arith.constant 0 : index
    %c0_143 = arith.constant 0 : index
    %338 = vector.load %arg10[%c0_142, %c0_143] : memref<8x128xf32, #tpu.memory_space<vmem>>, vector<8x128xf32>
    %c0_144 = arith.constant 0 : index
    %c0_145 = arith.constant 0 : index
    %339 = vector.load %arg11[%c0_144, %c0_145] : memref<8x128xf32, #tpu.memory_space<vmem>>, vector<8x128xf32>
    %340 = arith.index_cast %337 : i32 to index
    %c0_146 = arith.constant 0 : index
    %341 = vector.load %arg9[%340, %c0_146] : memref<128x512xf32, #tpu.memory_space<vmem>>, vector<8x512xf32>
    %342 = arith.truncf %338 : vector<8x128xf32> to vector<8x128xbf16>
    %cst_147 = arith.constant dense<0.000000e+00> : vector<8x512xf32>
    %343 = tpu.matmul %342, %11, %cst_147 {dimension_numbers = #tpu.dot_dimension_numbers<[1], [0], [0], [1], [0, 0, 1, 1], [], []>} : vector<8x128xbf16>, vector<128x512xbf16>, vector<8x512xf32> -> vector<8x512xf32>
    %344 = arith.addf %341, %343 : vector<8x512xf32>
    %345 = vector.extract_strided_slice %344 {offsets = [0, 0], sizes = [8, 128], strides = [1, 1]} : vector<8x512xf32> to vector<8x128xf32>
    %346 = arith.negf %345 : vector<8x128xf32>
    %347 = math.exp %346 : vector<8x128xf32>
    %cst_148 = arith.constant 1.000000e+00 : f32
    %348 = vector.broadcast %cst_148 : f32 to vector<8x128xf32>
    %349 = arith.addf %348, %347 : vector<8x128xf32>
    %350 = arith.divf %348, %349 : vector<8x128xf32>
    %351 = vector.extract_strided_slice %344 {offsets = [0, 128], sizes = [8, 128], strides = [1, 1]} : vector<8x512xf32> to vector<8x128xf32>
    %352 = arith.negf %351 : vector<8x128xf32>
    %353 = math.exp %352 : vector<8x128xf32>
    %cst_149 = arith.constant 1.000000e+00 : f32
    %354 = vector.broadcast %cst_149 : f32 to vector<8x128xf32>
    %355 = arith.addf %354, %353 : vector<8x128xf32>
    %356 = arith.divf %354, %355 : vector<8x128xf32>
    %357 = vector.extract_strided_slice %344 {offsets = [0, 256], sizes = [8, 128], strides = [1, 1]} : vector<8x512xf32> to vector<8x128xf32>
    %358 = math.tanh %357 : vector<8x128xf32>
    %359 = vector.extract_strided_slice %344 {offsets = [0, 384], sizes = [8, 128], strides = [1, 1]} : vector<8x512xf32> to vector<8x128xf32>
    %360 = arith.negf %359 : vector<8x128xf32>
    %361 = math.exp %360 : vector<8x128xf32>
    %cst_150 = arith.constant 1.000000e+00 : f32
    %362 = vector.broadcast %cst_150 : f32 to vector<8x128xf32>
    %363 = arith.addf %362, %361 : vector<8x128xf32>
    %364 = arith.divf %362, %363 : vector<8x128xf32>
    %365 = arith.mulf %356, %339 : vector<8x128xf32>
    %366 = arith.mulf %350, %358 : vector<8x128xf32>
    %367 = arith.addf %365, %366 : vector<8x128xf32>
    %368 = math.tanh %367 : vector<8x128xf32>
    %369 = arith.mulf %364, %368 : vector<8x128xf32>
    %c0_151 = arith.constant 0 : index
    %c0_152 = arith.constant 0 : index
    %370 = vector.load %arg10[%c0_151, %c0_152] : memref<8x128xf32, #tpu.memory_space<vmem>>, vector<8x128xf32>
    tpu.vector_store %arg10[%c0_151, %c0_152], %369 {strides = array<i32>} : memref<8x128xf32, #tpu.memory_space<vmem>>, vector<8x128xf32>,
    %c0_153 = arith.constant 0 : index
    %c0_154 = arith.constant 0 : index
    %371 = vector.load %arg11[%c0_153, %c0_154] : memref<8x128xf32, #tpu.memory_space<vmem>>, vector<8x128xf32>
    tpu.vector_store %arg11[%c0_153, %c0_154], %367 {strides = array<i32>} : memref<8x128xf32, #tpu.memory_space<vmem>>, vector<8x128xf32>,
    %c10_i32 = arith.constant 10 : i32
    %c8_i32_155 = arith.constant 8 : i32
    %372 = arith.muli %c10_i32, %c8_i32_155 : i32
    %373 = tpu.assume_multiple %372, 8 : i32
    %c0_156 = arith.constant 0 : index
    %c0_157 = arith.constant 0 : index
    %374 = vector.load %arg10[%c0_156, %c0_157] : memref<8x128xf32, #tpu.memory_space<vmem>>, vector<8x128xf32>
    %c0_158 = arith.constant 0 : index
    %c0_159 = arith.constant 0 : index
    %375 = vector.load %arg11[%c0_158, %c0_159] : memref<8x128xf32, #tpu.memory_space<vmem>>, vector<8x128xf32>
    %376 = arith.index_cast %373 : i32 to index
    %c0_160 = arith.constant 0 : index
    %377 = vector.load %arg9[%376, %c0_160] : memref<128x512xf32, #tpu.memory_space<vmem>>, vector<8x512xf32>
    %378 = arith.truncf %374 : vector<8x128xf32> to vector<8x128xbf16>
    %cst_161 = arith.constant dense<0.000000e+00> : vector<8x512xf32>
    %379 = tpu.matmul %378, %11, %cst_161 {dimension_numbers = #tpu.dot_dimension_numbers<[1], [0], [0], [1], [0, 0, 1, 1], [], []>} : vector<8x128xbf16>, vector<128x512xbf16>, vector<8x512xf32> -> vector<8x512xf32>
    %380 = arith.addf %377, %379 : vector<8x512xf32>
    %381 = vector.extract_strided_slice %380 {offsets = [0, 0], sizes = [8, 128], strides = [1, 1]} : vector<8x512xf32> to vector<8x128xf32>
    %382 = arith.negf %381 : vector<8x128xf32>
    %383 = math.exp %382 : vector<8x128xf32>
    %cst_162 = arith.constant 1.000000e+00 : f32
    %384 = vector.broadcast %cst_162 : f32 to vector<8x128xf32>
    %385 = arith.addf %384, %383 : vector<8x128xf32>
    %386 = arith.divf %384, %385 : vector<8x128xf32>
    %387 = vector.extract_strided_slice %380 {offsets = [0, 128], sizes = [8, 128], strides = [1, 1]} : vector<8x512xf32> to vector<8x128xf32>
    %388 = arith.negf %387 : vector<8x128xf32>
    %389 = math.exp %388 : vector<8x128xf32>
    %cst_163 = arith.constant 1.000000e+00 : f32
    %390 = vector.broadcast %cst_163 : f32 to vector<8x128xf32>
    %391 = arith.addf %390, %389 : vector<8x128xf32>
    %392 = arith.divf %390, %391 : vector<8x128xf32>
    %393 = vector.extract_strided_slice %380 {offsets = [0, 256], sizes = [8, 128], strides = [1, 1]} : vector<8x512xf32> to vector<8x128xf32>
    %394 = math.tanh %393 : vector<8x128xf32>
    %395 = vector.extract_strided_slice %380 {offsets = [0, 384], sizes = [8, 128], strides = [1, 1]} : vector<8x512xf32> to vector<8x128xf32>
    %396 = arith.negf %395 : vector<8x128xf32>
    %397 = math.exp %396 : vector<8x128xf32>
    %cst_164 = arith.constant 1.000000e+00 : f32
    %398 = vector.broadcast %cst_164 : f32 to vector<8x128xf32>
    %399 = arith.addf %398, %397 : vector<8x128xf32>
    %400 = arith.divf %398, %399 : vector<8x128xf32>
    %401 = arith.mulf %392, %375 : vector<8x128xf32>
    %402 = arith.mulf %386, %394 : vector<8x128xf32>
    %403 = arith.addf %401, %402 : vector<8x128xf32>
    %404 = math.tanh %403 : vector<8x128xf32>
    %405 = arith.mulf %400, %404 : vector<8x128xf32>
    %c0_165 = arith.constant 0 : index
    %c0_166 = arith.constant 0 : index
    %406 = vector.load %arg10[%c0_165, %c0_166] : memref<8x128xf32, #tpu.memory_space<vmem>>, vector<8x128xf32>
    tpu.vector_store %arg10[%c0_165, %c0_166], %405 {strides = array<i32>} : memref<8x128xf32, #tpu.memory_space<vmem>>, vector<8x128xf32>,
    %c0_167 = arith.constant 0 : index
    %c0_168 = arith.constant 0 : index
    %407 = vector.load %arg11[%c0_167, %c0_168] : memref<8x128xf32, #tpu.memory_space<vmem>>, vector<8x128xf32>
    tpu.vector_store %arg11[%c0_167, %c0_168], %403 {strides = array<i32>} : memref<8x128xf32, #tpu.memory_space<vmem>>, vector<8x128xf32>,
    %c11_i32 = arith.constant 11 : i32
    %c8_i32_169 = arith.constant 8 : i32
    %408 = arith.muli %c11_i32, %c8_i32_169 : i32
    %409 = tpu.assume_multiple %408, 8 : i32
    %c0_170 = arith.constant 0 : index
    %c0_171 = arith.constant 0 : index
    %410 = vector.load %arg10[%c0_170, %c0_171] : memref<8x128xf32, #tpu.memory_space<vmem>>, vector<8x128xf32>
    %c0_172 = arith.constant 0 : index
    %c0_173 = arith.constant 0 : index
    %411 = vector.load %arg11[%c0_172, %c0_173] : memref<8x128xf32, #tpu.memory_space<vmem>>, vector<8x128xf32>
    %412 = arith.index_cast %409 : i32 to index
    %c0_174 = arith.constant 0 : index
    %413 = vector.load %arg9[%412, %c0_174] : memref<128x512xf32, #tpu.memory_space<vmem>>, vector<8x512xf32>
    %414 = arith.truncf %410 : vector<8x128xf32> to vector<8x128xbf16>
    %cst_175 = arith.constant dense<0.000000e+00> : vector<8x512xf32>
    %415 = tpu.matmul %414, %11, %cst_175 {dimension_numbers = #tpu.dot_dimension_numbers<[1], [0], [0], [1], [0, 0, 1, 1], [], []>} : vector<8x128xbf16>, vector<128x512xbf16>, vector<8x512xf32> -> vector<8x512xf32>
    %416 = arith.addf %413, %415 : vector<8x512xf32>
    %417 = vector.extract_strided_slice %416 {offsets = [0, 0], sizes = [8, 128], strides = [1, 1]} : vector<8x512xf32> to vector<8x128xf32>
    %418 = arith.negf %417 : vector<8x128xf32>
    %419 = math.exp %418 : vector<8x128xf32>
    %cst_176 = arith.constant 1.000000e+00 : f32
    %420 = vector.broadcast %cst_176 : f32 to vector<8x128xf32>
    %421 = arith.addf %420, %419 : vector<8x128xf32>
    %422 = arith.divf %420, %421 : vector<8x128xf32>
    %423 = vector.extract_strided_slice %416 {offsets = [0, 128], sizes = [8, 128], strides = [1, 1]} : vector<8x512xf32> to vector<8x128xf32>
    %424 = arith.negf %423 : vector<8x128xf32>
    %425 = math.exp %424 : vector<8x128xf32>
    %cst_177 = arith.constant 1.000000e+00 : f32
    %426 = vector.broadcast %cst_177 : f32 to vector<8x128xf32>
    %427 = arith.addf %426, %425 : vector<8x128xf32>
    %428 = arith.divf %426, %427 : vector<8x128xf32>
    %429 = vector.extract_strided_slice %416 {offsets = [0, 256], sizes = [8, 128], strides = [1, 1]} : vector<8x512xf32> to vector<8x128xf32>
    %430 = math.tanh %429 : vector<8x128xf32>
    %431 = vector.extract_strided_slice %416 {offsets = [0, 384], sizes = [8, 128], strides = [1, 1]} : vector<8x512xf32> to vector<8x128xf32>
    %432 = arith.negf %431 : vector<8x128xf32>
    %433 = math.exp %432 : vector<8x128xf32>
    %cst_178 = arith.constant 1.000000e+00 : f32
    %434 = vector.broadcast %cst_178 : f32 to vector<8x128xf32>
    %435 = arith.addf %434, %433 : vector<8x128xf32>
    %436 = arith.divf %434, %435 : vector<8x128xf32>
    %437 = arith.mulf %428, %411 : vector<8x128xf32>
    %438 = arith.mulf %422, %430 : vector<8x128xf32>
    %439 = arith.addf %437, %438 : vector<8x128xf32>
    %440 = math.tanh %439 : vector<8x128xf32>
    %441 = arith.mulf %436, %440 : vector<8x128xf32>
    %c0_179 = arith.constant 0 : index
    %c0_180 = arith.constant 0 : index
    %442 = vector.load %arg10[%c0_179, %c0_180] : memref<8x128xf32, #tpu.memory_space<vmem>>, vector<8x128xf32>
    tpu.vector_store %arg10[%c0_179, %c0_180], %441 {strides = array<i32>} : memref<8x128xf32, #tpu.memory_space<vmem>>, vector<8x128xf32>,
    %c0_181 = arith.constant 0 : index
    %c0_182 = arith.constant 0 : index
    %443 = vector.load %arg11[%c0_181, %c0_182] : memref<8x128xf32, #tpu.memory_space<vmem>>, vector<8x128xf32>
    tpu.vector_store %arg11[%c0_181, %c0_182], %439 {strides = array<i32>} : memref<8x128xf32, #tpu.memory_space<vmem>>, vector<8x128xf32>,
    %c12_i32 = arith.constant 12 : i32
    %c8_i32_183 = arith.constant 8 : i32
    %444 = arith.muli %c12_i32, %c8_i32_183 : i32
    %445 = tpu.assume_multiple %444, 8 : i32
    %c0_184 = arith.constant 0 : index
    %c0_185 = arith.constant 0 : index
    %446 = vector.load %arg10[%c0_184, %c0_185] : memref<8x128xf32, #tpu.memory_space<vmem>>, vector<8x128xf32>
    %c0_186 = arith.constant 0 : index
    %c0_187 = arith.constant 0 : index
    %447 = vector.load %arg11[%c0_186, %c0_187] : memref<8x128xf32, #tpu.memory_space<vmem>>, vector<8x128xf32>
    %448 = arith.index_cast %445 : i32 to index
    %c0_188 = arith.constant 0 : index
    %449 = vector.load %arg9[%448, %c0_188] : memref<128x512xf32, #tpu.memory_space<vmem>>, vector<8x512xf32>
    %450 = arith.truncf %446 : vector<8x128xf32> to vector<8x128xbf16>
    %cst_189 = arith.constant dense<0.000000e+00> : vector<8x512xf32>
    %451 = tpu.matmul %450, %11, %cst_189 {dimension_numbers = #tpu.dot_dimension_numbers<[1], [0], [0], [1], [0, 0, 1, 1], [], []>} : vector<8x128xbf16>, vector<128x512xbf16>, vector<8x512xf32> -> vector<8x512xf32>
    %452 = arith.addf %449, %451 : vector<8x512xf32>
    %453 = vector.extract_strided_slice %452 {offsets = [0, 0], sizes = [8, 128], strides = [1, 1]} : vector<8x512xf32> to vector<8x128xf32>
    %454 = arith.negf %453 : vector<8x128xf32>
    %455 = math.exp %454 : vector<8x128xf32>
    %cst_190 = arith.constant 1.000000e+00 : f32
    %456 = vector.broadcast %cst_190 : f32 to vector<8x128xf32>
    %457 = arith.addf %456, %455 : vector<8x128xf32>
    %458 = arith.divf %456, %457 : vector<8x128xf32>
    %459 = vector.extract_strided_slice %452 {offsets = [0, 128], sizes = [8, 128], strides = [1, 1]} : vector<8x512xf32> to vector<8x128xf32>
    %460 = arith.negf %459 : vector<8x128xf32>
    %461 = math.exp %460 : vector<8x128xf32>
    %cst_191 = arith.constant 1.000000e+00 : f32
    %462 = vector.broadcast %cst_191 : f32 to vector<8x128xf32>
    %463 = arith.addf %462, %461 : vector<8x128xf32>
    %464 = arith.divf %462, %463 : vector<8x128xf32>
    %465 = vector.extract_strided_slice %452 {offsets = [0, 256], sizes = [8, 128], strides = [1, 1]} : vector<8x512xf32> to vector<8x128xf32>
    %466 = math.tanh %465 : vector<8x128xf32>
    %467 = vector.extract_strided_slice %452 {offsets = [0, 384], sizes = [8, 128], strides = [1, 1]} : vector<8x512xf32> to vector<8x128xf32>
    %468 = arith.negf %467 : vector<8x128xf32>
    %469 = math.exp %468 : vector<8x128xf32>
    %cst_192 = arith.constant 1.000000e+00 : f32
    %470 = vector.broadcast %cst_192 : f32 to vector<8x128xf32>
    %471 = arith.addf %470, %469 : vector<8x128xf32>
    %472 = arith.divf %470, %471 : vector<8x128xf32>
    %473 = arith.mulf %464, %447 : vector<8x128xf32>
    %474 = arith.mulf %458, %466 : vector<8x128xf32>
    %475 = arith.addf %473, %474 : vector<8x128xf32>
    %476 = math.tanh %475 : vector<8x128xf32>
    %477 = arith.mulf %472, %476 : vector<8x128xf32>
    %c0_193 = arith.constant 0 : index
    %c0_194 = arith.constant 0 : index
    %478 = vector.load %arg10[%c0_193, %c0_194] : memref<8x128xf32, #tpu.memory_space<vmem>>, vector<8x128xf32>
    tpu.vector_store %arg10[%c0_193, %c0_194], %477 {strides = array<i32>} : memref<8x128xf32, #tpu.memory_space<vmem>>, vector<8x128xf32>,
    %c0_195 = arith.constant 0 : index
    %c0_196 = arith.constant 0 : index
    %479 = vector.load %arg11[%c0_195, %c0_196] : memref<8x128xf32, #tpu.memory_space<vmem>>, vector<8x128xf32>
    tpu.vector_store %arg11[%c0_195, %c0_196], %475 {strides = array<i32>} : memref<8x128xf32, #tpu.memory_space<vmem>>, vector<8x128xf32>,
    %c13_i32 = arith.constant 13 : i32
    %c8_i32_197 = arith.constant 8 : i32
    %480 = arith.muli %c13_i32, %c8_i32_197 : i32
    %481 = tpu.assume_multiple %480, 8 : i32
    %c0_198 = arith.constant 0 : index
    %c0_199 = arith.constant 0 : index
    %482 = vector.load %arg10[%c0_198, %c0_199] : memref<8x128xf32, #tpu.memory_space<vmem>>, vector<8x128xf32>
    %c0_200 = arith.constant 0 : index
    %c0_201 = arith.constant 0 : index
    %483 = vector.load %arg11[%c0_200, %c0_201] : memref<8x128xf32, #tpu.memory_space<vmem>>, vector<8x128xf32>
    %484 = arith.index_cast %481 : i32 to index
    %c0_202 = arith.constant 0 : index
    %485 = vector.load %arg9[%484, %c0_202] : memref<128x512xf32, #tpu.memory_space<vmem>>, vector<8x512xf32>
    %486 = arith.truncf %482 : vector<8x128xf32> to vector<8x128xbf16>
    %cst_203 = arith.constant dense<0.000000e+00> : vector<8x512xf32>
    %487 = tpu.matmul %486, %11, %cst_203 {dimension_numbers = #tpu.dot_dimension_numbers<[1], [0], [0], [1], [0, 0, 1, 1], [], []>} : vector<8x128xbf16>, vector<128x512xbf16>, vector<8x512xf32> -> vector<8x512xf32>
    %488 = arith.addf %485, %487 : vector<8x512xf32>
    %489 = vector.extract_strided_slice %488 {offsets = [0, 0], sizes = [8, 128], strides = [1, 1]} : vector<8x512xf32> to vector<8x128xf32>
    %490 = arith.negf %489 : vector<8x128xf32>
    %491 = math.exp %490 : vector<8x128xf32>
    %cst_204 = arith.constant 1.000000e+00 : f32
    %492 = vector.broadcast %cst_204 : f32 to vector<8x128xf32>
    %493 = arith.addf %492, %491 : vector<8x128xf32>
    %494 = arith.divf %492, %493 : vector<8x128xf32>
    %495 = vector.extract_strided_slice %488 {offsets = [0, 128], sizes = [8, 128], strides = [1, 1]} : vector<8x512xf32> to vector<8x128xf32>
    %496 = arith.negf %495 : vector<8x128xf32>
    %497 = math.exp %496 : vector<8x128xf32>
    %cst_205 = arith.constant 1.000000e+00 : f32
    %498 = vector.broadcast %cst_205 : f32 to vector<8x128xf32>
    %499 = arith.addf %498, %497 : vector<8x128xf32>
    %500 = arith.divf %498, %499 : vector<8x128xf32>
    %501 = vector.extract_strided_slice %488 {offsets = [0, 256], sizes = [8, 128], strides = [1, 1]} : vector<8x512xf32> to vector<8x128xf32>
    %502 = math.tanh %501 : vector<8x128xf32>
    %503 = vector.extract_strided_slice %488 {offsets = [0, 384], sizes = [8, 128], strides = [1, 1]} : vector<8x512xf32> to vector<8x128xf32>
    %504 = arith.negf %503 : vector<8x128xf32>
    %505 = math.exp %504 : vector<8x128xf32>
    %cst_206 = arith.constant 1.000000e+00 : f32
    %506 = vector.broadcast %cst_206 : f32 to vector<8x128xf32>
    %507 = arith.addf %506, %505 : vector<8x128xf32>
    %508 = arith.divf %506, %507 : vector<8x128xf32>
    %509 = arith.mulf %500, %483 : vector<8x128xf32>
    %510 = arith.mulf %494, %502 : vector<8x128xf32>
    %511 = arith.addf %509, %510 : vector<8x128xf32>
    %512 = math.tanh %511 : vector<8x128xf32>
    %513 = arith.mulf %508, %512 : vector<8x128xf32>
    %c0_207 = arith.constant 0 : index
    %c0_208 = arith.constant 0 : index
    %514 = vector.load %arg10[%c0_207, %c0_208] : memref<8x128xf32, #tpu.memory_space<vmem>>, vector<8x128xf32>
    tpu.vector_store %arg10[%c0_207, %c0_208], %513 {strides = array<i32>} : memref<8x128xf32, #tpu.memory_space<vmem>>, vector<8x128xf32>,
    %c0_209 = arith.constant 0 : index
    %c0_210 = arith.constant 0 : index
    %515 = vector.load %arg11[%c0_209, %c0_210] : memref<8x128xf32, #tpu.memory_space<vmem>>, vector<8x128xf32>
    tpu.vector_store %arg11[%c0_209, %c0_210], %511 {strides = array<i32>} : memref<8x128xf32, #tpu.memory_space<vmem>>, vector<8x128xf32>,
    %c14_i32 = arith.constant 14 : i32
    %c8_i32_211 = arith.constant 8 : i32
    %516 = arith.muli %c14_i32, %c8_i32_211 : i32
    %517 = tpu.assume_multiple %516, 8 : i32
    %c0_212 = arith.constant 0 : index
    %c0_213 = arith.constant 0 : index
    %518 = vector.load %arg10[%c0_212, %c0_213] : memref<8x128xf32, #tpu.memory_space<vmem>>, vector<8x128xf32>
    %c0_214 = arith.constant 0 : index
    %c0_215 = arith.constant 0 : index
    %519 = vector.load %arg11[%c0_214, %c0_215] : memref<8x128xf32, #tpu.memory_space<vmem>>, vector<8x128xf32>
    %520 = arith.index_cast %517 : i32 to index
    %c0_216 = arith.constant 0 : index
    %521 = vector.load %arg9[%520, %c0_216] : memref<128x512xf32, #tpu.memory_space<vmem>>, vector<8x512xf32>
    %522 = arith.truncf %518 : vector<8x128xf32> to vector<8x128xbf16>
    %cst_217 = arith.constant dense<0.000000e+00> : vector<8x512xf32>
    %523 = tpu.matmul %522, %11, %cst_217 {dimension_numbers = #tpu.dot_dimension_numbers<[1], [0], [0], [1], [0, 0, 1, 1], [], []>} : vector<8x128xbf16>, vector<128x512xbf16>, vector<8x512xf32> -> vector<8x512xf32>
    %524 = arith.addf %521, %523 : vector<8x512xf32>
    %525 = vector.extract_strided_slice %524 {offsets = [0, 0], sizes = [8, 128], strides = [1, 1]} : vector<8x512xf32> to vector<8x128xf32>
    %526 = arith.negf %525 : vector<8x128xf32>
    %527 = math.exp %526 : vector<8x128xf32>
    %cst_218 = arith.constant 1.000000e+00 : f32
    %528 = vector.broadcast %cst_218 : f32 to vector<8x128xf32>
    %529 = arith.addf %528, %527 : vector<8x128xf32>
    %530 = arith.divf %528, %529 : vector<8x128xf32>
    %531 = vector.extract_strided_slice %524 {offsets = [0, 128], sizes = [8, 128], strides = [1, 1]} : vector<8x512xf32> to vector<8x128xf32>
    %532 = arith.negf %531 : vector<8x128xf32>
    %533 = math.exp %532 : vector<8x128xf32>
    %cst_219 = arith.constant 1.000000e+00 : f32
    %534 = vector.broadcast %cst_219 : f32 to vector<8x128xf32>
    %535 = arith.addf %534, %533 : vector<8x128xf32>
    %536 = arith.divf %534, %535 : vector<8x128xf32>
    %537 = vector.extract_strided_slice %524 {offsets = [0, 256], sizes = [8, 128], strides = [1, 1]} : vector<8x512xf32> to vector<8x128xf32>
    %538 = math.tanh %537 : vector<8x128xf32>
    %539 = vector.extract_strided_slice %524 {offsets = [0, 384], sizes = [8, 128], strides = [1, 1]} : vector<8x512xf32> to vector<8x128xf32>
    %540 = arith.negf %539 : vector<8x128xf32>
    %541 = math.exp %540 : vector<8x128xf32>
    %cst_220 = arith.constant 1.000000e+00 : f32
    %542 = vector.broadcast %cst_220 : f32 to vector<8x128xf32>
    %543 = arith.addf %542, %541 : vector<8x128xf32>
    %544 = arith.divf %542, %543 : vector<8x128xf32>
    %545 = arith.mulf %536, %519 : vector<8x128xf32>
    %546 = arith.mulf %530, %538 : vector<8x128xf32>
    %547 = arith.addf %545, %546 : vector<8x128xf32>
    %548 = math.tanh %547 : vector<8x128xf32>
    %549 = arith.mulf %544, %548 : vector<8x128xf32>
    %c0_221 = arith.constant 0 : index
    %c0_222 = arith.constant 0 : index
    %550 = vector.load %arg10[%c0_221, %c0_222] : memref<8x128xf32, #tpu.memory_space<vmem>>, vector<8x128xf32>
    tpu.vector_store %arg10[%c0_221, %c0_222], %549 {strides = array<i32>} : memref<8x128xf32, #tpu.memory_space<vmem>>, vector<8x128xf32>,
    %c0_223 = arith.constant 0 : index
    %c0_224 = arith.constant 0 : index
    %551 = vector.load %arg11[%c0_223, %c0_224] : memref<8x128xf32, #tpu.memory_space<vmem>>, vector<8x128xf32>
    tpu.vector_store %arg11[%c0_223, %c0_224], %547 {strides = array<i32>} : memref<8x128xf32, #tpu.memory_space<vmem>>, vector<8x128xf32>,
    %c15_i32 = arith.constant 15 : i32
    %c8_i32_225 = arith.constant 8 : i32
    %552 = arith.muli %c15_i32, %c8_i32_225 : i32
    %553 = tpu.assume_multiple %552, 8 : i32
    %c0_226 = arith.constant 0 : index
    %c0_227 = arith.constant 0 : index
    %554 = vector.load %arg10[%c0_226, %c0_227] : memref<8x128xf32, #tpu.memory_space<vmem>>, vector<8x128xf32>
    %c0_228 = arith.constant 0 : index
    %c0_229 = arith.constant 0 : index
    %555 = vector.load %arg11[%c0_228, %c0_229] : memref<8x128xf32, #tpu.memory_space<vmem>>, vector<8x128xf32>
    %556 = arith.index_cast %553 : i32 to index
    %c0_230 = arith.constant 0 : index
    %557 = vector.load %arg9[%556, %c0_230] : memref<128x512xf32, #tpu.memory_space<vmem>>, vector<8x512xf32>
    %558 = arith.truncf %554 : vector<8x128xf32> to vector<8x128xbf16>
    %cst_231 = arith.constant dense<0.000000e+00> : vector<8x512xf32>
    %559 = tpu.matmul %558, %11, %cst_231 {dimension_numbers = #tpu.dot_dimension_numbers<[1], [0], [0], [1], [0, 0, 1, 1], [], []>} : vector<8x128xbf16>, vector<128x512xbf16>, vector<8x512xf32> -> vector<8x512xf32>
    %560 = arith.addf %557, %559 : vector<8x512xf32>
    %561 = vector.extract_strided_slice %560 {offsets = [0, 0], sizes = [8, 128], strides = [1, 1]} : vector<8x512xf32> to vector<8x128xf32>
    %562 = arith.negf %561 : vector<8x128xf32>
    %563 = math.exp %562 : vector<8x128xf32>
    %cst_232 = arith.constant 1.000000e+00 : f32
    %564 = vector.broadcast %cst_232 : f32 to vector<8x128xf32>
    %565 = arith.addf %564, %563 : vector<8x128xf32>
    %566 = arith.divf %564, %565 : vector<8x128xf32>
    %567 = vector.extract_strided_slice %560 {offsets = [0, 128], sizes = [8, 128], strides = [1, 1]} : vector<8x512xf32> to vector<8x128xf32>
    %568 = arith.negf %567 : vector<8x128xf32>
    %569 = math.exp %568 : vector<8x128xf32>
    %cst_233 = arith.constant 1.000000e+00 : f32
    %570 = vector.broadcast %cst_233 : f32 to vector<8x128xf32>
    %571 = arith.addf %570, %569 : vector<8x128xf32>
    %572 = arith.divf %570, %571 : vector<8x128xf32>
    %573 = vector.extract_strided_slice %560 {offsets = [0, 256], sizes = [8, 128], strides = [1, 1]} : vector<8x512xf32> to vector<8x128xf32>
    %574 = math.tanh %573 : vector<8x128xf32>
    %575 = vector.extract_strided_slice %560 {offsets = [0, 384], sizes = [8, 128], strides = [1, 1]} : vector<8x512xf32> to vector<8x128xf32>
    %576 = arith.negf %575 : vector<8x128xf32>
    %577 = math.exp %576 : vector<8x128xf32>
    %cst_234 = arith.constant 1.000000e+00 : f32
    %578 = vector.broadcast %cst_234 : f32 to vector<8x128xf32>
    %579 = arith.addf %578, %577 : vector<8x128xf32>
    %580 = arith.divf %578, %579 : vector<8x128xf32>
    %581 = arith.mulf %572, %555 : vector<8x128xf32>
    %582 = arith.mulf %566, %574 : vector<8x128xf32>
    %583 = arith.addf %581, %582 : vector<8x128xf32>
    %584 = math.tanh %583 : vector<8x128xf32>
    %585 = arith.mulf %580, %584 : vector<8x128xf32>
    %c0_235 = arith.constant 0 : index
    %c0_236 = arith.constant 0 : index
    %586 = vector.load %arg10[%c0_235, %c0_236] : memref<8x128xf32, #tpu.memory_space<vmem>>, vector<8x128xf32>
    tpu.vector_store %arg10[%c0_235, %c0_236], %585 {strides = array<i32>} : memref<8x128xf32, #tpu.memory_space<vmem>>, vector<8x128xf32>,
    %c0_237 = arith.constant 0 : index
    %c0_238 = arith.constant 0 : index
    %587 = vector.load %arg11[%c0_237, %c0_238] : memref<8x128xf32, #tpu.memory_space<vmem>>, vector<8x128xf32>
    tpu.vector_store %arg11[%c0_237, %c0_238], %583 {strides = array<i32>} : memref<8x128xf32, #tpu.memory_space<vmem>>, vector<8x128xf32>,
    %c16_i32 = arith.constant 16 : i32
    %c0_239 = arith.constant 0 : index
    %c0_240 = arith.constant 0 : index
    %588 = vector.load %arg10[%c0_239, %c0_240] : memref<8x128xf32, #tpu.memory_space<vmem>>, vector<8x128xf32>
    %589 = arith.truncf %588 : vector<8x128xf32> to vector<8x128xbf16>
    %c0_241 = arith.constant 0 : index
    %c0_242 = arith.constant 0 : index
    %590 = vector.load %arg4[%c0_241, %c0_242] : memref<128x128xbf16, #tpu.memory_space<vmem>>, vector<128x128xbf16>
    %cst_243 = arith.constant dense<0.000000e+00> : vector<8x128xf32>
    %591 = tpu.matmul %589, %590, %cst_243 {dimension_numbers = #tpu.dot_dimension_numbers<[1], [0], [0], [1], [0, 0, 1, 1], [], []>} : vector<8x128xbf16>, vector<128x128xbf16>, vector<8x128xf32> -> vector<8x128xf32>
    %c0_244 = arith.constant 0 : index
    %c0_245 = arith.constant 0 : index
    %592 = vector.load %arg5[%c0_244, %c0_245] : memref<1x128xf32, #tpu.memory_space<vmem>>, vector<1x128xf32>
    %593 = vector.broadcast %592 : vector<1x128xf32> to vector<8x128xf32>
    %594 = arith.addf %591, %593 : vector<8x128xf32>
    %cst_246 = arith.constant 0.000000e+00 : f32
    %595 = vector.broadcast %cst_246 : f32 to vector<8x128xf32>
    %596 = arith.maximumf %594, %595 : vector<8x128xf32>
    %597 = arith.truncf %596 : vector<8x128xf32> to vector<8x128xbf16>
    %c0_247 = arith.constant 0 : index
    %c0_248 = arith.constant 0 : index
    %598 = vector.load %arg6[%c0_247, %c0_248] : memref<128x10xbf16, #tpu.memory_space<vmem>>, vector<128x10xbf16>
    %cst_249 = arith.constant dense<0.000000e+00> : vector<8x10xf32>
    %599 = tpu.matmul %597, %598, %cst_249 {dimension_numbers = #tpu.dot_dimension_numbers<[1], [0], [0], [1], [0, 0, 1, 1], [], []>} : vector<8x128xbf16>, vector<128x10xbf16>, vector<8x10xf32> -> vector<8x10xf32>
    %c0_250 = arith.constant 0 : index
    %c0_251 = arith.constant 0 : index
    %600 = vector.load %arg7[%c0_250, %c0_251] : memref<1x10xf32, #tpu.memory_space<vmem>>, vector<1x10xf32>
    %601 = vector.broadcast %600 : vector<1x10xf32> to vector<8x10xf32>
    %602 = arith.addf %599, %601 : vector<8x10xf32>
    %c0_252 = arith.constant 0 : index
    %c0_253 = arith.constant 0 : index
    %603 = vector.load %arg8[%c0_252, %c0_253] : memref<8x10xf32, #tpu.memory_space<vmem>>, vector<8x10xf32>
    tpu.vector_store %arg8[%c0_252, %c0_253], %602 {strides = array<i32>} : memref<8x10xf32, #tpu.memory_space<vmem>>, vector<8x10xf32>,
    return
  }
}

</mosaic_0001>

<bundles_post_ra>
// kernel: lstm_model_forward.2
= control target key start
LH: loop header
LB: loop body
LE: loop exit
PB: predicated region body
PF: predicated region fallthrough
CT: control target
= control target key end

     0   :  { %9 = vsyncpa [#allocation6], 0  ;;  %s3228_s15 = smov [#allocation5]   ;;  %s4448_s0 = inlined_call_operand.vmem [shape: bf16[128,32], index: 0, kind: input, shape index: {}]   ;;  %s4449_s1 = inlined_call_operand.vmem [shape: bf16[32,512], index: 1, kind: input, shape index: {}]   ;;  %s4450_s2 = inlined_call_operand.hbm [shape: bf16[128,512], index: 2, kind: input, shape index: {}]   ;;  %s4451_s3 = inlined_call_operand.vmem [shape: f32[1,512], index: 3, kind: input, shape index: {}]   ;;  %s4452_s4 = inlined_call_operand.vmem [shape: bf16[16,8,128], index: 4, kind: output, shape index: {}]  }
   0x1   :  { %s19_s16 = sshll.u32 %s3228_s15, 4  ;;  %s20_s16 = int_to_ptr.vmem [resolvable:$true] %s19_s16 }
   0x2   :  { %s3214_s17 = scalar_lea.vmem %s20_s16, 4096  ;;  %p3219_p1 = scmp.lt.s32.totalorder %s20_s16, %s20_s16 }
   0x3   :  { %p3215_p0 = scmp.ne.s32.totalorder %s20_s16, %s3214_s17  ;;  %p3220_p2 = scmp.lt.s32.totalorder %s3214_s17, %s3214_s17 }
   0x5   :  { %p3221_p3 = por %p3220_p2, %p3219_p1 }
   0x7   :  { %p3222_p4 = pnand %p3221_p3, %p3215_p0 }
   0x9   :  { %3225 = shalt.err (!%p3222_p4)
}
   0xa   :  { %s3229_s18 = smov 256   ;;  %s3230_s19 = smov 16  }
   0xb   :  { %25 = dma.hbm_to_vmem [thread:$0]  %s4450_s2, 4096, %s20_s16, [#allocation6], %s3229_s18, %s3229_s18, %s3230_s19  }
   0xc   :  { %3226 = dma.done.wait [#allocation6], 4096  }
   0xd   :  { %3227 = vsyncadd [#allocation6], 4294963200  ;;  %v4453_v0 = vmov 0   ;;  %v2818_v1 = vld [vmem:[%s4449_s1 + $0x24] ss:$16 sps:$4 sm:$0xff]   ;;  %vm158_vm0 = vcmask 261120   ;;  %v58_v50 = vlaneseq }
   0xe   :  { %215 = vmatprep.mubr.bf16.mxu0 %v4453_v0  ;;  %328 = vmatprep.mubr.bf16.mxu1 %v4453_v0  ;;  %v2820_v2 = vld [vmem:[%s4449_s1 + $0x2c] ss:$16 sps:$4 sm:$0xff]   ;;  %v2822_v3 = vld [vmem:[%s4449_s1 + $0x20] ss:$16 sps:$4 sm:$0xff]   ;;  %v2823_v4 = vld [vmem:[%s4449_s1 + $0x28] ss:$16 sps:$4 sm:$0xff]  }
   0xf   :  { %195 = vmatprep.subr.bf16.mxu0 %v2818_v1  ;;  %308 = vmatprep.subr.bf16.mxu1 %v2820_v2  ;;  %v2824_v5 = vld [vmem:[%s4449_s1 + $0x4] ss:$16 sps:$4 sm:$0xff]   ;;  %v2826_v6 = vld [vmem:[%s4449_s1 + $0xc] ss:$16 sps:$4 sm:$0xff]   ;;  %v2828_v7 = vld [vmem:[%s4449_s1] ss:$16 sps:$4 sm:$0xff]  }
  0x10   :  { %196 = vmatpush1.bf16.msra.mxu0 %v2822_v3  ;;  %309 = vmatpush1.bf16.msra.mxu1 %v2823_v4  ;;  %v2829_v8 = vld [vmem:[%s4449_s1 + $0x8] ss:$16 sps:$4 sm:$0xff]   ;;  %v2830_v9 = vld [vmem:[%s4448_s0] sm:$0xff]   ;;  %v3307_v15 = vld [vmem:[#allocation5 + $0xec] ss:$16 sps:$4 sm:$0xff]   ;;  %v3232_v49 = vmov 0.0|0.0  }
  0x11   :  { %197 = vmatprep.subr.bf16.mxu0 %v2824_v5  ;;  %310 = vmatprep.subr.bf16.mxu1 %v2826_v6  ;;  %v3290_v10 = vld [vmem:[#allocation5 + $0xe4] ss:$16 sps:$4 sm:$0xff]   ;;  %v3292_v11 = vld [vmem:[#allocation5 + $0xe0] ss:$16 sps:$4 sm:$0xff]   ;;  %v3309_v16 = vld [vmem:[#allocation5 + $0xe8] ss:$16 sps:$4 sm:$0xff]  }
  0x12   :  { %v3295_v12 = vld [vmem:[#allocation5 + $0xc4] ss:$16 sps:$4 sm:$0xff]   ;;  %v3299_v13 = vld [vmem:[#allocation5 + $0xc0] ss:$16 sps:$4 sm:$0xff]   ;;  %v2834_v17 = vld [vmem:[%s4448_s0 + $0x8] sm:$0xff]   ;;  %v59_v51 = vshrl.u32 %v58_v50, 7 }
  0x13   :  { %v3303_v14 = vld [vmem:[#allocation5 + $0xa4] ss:$16 sps:$4 sm:$0xff]   ;;  %v3314_v18 = vld [vmem:[#allocation5 + $0xa0] ss:$16 sps:$4 sm:$0xff]   ;;  %v3319_v19 = vld [vmem:[#allocation5 + $0xcc] ss:$16 sps:$4 sm:$0xff]  }
  0x14   :  { %198 = vmatpush1.bf16.msra.mxu0 %v2828_v7  ;;  %311 = vmatpush1.bf16.msra.mxu1 %v2829_v8  ;;  %v3322_v20 = vld [vmem:[#allocation5 + $0xc8] ss:$16 sps:$4 sm:$0xff]   ;;  %v3324_v21 = vld [vmem:[#allocation5 + $0x84] ss:$16 sps:$4 sm:$0xff]   ;;  %v3331_v22 = vld [vmem:[#allocation5 + $0x80] ss:$16 sps:$4 sm:$0xff]  }
  0x15   :  { %677 = vmatprep.subr.bf16.mxu0 %v3290_v10  ;;  %718 = vmatprep.subr.bf16.mxu1 %v3307_v15  ;;  %v3333_v23 = vld [vmem:[#allocation5 + $0xac] ss:$16 sps:$4 sm:$0xff]   ;;  %v3337_v24 = vld [vmem:[#allocation5 + $0xa8] ss:$16 sps:$4 sm:$0xff]   ;;  %v3340_v25 = vld [vmem:[#allocation5 + $0x64] ss:$16 sps:$4 sm:$0xff]  }
  0x16   :  { %v2838_v26 = vld [vmem:[%s4448_s0 + $0x10] sm:$0xff]   ;;  %v3348_v28 = vld [vmem:[#allocation5 + $0x8c] ss:$16 sps:$4 sm:$0xff]   ;;  %v3352_v29 = vld [vmem:[#allocation5 + $0x88] ss:$16 sps:$4 sm:$0xff]   ;;  %v68_v52 = vsub.s32 2, %v59_v51 }
  0x17   :  { %2702 = vmatmul.mubr.msk.bf16.vlgmr.msra.gmra.mxu0 %vm158_vm0, %v2830_v9  ;;  %2710 = vmatmul.mubr.msk.bf16.vlgmr.msra.gmra.mxu1 %vm158_vm0, %v2830_v9  ;;  %v3346_v27 = vld [vmem:[#allocation5 + $0x60] ss:$16 sps:$4 sm:$0xff]   ;;  %v3355_v30 = vld [vmem:[#allocation5 + $0x44] ss:$16 sps:$4 sm:$0xff]   ;;  %v3360_v31 = vld [vmem:[#allocation5 + $0x6c] ss:$16 sps:$4 sm:$0xff]  }
  0x18   :  { %678 = vmatpush1.bf16.msra.mxu0 %v3292_v11  ;;  %225 = vmatprep.mubr.bf16.mxu0 %v4453_v0  ;;  %v3364_v32 = vld [vmem:[#allocation5 + $0x40] ss:$16 sps:$4 sm:$0xff]   ;;  %v3368_v33 = vld [vmem:[#allocation5 + $0x24] ss:$16 sps:$4 sm:$0xff]   ;;  %v3370_v34 = vld [vmem:[#allocation5 + $0x68] ss:$16 sps:$4 sm:$0xff]  }
  0x19   :  { %338 = vmatprep.mubr.bf16.mxu1 %v4453_v0  ;;  %679 = vmatprep.subr.bf16.mxu0 %v3295_v12  ;;  %v3374_v35 = vld [vmem:[#allocation5 + $0x4c] ss:$16 sps:$4 sm:$0xff]   ;;  %v3379_v37 = vld [vmem:[#allocation5 + $0x20] ss:$16 sps:$4 sm:$0xff]   ;;  %v3383_v38 = vld [vmem:[#allocation5 + $0x48] ss:$16 sps:$4 sm:$0xff]  }
  0x1a   :  { %719 = vmatpush1.bf16.msra.mxu1 %v3309_v16  ;;  %v2845_v36 = vld [vmem:[%s4448_s0 + $0x18] sm:$0xff]   ;;  %v3387_v39 = vld [vmem:[#allocation5 + $0x4] ss:$16 sps:$4 sm:$0xff]   ;;  %v3397_v41 = vld [vmem:[#allocation5] ss:$16 sps:$4 sm:$0xff]   ;;  %v60_v53 = vsub.s32 0, %v59_v51 }
  0x1b   :  { %720 = vmatprep.subr.bf16.mxu1 %v3319_v19  ;;  %v3389_v40 = vld [vmem:[#allocation5 + $0x2c] ss:$16 sps:$4 sm:$0xff]   ;;  %v3399_v42 = vld [vmem:[#allocation5 + $0x28] ss:$16 sps:$4 sm:$0xff]   ;;  %v2852_v44 = vld [vmem:[%s4448_s0 + $0x20] sm:$0xff]   ;;  %v72_v54 = vsub.s32 3, %v59_v51 }
  0x1c   :  { %680 = vmatpush1.bf16.msra.mxu0 %v3299_v13  ;;  %v3403_v43 = vld [vmem:[#allocation5 + $0xc] ss:$16 sps:$4 sm:$0xff]   ;;  %v3410_v45 = vld [vmem:[#allocation5 + $0x8] ss:$16 sps:$4 sm:$0xff]   ;;  %v2866_v47 = vld [vmem:[%s4448_s0 + $0x30] sm:$0xff]   ;;  %v64_v59 = vsub.s32 1, %v59_v51 }
  0x1d   :  { %681 = vmatprep.subr.bf16.mxu0 %v3303_v14  ;;  %v2859_v46 = vld [vmem:[%s4448_s0 + $0x28] sm:$0xff]   ;;  %v2876_v48 = vld [vmem:[%s4448_s0 + $0x38] sm:$0xff]   ;;  %v56_v55 = vld [vmem:[%s4451_s3] sm:$0xf] }
  0x1e   :  { %721 = vmatpush1.bf16.msra.mxu1 %v3322_v20  ;;  %v3482_v58 = vrot.slane %v56_v55, %v68_v52  ;;  %v3488_v62 = vrot.slane %v56_v55, %v60_v53  ;;  %v3490_v63 = vrot.slane %v56_v55, %v72_v54  ;;  %v3492_v3 = vrot.slane %v56_v55, %v64_v59 }
  0x1f   :  { %2703 = vmatmul.mubr.msk.bf16.gmra.mxu0 %vm158_vm0, %v2834_v17  ;;  %2711 = vmatmul.mubr.msk.bf16.gmra.mxu1 %vm158_vm0, %v2834_v17 }
  0x20   :  { %235 = vmatprep.mubr.bf16.mxu0 %v4453_v0  ;;  %348 = vmatprep.mubr.bf16.mxu1 %v4453_v0 }
  0x21   :  { %682 = vmatpush1.bf16.msra.mxu0 %v3314_v18  ;;  %722 = vmatprep.subr.bf16.mxu1 %v3333_v23 }
  0x22   :  { %683 = vmatprep.subr.bf16.mxu0 %v3324_v21  ;;  %723 = vmatpush1.bf16.msra.mxu1 %v3337_v24 }
  0x23   :  { %724 = vmatprep.subr.bf16.mxu1 %v3348_v28 }
  0x25   :  { %684 = vmatpush1.bf16.msra.mxu0 %v3331_v22 }
  0x26   :  { %685 = vmatprep.subr.bf16.mxu0 %v3340_v25  ;;  %725 = vmatpush1.bf16.msra.mxu1 %v3352_v29 }
  0x27   :  { %2704 = vmatmul.mubr.msk.bf16.gmra.mxu0 %vm158_vm0, %v2838_v26  ;;  %2712 = vmatmul.mubr.msk.bf16.gmra.mxu1 %vm158_vm0, %v2838_v26 }
  0x28   :  { %245 = vmatprep.mubr.bf16.mxu0 %v4453_v0  ;;  %358 = vmatprep.mubr.bf16.mxu1 %v4453_v0 }
  0x29   :  { %686 = vmatpush1.bf16.msra.mxu0 %v3346_v27  ;;  %726 = vmatprep.subr.bf16.mxu1 %v3360_v31 }
  0x2a   :  { %687 = vmatprep.subr.bf16.mxu0 %v3355_v30  ;;  %727 = vmatpush1.bf16.msra.mxu1 %v3370_v34 }
  0x2b   :  { %728 = vmatprep.subr.bf16.mxu1 %v3374_v35 }
  0x2d   :  { %688 = vmatpush1.bf16.msra.mxu0 %v3364_v32 }
  0x2e   :  { %689 = vmatprep.subr.bf16.mxu0 %v3368_v33  ;;  %729 = vmatpush1.bf16.msra.mxu1 %v3383_v38 }
  0x2f   :  { %2705 = vmatmul.mubr.msk.bf16.gmra.mxu0 %vm158_vm0, %v2845_v36  ;;  %2713 = vmatmul.mubr.msk.bf16.gmra.mxu1 %vm158_vm0, %v2845_v36 }
  0x30   :  { %255 = vmatprep.mubr.bf16.mxu0 %v4453_v0  ;;  %368 = vmatprep.mubr.bf16.mxu1 %v4453_v0 }
  0x31   :  { %690 = vmatpush1.bf16.msra.mxu0 %v3379_v37  ;;  %730 = vmatprep.subr.bf16.mxu1 %v3389_v40 }
  0x32   :  { %691 = vmatprep.subr.bf16.mxu0 %v3387_v39  ;;  %731 = vmatpush1.bf16.msra.mxu1 %v3399_v42 }
  0x33   :  { %732 = vmatprep.subr.bf16.mxu1 %v3403_v43 }
  0x35   :  { %692 = vmatpush1.bf16.msra.mxu0 %v3397_v41 }
  0x36   :  { %801 = vmatprep.subr.bf16.mxu0 %v3290_v10  ;;  %733 = vmatpush1.bf16.msra.mxu1 %v3410_v45 }
  0x37   :  { %2706 = vmatmul.mubr.msk.bf16.gmra.mxu0 %vm158_vm0, %v2852_v44  ;;  %2714 = vmatmul.mubr.msk.bf16.gmra.mxu1 %vm158_vm0, %v2852_v44 }
  0x38   :  { %265 = vmatprep.mubr.bf16.mxu0 %v4453_v0  ;;  %378 = vmatprep.mubr.bf16.mxu1 %v4453_v0 }
  0x39   :  { %842 = vmatprep.subr.bf16.mxu1 %v3307_v15 }
  0x3f   :  { %2707 = vmatmul.mubr.msk.bf16.gmra.mxu0 %vm158_vm0, %v2859_v46  ;;  %2715 = vmatmul.mubr.msk.bf16.gmra.mxu1 %vm158_vm0, %v2859_v46 }
  0x40   :  { %275 = vmatprep.mubr.bf16.mxu0 %v4453_v0  ;;  %388 = vmatprep.mubr.bf16.mxu1 %v4453_v0 }
  0x47   :  { %2708 = vmatmul.mubr.msk.bf16.gmra.mxu0 %vm158_vm0, %v2866_v47  ;;  %2716 = vmatmul.mubr.msk.bf16.gmra.mxu1 %vm158_vm0, %v2866_v47 }
  0x48   :  { %285 = vmatprep.mubr.bf16.mxu0 %v4453_v0  ;;  %398 = vmatprep.mubr.bf16.mxu1 %v4453_v0 }
  0x4f   :  { %2709 = vmatmul.mubr.msk.bf16.gmra.mxu0 %vm158_vm0, %v2876_v48  ;;  %2717 = vmatmul.mubr.msk.bf16.gmra.mxu1 %vm158_vm0, %v2876_v48 }
  0x50   :  { %709 = vmatprep.mubr.bf16.mxu0 %v4453_v0  ;;  %750 = vmatprep.mubr.bf16.mxu1 %v4453_v0 }
  0x57   :  { %710 = vmatmul.mubr.bf16.vlgmr.msra.gmra.mxu0 %v3232_v49  ;;  %751 = vmatmul.mubr.bf16.vlgmr.msra.gmra.mxu1 %v3232_v49 }
  0x58   :  { %802 = vmatpush1.bf16.msra.mxu0 %v3292_v11  ;;  %843 = vmatpush1.bf16.msra.mxu1 %v3309_v16 }
  0x59   :  { %803 = vmatprep.subr.bf16.mxu0 %v3295_v12  ;;  %844 = vmatprep.subr.bf16.mxu1 %v3319_v19 }
  0x5a   :  { %833 = vmatprep.mubr.bf16.mxu0 %v4453_v0  ;;  %874 = vmatprep.mubr.bf16.mxu1 %v4453_v0 }
  0x5c   :  { %804 = vmatpush1.bf16.msra.mxu0 %v3299_v13  ;;  %845 = vmatpush1.bf16.msra.mxu1 %v3322_v20 }
  0x5d   :  { %805 = vmatprep.subr.bf16.mxu0 %v3303_v14  ;;  %846 = vmatprep.subr.bf16.mxu1 %v3333_v23 }
  0x60   :  { %806 = vmatpush1.bf16.msra.mxu0 %v3314_v18  ;;  %847 = vmatpush1.bf16.msra.mxu1 %v3337_v24 }
  0x61   :  { %807 = vmatprep.subr.bf16.mxu0 %v3324_v21  ;;  %848 = vmatprep.subr.bf16.mxu1 %v3348_v28 }
  0x64   :  { %808 = vmatpush1.bf16.msra.mxu0 %v3331_v22  ;;  %849 = vmatpush1.bf16.msra.mxu1 %v3352_v29 }
  0x65   :  { %809 = vmatprep.subr.bf16.mxu0 %v3340_v25  ;;  %850 = vmatprep.subr.bf16.mxu1 %v3360_v31 }
  0x68   :  { %810 = vmatpush1.bf16.msra.mxu0 %v3346_v27  ;;  %851 = vmatpush1.bf16.msra.mxu1 %v3370_v34 }
  0x69   :  { %811 = vmatprep.subr.bf16.mxu0 %v3355_v30  ;;  %852 = vmatprep.subr.bf16.mxu1 %v3374_v35 }
  0x6c   :  { %812 = vmatpush1.bf16.msra.mxu0 %v3364_v32  ;;  %853 = vmatpush1.bf16.msra.mxu1 %v3383_v38 }
  0x6d   :  { %813 = vmatprep.subr.bf16.mxu0 %v3368_v33  ;;  %854 = vmatprep.subr.bf16.mxu1 %v3389_v40 }
  0x70   :  { %814 = vmatpush1.bf16.msra.mxu0 %v3379_v37  ;;  %855 = vmatpush1.bf16.msra.mxu1 %v3399_v42 }
  0x71   :  { %815 = vmatprep.subr.bf16.mxu0 %v3387_v39  ;;  %856 = vmatprep.subr.bf16.mxu1 %v3403_v43 }
  0x74   :  { %816 = vmatpush1.bf16.msra.mxu0 %v3397_v41  ;;  %857 = vmatpush1.bf16.msra.mxu1 %v3410_v45 }
  0x75   :  { %926 = vmatprep.subr.bf16.mxu0 %v3290_v10  ;;  %967 = vmatprep.subr.bf16.mxu1 %v3307_v15 }
  0xd7   :  { %v3478_v56 = vpop.f32.mrf.mxu0  ;;  %v3480_v57 = vpop.f32.mrf.mxu1 }
  0xd9   :  { %v3484_v60 = vpop.f32.mrf.mxu0  ;;  %v3486_v61 = vpop.f32.mrf.mxu1 }
  0xdb   :  { %v221_v1 = vpop.f32.mrf.mxu0  ;;  %v334_v2 = vpop.f32.mrf.mxu1 }
  0xdc   :  { %v3495_v4 = vadd.f32 %v221_v1, %v3488_v62  ;;  %v3498_v5 = vadd.f32 %v334_v2, %v3482_v58 }
  0xdd   :  { %v223_v6 = vpop.f32.mrf.mxu0  ;;  %v336_v7 = vpop.f32.mrf.mxu1 }
  0xde   :  { %v3501_v8 = vadd.f32 %v223_v6, %v3492_v3  ;;  %v3504_v9 = vadd.f32 %v336_v7, %v3490_v63 }
  0xdf   :  { %v227_v17 = vpop.f32.mrf.mxu0  ;;  %v340_v26 = vpop.f32.mrf.mxu1 }
  0xe0   :  { %v3507_v36 = vadd.f32 %v227_v17, %v3488_v62  ;;  %v3510_v44 = vadd.f32 %v340_v26, %v3482_v58 }
  0xe1   :  { %v229_v46 = vpop.f32.mrf.mxu0  ;;  %v342_v47 = vpop.f32.mrf.mxu1 }
  0xe2   :  { %v3513_v48 = vadd.f32 %v229_v46, %v3492_v3  ;;  %v3516_v49 = vadd.f32 %v342_v47, %v3490_v63 }
  0xe3   :  { %v231_v50 = vpop.f32.mrf.mxu0  ;;  %v344_v51 = vpop.f32.mrf.mxu1 }
  0xe4   :  { %v3519_v52 = vadd.f32 %v231_v50, %v3488_v62  ;;  %v3522_v53 = vadd.f32 %v344_v51, %v3482_v58 }
  0xe5   :  { %v233_v54 = vpop.f32.mrf.mxu0  ;;  %v346_v55 = vpop.f32.mrf.mxu1 }
  0xe6   :  { %4455 = vst [vmem:[#allocation8_spill] sm:$0xff] %v3522_v53  ;;  %v3525_v59 = vadd.f32 %v233_v54, %v3492_v3  ;;  %v3528_v1 = vadd.f32 %v346_v55, %v3490_v63 }
  0xe7   :  { %v237_v2 = vpop.f32.mrf.mxu0  ;;  %v350_v6 = vpop.f32.mrf.mxu1 }
  0xe8   :  { %4456 = vst [vmem:[#allocation9_spill] sm:$0xff] %v3525_v59  ;;  %4457 = vst [vmem:[#allocation10_spill] sm:$0xff] %v3528_v1  ;;  %v3531_v7 = vadd.f32 %v237_v2, %v3488_v62  ;;  %v3534_v17 = vadd.f32 %v350_v6, %v3482_v58 }
  0xe9   :  { %v239_v26 = vpop.f32.mrf.mxu0  ;;  %v352_v46 = vpop.f32.mrf.mxu1 }
  0xea   :  { %4458 = vst [vmem:[#allocation11_spill] sm:$0xff] %v3531_v7  ;;  %4459 = vst [vmem:[#allocation12_spill] sm:$0xff] %v3534_v17  ;;  %v3537_v47 = vadd.f32 %v239_v26, %v3492_v3  ;;  %v3540_v50 = vadd.f32 %v352_v46, %v3490_v63 }
  0xeb   :  { %v241_v51 = vpop.f32.mrf.mxu0  ;;  %v354_v54 = vpop.f32.mrf.mxu1 }
  0xec   :  { %4460 = vst [vmem:[#allocation13_spill] sm:$0xff] %v3537_v47  ;;  %4461 = vst [vmem:[#allocation14_spill] sm:$0xff] %v3540_v50  ;;  %v3543_v55 = vadd.f32 %v241_v51, %v3488_v62  ;;  %v3546_v0 = vadd.f32 %v354_v54, %v3482_v58 }
  0xed   :  { %v243_v2 = vpop.f32.mrf.mxu0  ;;  %v356_v7 = vpop.f32.mrf.mxu1 }
  0xee   :  { %4462 = vst [vmem:[#allocation15_spill] sm:$0xff] %v3543_v55  ;;  %4463 = vst [vmem:[#allocation16_spill] sm:$0xff] %v3546_v0  ;;  %v3549_v6 = vadd.f32 %v243_v2, %v3492_v3  ;;  %v3552_v17 = vadd.f32 %v356_v7, %v3490_v63 }
  0xef   :  { %v247_v26 = vpop.f32.mrf.mxu0  ;;  %v360_v47 = vpop.f32.mrf.mxu1 }
  0xf0   :  { %4464 = vst [vmem:[#allocation17_spill] sm:$0xff] %v3549_v6  ;;  %4465 = vst [vmem:[#allocation18_spill] sm:$0xff] %v3552_v17  ;;  %v3555_v46 = vadd.f32 %v247_v26, %v3488_v62  ;;  %v3558_v50 = vadd.f32 %v360_v47, %v3482_v58 }
  0xf1   :  { %v249_v51 = vpop.f32.mrf.mxu0  ;;  %v362_v55 = vpop.f32.mrf.mxu1 }
  0xf2   :  { %4466 = vst [vmem:[#allocation19_spill] sm:$0xff] %v3555_v46  ;;  %4467 = vst [vmem:[#allocation20_spill] sm:$0xff] %v3558_v50  ;;  %v3561_v54 = vadd.f32 %v249_v51, %v3492_v3  ;;  %v3564_v0 = vadd.f32 %v362_v55, %v3490_v63 }
  0xf3   :  { %v251_v2 = vpop.f32.mrf.mxu0  ;;  %v364_v6 = vpop.f32.mrf.mxu1 }
  0xf4   :  { %4468 = vst [vmem:[#allocation21_spill] sm:$0xff] %v3561_v54  ;;  %4469 = vst [vmem:[#allocation22_spill] sm:$0xff] %v3564_v0  ;;  %v3567_v7 = vadd.f32 %v251_v2, %v3488_v62  ;;  %v3570_v17 = vadd.f32 %v364_v6, %v3482_v58 }
  0xf5   :  { %v253_v26 = vpop.f32.mrf.mxu0  ;;  %v366_v46 = vpop.f32.mrf.mxu1 }
  0xf6   :  { %4470 = vst [vmem:[#allocation23_spill] sm:$0xff] %v3567_v7  ;;  %4471 = vst [vmem:[#allocation24_spill] sm:$0xff] %v3570_v17  ;;  %v3573_v47 = vadd.f32 %v253_v26, %v3492_v3  ;;  %v3576_v50 = vadd.f32 %v366_v46, %v3490_v63 }
  0xf7   :  { %v257_v51 = vpop.f32.mrf.mxu0  ;;  %v370_v54 = vpop.f32.mrf.mxu1 }
  0xf8   :  { %4472 = vst [vmem:[#allocation25_spill] sm:$0xff] %v3573_v47  ;;  %4473 = vst [vmem:[#allocation26_spill] sm:$0xff] %v3576_v50  ;;  %v3579_v55 = vadd.f32 %v257_v51, %v3488_v62  ;;  %v3582_v0 = vadd.f32 %v370_v54, %v3482_v58 }
  0xf9   :  { %v259_v2 = vpop.f32.mrf.mxu0  ;;  %v372_v7 = vpop.f32.mrf.mxu1 }
  0xfa   :  { %4474 = vst [vmem:[#allocation27_spill] sm:$0xff] %v3579_v55  ;;  %4475 = vst [vmem:[#allocation28_spill] sm:$0xff] %v3582_v0  ;;  %v3585_v6 = vadd.f32 %v259_v2, %v3492_v3  ;;  %v3588_v17 = vadd.f32 %v372_v7, %v3490_v63 }
  0xfb   :  { %v261_v26 = vpop.f32.mrf.mxu0  ;;  %v374_v47 = vpop.f32.mrf.mxu1 }
  0xfc   :  { %4476 = vst [vmem:[#allocation29_spill] sm:$0xff] %v3585_v6  ;;  %4477 = vst [vmem:[#allocation30_spill] sm:$0xff] %v3588_v17  ;;  %v3591_v46 = vadd.f32 %v261_v26, %v3488_v62  ;;  %v3594_v50 = vadd.f32 %v374_v47, %v3482_v58 }
  0xfd   :  { %v263_v51 = vpop.f32.mrf.mxu0  ;;  %v376_v55 = vpop.f32.mrf.mxu1 }
  0xfe   :  { %4478 = vst [vmem:[#allocation31_spill] sm:$0xff] %v3591_v46  ;;  %4479 = vst [vmem:[#allocation32_spill] sm:$0xff] %v3594_v50  ;;  %v3597_v54 = vadd.f32 %v263_v51, %v3492_v3  ;;  %v3600_v0 = vadd.f32 %v376_v55, %v3490_v63 }
  0xff   :  { %v267_v2 = vpop.f32.mrf.mxu0  ;;  %v380_v6 = vpop.f32.mrf.mxu1 }
 0x100   :  { %4480 = vst [vmem:[#allocation33_spill] sm:$0xff] %v3597_v54  ;;  %4481 = vst [vmem:[#allocation34_spill] sm:$0xff] %v3600_v0  ;;  %v3603_v7 = vadd.f32 %v267_v2, %v3488_v62  ;;  %v3606_v17 = vadd.f32 %v380_v6, %v3482_v58 }
 0x101   :  { %v269_v26 = vpop.f32.mrf.mxu0  ;;  %v382_v46 = vpop.f32.mrf.mxu1 }
 0x102   :  { %4482 = vst [vmem:[#allocation35_spill] sm:$0xff] %v3603_v7  ;;  %4483 = vst [vmem:[#allocation36_spill] sm:$0xff] %v3606_v17  ;;  %v3609_v47 = vadd.f32 %v269_v26, %v3492_v3  ;;  %v3612_v50 = vadd.f32 %v382_v46, %v3490_v63 }
 0x103   :  { %v271_v51 = vpop.f32.mrf.mxu0  ;;  %v384_v54 = vpop.f32.mrf.mxu1 }
 0x104   :  { %4484 = vst [vmem:[#allocation37_spill] sm:$0xff] %v3609_v47  ;;  %4485 = vst [vmem:[#allocation38_spill] sm:$0xff] %v3612_v50  ;;  %v3615_v55 = vadd.f32 %v271_v51, %v3488_v62  ;;  %v3618_v0 = vadd.f32 %v384_v54, %v3482_v58 }
 0x105   :  { %v273_v2 = vpop.f32.mrf.mxu0  ;;  %v386_v7 = vpop.f32.mrf.mxu1 }
 0x106   :  { %4486 = vst [vmem:[#allocation39_spill] sm:$0xff] %v3615_v55  ;;  %4487 = vst [vmem:[#allocation40_spill] sm:$0xff] %v3618_v0  ;;  %v3621_v6 = vadd.f32 %v273_v2, %v3492_v3  ;;  %v3624_v17 = vadd.f32 %v386_v7, %v3490_v63 }
 0x107   :  { %v277_v26 = vpop.f32.mrf.mxu0  ;;  %v390_v47 = vpop.f32.mrf.mxu1 }
 0x108   :  { %4488 = vst [vmem:[#allocation41_spill] sm:$0xff] %v3621_v6  ;;  %4489 = vst [vmem:[#allocation42_spill] sm:$0xff] %v3624_v17  ;;  %v3627_v46 = vadd.f32 %v277_v26, %v3488_v62  ;;  %v3630_v50 = vadd.f32 %v390_v47, %v3482_v58 }
 0x109   :  { %v279_v51 = vpop.f32.mrf.mxu0  ;;  %v392_v55 = vpop.f32.mrf.mxu1 }
 0x10a   :  { %4490 = vst [vmem:[#allocation43_spill] sm:$0xff] %v3627_v46  ;;  %4491 = vst [vmem:[#allocation44_spill] sm:$0xff] %v3630_v50  ;;  %v3633_v54 = vadd.f32 %v279_v51, %v3492_v3  ;;  %v3636_v0 = vadd.f32 %v392_v55, %v3490_v63 }
 0x10b   :  { %v281_v2 = vpop.f32.mrf.mxu0  ;;  %v394_v6 = vpop.f32.mrf.mxu1 }
 0x10c   :  { %4492 = vst [vmem:[#allocation45_spill] sm:$0xff] %v3633_v54  ;;  %4493 = vst [vmem:[#allocation46_spill] sm:$0xff] %v3636_v0  ;;  %v3639_v7 = vadd.f32 %v281_v2, %v3488_v62  ;;  %v3642_v17 = vadd.f32 %v394_v6, %v3482_v58 }
 0x10d   :  { %v283_v26 = vpop.f32.mrf.mxu0  ;;  %v396_v46 = vpop.f32.mrf.mxu1 }
 0x10e   :  { %4494 = vst [vmem:[#allocation47_spill] sm:$0xff] %v3639_v7  ;;  %4495 = vst [vmem:[#allocation48_spill] sm:$0xff] %v3642_v17  ;;  %v3645_v47 = vadd.f32 %v283_v26, %v3492_v3  ;;  %v3648_v50 = vadd.f32 %v396_v46, %v3490_v63 }
 0x10f   :  { %v287_v51 = vpop.f32.mrf.mxu0  ;;  %v400_v54 = vpop.f32.mrf.mxu1 }
 0x110   :  { %4496 = vst [vmem:[#allocation49_spill] sm:$0xff] %v3645_v47  ;;  %4497 = vst [vmem:[#allocation50_spill] sm:$0xff] %v3648_v50  ;;  %v3651_v55 = vadd.f32 %v287_v51, %v3488_v62  ;;  %v3654_v0 = vadd.f32 %v400_v54, %v3482_v58  ;;  %v218_v54 = vadd.f32 %v3478_v56, %v3488_v62 }
 0x111   :  { %v289_v2 = vpop.f32.mrf.mxu0  ;;  %v402_v7 = vpop.f32.mrf.mxu1 }
 0x112   :  { %4498 = vst [vmem:[#allocation51_spill] sm:$0xff] %v3651_v55  ;;  %4499 = vst [vmem:[#allocation52_spill] sm:$0xff] %v3654_v0  ;;  %v3657_v6 = vadd.f32 %v289_v2, %v3492_v3  ;;  %v3660_v17 = vadd.f32 %v402_v7, %v3490_v63 }
 0x113   :  { %v291_v26 = vpop.f32.mrf.mxu0  ;;  %v404_v47 = vpop.f32.mrf.mxu1 }
 0x114   :  { %4500 = vst [vmem:[#allocation53_spill] sm:$0xff] %v3657_v6  ;;  %4501 = vst [vmem:[#allocation54_spill] sm:$0xff] %v3660_v17  ;;  %v3663_v46 = vadd.f32 %v291_v26, %v3488_v62  ;;  %v3666_v50 = vadd.f32 %v404_v47, %v3482_v58  ;;  %v220_v26 = vadd.f32 %v3484_v60, %v3492_v3 }
 0x115   :  { %v293_v51 = vpop.f32.mrf.mxu0  ;;  %v406_v55 = vpop.f32.mrf.mxu1 }
 0x116   :  { %4502 = vst [vmem:[#allocation55_spill] sm:$0xff] %v3663_v46  ;;  %4503 = vst [vmem:[#allocation56_spill] sm:$0xff] %v3666_v50  ;;  %v3671_v0 = vadd.f32 %v293_v51, %v3492_v3  ;;  %v3674_v2 = vadd.f32 %v406_v55, %v3490_v63  ;;  %v333_v55 = vadd.f32 %v3486_v61, %v3490_v63 }
 0x117   :  { %v711_v7 = vpop.f32.mrf.mxu0  ;;  %v752_v17 = vpop.f32.mrf.mxu1 }
 0x118   :  { %4504 = vst [vmem:[#allocation57_spill] sm:$0xff] %v3671_v0  ;;  %4505 = vst [vmem:[#allocation58_spill] sm:$0xff] %v3674_v2  ;;  %v759_v46 = vadd.f32 %v711_v7, %v218_v54  ;;  %v331_v0 = vadd.f32 %v3480_v57, %v3482_v58 }
 0x119   :  { %v713_v6 = vpop.f32.mrf.mxu0  ;;  %v754_v47 = vpop.f32.mrf.mxu1 }
 0x11a   :  { %v2750_v50 = vmul.f32 -1.442695, %v759_v46  ;;  %v760_v53 = vadd.f32 %v713_v6, %v220_v26  ;;  %v762_v2 = vadd.f32 %v754_v47, %v333_v55  ;;  %v761_v60 = vadd.f32 %v752_v17, %v331_v0 }
 0x11b   :  { %v715_v1 = vpop.f32.mrf.mxu0  ;;  %v756_v59 = vpop.f32.mrf.mxu1 }
 0x11c   :  { %2886 = vpow2.f32 %v2750_v50  ;;  %v2751_v56 = vmul.f32 -1.442695, %v760_v53  ;;  %v2752_v3 = vmul.f32 -1.442695, %v762_v2  ;;  %v4506_v2 = vmov 0  }
 0x11d   :  { %v716_v62 = vpop.f32.mrf.mxu0  ;;  %v757_v51 = vpop.f32.mrf.mxu1 }
 0x11e   :  { %2888 = vpow2.f32 %v2751_v56 }
 0x11f   :  { %2890 = vtanh.f32 %v761_v60 }
 0x120   :  { %2892 = vpow2.f32 %v2752_v3 }
 0x129   :  { %v2887_v54 = vpop.eup %2886 }
 0x12a   :  { %v766_v7 = vadd.f32 1.0, %v2887_v54 }
 0x12b   :  { %v2889_v6 = vpop.eup %2888 }
 0x12c   :  { %2894 = vrcp.f32 %v766_v7  ;;  %v772_v59 = vadd.f32 1.0, %v2889_v6  ;;  %v2891_v53 = vpop.eup %2890 }
 0x12d   :  { %v2893_v1 = vpop.eup %2892 }
 0x12e   :  { %2896 = vrcp.f32 %v772_v59  ;;  %v779_v61 = vadd.f32 1.0, %v2893_v1 }
 0x130   :  { %2898 = vrcp.f32 %v779_v61 }
 0x139   :  { %v2895_v50 = vpop.eup %2894 }
 0x13a   :  { %v783_v46 = vmul.f32 %v2895_v50, %v2891_v53 }
 0x13b   :  { %v2897_v26 = vpop.eup %2896 }
 0x13c   :  { %v782_v63 = vmul.f32 0.0, %v2897_v26 }
 0x13d   :  { %v2899_v0 = vpop.eup %2898 }
 0x13e   :  { %v3682_v47 = vadd.f32 %v783_v46, %v782_v63 }
 0x140   :  { %2900 = vtanh.f32 %v3682_v47 }
 0x14d   :  { %v2901_v57 = vpop.eup %2900 }
 0x14e   :  { %v786_v58 = vmul.f32 %v2901_v57, %v2899_v0 }
 0x150   :  { %v789_v17 = vpack.c.bf16 %v786_v58, %v786_v58 }
 0x152   :  { %790 = vst [vmem:[%s4452_s4] sm:$0xf] %v789_v17  ;;  %834 = vmatmul.mubr.bf16.vlgmr.msra.gmra.mxu0 %v789_v17  ;;  %875 = vmatmul.mubr.bf16.vlgmr.msra.gmra.mxu1 %v789_v17 }
 0x153   :  { %927 = vmatpush1.bf16.msra.mxu0 %v3292_v11  ;;  %968 = vmatpush1.bf16.msra.mxu1 %v3309_v16 }
 0x154   :  { %928 = vmatprep.subr.bf16.mxu0 %v3295_v12  ;;  %969 = vmatprep.subr.bf16.mxu1 %v3319_v19 }
 0x155   :  { %958 = vmatprep.mubr.bf16.mxu0 %v4506_v2  ;;  %999 = vmatprep.mubr.bf16.mxu1 %v4506_v2 }
 0x157   :  { %929 = vmatpush1.bf16.msra.mxu0 %v3299_v13  ;;  %970 = vmatpush1.bf16.msra.mxu1 %v3322_v20 }
 0x158   :  { %930 = vmatprep.subr.bf16.mxu0 %v3303_v14  ;;  %971 = vmatprep.subr.bf16.mxu1 %v3333_v23 }
 0x15b   :  { %931 = vmatpush1.bf16.msra.mxu0 %v3314_v18  ;;  %972 = vmatpush1.bf16.msra.mxu1 %v3337_v24 }
 0x15c   :  { %932 = vmatprep.subr.bf16.mxu0 %v3324_v21  ;;  %973 = vmatprep.subr.bf16.mxu1 %v3348_v28 }
 0x15f   :  { %933 = vmatpush1.bf16.msra.mxu0 %v3331_v22  ;;  %974 = vmatpush1.bf16.msra.mxu1 %v3352_v29 }
 0x160   :  { %934 = vmatprep.subr.bf16.mxu0 %v3340_v25  ;;  %975 = vmatprep.subr.bf16.mxu1 %v3360_v31 }
 0x163   :  { %935 = vmatpush1.bf16.msra.mxu0 %v3346_v27  ;;  %976 = vmatpush1.bf16.msra.mxu1 %v3370_v34 }
 0x164   :  { %936 = vmatprep.subr.bf16.mxu0 %v3355_v30  ;;  %977 = vmatprep.subr.bf16.mxu1 %v3374_v35 }
 0x167   :  { %937 = vmatpush1.bf16.msra.mxu0 %v3364_v32  ;;  %978 = vmatpush1.bf16.msra.mxu1 %v3383_v38 }
 0x168   :  { %938 = vmatprep.subr.bf16.mxu0 %v3368_v33  ;;  %979 = vmatprep.subr.bf16.mxu1 %v3389_v40 }
 0x16b   :  { %939 = vmatpush1.bf16.msra.mxu0 %v3379_v37  ;;  %980 = vmatpush1.bf16.msra.mxu1 %v3399_v42 }
 0x16c   :  { %940 = vmatprep.subr.bf16.mxu0 %v3387_v39  ;;  %981 = vmatprep.subr.bf16.mxu1 %v3403_v43 }
 0x16f   :  { %941 = vmatpush1.bf16.msra.mxu0 %v3397_v41  ;;  %982 = vmatpush1.bf16.msra.mxu1 %v3410_v45 }
 0x170   :  { %1051 = vmatprep.subr.bf16.mxu0 %v3290_v10  ;;  %1092 = vmatprep.subr.bf16.mxu1 %v3307_v15 }
 0x212   :  { %v835_v56 = vpop.f32.mrf.mxu0  ;;  %v876_v62 = vpop.f32.mrf.mxu1 }
 0x213   :  { %v883_v51 = vadd.f32 %v835_v56, %v3495_v4  ;;  %v885_v46 = vadd.f32 %v876_v62, %v3498_v5 }
 0x214   :  { %v837_v55 = vpop.f32.mrf.mxu0  ;;  %v878_v60 = vpop.f32.mrf.mxu1 }
 0x215   :  { %v2753_v3 = vmul.f32 -1.442695, %v883_v51  ;;  %v884_v54 = vadd.f32 %v837_v55, %v3501_v8  ;;  %v886_v50 = vadd.f32 %v878_v60, %v3504_v9 }
 0x216   :  { %v839_v7 = vpop.f32.mrf.mxu0  ;;  %v880_v6 = vpop.f32.mrf.mxu1 }
 0x217   :  { %2902 = vpow2.f32 %v2753_v3  ;;  %v2754_v59 = vmul.f32 -1.442695, %v884_v54  ;;  %v2755_v26 = vmul.f32 -1.442695, %v886_v50 }
 0x218   :  { %v840_v53 = vpop.f32.mrf.mxu0  ;;  %v881_v1 = vpop.f32.mrf.mxu1 }
 0x219   :  { %2904 = vpow2.f32 %v2754_v59 }
 0x21a   :  { %2906 = vtanh.f32 %v885_v46 }
 0x21b   :  { %2908 = vpow2.f32 %v2755_v26 }
 0x224   :  { %v2903_v61 = vpop.eup %2902 }
 0x225   :  { %v890_v63 = vadd.f32 1.0, %v2903_v61 }
 0x226   :  { %v2905_v4 = vpop.eup %2904 }
 0x227   :  { %2910 = vrcp.f32 %v890_v63  ;;  %v896_v0 = vadd.f32 1.0, %v2905_v4  ;;  %v2907_v8 = vpop.eup %2906 }
 0x228   :  { %v2909_v57 = vpop.eup %2908 }
 0x229   :  { %2912 = vrcp.f32 %v896_v0  ;;  %v903_v51 = vadd.f32 1.0, %v2909_v57 }
 0x22b   :  { %2914 = vrcp.f32 %v903_v51 }
 0x234   :  { %v2911_v58 = vpop.eup %2910 }
 0x235   :  { %v907_v17 = vmul.f32 %v2911_v58, %v2907_v8 }
 0x236   :  { %v2913_v56 = vpop.eup %2912 }
 0x237   :  { %v906_v55 = vmul.f32 %v2913_v56, %v3682_v47 }
 0x238   :  { %v2915_v5 = vpop.eup %2914 }
 0x239   :  { %v3727_v9 = vadd.f32 %v907_v17, %v906_v55 }
 0x23b   :  { %2916 = vtanh.f32 %v3727_v9 }
 0x248   :  { %v2917_v62 = vpop.eup %2916 }
 0x249   :  { %v910_v60 = vmul.f32 %v2917_v62, %v2915_v5  ;;  %v3778_v62 = vld [vmem:[#allocation5 + $0xe0] ss:$16 sps:$4 sm:$0xff]  }
 0x24b   :  { %v913_v3 = vpack.c.bf16 %v910_v60, %v910_v60  ;;  %v3788_v60 = vld [vmem:[#allocation5 + $0xc0] ss:$16 sps:$4 sm:$0xff]  }
 0x24d   :  { %2756 = vst [vmem:[%s4452_s4 + $0x4] sm:$0xf] %v913_v3  ;;  %959 = vmatmul.mubr.bf16.vlgmr.msra.gmra.mxu0 %v913_v3  ;;  %1000 = vmatmul.mubr.bf16.vlgmr.msra.gmra.mxu1 %v913_v3 }
 0x24e   :  { %1052 = vmatpush1.bf16.msra.mxu0 %v3292_v11  ;;  %1093 = vmatpush1.bf16.msra.mxu1 %v3309_v16 }
 0x24f   :  { %1053 = vmatprep.subr.bf16.mxu0 %v3295_v12  ;;  %1094 = vmatprep.subr.bf16.mxu1 %v3319_v19 }
 0x250   :  { %1083 = vmatprep.mubr.bf16.mxu0 %v4506_v2  ;;  %1124 = vmatprep.mubr.bf16.mxu1 %v4506_v2 }
 0x252   :  { %1054 = vmatpush1.bf16.msra.mxu0 %v3299_v13  ;;  %1095 = vmatpush1.bf16.msra.mxu1 %v3322_v20 }
 0x253   :  { %1055 = vmatprep.subr.bf16.mxu0 %v3303_v14  ;;  %1096 = vmatprep.subr.bf16.mxu1 %v3333_v23 }
 0x256   :  { %1056 = vmatpush1.bf16.msra.mxu0 %v3314_v18  ;;  %1097 = vmatpush1.bf16.msra.mxu1 %v3337_v24 }
 0x257   :  { %1057 = vmatprep.subr.bf16.mxu0 %v3324_v21  ;;  %1098 = vmatprep.subr.bf16.mxu1 %v3348_v28 }
 0x25a   :  { %1058 = vmatpush1.bf16.msra.mxu0 %v3331_v22  ;;  %1099 = vmatpush1.bf16.msra.mxu1 %v3352_v29 }
 0x25b   :  { %1059 = vmatprep.subr.bf16.mxu0 %v3340_v25  ;;  %1100 = vmatprep.subr.bf16.mxu1 %v3360_v31 }
 0x25e   :  { %1060 = vmatpush1.bf16.msra.mxu0 %v3346_v27  ;;  %1101 = vmatpush1.bf16.msra.mxu1 %v3370_v34 }
 0x25f   :  { %1061 = vmatprep.subr.bf16.mxu0 %v3355_v30  ;;  %1102 = vmatprep.subr.bf16.mxu1 %v3374_v35 }
 0x262   :  { %1062 = vmatpush1.bf16.msra.mxu0 %v3364_v32  ;;  %1103 = vmatpush1.bf16.msra.mxu1 %v3383_v38 }
 0x263   :  { %1063 = vmatprep.subr.bf16.mxu0 %v3368_v33  ;;  %1104 = vmatprep.subr.bf16.mxu1 %v3389_v40 }
 0x266   :  { %1064 = vmatpush1.bf16.msra.mxu0 %v3379_v37  ;;  %1105 = vmatpush1.bf16.msra.mxu1 %v3399_v42 }
 0x267   :  { %1065 = vmatprep.subr.bf16.mxu0 %v3387_v39  ;;  %1106 = vmatprep.subr.bf16.mxu1 %v3403_v43 }
 0x26a   :  { %1066 = vmatpush1.bf16.msra.mxu0 %v3397_v41  ;;  %1107 = vmatpush1.bf16.msra.mxu1 %v3410_v45 }
 0x26b   :  { %1176 = vmatprep.subr.bf16.mxu0 %v3290_v10  ;;  %1217 = vmatprep.subr.bf16.mxu1 %v3307_v15 }
 0x30d   :  { %v960_v11 = vpop.f32.mrf.mxu0  ;;  %v1001_v12 = vpop.f32.mrf.mxu1 }
 0x30e   :  { %v1008_v13 = vadd.f32 %v960_v11, %v3507_v36  ;;  %v1010_v15 = vadd.f32 %v1001_v12, %v3510_v44 }
 0x30f   :  { %v962_v47 = vpop.f32.mrf.mxu0  ;;  %v1003_v54 = vpop.f32.mrf.mxu1 }
 0x310   :  { %v2757_v7 = vmul.f32 -1.442695, %v1008_v13  ;;  %v1009_v6 = vadd.f32 %v962_v47, %v3513_v48  ;;  %v1011_v10 = vadd.f32 %v1003_v54, %v3516_v49 }
 0x311   :  { %v964_v59 = vpop.f32.mrf.mxu0  ;;  %v1005_v53 = vpop.f32.mrf.mxu1 }
 0x312   :  { %2918 = vpow2.f32 %v2757_v7  ;;  %v2758_v1 = vmul.f32 -1.442695, %v1009_v6  ;;  %v2759_v26 = vmul.f32 -1.442695, %v1011_v10  ;;  %v3834_v10 = vld [vmem:[#allocation5 + $0xe8] ss:$16 sps:$4 sm:$0xff]  }
 0x313   :  { %v965_v50 = vpop.f32.mrf.mxu0  ;;  %v1006_v46 = vpop.f32.mrf.mxu1 }
 0x314   :  { %2920 = vpow2.f32 %v2758_v1 }
 0x315   :  { %2922 = vtanh.f32 %v1010_v15  ;;  %v3838_v15 = vld [vmem:[#allocation5 + $0xcc] ss:$16 sps:$4 sm:$0xff]  }
 0x316   :  { %2924 = vpow2.f32 %v2759_v26  ;;  %v3844_v26 = vld [vmem:[#allocation5 + $0xc8] ss:$16 sps:$4 sm:$0xff]  }
 0x31f   :  { %v2919_v61 = vpop.eup %2918 }
 0x320   :  { %v1015_v63 = vadd.f32 1.0, %v2919_v61  ;;  %v3847_v61 = vld [vmem:[#allocation5 + $0xa4] ss:$16 sps:$4 sm:$0xff]  }
 0x321   :  { %v2921_v36 = vpop.eup %2920 }
 0x322   :  { %2926 = vrcp.f32 %v1015_v63  ;;  %v1021_v4 = vadd.f32 1.0, %v2921_v36  ;;  %v2923_v48 = vpop.eup %2922  ;;  %v3850_v63 = vld [vmem:[#allocation5 + $0xac] ss:$16 sps:$4 sm:$0xff]   ;;  %v3853_v36 = vld [vmem:[#allocation5 + $0xa0] ss:$16 sps:$4 sm:$0xff]  }
 0x323   :  { %v2925_v0 = vpop.eup %2924 }
 0x324   :  { %2928 = vrcp.f32 %v1021_v4  ;;  %v1028_v17 = vadd.f32 1.0, %v2925_v0  ;;  %v3856_v4 = vld [vmem:[#allocation5 + $0xa8] ss:$16 sps:$4 sm:$0xff]   ;;  %v3862_v0 = vld [vmem:[#allocation5 + $0x8c] ss:$16 sps:$4 sm:$0xff]  }
 0x326   :  { %2930 = vrcp.f32 %v1028_v17  ;;  %v3874_v17 = vld [vmem:[#allocation5 + $0x6c] ss:$16 sps:$4 sm:$0xff]  }
 0x32f   :  { %v2927_v8 = vpop.eup %2926 }
 0x330   :  { %v1032_v57 = vmul.f32 %v2927_v8, %v2923_v48  ;;  %v3859_v48 = vld [vmem:[#allocation5 + $0x84] ss:$16 sps:$4 sm:$0xff]   ;;  %v3865_v8 = vld [vmem:[#allocation5 + $0x80] ss:$16 sps:$4 sm:$0xff]  }
 0x331   :  { %v2929_v58 = vpop.eup %2928 }
 0x332   :  { %v1031_v56 = vmul.f32 %v2929_v58, %v3727_v9  ;;  %v3782_v9 = vld [vmem:[#allocation5 + $0xc4] ss:$16 sps:$4 sm:$0xff]  }
 0x333   :  { %v2931_v44 = vpop.eup %2930  ;;  %v3871_v58 = vld [vmem:[#allocation5 + $0x64] ss:$16 sps:$4 sm:$0xff]  }
 0x334   :  { %v3772_v49 = vadd.f32 %v1032_v57, %v1031_v56  ;;  %v3868_v57 = vld [vmem:[#allocation5 + $0x88] ss:$16 sps:$4 sm:$0xff]   ;;  %v3877_v56 = vld [vmem:[#allocation5 + $0x60] ss:$16 sps:$4 sm:$0xff]  }
 0x336   :  { %2932 = vtanh.f32 %v3772_v49 }
 0x343   :  { %v2933_v51 = vpop.eup %2932 }
 0x344   :  { %v1035_v55 = vmul.f32 %v2933_v51, %v2931_v44  ;;  %v3883_v44 = vld [vmem:[#allocation5 + $0x44] ss:$16 sps:$4 sm:$0xff]   ;;  %v3886_v51 = vld [vmem:[#allocation5 + $0x4c] ss:$16 sps:$4 sm:$0xff]  }
 0x346   :  { %v1038_v5 = vpack.c.bf16 %v1035_v55, %v1035_v55  ;;  %v3889_v55 = vld [vmem:[#allocation5 + $0x40] ss:$16 sps:$4 sm:$0xff]  }
 0x348   :  { %2760 = vst [vmem:[%s4452_s4 + $0x8] sm:$0xf] %v1038_v5  ;;  %1084 = vmatmul.mubr.bf16.vlgmr.msra.gmra.mxu0 %v1038_v5  ;;  %1125 = vmatmul.mubr.bf16.vlgmr.msra.gmra.mxu1 %v1038_v5  ;;  %v3892_v5 = vld [vmem:[#allocation5 + $0x48] ss:$16 sps:$4 sm:$0xff]  }
 0x349   :  { %1177 = vmatpush1.bf16.msra.mxu0 %v3778_v62  ;;  %1218 = vmatpush1.bf16.msra.mxu1 %v3309_v16  ;;  %v3819_v16 = vld [vmem:[#allocation5 + $0xec] ss:$16 sps:$4 sm:$0xff]  }
 0x34a   :  { %1178 = vmatprep.subr.bf16.mxu0 %v3782_v9  ;;  %1219 = vmatprep.subr.bf16.mxu1 %v3319_v19 }
 0x34b   :  { %1208 = vmatprep.mubr.bf16.mxu0 %v4506_v2  ;;  %1249 = vmatprep.mubr.bf16.mxu1 %v4506_v2 }
 0x34d   :  { %1179 = vmatpush1.bf16.msra.mxu0 %v3788_v60  ;;  %1220 = vmatpush1.bf16.msra.mxu1 %v3322_v20 }
 0x34e   :  { %1180 = vmatprep.subr.bf16.mxu0 %v3303_v14  ;;  %1221 = vmatprep.subr.bf16.mxu1 %v3333_v23  ;;  %v3816_v14 = vld [vmem:[#allocation5 + $0xe4] ss:$16 sps:$4 sm:$0xff]  }
 0x351   :  { %1181 = vmatpush1.bf16.msra.mxu0 %v3314_v18  ;;  %1222 = vmatpush1.bf16.msra.mxu1 %v3337_v24  ;;  %v4507_v24 = vld [vmem:[#allocation9_spill] sm:$0xff] }
 0x352   :  { %1182 = vmatprep.subr.bf16.mxu0 %v3324_v21  ;;  %1223 = vmatprep.subr.bf16.mxu1 %v3348_v28 }
 0x355   :  { %1183 = vmatpush1.bf16.msra.mxu0 %v3331_v22  ;;  %1224 = vmatpush1.bf16.msra.mxu1 %v3352_v29 }
 0x356   :  { %1184 = vmatprep.subr.bf16.mxu0 %v3340_v25  ;;  %1225 = vmatprep.subr.bf16.mxu1 %v3360_v31 }
 0x359   :  { %1185 = vmatpush1.bf16.msra.mxu0 %v3346_v27  ;;  %1226 = vmatpush1.bf16.msra.mxu1 %v3370_v34  ;;  %v4509_v34 = vld [vmem:[#allocation8_spill] sm:$0xff] }
 0x35a   :  { %1186 = vmatprep.subr.bf16.mxu0 %v3355_v30  ;;  %1227 = vmatprep.subr.bf16.mxu1 %v3374_v35 }
 0x35d   :  { %1187 = vmatpush1.bf16.msra.mxu0 %v3364_v32  ;;  %1228 = vmatpush1.bf16.msra.mxu1 %v3383_v38  ;;  %v4508_v32 = vld [vmem:[#allocation10_spill] sm:$0xff] }
 0x35e   :  { %1188 = vmatprep.subr.bf16.mxu0 %v3368_v33  ;;  %1229 = vmatprep.subr.bf16.mxu1 %v3389_v40 }
 0x361   :  { %1189 = vmatpush1.bf16.msra.mxu0 %v3379_v37  ;;  %1230 = vmatpush1.bf16.msra.mxu1 %v3399_v42 }
 0x362   :  { %1190 = vmatprep.subr.bf16.mxu0 %v3387_v39  ;;  %1231 = vmatprep.subr.bf16.mxu1 %v3403_v43 }
 0x365   :  { %1191 = vmatpush1.bf16.msra.mxu0 %v3397_v41  ;;  %1232 = vmatpush1.bf16.msra.mxu1 %v3410_v45 }
 0x366   :  { %1301 = vmatprep.subr.bf16.mxu0 %v3816_v14  ;;  %1342 = vmatprep.subr.bf16.mxu1 %v3819_v16 }
 0x408   :  { %v1085_v18 = vpop.f32.mrf.mxu0  ;;  %v1126_v19 = vpop.f32.mrf.mxu1 }
 0x409   :  { %v1133_v20 = vadd.f32 %v1085_v18, %v3519_v52  ;;  %v1135_v35 = vadd.f32 %v1126_v19, %v4509_v34  ;;  %v3895_v18 = vld [vmem:[#allocation5 + $0x24] ss:$16 sps:$4 sm:$0xff]   ;;  %v3899_v19 = vld [vmem:[#allocation5 + $0x20] ss:$16 sps:$4 sm:$0xff]  }
 0x40a   :  { %v1087_v21 = vpop.f32.mrf.mxu0  ;;  %v1128_v22 = vpop.f32.mrf.mxu1 }
 0x40b   :  { %v2761_v23 = vmul.f32 -1.442695, %v1133_v20  ;;  %v1134_v25 = vadd.f32 %v1087_v21, %v4507_v24  ;;  %v1136_v33 = vadd.f32 %v1128_v22, %v4508_v32  ;;  %v3903_v20 = vld [vmem:[#allocation5 + $0x4] ss:$16 sps:$4 sm:$0xff]   ;;  %v4510_v22 = vld [vmem:[#allocation11_spill] sm:$0xff] }
 0x40c   :  { %v1089_v27 = vpop.f32.mrf.mxu0  ;;  %v1130_v28 = vpop.f32.mrf.mxu1 }
 0x40d   :  { %2934 = vpow2.f32 %v2761_v23  ;;  %v2762_v29 = vmul.f32 -1.442695, %v1134_v25  ;;  %v2763_v37 = vmul.f32 -1.442695, %v1136_v33  ;;  %v4511_v27 = vld [vmem:[#allocation13_spill] sm:$0xff]  ;;  %v4513_v33 = vld [vmem:[#allocation12_spill] sm:$0xff] }
 0x40e   :  { %v1090_v30 = vpop.f32.mrf.mxu0  ;;  %v1131_v31 = vpop.f32.mrf.mxu1 }
 0x40f   :  { %2936 = vpow2.f32 %v2762_v29 }
 0x410   :  { %2938 = vtanh.f32 %v1135_v35 }
 0x411   :  { %2940 = vpow2.f32 %v2763_v37 }
 0x41a   :  { %v2935_v38 = vpop.eup %2934 }
 0x41b   :  { %v1140_v39 = vadd.f32 1.0, %v2935_v38 }
 0x41c   :  { %v2937_v52 = vpop.eup %2936 }
 0x41d   :  { %2942 = vrcp.f32 %v1140_v39  ;;  %v1146_v3 = vadd.f32 1.0, %v2937_v52  ;;  %v2939_v11 = vpop.eup %2938 }
 0x41e   :  { %v2941_v12 = vpop.eup %2940 }
 0x41f   :  { %2944 = vrcp.f32 %v1146_v3  ;;  %v1153_v7 = vadd.f32 1.0, %v2941_v12 }
 0x421   :  { %2946 = vrcp.f32 %v1153_v7 }
 0x42a   :  { %v2943_v13 = vpop.eup %2942 }
 0x42b   :  { %v1157_v47 = vmul.f32 %v2943_v13, %v2939_v11 }
 0x42c   :  { %v2945_v54 = vpop.eup %2944 }
 0x42d   :  { %v1156_v6 = vmul.f32 %v2945_v54, %v3772_v49  ;;  %v3880_v49 = vld [vmem:[#allocation5 + $0x68] ss:$16 sps:$4 sm:$0xff]  }
 0x42e   :  { %v2947_v53 = vpop.eup %2946 }
 0x42f   :  { %v3827_v59 = vadd.f32 %v1157_v47, %v1156_v6 }
 0x431   :  { %2948 = vtanh.f32 %v3827_v59 }
 0x43e   :  { %v2949_v1 = vpop.eup %2948 }
 0x43f   :  { %v1160_v50 = vmul.f32 %v2949_v1, %v2947_v53 }
 0x441   :  { %v1163_v46 = vpack.c.bf16 %v1160_v50, %v1160_v50 }
 0x443   :  { %2764 = vst [vmem:[%s4452_s4 + $0xc] sm:$0xf] %v1163_v46  ;;  %1209 = vmatmul.mubr.bf16.vlgmr.msra.gmra.mxu0 %v1163_v46  ;;  %1250 = vmatmul.mubr.bf16.vlgmr.msra.gmra.mxu1 %v1163_v46 }
 0x444   :  { %1302 = vmatpush1.bf16.msra.mxu0 %v3778_v62  ;;  %1343 = vmatpush1.bf16.msra.mxu1 %v3834_v10 }
 0x445   :  { %1303 = vmatprep.subr.bf16.mxu0 %v3782_v9  ;;  %1344 = vmatprep.subr.bf16.mxu1 %v3838_v15 }
 0x446   :  { %1333 = vmatprep.mubr.bf16.mxu0 %v4506_v2  ;;  %1374 = vmatprep.mubr.bf16.mxu1 %v4506_v2 }
 0x448   :  { %1304 = vmatpush1.bf16.msra.mxu0 %v3788_v60  ;;  %1345 = vmatpush1.bf16.msra.mxu1 %v3844_v26 }
 0x449   :  { %1305 = vmatprep.subr.bf16.mxu0 %v3847_v61  ;;  %1346 = vmatprep.subr.bf16.mxu1 %v3850_v63 }
 0x44c   :  { %1306 = vmatpush1.bf16.msra.mxu0 %v3853_v36  ;;  %1347 = vmatpush1.bf16.msra.mxu1 %v3856_v4 }
 0x44d   :  { %1307 = vmatprep.subr.bf16.mxu0 %v3859_v48  ;;  %1348 = vmatprep.subr.bf16.mxu1 %v3862_v0 }
 0x450   :  { %1308 = vmatpush1.bf16.msra.mxu0 %v3865_v8  ;;  %1349 = vmatpush1.bf16.msra.mxu1 %v3868_v57 }
 0x451   :  { %1309 = vmatprep.subr.bf16.mxu0 %v3871_v58  ;;  %1350 = vmatprep.subr.bf16.mxu1 %v3874_v17 }
 0x454   :  { %1310 = vmatpush1.bf16.msra.mxu0 %v3877_v56  ;;  %1351 = vmatpush1.bf16.msra.mxu1 %v3880_v49 }
 0x455   :  { %1311 = vmatprep.subr.bf16.mxu0 %v3883_v44  ;;  %1352 = vmatprep.subr.bf16.mxu1 %v3886_v51 }
 0x458   :  { %1312 = vmatpush1.bf16.msra.mxu0 %v3889_v55  ;;  %1353 = vmatpush1.bf16.msra.mxu1 %v3892_v5 }
 0x459   :  { %1313 = vmatprep.subr.bf16.mxu0 %v3895_v18  ;;  %1354 = vmatprep.subr.bf16.mxu1 %v3389_v40 }
 0x45c   :  { %1314 = vmatpush1.bf16.msra.mxu0 %v3899_v19  ;;  %1355 = vmatpush1.bf16.msra.mxu1 %v3399_v42 }
 0x45d   :  { %1315 = vmatprep.subr.bf16.mxu0 %v3903_v20  ;;  %1356 = vmatprep.subr.bf16.mxu1 %v3403_v43 }
 0x460   :  { %1316 = vmatpush1.bf16.msra.mxu0 %v3397_v41  ;;  %1357 = vmatpush1.bf16.msra.mxu1 %v3410_v45  ;;  %v4512_v45 = vld [vmem:[#allocation14_spill] sm:$0xff] }
 0x461   :  { %1426 = vmatprep.subr.bf16.mxu0 %v3816_v14  ;;  %1467 = vmatprep.subr.bf16.mxu1 %v3819_v16 }
 0x503   :  { %v1210_v40 = vpop.f32.mrf.mxu0  ;;  %v1251_v21 = vpop.f32.mrf.mxu1 }
 0x504   :  { %v1258_v23 = vadd.f32 %v1210_v40, %v4510_v22  ;;  %v1260_v34 = vadd.f32 %v1251_v21, %v4513_v33  ;;  %v3951_v40 = vld [vmem:[#allocation5 + $0x28] ss:$16 sps:$4 sm:$0xff]   ;;  %v3955_v21 = vld [vmem:[#allocation5 + $0xc] ss:$16 sps:$4 sm:$0xff]   ;;  %v3958_v22 = vld [vmem:[#allocation5] ss:$16 sps:$4 sm:$0xff]  }
 0x505   :  { %v1212_v24 = vpop.f32.mrf.mxu0  ;;  %v1253_v42 = vpop.f32.mrf.mxu1 }
 0x506   :  { %v2765_v25 = vmul.f32 -1.442695, %v1258_v23  ;;  %v1259_v28 = vadd.f32 %v1212_v24, %v4511_v27  ;;  %v1261_v32 = vadd.f32 %v1253_v42, %v4512_v45  ;;  %v3961_v23 = vld [vmem:[#allocation5 + $0x8] ss:$16 sps:$4 sm:$0xff]  }
 0x507   :  { %v1214_v29 = vpop.f32.mrf.mxu0  ;;  %v1255_v30 = vpop.f32.mrf.mxu1 }
 0x508   :  { %2950 = vpow2.f32 %v2765_v25  ;;  %v2766_v43 = vmul.f32 -1.442695, %v1259_v28  ;;  %v2767_v35 = vmul.f32 -1.442695, %v1261_v32  ;;  %v4514_v25 = vld [vmem:[#allocation15_spill] sm:$0xff] }
 0x509   :  { %v1215_v41 = vpop.f32.mrf.mxu0  ;;  %v1256_v31 = vpop.f32.mrf.mxu1 }
 0x50a   :  { %2952 = vpow2.f32 %v2766_v43  ;;  %v4515_v43 = vld [vmem:[#allocation17_spill] sm:$0xff] }
 0x50b   :  { %2954 = vtanh.f32 %v1260_v34 }
 0x50c   :  { %2956 = vpow2.f32 %v2767_v35  ;;  %v4516_v35 = vld [vmem:[#allocation18_spill] sm:$0xff] }
 0x515   :  { %v2951_v37 = vpop.eup %2950 }
 0x516   :  { %v1265_v38 = vadd.f32 1.0, %v2951_v37 }
 0x517   :  { %v2953_v39 = vpop.eup %2952 }
 0x518   :  { %2958 = vrcp.f32 %v1265_v38  ;;  %v1271_v52 = vadd.f32 1.0, %v2953_v39  ;;  %v2955_v3 = vpop.eup %2954  ;;  %v4517_v38 = vld [vmem:[#allocation16_spill] sm:$0xff] }
 0x519   :  { %v2957_v11 = vpop.eup %2956 }
 0x51a   :  { %2960 = vrcp.f32 %v1271_v52  ;;  %v1278_v54 = vadd.f32 1.0, %v2957_v11 }
 0x51c   :  { %2962 = vrcp.f32 %v1278_v54 }
 0x525   :  { %v2959_v12 = vpop.eup %2958 }
 0x526   :  { %v1282_v13 = vmul.f32 %v2959_v12, %v2955_v3 }
 0x527   :  { %v2961_v47 = vpop.eup %2960 }
 0x528   :  { %v1281_v7 = vmul.f32 %v2961_v47, %v3827_v59  ;;  %v3947_v59 = vld [vmem:[#allocation5 + $0x2c] ss:$16 sps:$4 sm:$0xff]  }
 0x529   :  { %v2963_v53 = vpop.eup %2962 }
 0x52a   :  { %v3916_v6 = vadd.f32 %v1282_v13, %v1281_v7 }
 0x52c   :  { %2964 = vtanh.f32 %v3916_v6 }
 0x539   :  { %v2965_v1 = vpop.eup %2964 }
 0x53a   :  { %v1285_v50 = vmul.f32 %v2965_v1, %v2963_v53 }
 0x53c   :  { %v1288_v46 = vpack.c.bf16 %v1285_v50, %v1285_v50 }
 0x53e   :  { %2768 = vst [vmem:[%s4452_s4 + $0x10] sm:$0xf] %v1288_v46  ;;  %1334 = vmatmul.mubr.bf16.vlgmr.msra.gmra.mxu0 %v1288_v46  ;;  %1375 = vmatmul.mubr.bf16.vlgmr.msra.gmra.mxu1 %v1288_v46 }
 0x53f   :  { %1427 = vmatpush1.bf16.msra.mxu0 %v3778_v62  ;;  %1468 = vmatpush1.bf16.msra.mxu1 %v3834_v10 }
 0x540   :  { %1428 = vmatprep.subr.bf16.mxu0 %v3782_v9  ;;  %1469 = vmatprep.subr.bf16.mxu1 %v3838_v15 }
 0x541   :  { %1458 = vmatprep.mubr.bf16.mxu0 %v4506_v2  ;;  %1499 = vmatprep.mubr.bf16.mxu1 %v4506_v2 }
 0x543   :  { %1429 = vmatpush1.bf16.msra.mxu0 %v3788_v60  ;;  %1470 = vmatpush1.bf16.msra.mxu1 %v3844_v26 }
 0x544   :  { %1430 = vmatprep.subr.bf16.mxu0 %v3847_v61  ;;  %1471 = vmatprep.subr.bf16.mxu1 %v3850_v63 }
 0x547   :  { %1431 = vmatpush1.bf16.msra.mxu0 %v3853_v36  ;;  %1472 = vmatpush1.bf16.msra.mxu1 %v3856_v4 }
 0x548   :  { %1432 = vmatprep.subr.bf16.mxu0 %v3859_v48  ;;  %1473 = vmatprep.subr.bf16.mxu1 %v3862_v0 }
 0x54b   :  { %1433 = vmatpush1.bf16.msra.mxu0 %v3865_v8  ;;  %1474 = vmatpush1.bf16.msra.mxu1 %v3868_v57 }
 0x54c   :  { %1434 = vmatprep.subr.bf16.mxu0 %v3871_v58  ;;  %1475 = vmatprep.subr.bf16.mxu1 %v3874_v17 }
 0x54f   :  { %1435 = vmatpush1.bf16.msra.mxu0 %v3877_v56  ;;  %1476 = vmatpush1.bf16.msra.mxu1 %v3880_v49 }
 0x550   :  { %1436 = vmatprep.subr.bf16.mxu0 %v3883_v44  ;;  %1477 = vmatprep.subr.bf16.mxu1 %v3886_v51 }
 0x553   :  { %1437 = vmatpush1.bf16.msra.mxu0 %v3889_v55  ;;  %1478 = vmatpush1.bf16.msra.mxu1 %v3892_v5 }
 0x554   :  { %1438 = vmatprep.subr.bf16.mxu0 %v3895_v18  ;;  %1479 = vmatprep.subr.bf16.mxu1 %v3947_v59 }
 0x557   :  { %1439 = vmatpush1.bf16.msra.mxu0 %v3899_v19  ;;  %1480 = vmatpush1.bf16.msra.mxu1 %v3951_v40 }
 0x558   :  { %1440 = vmatprep.subr.bf16.mxu0 %v3903_v20  ;;  %1481 = vmatprep.subr.bf16.mxu1 %v3955_v21 }
 0x55b   :  { %1441 = vmatpush1.bf16.msra.mxu0 %v3958_v22  ;;  %1482 = vmatpush1.bf16.msra.mxu1 %v3961_v23 }
 0x55c   :  { %1551 = vmatprep.subr.bf16.mxu0 %v3816_v14  ;;  %1592 = vmatprep.subr.bf16.mxu1 %v3819_v16 }
 0x5fe   :  { %v1335_v24 = vpop.f32.mrf.mxu0  ;;  %v1376_v42 = vpop.f32.mrf.mxu1 }
 0x5ff   :  { %v1383_v27 = vadd.f32 %v1335_v24, %v4514_v25  ;;  %v1385_v39 = vadd.f32 %v1376_v42, %v4517_v38 }
 0x600   :  { %v1337_v28 = vpop.f32.mrf.mxu0  ;;  %v1378_v29 = vpop.f32.mrf.mxu1 }
 0x601   :  { %v2769_v30 = vmul.f32 -1.442695, %v1383_v27  ;;  %v1384_v41 = vadd.f32 %v1337_v28, %v4515_v43  ;;  %v1386_v37 = vadd.f32 %v1378_v29, %v4516_v35 }
 0x602   :  { %v1339_v31 = vpop.f32.mrf.mxu0  ;;  %v1380_v45 = vpop.f32.mrf.mxu1 }
 0x603   :  { %2966 = vpow2.f32 %v2769_v30  ;;  %v2770_v32 = vmul.f32 -1.442695, %v1384_v41  ;;  %v2771_v52 = vmul.f32 -1.442695, %v1386_v37  ;;  %v4518_v30 = vld [vmem:[#allocation19_spill] sm:$0xff] }
 0x604   :  { %v1340_v33 = vpop.f32.mrf.mxu0  ;;  %v1381_v34 = vpop.f32.mrf.mxu1 }
 0x605   :  { %2968 = vpow2.f32 %v2770_v32  ;;  %v4519_v32 = vld [vmem:[#allocation21_spill] sm:$0xff] }
 0x606   :  { %2970 = vtanh.f32 %v1385_v39 }
 0x607   :  { %2972 = vpow2.f32 %v2771_v52  ;;  %v4520_v52 = vld [vmem:[#allocation22_spill] sm:$0xff] }
 0x610   :  { %v2967_v3 = vpop.eup %2966 }
 0x611   :  { %v1390_v11 = vadd.f32 1.0, %v2967_v3 }
 0x612   :  { %v2969_v12 = vpop.eup %2968 }
 0x613   :  { %2974 = vrcp.f32 %v1390_v11  ;;  %v1396_v13 = vadd.f32 1.0, %v2969_v12  ;;  %v2971_v47 = vpop.eup %2970  ;;  %v4521_v11 = vld [vmem:[#allocation20_spill] sm:$0xff] }
 0x614   :  { %v2973_v54 = vpop.eup %2972 }
 0x615   :  { %2976 = vrcp.f32 %v1396_v13  ;;  %v1403_v50 = vadd.f32 1.0, %v2973_v54 }
 0x617   :  { %2978 = vrcp.f32 %v1403_v50 }
 0x620   :  { %v2975_v7 = vpop.eup %2974 }
 0x621   :  { %v1407_v53 = vmul.f32 %v2975_v7, %v2971_v47 }
 0x622   :  { %v2977_v1 = vpop.eup %2976 }
 0x623   :  { %v1406_v46 = vmul.f32 %v2977_v1, %v3916_v6 }
 0x624   :  { %v2979_v42 = vpop.eup %2978 }
 0x625   :  { %v3971_v24 = vadd.f32 %v1407_v53, %v1406_v46 }
 0x627   :  { %2980 = vtanh.f32 %v3971_v24 }
 0x634   :  { %v2981_v25 = vpop.eup %2980 }
 0x635   :  { %v1410_v27 = vmul.f32 %v2981_v25, %v2979_v42 }
 0x637   :  { %v1413_v28 = vpack.c.bf16 %v1410_v27, %v1410_v27 }
 0x639   :  { %2772 = vst [vmem:[%s4452_s4 + $0x14] sm:$0xf] %v1413_v28  ;;  %1459 = vmatmul.mubr.bf16.vlgmr.msra.gmra.mxu0 %v1413_v28  ;;  %1500 = vmatmul.mubr.bf16.vlgmr.msra.gmra.mxu1 %v1413_v28 }
 0x63a   :  { %1552 = vmatpush1.bf16.msra.mxu0 %v3778_v62  ;;  %1593 = vmatpush1.bf16.msra.mxu1 %v3834_v10 }
 0x63b   :  { %1553 = vmatprep.subr.bf16.mxu0 %v3782_v9  ;;  %1594 = vmatprep.subr.bf16.mxu1 %v3838_v15 }
 0x63c   :  { %1583 = vmatprep.mubr.bf16.mxu0 %v4506_v2  ;;  %1624 = vmatprep.mubr.bf16.mxu1 %v4506_v2 }
 0x63e   :  { %1554 = vmatpush1.bf16.msra.mxu0 %v3788_v60  ;;  %1595 = vmatpush1.bf16.msra.mxu1 %v3844_v26 }
 0x63f   :  { %1555 = vmatprep.subr.bf16.mxu0 %v3847_v61  ;;  %1596 = vmatprep.subr.bf16.mxu1 %v3850_v63 }
 0x642   :  { %1556 = vmatpush1.bf16.msra.mxu0 %v3853_v36  ;;  %1597 = vmatpush1.bf16.msra.mxu1 %v3856_v4 }
 0x643   :  { %1557 = vmatprep.subr.bf16.mxu0 %v3859_v48  ;;  %1598 = vmatprep.subr.bf16.mxu1 %v3862_v0 }
 0x646   :  { %1558 = vmatpush1.bf16.msra.mxu0 %v3865_v8  ;;  %1599 = vmatpush1.bf16.msra.mxu1 %v3868_v57 }
 0x647   :  { %1559 = vmatprep.subr.bf16.mxu0 %v3871_v58  ;;  %1600 = vmatprep.subr.bf16.mxu1 %v3874_v17 }
 0x64a   :  { %1560 = vmatpush1.bf16.msra.mxu0 %v3877_v56  ;;  %1601 = vmatpush1.bf16.msra.mxu1 %v3880_v49 }
 0x64b   :  { %1561 = vmatprep.subr.bf16.mxu0 %v3883_v44  ;;  %1602 = vmatprep.subr.bf16.mxu1 %v3886_v51 }
 0x64e   :  { %1562 = vmatpush1.bf16.msra.mxu0 %v3889_v55  ;;  %1603 = vmatpush1.bf16.msra.mxu1 %v3892_v5 }
 0x64f   :  { %1563 = vmatprep.subr.bf16.mxu0 %v3895_v18  ;;  %1604 = vmatprep.subr.bf16.mxu1 %v3947_v59 }
 0x652   :  { %1564 = vmatpush1.bf16.msra.mxu0 %v3899_v19  ;;  %1605 = vmatpush1.bf16.msra.mxu1 %v3951_v40 }
 0x653   :  { %1565 = vmatprep.subr.bf16.mxu0 %v3903_v20  ;;  %1606 = vmatprep.subr.bf16.mxu1 %v3955_v21 }
 0x656   :  { %1566 = vmatpush1.bf16.msra.mxu0 %v3958_v22  ;;  %1607 = vmatpush1.bf16.msra.mxu1 %v3961_v23 }
 0x657   :  { %1676 = vmatprep.subr.bf16.mxu0 %v3816_v14  ;;  %1717 = vmatprep.subr.bf16.mxu1 %v3819_v16 }
 0x6f9   :  { %v1460_v6 = vpop.f32.mrf.mxu0  ;;  %v1501_v29 = vpop.f32.mrf.mxu1 }
 0x6fa   :  { %v1508_v43 = vadd.f32 %v1460_v6, %v4518_v30  ;;  %v1510_v12 = vadd.f32 %v1501_v29, %v4521_v11 }
 0x6fb   :  { %v1462_v41 = vpop.f32.mrf.mxu0  ;;  %v1503_v31 = vpop.f32.mrf.mxu1 }
 0x6fc   :  { %v2773_v45 = vmul.f32 -1.442695, %v1508_v43  ;;  %v1509_v33 = vadd.f32 %v1462_v41, %v4519_v32  ;;  %v1511_v3 = vadd.f32 %v1503_v31, %v4520_v52 }
 0x6fd   :  { %v1464_v34 = vpop.f32.mrf.mxu0  ;;  %v1505_v35 = vpop.f32.mrf.mxu1 }
 0x6fe   :  { %2982 = vpow2.f32 %v2773_v45  ;;  %v2774_v37 = vmul.f32 -1.442695, %v1509_v33  ;;  %v2775_v13 = vmul.f32 -1.442695, %v1511_v3  ;;  %v4522_v45 = vld [vmem:[#allocation23_spill] sm:$0xff] }
 0x6ff   :  { %v1465_v38 = vpop.f32.mrf.mxu0  ;;  %v1506_v39 = vpop.f32.mrf.mxu1 }
 0x700   :  { %2984 = vpow2.f32 %v2774_v37  ;;  %v4523_v37 = vld [vmem:[#allocation25_spill] sm:$0xff] }
 0x701   :  { %2986 = vtanh.f32 %v1510_v12 }
 0x702   :  { %2988 = vpow2.f32 %v2775_v13  ;;  %v4524_v13 = vld [vmem:[#allocation26_spill] sm:$0xff] }
 0x70b   :  { %v2983_v47 = vpop.eup %2982 }
 0x70c   :  { %v1515_v54 = vadd.f32 1.0, %v2983_v47 }
 0x70d   :  { %v2985_v7 = vpop.eup %2984 }
 0x70e   :  { %2990 = vrcp.f32 %v1515_v54  ;;  %v1521_v53 = vadd.f32 1.0, %v2985_v7  ;;  %v2987_v1 = vpop.eup %2986  ;;  %v4525_v54 = vld [vmem:[#allocation24_spill] sm:$0xff] }
 0x70f   :  { %v2989_v50 = vpop.eup %2988 }
 0x710   :  { %2992 = vrcp.f32 %v1521_v53  ;;  %v1528_v27 = vadd.f32 1.0, %v2989_v50 }
 0x712   :  { %2994 = vrcp.f32 %v1528_v27 }
 0x71b   :  { %v2991_v46 = vpop.eup %2990 }
 0x71c   :  { %v1532_v42 = vmul.f32 %v2991_v46, %v2987_v1 }
 0x71d   :  { %v2993_v25 = vpop.eup %2992 }
 0x71e   :  { %v1531_v28 = vmul.f32 %v2993_v25, %v3971_v24 }
 0x71f   :  { %v2995_v29 = vpop.eup %2994 }
 0x720   :  { %v4016_v6 = vadd.f32 %v1532_v42, %v1531_v28 }
 0x722   :  { %2996 = vtanh.f32 %v4016_v6 }
 0x72f   :  { %v2997_v30 = vpop.eup %2996 }
 0x730   :  { %v1535_v43 = vmul.f32 %v2997_v30, %v2995_v29 }
 0x732   :  { %v1538_v41 = vpack.c.bf16 %v1535_v43, %v1535_v43 }
 0x734   :  { %2776 = vst [vmem:[%s4452_s4 + $0x18] sm:$0xf] %v1538_v41  ;;  %1584 = vmatmul.mubr.bf16.vlgmr.msra.gmra.mxu0 %v1538_v41  ;;  %1625 = vmatmul.mubr.bf16.vlgmr.msra.gmra.mxu1 %v1538_v41 }
 0x735   :  { %1677 = vmatpush1.bf16.msra.mxu0 %v3778_v62  ;;  %1718 = vmatpush1.bf16.msra.mxu1 %v3834_v10 }
 0x736   :  { %1678 = vmatprep.subr.bf16.mxu0 %v3782_v9  ;;  %1719 = vmatprep.subr.bf16.mxu1 %v3838_v15 }
 0x737   :  { %1708 = vmatprep.mubr.bf16.mxu0 %v4506_v2  ;;  %1749 = vmatprep.mubr.bf16.mxu1 %v4506_v2 }
 0x739   :  { %1679 = vmatpush1.bf16.msra.mxu0 %v3788_v60  ;;  %1720 = vmatpush1.bf16.msra.mxu1 %v3844_v26 }
 0x73a   :  { %1680 = vmatprep.subr.bf16.mxu0 %v3847_v61  ;;  %1721 = vmatprep.subr.bf16.mxu1 %v3850_v63 }
 0x73d   :  { %1681 = vmatpush1.bf16.msra.mxu0 %v3853_v36  ;;  %1722 = vmatpush1.bf16.msra.mxu1 %v3856_v4 }
 0x73e   :  { %1682 = vmatprep.subr.bf16.mxu0 %v3859_v48  ;;  %1723 = vmatprep.subr.bf16.mxu1 %v3862_v0 }
 0x741   :  { %1683 = vmatpush1.bf16.msra.mxu0 %v3865_v8  ;;  %1724 = vmatpush1.bf16.msra.mxu1 %v3868_v57 }
 0x742   :  { %1684 = vmatprep.subr.bf16.mxu0 %v3871_v58  ;;  %1725 = vmatprep.subr.bf16.mxu1 %v3874_v17 }
 0x745   :  { %1685 = vmatpush1.bf16.msra.mxu0 %v3877_v56  ;;  %1726 = vmatpush1.bf16.msra.mxu1 %v3880_v49 }
 0x746   :  { %1686 = vmatprep.subr.bf16.mxu0 %v3883_v44  ;;  %1727 = vmatprep.subr.bf16.mxu1 %v3886_v51 }
 0x749   :  { %1687 = vmatpush1.bf16.msra.mxu0 %v3889_v55  ;;  %1728 = vmatpush1.bf16.msra.mxu1 %v3892_v5 }
 0x74a   :  { %1688 = vmatprep.subr.bf16.mxu0 %v3895_v18  ;;  %1729 = vmatprep.subr.bf16.mxu1 %v3947_v59 }
 0x74d   :  { %1689 = vmatpush1.bf16.msra.mxu0 %v3899_v19  ;;  %1730 = vmatpush1.bf16.msra.mxu1 %v3951_v40 }
 0x74e   :  { %1690 = vmatprep.subr.bf16.mxu0 %v3903_v20  ;;  %1731 = vmatprep.subr.bf16.mxu1 %v3955_v21 }
 0x751   :  { %1691 = vmatpush1.bf16.msra.mxu0 %v3958_v22  ;;  %1732 = vmatpush1.bf16.msra.mxu1 %v3961_v23 }
 0x752   :  { %1801 = vmatprep.subr.bf16.mxu0 %v3816_v14  ;;  %1842 = vmatprep.subr.bf16.mxu1 %v3819_v16 }
 0x7f4   :  { %v1585_v24 = vpop.f32.mrf.mxu0  ;;  %v1626_v31 = vpop.f32.mrf.mxu1 }
 0x7f5   :  { %v1633_v32 = vadd.f32 %v1585_v24, %v4522_v45  ;;  %v1635_v7 = vadd.f32 %v1626_v31, %v4525_v54 }
 0x7f6   :  { %v1587_v33 = vpop.f32.mrf.mxu0  ;;  %v1628_v34 = vpop.f32.mrf.mxu1 }
 0x7f7   :  { %v2777_v35 = vmul.f32 -1.442695, %v1633_v32  ;;  %v1634_v38 = vadd.f32 %v1587_v33, %v4523_v37  ;;  %v1636_v47 = vadd.f32 %v1628_v34, %v4524_v13 }
 0x7f8   :  { %v1589_v39 = vpop.f32.mrf.mxu0  ;;  %v1630_v52 = vpop.f32.mrf.mxu1 }
 0x7f9   :  { %2998 = vpow2.f32 %v2777_v35  ;;  %v2778_v3 = vmul.f32 -1.442695, %v1634_v38  ;;  %v2779_v53 = vmul.f32 -1.442695, %v1636_v47  ;;  %v4526_v35 = vld [vmem:[#allocation27_spill] sm:$0xff] }
 0x7fa   :  { %v1590_v11 = vpop.f32.mrf.mxu0  ;;  %v1631_v12 = vpop.f32.mrf.mxu1 }
 0x7fb   :  { %3000 = vpow2.f32 %v2778_v3  ;;  %v4527_v3 = vld [vmem:[#allocation29_spill] sm:$0xff] }
 0x7fc   :  { %3002 = vtanh.f32 %v1635_v7 }
 0x7fd   :  { %3004 = vpow2.f32 %v2779_v53  ;;  %v4528_v53 = vld [vmem:[#allocation30_spill] sm:$0xff] }
 0x806   :  { %v2999_v1 = vpop.eup %2998 }
 0x807   :  { %v1640_v50 = vadd.f32 1.0, %v2999_v1 }
 0x808   :  { %v3001_v46 = vpop.eup %3000 }
 0x809   :  { %3006 = vrcp.f32 %v1640_v50  ;;  %v1646_v42 = vadd.f32 1.0, %v3001_v46  ;;  %v3003_v25 = vpop.eup %3002  ;;  %v4529_v50 = vld [vmem:[#allocation28_spill] sm:$0xff] }
 0x80a   :  { %v3005_v27 = vpop.eup %3004 }
 0x80b   :  { %3008 = vrcp.f32 %v1646_v42  ;;  %v1653_v43 = vadd.f32 1.0, %v3005_v27 }
 0x80d   :  { %3010 = vrcp.f32 %v1653_v43 }
 0x816   :  { %v3007_v28 = vpop.eup %3006 }
 0x817   :  { %v1657_v29 = vmul.f32 %v3007_v28, %v3003_v25 }
 0x818   :  { %v3009_v30 = vpop.eup %3008 }
 0x819   :  { %v1656_v41 = vmul.f32 %v3009_v30, %v4016_v6 }
 0x81a   :  { %v3011_v31 = vpop.eup %3010 }
 0x81b   :  { %v4061_v24 = vadd.f32 %v1657_v29, %v1656_v41 }
 0x81d   :  { %3012 = vtanh.f32 %v4061_v24 }
 0x82a   :  { %v3013_v45 = vpop.eup %3012 }
 0x82b   :  { %v1660_v32 = vmul.f32 %v3013_v45, %v3011_v31 }
 0x82d   :  { %v1663_v33 = vpack.c.bf16 %v1660_v32, %v1660_v32 }
 0x82f   :  { %2780 = vst [vmem:[%s4452_s4 + $0x1c] sm:$0xf] %v1663_v33  ;;  %1709 = vmatmul.mubr.bf16.vlgmr.msra.gmra.mxu0 %v1663_v33  ;;  %1750 = vmatmul.mubr.bf16.vlgmr.msra.gmra.mxu1 %v1663_v33 }
 0x830   :  { %1802 = vmatpush1.bf16.msra.mxu0 %v3778_v62  ;;  %1843 = vmatpush1.bf16.msra.mxu1 %v3834_v10 }
 0x831   :  { %1803 = vmatprep.subr.bf16.mxu0 %v3782_v9  ;;  %1844 = vmatprep.subr.bf16.mxu1 %v3838_v15 }
 0x832   :  { %1833 = vmatprep.mubr.bf16.mxu0 %v4506_v2  ;;  %1874 = vmatprep.mubr.bf16.mxu1 %v4506_v2 }
 0x834   :  { %1804 = vmatpush1.bf16.msra.mxu0 %v3788_v60  ;;  %1845 = vmatpush1.bf16.msra.mxu1 %v3844_v26 }
 0x835   :  { %1805 = vmatprep.subr.bf16.mxu0 %v3847_v61  ;;  %1846 = vmatprep.subr.bf16.mxu1 %v3850_v63 }
 0x838   :  { %1806 = vmatpush1.bf16.msra.mxu0 %v3853_v36  ;;  %1847 = vmatpush1.bf16.msra.mxu1 %v3856_v4 }
 0x839   :  { %1807 = vmatprep.subr.bf16.mxu0 %v3859_v48  ;;  %1848 = vmatprep.subr.bf16.mxu1 %v3862_v0 }
 0x83c   :  { %1808 = vmatpush1.bf16.msra.mxu0 %v3865_v8  ;;  %1849 = vmatpush1.bf16.msra.mxu1 %v3868_v57 }
 0x83d   :  { %1809 = vmatprep.subr.bf16.mxu0 %v3871_v58  ;;  %1850 = vmatprep.subr.bf16.mxu1 %v3874_v17 }
 0x840   :  { %1810 = vmatpush1.bf16.msra.mxu0 %v3877_v56  ;;  %1851 = vmatpush1.bf16.msra.mxu1 %v3880_v49 }
 0x841   :  { %1811 = vmatprep.subr.bf16.mxu0 %v3883_v44  ;;  %1852 = vmatprep.subr.bf16.mxu1 %v3886_v51 }
 0x844   :  { %1812 = vmatpush1.bf16.msra.mxu0 %v3889_v55  ;;  %1853 = vmatpush1.bf16.msra.mxu1 %v3892_v5 }
 0x845   :  { %1813 = vmatprep.subr.bf16.mxu0 %v3895_v18  ;;  %1854 = vmatprep.subr.bf16.mxu1 %v3947_v59 }
 0x848   :  { %1814 = vmatpush1.bf16.msra.mxu0 %v3899_v19  ;;  %1855 = vmatpush1.bf16.msra.mxu1 %v3951_v40 }
 0x849   :  { %1815 = vmatprep.subr.bf16.mxu0 %v3903_v20  ;;  %1856 = vmatprep.subr.bf16.mxu1 %v3955_v21 }
 0x84c   :  { %1816 = vmatpush1.bf16.msra.mxu0 %v3958_v22  ;;  %1857 = vmatpush1.bf16.msra.mxu1 %v3961_v23 }
 0x84d   :  { %1926 = vmatprep.subr.bf16.mxu0 %v3816_v14  ;;  %1967 = vmatprep.subr.bf16.mxu1 %v3819_v16 }
 0x8ef   :  { %v1710_v6 = vpop.f32.mrf.mxu0  ;;  %v1751_v34 = vpop.f32.mrf.mxu1 }
 0x8f0   :  { %v1758_v37 = vadd.f32 %v1710_v6, %v4526_v35  ;;  %v1760_v46 = vadd.f32 %v1751_v34, %v4529_v50  ;;  %v4533_v50 = vld [vmem:[#allocation32_spill] sm:$0xff] }
 0x8f1   :  { %v1712_v38 = vpop.f32.mrf.mxu0  ;;  %v1753_v39 = vpop.f32.mrf.mxu1 }
 0x8f2   :  { %v2781_v52 = vmul.f32 -1.442695, %v1758_v37  ;;  %v1759_v11 = vadd.f32 %v1712_v38, %v4527_v3  ;;  %v1761_v1 = vadd.f32 %v1753_v39, %v4528_v53 }
 0x8f3   :  { %v1714_v12 = vpop.f32.mrf.mxu0  ;;  %v1755_v13 = vpop.f32.mrf.mxu1 }
 0x8f4   :  { %3014 = vpow2.f32 %v2781_v52  ;;  %v2782_v47 = vmul.f32 -1.442695, %v1759_v11  ;;  %v2783_v42 = vmul.f32 -1.442695, %v1761_v1  ;;  %v4531_v11 = vld [vmem:[#allocation33_spill] sm:$0xff]  ;;  %v4532_v1 = vld [vmem:[#allocation34_spill] sm:$0xff] }
 0x8f5   :  { %v1715_v54 = vpop.f32.mrf.mxu0  ;;  %v1756_v7 = vpop.f32.mrf.mxu1 }
 0x8f6   :  { %3016 = vpow2.f32 %v2782_v47 }
 0x8f7   :  { %3018 = vtanh.f32 %v1760_v46 }
 0x8f8   :  { %3020 = vpow2.f32 %v2783_v42 }
 0x901   :  { %v3015_v25 = vpop.eup %3014 }
 0x902   :  { %v1765_v27 = vadd.f32 1.0, %v3015_v25 }
 0x903   :  { %v3017_v28 = vpop.eup %3016 }
 0x904   :  { %3022 = vrcp.f32 %v1765_v27  ;;  %v1771_v29 = vadd.f32 1.0, %v3017_v28  ;;  %v3019_v30 = vpop.eup %3018 }
 0x905   :  { %v3021_v43 = vpop.eup %3020 }
 0x906   :  { %3024 = vrcp.f32 %v1771_v29  ;;  %v1778_v32 = vadd.f32 1.0, %v3021_v43 }
 0x908   :  { %3026 = vrcp.f32 %v1778_v32 }
 0x911   :  { %v3023_v41 = vpop.eup %3022 }
 0x912   :  { %v1782_v31 = vmul.f32 %v3023_v41, %v3019_v30 }
 0x913   :  { %v3025_v45 = vpop.eup %3024 }
 0x914   :  { %v1781_v33 = vmul.f32 %v3025_v45, %v4061_v24 }
 0x915   :  { %v3027_v34 = vpop.eup %3026 }
 0x916   :  { %v4106_v6 = vadd.f32 %v1782_v31, %v1781_v33 }
 0x918   :  { %3028 = vtanh.f32 %v4106_v6 }
 0x925   :  { %v3029_v35 = vpop.eup %3028 }
 0x926   :  { %v1785_v37 = vmul.f32 %v3029_v35, %v3027_v34 }
 0x928   :  { %v1788_v38 = vpack.c.bf16 %v1785_v37, %v1785_v37 }
 0x92a   :  { %2784 = vst [vmem:[%s4452_s4 + $0x20] sm:$0xf] %v1788_v38  ;;  %1834 = vmatmul.mubr.bf16.vlgmr.msra.gmra.mxu0 %v1788_v38  ;;  %1875 = vmatmul.mubr.bf16.vlgmr.msra.gmra.mxu1 %v1788_v38 }
 0x92b   :  { %1927 = vmatpush1.bf16.msra.mxu0 %v3778_v62  ;;  %1968 = vmatpush1.bf16.msra.mxu1 %v3834_v10 }
 0x92c   :  { %1928 = vmatprep.subr.bf16.mxu0 %v3782_v9  ;;  %1969 = vmatprep.subr.bf16.mxu1 %v3838_v15 }
 0x92d   :  { %1958 = vmatprep.mubr.bf16.mxu0 %v4506_v2  ;;  %1999 = vmatprep.mubr.bf16.mxu1 %v4506_v2 }
 0x92f   :  { %1929 = vmatpush1.bf16.msra.mxu0 %v3788_v60  ;;  %1970 = vmatpush1.bf16.msra.mxu1 %v3844_v26  ;;  %v4530_v60 = vld [vmem:[#allocation31_spill] sm:$0xff] }
 0x930   :  { %1930 = vmatprep.subr.bf16.mxu0 %v3847_v61  ;;  %1971 = vmatprep.subr.bf16.mxu1 %v3850_v63 }
 0x933   :  { %1931 = vmatpush1.bf16.msra.mxu0 %v3853_v36  ;;  %1972 = vmatpush1.bf16.msra.mxu1 %v3856_v4 }
 0x934   :  { %1932 = vmatprep.subr.bf16.mxu0 %v3859_v48  ;;  %1973 = vmatprep.subr.bf16.mxu1 %v3862_v0 }
 0x937   :  { %1933 = vmatpush1.bf16.msra.mxu0 %v3865_v8  ;;  %1974 = vmatpush1.bf16.msra.mxu1 %v3868_v57 }
 0x938   :  { %1934 = vmatprep.subr.bf16.mxu0 %v3871_v58  ;;  %1975 = vmatprep.subr.bf16.mxu1 %v3874_v17 }
 0x93b   :  { %1935 = vmatpush1.bf16.msra.mxu0 %v3877_v56  ;;  %1976 = vmatpush1.bf16.msra.mxu1 %v3880_v49 }
 0x93c   :  { %1936 = vmatprep.subr.bf16.mxu0 %v3883_v44  ;;  %1977 = vmatprep.subr.bf16.mxu1 %v3886_v51 }
 0x93f   :  { %1937 = vmatpush1.bf16.msra.mxu0 %v3889_v55  ;;  %1978 = vmatpush1.bf16.msra.mxu1 %v3892_v5 }
 0x940   :  { %1938 = vmatprep.subr.bf16.mxu0 %v3895_v18  ;;  %1979 = vmatprep.subr.bf16.mxu1 %v3947_v59 }
 0x943   :  { %1939 = vmatpush1.bf16.msra.mxu0 %v3899_v19  ;;  %1980 = vmatpush1.bf16.msra.mxu1 %v3951_v40 }
 0x944   :  { %1940 = vmatprep.subr.bf16.mxu0 %v3903_v20  ;;  %1981 = vmatprep.subr.bf16.mxu1 %v3955_v21 }
 0x947   :  { %1941 = vmatpush1.bf16.msra.mxu0 %v3958_v22  ;;  %1982 = vmatpush1.bf16.msra.mxu1 %v3961_v23 }
 0x948   :  { %2051 = vmatprep.subr.bf16.mxu0 %v3816_v14  ;;  %2092 = vmatprep.subr.bf16.mxu1 %v3819_v16 }
 0x9ea   :  { %v1835_v62 = vpop.f32.mrf.mxu0  ;;  %v1876_v9 = vpop.f32.mrf.mxu1 }
 0x9eb   :  { %v1883_v24 = vadd.f32 %v1835_v62, %v4530_v60  ;;  %v1885_v16 = vadd.f32 %v1876_v9, %v4533_v50  ;;  %v4157_v62 = vld [vmem:[#allocation5 + $0xe0] ss:$16 sps:$4 sm:$0xff]  }
 0x9ec   :  { %v1837_v39 = vpop.f32.mrf.mxu0  ;;  %v1878_v52 = vpop.f32.mrf.mxu1  ;;  %v4167_v9 = vld [vmem:[#allocation5 + $0xc0] ss:$16 sps:$4 sm:$0xff]  }
 0x9ed   :  { %v2785_v3 = vmul.f32 -1.442695, %v1883_v24  ;;  %v1884_v12 = vadd.f32 %v1837_v39, %v4531_v11  ;;  %v1886_v14 = vadd.f32 %v1878_v52, %v4532_v1 }
 0x9ee   :  { %v1839_v13 = vpop.f32.mrf.mxu0  ;;  %v1880_v47 = vpop.f32.mrf.mxu1 }
 0x9ef   :  { %3030 = vpow2.f32 %v2785_v3  ;;  %v2786_v54 = vmul.f32 -1.442695, %v1884_v12  ;;  %v2787_v46 = vmul.f32 -1.442695, %v1886_v14 }
 0x9f0   :  { %v1840_v7 = vpop.f32.mrf.mxu0  ;;  %v1881_v53 = vpop.f32.mrf.mxu1 }
 0x9f1   :  { %3032 = vpow2.f32 %v2786_v54 }
 0x9f2   :  { %3034 = vtanh.f32 %v1885_v16  ;;  %v4213_v16 = vld [vmem:[#allocation5 + $0xe8] ss:$16 sps:$4 sm:$0xff]  }
 0x9f3   :  { %3036 = vpow2.f32 %v2787_v46  ;;  %v4217_v46 = vld [vmem:[#allocation5 + $0xcc] ss:$16 sps:$4 sm:$0xff]  }
 0x9fc   :  { %v3031_v42 = vpop.eup %3030 }
 0x9fd   :  { %v1890_v25 = vadd.f32 1.0, %v3031_v42  ;;  %v4223_v42 = vld [vmem:[#allocation5 + $0xc8] ss:$16 sps:$4 sm:$0xff]  }
 0x9fe   :  { %v3033_v27 = vpop.eup %3032 }
 0x9ff   :  { %3038 = vrcp.f32 %v1890_v25  ;;  %v1896_v28 = vadd.f32 1.0, %v3033_v27  ;;  %v3035_v29 = vpop.eup %3034  ;;  %v4226_v25 = vld [vmem:[#allocation5 + $0xa4] ss:$16 sps:$4 sm:$0xff]   ;;  %v4229_v27 = vld [vmem:[#allocation5 + $0xac] ss:$16 sps:$4 sm:$0xff]  }
 0xa00   :  { %v3037_v30 = vpop.eup %3036 }
 0xa01   :  { %3040 = vrcp.f32 %v1896_v28  ;;  %v1903_v45 = vadd.f32 1.0, %v3037_v30  ;;  %v4232_v28 = vld [vmem:[#allocation5 + $0xa0] ss:$16 sps:$4 sm:$0xff]   ;;  %v4238_v30 = vld [vmem:[#allocation5 + $0x84] ss:$16 sps:$4 sm:$0xff]  }
 0xa03   :  { %3042 = vrcp.f32 %v1903_v45  ;;  %v4250_v45 = vld [vmem:[#allocation5 + $0x64] ss:$16 sps:$4 sm:$0xff]  }
 0xa0c   :  { %v3039_v43 = vpop.eup %3038 }
 0xa0d   :  { %v1907_v41 = vmul.f32 %v3039_v43, %v3035_v29  ;;  %v4235_v29 = vld [vmem:[#allocation5 + $0xa8] ss:$16 sps:$4 sm:$0xff]   ;;  %v4241_v43 = vld [vmem:[#allocation5 + $0x8c] ss:$16 sps:$4 sm:$0xff]  }
 0xa0e   :  { %v3041_v31 = vpop.eup %3040 }
 0xa0f   :  { %v1906_v32 = vmul.f32 %v3041_v31, %v4106_v6  ;;  %v4161_v6 = vld [vmem:[#allocation5 + $0xc4] ss:$16 sps:$4 sm:$0xff]   ;;  %v4247_v31 = vld [vmem:[#allocation5 + $0x88] ss:$16 sps:$4 sm:$0xff]  }
 0xa10   :  { %v3043_v34 = vpop.eup %3042 }
 0xa11   :  { %v4151_v33 = vadd.f32 %v1907_v41, %v1906_v32  ;;  %v4244_v41 = vld [vmem:[#allocation5 + $0x80] ss:$16 sps:$4 sm:$0xff]   ;;  %v4253_v32 = vld [vmem:[#allocation5 + $0x6c] ss:$16 sps:$4 sm:$0xff]  }
 0xa13   :  { %3044 = vtanh.f32 %v4151_v33 }
 0xa20   :  { %v3045_v35 = vpop.eup %3044 }
 0xa21   :  { %v1910_v37 = vmul.f32 %v3045_v35, %v3043_v34  ;;  %v4259_v34 = vld [vmem:[#allocation5 + $0x68] ss:$16 sps:$4 sm:$0xff]   ;;  %v4262_v35 = vld [vmem:[#allocation5 + $0x44] ss:$16 sps:$4 sm:$0xff]  }
 0xa23   :  { %v1913_v38 = vpack.c.bf16 %v1910_v37, %v1910_v37  ;;  %v4265_v37 = vld [vmem:[#allocation5 + $0x4c] ss:$16 sps:$4 sm:$0xff]  }
 0xa25   :  { %2788 = vst [vmem:[%s4452_s4 + $0x24] sm:$0xf] %v1913_v38  ;;  %1959 = vmatmul.mubr.bf16.vlgmr.msra.gmra.mxu0 %v1913_v38  ;;  %2000 = vmatmul.mubr.bf16.vlgmr.msra.gmra.mxu1 %v1913_v38  ;;  %v4268_v38 = vld [vmem:[#allocation5 + $0x40] ss:$16 sps:$4 sm:$0xff]  }
 0xa26   :  { %2052 = vmatpush1.bf16.msra.mxu0 %v4157_v62  ;;  %2093 = vmatpush1.bf16.msra.mxu1 %v3834_v10  ;;  %v4195_v10 = vld [vmem:[#allocation5 + $0xe4] ss:$16 sps:$4 sm:$0xff]  }
 0xa27   :  { %2053 = vmatprep.subr.bf16.mxu0 %v4161_v6  ;;  %2094 = vmatprep.subr.bf16.mxu1 %v3838_v15  ;;  %v4198_v15 = vld [vmem:[#allocation5 + $0xec] ss:$16 sps:$4 sm:$0xff]  }
 0xa28   :  { %2083 = vmatprep.mubr.bf16.mxu0 %v4506_v2  ;;  %2124 = vmatprep.mubr.bf16.mxu1 %v4506_v2 }
 0xa2a   :  { %2054 = vmatpush1.bf16.msra.mxu0 %v4167_v9  ;;  %2095 = vmatpush1.bf16.msra.mxu1 %v3844_v26 }
 0xa2b   :  { %2055 = vmatprep.subr.bf16.mxu0 %v3847_v61  ;;  %2096 = vmatprep.subr.bf16.mxu1 %v3850_v63  ;;  %v4534_v63 = vld [vmem:[#allocation35_spill] sm:$0xff] }
 0xa2e   :  { %2056 = vmatpush1.bf16.msra.mxu0 %v3853_v36  ;;  %2097 = vmatpush1.bf16.msra.mxu1 %v3856_v4 }
 0xa2f   :  { %2057 = vmatprep.subr.bf16.mxu0 %v3859_v48  ;;  %2098 = vmatprep.subr.bf16.mxu1 %v3862_v0 }
 0xa32   :  { %2058 = vmatpush1.bf16.msra.mxu0 %v3865_v8  ;;  %2099 = vmatpush1.bf16.msra.mxu1 %v3868_v57  ;;  %v4535_v8 = vld [vmem:[#allocation37_spill] sm:$0xff] }
 0xa33   :  { %2059 = vmatprep.subr.bf16.mxu0 %v3871_v58  ;;  %2100 = vmatprep.subr.bf16.mxu1 %v3874_v17 }
 0xa36   :  { %2060 = vmatpush1.bf16.msra.mxu0 %v3877_v56  ;;  %2101 = vmatpush1.bf16.msra.mxu1 %v3880_v49 }
 0xa37   :  { %2061 = vmatprep.subr.bf16.mxu0 %v3883_v44  ;;  %2102 = vmatprep.subr.bf16.mxu1 %v3886_v51  ;;  %v4536_v51 = vld [vmem:[#allocation38_spill] sm:$0xff] }
 0xa3a   :  { %2062 = vmatpush1.bf16.msra.mxu0 %v3889_v55  ;;  %2103 = vmatpush1.bf16.msra.mxu1 %v3892_v5  ;;  %v4537_v5 = vld [vmem:[#allocation36_spill] sm:$0xff] }
 0xa3b   :  { %2063 = vmatprep.subr.bf16.mxu0 %v3895_v18  ;;  %2104 = vmatprep.subr.bf16.mxu1 %v3947_v59 }
 0xa3e   :  { %2064 = vmatpush1.bf16.msra.mxu0 %v3899_v19  ;;  %2105 = vmatpush1.bf16.msra.mxu1 %v3951_v40 }
 0xa3f   :  { %2065 = vmatprep.subr.bf16.mxu0 %v3903_v20  ;;  %2106 = vmatprep.subr.bf16.mxu1 %v3955_v21 }
 0xa42   :  { %2066 = vmatpush1.bf16.msra.mxu0 %v3958_v22  ;;  %2107 = vmatpush1.bf16.msra.mxu1 %v3961_v23 }
 0xa43   :  { %2176 = vmatprep.subr.bf16.mxu0 %v4195_v10  ;;  %2217 = vmatprep.subr.bf16.mxu1 %v4198_v15 }
 0xae5   :  { %v1960_v26 = vpop.f32.mrf.mxu0  ;;  %v2001_v61 = vpop.f32.mrf.mxu1 }
 0xae6   :  { %v2008_v36 = vadd.f32 %v1960_v26, %v4534_v63  ;;  %v2010_v18 = vadd.f32 %v2001_v61, %v4537_v5  ;;  %v4271_v26 = vld [vmem:[#allocation5 + $0x48] ss:$16 sps:$4 sm:$0xff]   ;;  %v4274_v61 = vld [vmem:[#allocation5 + $0x24] ss:$16 sps:$4 sm:$0xff]   ;;  %v4278_v63 = vld [vmem:[#allocation5 + $0x20] ss:$16 sps:$4 sm:$0xff]  }
 0xae7   :  { %v1962_v4 = vpop.f32.mrf.mxu0  ;;  %v2003_v48 = vpop.f32.mrf.mxu1 }
 0xae8   :  { %v2789_v0 = vmul.f32 -1.442695, %v2008_v36  ;;  %v2009_v57 = vadd.f32 %v1962_v4, %v4535_v8  ;;  %v2011_v55 = vadd.f32 %v2003_v48, %v4536_v51  ;;  %v4282_v36 = vld [vmem:[#allocation5 + $0x4] ss:$16 sps:$4 sm:$0xff]   ;;  %v4538_v48 = vld [vmem:[#allocation39_spill] sm:$0xff] }
 0xae9   :  { %v1964_v58 = vpop.f32.mrf.mxu0  ;;  %v2005_v17 = vpop.f32.mrf.mxu1 }
 0xaea   :  { %3046 = vpow2.f32 %v2789_v0  ;;  %v2790_v56 = vmul.f32 -1.442695, %v2009_v57  ;;  %v2791_v19 = vmul.f32 -1.442695, %v2011_v55  ;;  %v4539_v58 = vld [vmem:[#allocation41_spill] sm:$0xff]  ;;  %v4541_v55 = vld [vmem:[#allocation40_spill] sm:$0xff] }
 0xaeb   :  { %v1965_v49 = vpop.f32.mrf.mxu0  ;;  %v2006_v44 = vpop.f32.mrf.mxu1 }
 0xaec   :  { %3048 = vpow2.f32 %v2790_v56 }
 0xaed   :  { %3050 = vtanh.f32 %v2010_v18 }
 0xaee   :  { %3052 = vpow2.f32 %v2791_v19 }
 0xaf7   :  { %v3047_v20 = vpop.eup %3046 }
 0xaf8   :  { %v2015_v60 = vadd.f32 1.0, %v3047_v20 }
 0xaf9   :  { %v3049_v24 = vpop.eup %3048 }
 0xafa   :  { %3054 = vrcp.f32 %v2015_v60  ;;  %v2021_v39 = vadd.f32 1.0, %v3049_v24  ;;  %v3051_v52 = vpop.eup %3050 }
 0xafb   :  { %v3053_v3 = vpop.eup %3052 }
 0xafc   :  { %3056 = vrcp.f32 %v2021_v39  ;;  %v2028_v47 = vadd.f32 1.0, %v3053_v3 }
 0xafe   :  { %3058 = vrcp.f32 %v2028_v47 }
 0xb07   :  { %v3055_v11 = vpop.eup %3054 }
 0xb08   :  { %v2032_v12 = vmul.f32 %v3055_v11, %v3051_v52 }
 0xb09   :  { %v3057_v13 = vpop.eup %3056 }
 0xb0a   :  { %v2031_v54 = vmul.f32 %v3057_v13, %v4151_v33  ;;  %v4256_v33 = vld [vmem:[#allocation5 + $0x60] ss:$16 sps:$4 sm:$0xff]  }
 0xb0b   :  { %v3059_v53 = vpop.eup %3058 }
 0xb0c   :  { %v4206_v7 = vadd.f32 %v2032_v12, %v2031_v54 }
 0xb0e   :  { %3060 = vtanh.f32 %v4206_v7 }
 0xb1b   :  { %v3061_v1 = vpop.eup %3060 }
 0xb1c   :  { %v2035_v14 = vmul.f32 %v3061_v1, %v3059_v53 }
 0xb1e   :  { %v2038_v50 = vpack.c.bf16 %v2035_v14, %v2035_v14 }
 0xb20   :  { %2792 = vst [vmem:[%s4452_s4 + $0x28] sm:$0xf] %v2038_v50  ;;  %2084 = vmatmul.mubr.bf16.vlgmr.msra.gmra.mxu0 %v2038_v50  ;;  %2125 = vmatmul.mubr.bf16.vlgmr.msra.gmra.mxu1 %v2038_v50 }
 0xb21   :  { %2177 = vmatpush1.bf16.msra.mxu0 %v4157_v62  ;;  %2218 = vmatpush1.bf16.msra.mxu1 %v4213_v16 }
 0xb22   :  { %2178 = vmatprep.subr.bf16.mxu0 %v4161_v6  ;;  %2219 = vmatprep.subr.bf16.mxu1 %v4217_v46 }
 0xb23   :  { %2208 = vmatprep.mubr.bf16.mxu0 %v4506_v2  ;;  %2249 = vmatprep.mubr.bf16.mxu1 %v4506_v2 }
 0xb25   :  { %2179 = vmatpush1.bf16.msra.mxu0 %v4167_v9  ;;  %2220 = vmatpush1.bf16.msra.mxu1 %v4223_v42 }
 0xb26   :  { %2180 = vmatprep.subr.bf16.mxu0 %v4226_v25  ;;  %2221 = vmatprep.subr.bf16.mxu1 %v4229_v27 }
 0xb29   :  { %2181 = vmatpush1.bf16.msra.mxu0 %v4232_v28  ;;  %2222 = vmatpush1.bf16.msra.mxu1 %v4235_v29 }
 0xb2a   :  { %2182 = vmatprep.subr.bf16.mxu0 %v4238_v30  ;;  %2223 = vmatprep.subr.bf16.mxu1 %v4241_v43 }
 0xb2d   :  { %2183 = vmatpush1.bf16.msra.mxu0 %v4244_v41  ;;  %2224 = vmatpush1.bf16.msra.mxu1 %v4247_v31 }
 0xb2e   :  { %2184 = vmatprep.subr.bf16.mxu0 %v4250_v45  ;;  %2225 = vmatprep.subr.bf16.mxu1 %v4253_v32 }
 0xb31   :  { %2185 = vmatpush1.bf16.msra.mxu0 %v4256_v33  ;;  %2226 = vmatpush1.bf16.msra.mxu1 %v4259_v34 }
 0xb32   :  { %2186 = vmatprep.subr.bf16.mxu0 %v4262_v35  ;;  %2227 = vmatprep.subr.bf16.mxu1 %v4265_v37 }
 0xb35   :  { %2187 = vmatpush1.bf16.msra.mxu0 %v4268_v38  ;;  %2228 = vmatpush1.bf16.msra.mxu1 %v4271_v26 }
 0xb36   :  { %2188 = vmatprep.subr.bf16.mxu0 %v4274_v61  ;;  %2229 = vmatprep.subr.bf16.mxu1 %v3947_v59 }
 0xb39   :  { %2189 = vmatpush1.bf16.msra.mxu0 %v4278_v63  ;;  %2230 = vmatpush1.bf16.msra.mxu1 %v3951_v40 }
 0xb3a   :  { %2190 = vmatprep.subr.bf16.mxu0 %v4282_v36  ;;  %2231 = vmatprep.subr.bf16.mxu1 %v3955_v21 }
 0xb3d   :  { %2191 = vmatpush1.bf16.msra.mxu0 %v3958_v22  ;;  %2232 = vmatpush1.bf16.msra.mxu1 %v3961_v23  ;;  %v4540_v23 = vld [vmem:[#allocation42_spill] sm:$0xff] }
 0xb3e   :  { %2301 = vmatprep.subr.bf16.mxu0 %v4195_v10  ;;  %2342 = vmatprep.subr.bf16.mxu1 %v4198_v15 }
 0xbe0   :  { %v2085_v59 = vpop.f32.mrf.mxu0  ;;  %v2126_v4 = vpop.f32.mrf.mxu1 }
 0xbe1   :  { %v2133_v0 = vadd.f32 %v2085_v59, %v4538_v48  ;;  %v2135_v5 = vadd.f32 %v2126_v4, %v4541_v55  ;;  %v4330_v59 = vld [vmem:[#allocation5 + $0x28] ss:$16 sps:$4 sm:$0xff]   ;;  %v4334_v4 = vld [vmem:[#allocation5 + $0xc] ss:$16 sps:$4 sm:$0xff]   ;;  %v4337_v48 = vld [vmem:[#allocation5] ss:$16 sps:$4 sm:$0xff]  }
 0xbe2   :  { %v2087_v8 = vpop.f32.mrf.mxu0  ;;  %v2128_v40 = vpop.f32.mrf.mxu1 }
 0xbe3   :  { %v2793_v57 = vmul.f32 -1.442695, %v2133_v0  ;;  %v2134_v17 = vadd.f32 %v2087_v8, %v4539_v58  ;;  %v2136_v51 = vadd.f32 %v2128_v40, %v4540_v23  ;;  %v4340_v0 = vld [vmem:[#allocation5 + $0x8] ss:$16 sps:$4 sm:$0xff]  }
 0xbe4   :  { %v2089_v56 = vpop.f32.mrf.mxu0  ;;  %v2130_v49 = vpop.f32.mrf.mxu1 }
 0xbe5   :  { %3062 = vpow2.f32 %v2793_v57  ;;  %v2794_v21 = vmul.f32 -1.442695, %v2134_v17  ;;  %v2795_v18 = vmul.f32 -1.442695, %v2136_v51  ;;  %v4542_v57 = vld [vmem:[#allocation43_spill] sm:$0xff] }
 0xbe6   :  { %v2090_v22 = vpop.f32.mrf.mxu0  ;;  %v2131_v44 = vpop.f32.mrf.mxu1 }
 0xbe7   :  { %3064 = vpow2.f32 %v2794_v21  ;;  %v4543_v21 = vld [vmem:[#allocation45_spill] sm:$0xff] }
 0xbe8   :  { %3066 = vtanh.f32 %v2135_v5 }
 0xbe9   :  { %3068 = vpow2.f32 %v2795_v18  ;;  %v4544_v18 = vld [vmem:[#allocation46_spill] sm:$0xff] }
 0xbf2   :  { %v3063_v19 = vpop.eup %3062 }
 0xbf3   :  { %v2140_v20 = vadd.f32 1.0, %v3063_v19 }
 0xbf4   :  { %v3065_v60 = vpop.eup %3064 }
 0xbf5   :  { %3070 = vrcp.f32 %v2140_v20  ;;  %v2146_v24 = vadd.f32 1.0, %v3065_v60  ;;  %v3067_v39 = vpop.eup %3066  ;;  %v4545_v20 = vld [vmem:[#allocation44_spill] sm:$0xff] }
 0xbf6   :  { %v3069_v52 = vpop.eup %3068 }
 0xbf7   :  { %3072 = vrcp.f32 %v2146_v24  ;;  %v2153_v13 = vadd.f32 1.0, %v3069_v52 }
 0xbf9   :  { %3074 = vrcp.f32 %v2153_v13 }
 0xc02   :  { %v3071_v3 = vpop.eup %3070 }
 0xc03   :  { %v2157_v11 = vmul.f32 %v3071_v3, %v3067_v39 }
 0xc04   :  { %v3073_v12 = vpop.eup %3072 }
 0xc05   :  { %v2156_v47 = vmul.f32 %v3073_v12, %v4206_v7  ;;  %v4326_v7 = vld [vmem:[#allocation5 + $0x2c] ss:$16 sps:$4 sm:$0xff]  }
 0xc06   :  { %v3075_v53 = vpop.eup %3074 }
 0xc07   :  { %v4295_v54 = vadd.f32 %v2157_v11, %v2156_v47 }
 0xc09   :  { %3076 = vtanh.f32 %v4295_v54 }
 0xc16   :  { %v3077_v1 = vpop.eup %3076 }
 0xc17   :  { %v2160_v14 = vmul.f32 %v3077_v1, %v3075_v53 }
 0xc19   :  { %v2163_v50 = vpack.c.bf16 %v2160_v14, %v2160_v14 }
 0xc1b   :  { %2796 = vst [vmem:[%s4452_s4 + $0x2c] sm:$0xf] %v2163_v50  ;;  %2209 = vmatmul.mubr.bf16.vlgmr.msra.gmra.mxu0 %v2163_v50  ;;  %2250 = vmatmul.mubr.bf16.vlgmr.msra.gmra.mxu1 %v2163_v50 }
 0xc1c   :  { %2302 = vmatpush1.bf16.msra.mxu0 %v4157_v62  ;;  %2343 = vmatpush1.bf16.msra.mxu1 %v4213_v16 }
 0xc1d   :  { %2303 = vmatprep.subr.bf16.mxu0 %v4161_v6  ;;  %2344 = vmatprep.subr.bf16.mxu1 %v4217_v46 }
 0xc1e   :  { %2333 = vmatprep.mubr.bf16.mxu0 %v4506_v2  ;;  %2374 = vmatprep.mubr.bf16.mxu1 %v4506_v2 }
 0xc20   :  { %2304 = vmatpush1.bf16.msra.mxu0 %v4167_v9  ;;  %2345 = vmatpush1.bf16.msra.mxu1 %v4223_v42 }
 0xc21   :  { %2305 = vmatprep.subr.bf16.mxu0 %v4226_v25  ;;  %2346 = vmatprep.subr.bf16.mxu1 %v4229_v27 }
 0xc24   :  { %2306 = vmatpush1.bf16.msra.mxu0 %v4232_v28  ;;  %2347 = vmatpush1.bf16.msra.mxu1 %v4235_v29 }
 0xc25   :  { %2307 = vmatprep.subr.bf16.mxu0 %v4238_v30  ;;  %2348 = vmatprep.subr.bf16.mxu1 %v4241_v43 }
 0xc28   :  { %2308 = vmatpush1.bf16.msra.mxu0 %v4244_v41  ;;  %2349 = vmatpush1.bf16.msra.mxu1 %v4247_v31 }
 0xc29   :  { %2309 = vmatprep.subr.bf16.mxu0 %v4250_v45  ;;  %2350 = vmatprep.subr.bf16.mxu1 %v4253_v32 }
 0xc2c   :  { %2310 = vmatpush1.bf16.msra.mxu0 %v4256_v33  ;;  %2351 = vmatpush1.bf16.msra.mxu1 %v4259_v34 }
 0xc2d   :  { %2311 = vmatprep.subr.bf16.mxu0 %v4262_v35  ;;  %2352 = vmatprep.subr.bf16.mxu1 %v4265_v37 }
 0xc30   :  { %2312 = vmatpush1.bf16.msra.mxu0 %v4268_v38  ;;  %2353 = vmatpush1.bf16.msra.mxu1 %v4271_v26 }
 0xc31   :  { %2313 = vmatprep.subr.bf16.mxu0 %v4274_v61  ;;  %2354 = vmatprep.subr.bf16.mxu1 %v4326_v7 }
 0xc34   :  { %2314 = vmatpush1.bf16.msra.mxu0 %v4278_v63  ;;  %2355 = vmatpush1.bf16.msra.mxu1 %v4330_v59 }
 0xc35   :  { %2315 = vmatprep.subr.bf16.mxu0 %v4282_v36  ;;  %2356 = vmatprep.subr.bf16.mxu1 %v4334_v4 }
 0xc38   :  { %2316 = vmatpush1.bf16.msra.mxu0 %v4337_v48  ;;  %2357 = vmatpush1.bf16.msra.mxu1 %v4340_v0 }
 0xc39   :  { %2426 = vmatprep.subr.bf16.mxu0 %v4195_v10  ;;  %2467 = vmatprep.subr.bf16.mxu1 %v4198_v15 }
 0xcdb   :  { %v2210_v8 = vpop.f32.mrf.mxu0  ;;  %v2251_v40 = vpop.f32.mrf.mxu1 }
 0xcdc   :  { %v2258_v58 = vadd.f32 %v2210_v8, %v4542_v57  ;;  %v2260_v60 = vadd.f32 %v2251_v40, %v4545_v20 }
 0xcdd   :  { %v2212_v17 = vpop.f32.mrf.mxu0  ;;  %v2253_v56 = vpop.f32.mrf.mxu1 }
 0xcde   :  { %v2797_v49 = vmul.f32 -1.442695, %v2258_v58  ;;  %v2259_v22 = vadd.f32 %v2212_v17, %v4543_v21  ;;  %v2261_v19 = vadd.f32 %v2253_v56, %v4544_v18 }
 0xcdf   :  { %v2214_v44 = vpop.f32.mrf.mxu0  ;;  %v2255_v23 = vpop.f32.mrf.mxu1 }
 0xce0   :  { %3078 = vpow2.f32 %v2797_v49  ;;  %v2798_v51 = vmul.f32 -1.442695, %v2259_v22  ;;  %v2799_v24 = vmul.f32 -1.442695, %v2261_v19  ;;  %v4546_v49 = vld [vmem:[#allocation47_spill] sm:$0xff] }
 0xce1   :  { %v2215_v55 = vpop.f32.mrf.mxu0  ;;  %v2256_v5 = vpop.f32.mrf.mxu1 }
 0xce2   :  { %3080 = vpow2.f32 %v2798_v51  ;;  %v4547_v51 = vld [vmem:[#allocation49_spill] sm:$0xff] }
 0xce3   :  { %3082 = vtanh.f32 %v2260_v60 }
 0xce4   :  { %3084 = vpow2.f32 %v2799_v24  ;;  %v4548_v24 = vld [vmem:[#allocation50_spill] sm:$0xff] }
 0xced   :  { %v3079_v39 = vpop.eup %3078 }
 0xcee   :  { %v2265_v52 = vadd.f32 1.0, %v3079_v39  ;;  %v4549_v39 = vld [vmem:[#allocation48_spill] sm:$0xff] }
 0xcef   :  { %v3081_v3 = vpop.eup %3080 }
 0xcf0   :  { %3086 = vrcp.f32 %v2265_v52  ;;  %v2271_v11 = vadd.f32 1.0, %v3081_v3  ;;  %v3083_v12 = vpop.eup %3082 }
 0xcf1   :  { %v3085_v13 = vpop.eup %3084 }
 0xcf2   :  { %3088 = vrcp.f32 %v2271_v11  ;;  %v2278_v14 = vadd.f32 1.0, %v3085_v13 }
 0xcf4   :  { %3090 = vrcp.f32 %v2278_v14 }
 0xcfd   :  { %v3087_v47 = vpop.eup %3086 }
 0xcfe   :  { %v2282_v53 = vmul.f32 %v3087_v47, %v3083_v12 }
 0xcff   :  { %v3089_v1 = vpop.eup %3088 }
 0xd00   :  { %v2281_v50 = vmul.f32 %v3089_v1, %v4295_v54 }
 0xd01   :  { %v3091_v40 = vpop.eup %3090 }
 0xd02   :  { %v4350_v8 = vadd.f32 %v2282_v53, %v2281_v50 }
 0xd04   :  { %3092 = vtanh.f32 %v4350_v8 }
 0xd11   :  { %v3093_v57 = vpop.eup %3092 }
 0xd12   :  { %v2285_v58 = vmul.f32 %v3093_v57, %v3091_v40 }
 0xd14   :  { %v2288_v17 = vpack.c.bf16 %v2285_v58, %v2285_v58 }
 0xd16   :  { %2800 = vst [vmem:[%s4452_s4 + $0x30] sm:$0xf] %v2288_v17  ;;  %2334 = vmatmul.mubr.bf16.vlgmr.msra.gmra.mxu0 %v2288_v17  ;;  %2375 = vmatmul.mubr.bf16.vlgmr.msra.gmra.mxu1 %v2288_v17 }
 0xd17   :  { %2427 = vmatpush1.bf16.msra.mxu0 %v4157_v62  ;;  %2468 = vmatpush1.bf16.msra.mxu1 %v4213_v16 }
 0xd18   :  { %2428 = vmatprep.subr.bf16.mxu0 %v4161_v6  ;;  %2469 = vmatprep.subr.bf16.mxu1 %v4217_v46 }
 0xd19   :  { %2458 = vmatprep.mubr.bf16.mxu0 %v4506_v2  ;;  %2499 = vmatprep.mubr.bf16.mxu1 %v4506_v2 }
 0xd1b   :  { %2429 = vmatpush1.bf16.msra.mxu0 %v4167_v9  ;;  %2470 = vmatpush1.bf16.msra.mxu1 %v4223_v42 }
 0xd1c   :  { %2430 = vmatprep.subr.bf16.mxu0 %v4226_v25  ;;  %2471 = vmatprep.subr.bf16.mxu1 %v4229_v27 }
 0xd1f   :  { %2431 = vmatpush1.bf16.msra.mxu0 %v4232_v28  ;;  %2472 = vmatpush1.bf16.msra.mxu1 %v4235_v29 }
 0xd20   :  { %2432 = vmatprep.subr.bf16.mxu0 %v4238_v30  ;;  %2473 = vmatprep.subr.bf16.mxu1 %v4241_v43 }
 0xd23   :  { %2433 = vmatpush1.bf16.msra.mxu0 %v4244_v41  ;;  %2474 = vmatpush1.bf16.msra.mxu1 %v4247_v31 }
 0xd24   :  { %2434 = vmatprep.subr.bf16.mxu0 %v4250_v45  ;;  %2475 = vmatprep.subr.bf16.mxu1 %v4253_v32 }
 0xd27   :  { %2435 = vmatpush1.bf16.msra.mxu0 %v4256_v33  ;;  %2476 = vmatpush1.bf16.msra.mxu1 %v4259_v34 }
 0xd28   :  { %2436 = vmatprep.subr.bf16.mxu0 %v4262_v35  ;;  %2477 = vmatprep.subr.bf16.mxu1 %v4265_v37 }
 0xd2b   :  { %2437 = vmatpush1.bf16.msra.mxu0 %v4268_v38  ;;  %2478 = vmatpush1.bf16.msra.mxu1 %v4271_v26 }
 0xd2c   :  { %2438 = vmatprep.subr.bf16.mxu0 %v4274_v61  ;;  %2479 = vmatprep.subr.bf16.mxu1 %v4326_v7 }
 0xd2f   :  { %2439 = vmatpush1.bf16.msra.mxu0 %v4278_v63  ;;  %2480 = vmatpush1.bf16.msra.mxu1 %v4330_v59 }
 0xd30   :  { %2440 = vmatprep.subr.bf16.mxu0 %v4282_v36  ;;  %2481 = vmatprep.subr.bf16.mxu1 %v4334_v4 }
 0xd33   :  { %2441 = vmatpush1.bf16.msra.mxu0 %v4337_v48  ;;  %2482 = vmatpush1.bf16.msra.mxu1 %v4340_v0 }
 0xd34   :  { %2551 = vmatprep.subr.bf16.mxu0 %v4195_v10  ;;  %2592 = vmatprep.subr.bf16.mxu1 %v4198_v15 }
 0xdd6   :  { %v2335_v54 = vpop.f32.mrf.mxu0  ;;  %v2376_v56 = vpop.f32.mrf.mxu1 }
 0xdd7   :  { %v2383_v21 = vadd.f32 %v2335_v54, %v4546_v49  ;;  %v2385_v15 = vadd.f32 %v2376_v56, %v4549_v39 }
 0xdd8   :  { %v2337_v22 = vpop.f32.mrf.mxu0  ;;  %v2378_v44 = vpop.f32.mrf.mxu1 }
 0xdd9   :  { %v2801_v23 = vmul.f32 -1.442695, %v2383_v21  ;;  %v2384_v55 = vadd.f32 %v2337_v22, %v4547_v51  ;;  %v2386_v10 = vadd.f32 %v2378_v44, %v4548_v24 }
 0xdda   :  { %v2339_v5 = vpop.f32.mrf.mxu0  ;;  %v2380_v18 = vpop.f32.mrf.mxu1 }
 0xddb   :  { %3094 = vpow2.f32 %v2801_v23  ;;  %v2802_v19 = vmul.f32 -1.442695, %v2384_v55  ;;  %v2803_v52 = vmul.f32 -1.442695, %v2386_v10  ;;  %v4554_v55 = vld [vmem:[#allocation55_spill] sm:$0xff] }
 0xddc   :  { %v2340_v20 = vpop.f32.mrf.mxu0  ;;  %v2381_v60 = vpop.f32.mrf.mxu1 }
 0xddd   :  { %3096 = vpow2.f32 %v2802_v19  ;;  %v4555_v60 = vld [vmem:[#allocation57_spill] sm:$0xff] }
 0xdde   :  { %3098 = vtanh.f32 %v2385_v15 }
 0xddf   :  { %3100 = vpow2.f32 %v2803_v52 }
 0xde8   :  { %v3095_v3 = vpop.eup %3094 }
 0xde9   :  { %v2390_v11 = vadd.f32 1.0, %v3095_v3 }
 0xdea   :  { %v3097_v12 = vpop.eup %3096 }
 0xdeb   :  { %3102 = vrcp.f32 %v2390_v11  ;;  %v2396_v13 = vadd.f32 1.0, %v3097_v12  ;;  %v3099_v47 = vpop.eup %3098  ;;  %v4556_v11 = vld [vmem:[#allocation58_spill] sm:$0xff] }
 0xdec   :  { %v3101_v53 = vpop.eup %3100 }
 0xded   :  { %3104 = vrcp.f32 %v2396_v13  ;;  %v2403_v40 = vadd.f32 1.0, %v3101_v53  ;;  %v4557_v13 = vld [vmem:[#allocation56_spill] sm:$0xff] }
 0xdef   :  { %3106 = vrcp.f32 %v2403_v40 }
 0xdf8   :  { %v3103_v1 = vpop.eup %3102 }
 0xdf9   :  { %v2407_v14 = vmul.f32 %v3103_v1, %v3099_v47 }
 0xdfa   :  { %v3105_v50 = vpop.eup %3104 }
 0xdfb   :  { %v2406_v57 = vmul.f32 %v3105_v50, %v4350_v8 }
 0xdfc   :  { %v3107_v17 = vpop.eup %3106 }
 0xdfd   :  { %v4395_v58 = vadd.f32 %v2407_v14, %v2406_v57 }
 0xdff   :  { %3108 = vtanh.f32 %v4395_v58 }
 0xe0c   :  { %v3109_v54 = vpop.eup %3108 }
 0xe0d   :  { %v2410_v56 = vmul.f32 %v3109_v54, %v3107_v17 }
 0xe0f   :  { %v2413_v49 = vpack.c.bf16 %v2410_v56, %v2410_v56 }
 0xe11   :  { %2804 = vst [vmem:[%s4452_s4 + $0x34] sm:$0xf] %v2413_v49  ;;  %2459 = vmatmul.mubr.bf16.vlgmr.msra.gmra.mxu0 %v2413_v49  ;;  %2500 = vmatmul.mubr.bf16.vlgmr.msra.gmra.mxu1 %v2413_v49 }
 0xe12   :  { %2552 = vmatpush1.bf16.msra.mxu0 %v4157_v62  ;;  %2593 = vmatpush1.bf16.msra.mxu1 %v4213_v16 }
 0xe13   :  { %2553 = vmatprep.subr.bf16.mxu0 %v4161_v6  ;;  %2594 = vmatprep.subr.bf16.mxu1 %v4217_v46  ;;  %v4550_v6 = vld [vmem:[#allocation51_spill] sm:$0xff] }
 0xe14   :  { %2583 = vmatprep.mubr.bf16.mxu0 %v4506_v2  ;;  %2624 = vmatprep.mubr.bf16.mxu1 %v4506_v2 }
 0xe16   :  { %2554 = vmatpush1.bf16.msra.mxu0 %v4167_v9  ;;  %2595 = vmatpush1.bf16.msra.mxu1 %v4223_v42 }
 0xe17   :  { %2555 = vmatprep.subr.bf16.mxu0 %v4226_v25  ;;  %2596 = vmatprep.subr.bf16.mxu1 %v4229_v27  ;;  %v4551_v25 = vld [vmem:[#allocation53_spill] sm:$0xff] }
 0xe1a   :  { %2556 = vmatpush1.bf16.msra.mxu0 %v4232_v28  ;;  %2597 = vmatpush1.bf16.msra.mxu1 %v4235_v29 }
 0xe1b   :  { %2557 = vmatprep.subr.bf16.mxu0 %v4238_v30  ;;  %2598 = vmatprep.subr.bf16.mxu1 %v4241_v43 }
 0xe1e   :  { %2558 = vmatpush1.bf16.msra.mxu0 %v4244_v41  ;;  %2599 = vmatpush1.bf16.msra.mxu1 %v4247_v31  ;;  %v4552_v31 = vld [vmem:[#allocation54_spill] sm:$0xff] }
 0xe1f   :  { %2559 = vmatprep.subr.bf16.mxu0 %v4250_v45  ;;  %2600 = vmatprep.subr.bf16.mxu1 %v4253_v32  ;;  %v4553_v32 = vld [vmem:[#allocation52_spill] sm:$0xff] }
 0xe22   :  { %2560 = vmatpush1.bf16.msra.mxu0 %v4256_v33  ;;  %2601 = vmatpush1.bf16.msra.mxu1 %v4259_v34 }
 0xe23   :  { %2561 = vmatprep.subr.bf16.mxu0 %v4262_v35  ;;  %2602 = vmatprep.subr.bf16.mxu1 %v4265_v37 }
 0xe26   :  { %2562 = vmatpush1.bf16.msra.mxu0 %v4268_v38  ;;  %2603 = vmatpush1.bf16.msra.mxu1 %v4271_v26 }
 0xe27   :  { %2563 = vmatprep.subr.bf16.mxu0 %v4274_v61  ;;  %2604 = vmatprep.subr.bf16.mxu1 %v4326_v7 }
 0xe2a   :  { %2564 = vmatpush1.bf16.msra.mxu0 %v4278_v63  ;;  %2605 = vmatpush1.bf16.msra.mxu1 %v4330_v59 }
 0xe2b   :  { %2565 = vmatprep.subr.bf16.mxu0 %v4282_v36  ;;  %2606 = vmatprep.subr.bf16.mxu1 %v4334_v4 }
 0xe2e   :  { %2566 = vmatpush1.bf16.msra.mxu0 %v4337_v48  ;;  %2607 = vmatpush1.bf16.msra.mxu1 %v4340_v0 }
 0xed1   :  { %v2460_v2 = vpop.f32.mrf.mxu0  ;;  %v2501_v62 = vpop.f32.mrf.mxu1 }
 0xed2   :  { %v2508_v9 = vadd.f32 %v2460_v2, %v4550_v6  ;;  %v2510_v33 = vadd.f32 %v2501_v62, %v4553_v32 }
 0xed3   :  { %v2462_v16 = vpop.f32.mrf.mxu0  ;;  %v2503_v46 = vpop.f32.mrf.mxu1 }
 0xed4   :  { %v2805_v42 = vmul.f32 -1.442695, %v2508_v9  ;;  %v2509_v27 = vadd.f32 %v2462_v16, %v4551_v25  ;;  %v2511_v45 = vadd.f32 %v2503_v46, %v4552_v31 }
 0xed5   :  { %v2464_v28 = vpop.f32.mrf.mxu0  ;;  %v2505_v29 = vpop.f32.mrf.mxu1 }
 0xed6   :  { %3110 = vpow2.f32 %v2805_v42  ;;  %v2806_v30 = vmul.f32 -1.442695, %v2509_v27  ;;  %v2807_v34 = vmul.f32 -1.442695, %v2511_v45 }
 0xed7   :  { %v2465_v43 = vpop.f32.mrf.mxu0  ;;  %v2506_v41 = vpop.f32.mrf.mxu1 }
 0xed8   :  { %3112 = vpow2.f32 %v2806_v30 }
 0xed9   :  { %3114 = vtanh.f32 %v2510_v33 }
 0xeda   :  { %3116 = vpow2.f32 %v2807_v34 }
 0xee3   :  { %v3111_v35 = vpop.eup %3110 }
 0xee4   :  { %v2515_v37 = vadd.f32 1.0, %v3111_v35 }
 0xee5   :  { %v3113_v38 = vpop.eup %3112 }
 0xee6   :  { %3118 = vrcp.f32 %v2515_v37  ;;  %v2521_v26 = vadd.f32 1.0, %v3113_v38  ;;  %v3115_v61 = vpop.eup %3114 }
 0xee7   :  { %v3117_v63 = vpop.eup %3116 }
 0xee8   :  { %3120 = vrcp.f32 %v2521_v26  ;;  %v2528_v4 = vadd.f32 1.0, %v3117_v63 }
 0xeea   :  { %3122 = vrcp.f32 %v2528_v4 }
 0xef3   :  { %v3119_v36 = vpop.eup %3118 }
 0xef4   :  { %v2532_v7 = vmul.f32 %v3119_v36, %v3115_v61 }
 0xef5   :  { %v3121_v59 = vpop.eup %3120 }
 0xef6   :  { %v2531_v48 = vmul.f32 %v3121_v59, %v4395_v58 }
 0xef7   :  { %v3123_v8 = vpop.eup %3122 }
 0xef8   :  { %v2533_v0 = vadd.f32 %v2532_v7, %v2531_v48 }
 0xefa   :  { %3124 = vtanh.f32 %v2533_v0 }
 0xf07   :  { %v3125_v21 = vpop.eup %3124 }
 0xf08   :  { %v2535_v22 = vmul.f32 %v3125_v21, %v3123_v8 }
 0xf0a   :  { %v2538_v44 = vpack.c.bf16 %v2535_v22, %v2535_v22 }
 0xf0c   :  { %2808 = vst [vmem:[%s4452_s4 + $0x38] sm:$0xf] %v2538_v44  ;;  %2584 = vmatmul.mubr.bf16.vlgmr.msra.gmra.mxu0 %v2538_v44  ;;  %2625 = vmatmul.mubr.bf16.vlgmr.msra.gmra.mxu1 %v2538_v44 }
 0xfcc   :  { %v2585_v23 = vpop.f32.mrf.mxu0  ;;  %v2626_v51 = vpop.f32.mrf.mxu1 }
 0xfcd   :  { %v2633_v5 = vadd.f32 %v2585_v23, %v4554_v55  ;;  %v2635_v47 = vadd.f32 %v2626_v51, %v4557_v13 }
 0xfce   :  { %v2587_v18 = vpop.f32.mrf.mxu0  ;;  %v2628_v19 = vpop.f32.mrf.mxu1 }
 0xfcf   :  { %v2809_v20 = vmul.f32 -1.442695, %v2633_v5  ;;  %v2634_v24 = vadd.f32 %v2587_v18, %v4555_v60  ;;  %v2636_v12 = vadd.f32 %v2628_v19, %v4556_v11 }
 0xfd0   :  { %v2589_v10 = vpop.f32.mrf.mxu0  ;;  %v2630_v39 = vpop.f32.mrf.mxu1 }
 0xfd1   :  { %3126 = vpow2.f32 %v2809_v20  ;;  %v2810_v15 = vmul.f32 -1.442695, %v2634_v24  ;;  %v2811_v53 = vmul.f32 -1.442695, %v2636_v12 }
 0xfd2   :  { %v2590_v52 = vpop.f32.mrf.mxu0  ;;  %v2631_v3 = vpop.f32.mrf.mxu1 }
 0xfd3   :  { %3128 = vpow2.f32 %v2810_v15 }
 0xfd4   :  { %3130 = vtanh.f32 %v2635_v47 }
 0xfd5   :  { %3132 = vpow2.f32 %v2811_v53 }
 0xfde   :  { %v3127_v1 = vpop.eup %3126 }
 0xfdf   :  { %v2640_v14 = vadd.f32 1.0, %v3127_v1 }
 0xfe0   :  { %v3129_v50 = vpop.eup %3128 }
 0xfe1   :  { %3134 = vrcp.f32 %v2640_v14  ;;  %v2646_v40 = vadd.f32 1.0, %v3129_v50  ;;  %v3131_v57 = vpop.eup %3130 }
 0xfe2   :  { %v3133_v58 = vpop.eup %3132 }
 0xfe3   :  { %3136 = vrcp.f32 %v2646_v40  ;;  %v2653_v49 = vadd.f32 1.0, %v3133_v58 }
 0xfe5   :  { %3138 = vrcp.f32 %v2653_v49 }
 0xfee   :  { %v3135_v17 = vpop.eup %3134 }
 0xfef   :  { %v2657_v54 = vmul.f32 %v3135_v17, %v3131_v57 }
 0xff0   :  { %v3137_v56 = vpop.eup %3136 }
 0xff1   :  { %v2656_v2 = vmul.f32 %v3137_v56, %v2533_v0 }
 0xff2   :  { %v3139_v6 = vpop.eup %3138 }
 0xff3   :  { %v2658_v62 = vadd.f32 %v2657_v54, %v2656_v2 }
 0xff5   :  { %3140 = vtanh.f32 %v2658_v62 }
0x1002   :  { %v3141_v9 = vpop.eup %3140 }
0x1003   :  { %v2660_v16 = vmul.f32 %v3141_v9, %v3139_v6 }
0x1005   :  { %v2663_v46 = vpack.c.bf16 %v2660_v16, %v2660_v16 }
0x1007   :  { %2812 = vst [vmem:[%s4452_s4 + $0x3c] sm:$0xf] %v2663_v46 }
0x1008   :  { %2670 = vsyncpa [#allocation6], 1 }

// kernel: lstm_model_forward.3
= control target key start
LH: loop header
LB: loop body
LE: loop exit
PB: predicated region body
PF: predicated region fallthrough
CT: control target
= control target key end

     0   :  { %v5286_v2 = vmov 0   ;;  %s5277_s0 = inlined_call_operand.vmem [shape: bf16[128,128], index: 0, kind: input, shape index: {}]   ;;  %s5278_s1 = inlined_call_operand.vmem [shape: bf16[128,512], index: 1, kind: input, shape index: {}]   ;;  %s5279_s2 = inlined_call_operand.vmem [shape: bf16[128,512], index: 2, kind: input, shape index: {}]   ;;  %s5280_s3 = inlined_call_operand.vmem [shape: f32[1,512], index: 3, kind: input, shape index: {}]   ;;  %s5281_s4 = inlined_call_operand.vmem [shape: bf16[128,128], index: 4, kind: input, shape index: {}]   ;;  %s5282_s5 = inlined_call_operand.vmem [shape: f32[1,128], index: 5, kind: input, shape index: {}]   ;;  %s5283_s6 = inlined_call_operand.vmem [shape: bf16[128,10], index: 6, kind: input, shape index: {}]   ;;  %s5284_s7 = inlined_call_operand.vmem [shape: f32[1,10], index: 7, kind: input, shape index: {}]   ;;  %s5285_s8 = inlined_call_operand.hbm [shape: f32[8,10], index: 8, kind: output, shape index: {}]  }
   0x1   :  { %v3203_v0 = vld [vmem:[%s5278_s1 + $0xe4] ss:$16 sps:$4 sm:$0xff]   ;;  %v3205_v1 = vld [vmem:[%s5278_s1 + $0xec] ss:$16 sps:$4 sm:$0xff]   ;;  %341 = vmatprep.mubr.bf16.mxu0 %v5286_v2  ;;  %454 = vmatprep.mubr.bf16.mxu1 %v5286_v2  ;;  %v3207_v3 = vld [vmem:[%s5278_s1 + $0xe0] ss:$16 sps:$4 sm:$0xff]  }
   0x2   :  { %309 = vmatprep.subr.bf16.mxu0 %v3203_v0  ;;  %v3208_v4 = vld [vmem:[%s5278_s1 + $0xe8] ss:$16 sps:$4 sm:$0xff]   ;;  %422 = vmatprep.subr.bf16.mxu1 %v3205_v1  ;;  %v3209_v5 = vld [vmem:[%s5278_s1 + $0xc4] ss:$16 sps:$4 sm:$0xff]   ;;  %v3211_v6 = vld [vmem:[%s5278_s1 + $0xcc] ss:$16 sps:$4 sm:$0xff]  }
   0x3   :  { %310 = vmatpush1.bf16.msra.mxu0 %v3207_v3  ;;  %423 = vmatpush1.bf16.msra.mxu1 %v3208_v4  ;;  %v3213_v7 = vld [vmem:[%s5278_s1 + $0xc0] ss:$16 sps:$4 sm:$0xff]   ;;  %v3214_v8 = vld [vmem:[%s5278_s1 + $0xc8] ss:$16 sps:$4 sm:$0xff]   ;;  %v3215_v9 = vld [vmem:[%s5278_s1 + $0xa4] ss:$16 sps:$4 sm:$0xff]  }
   0x4   :  { %311 = vmatprep.subr.bf16.mxu0 %v3209_v5  ;;  %424 = vmatprep.subr.bf16.mxu1 %v3211_v6  ;;  %v3217_v10 = vld [vmem:[%s5278_s1 + $0xac] ss:$16 sps:$4 sm:$0xff]   ;;  %v3219_v11 = vld [vmem:[%s5278_s1 + $0xa0] ss:$16 sps:$4 sm:$0xff]   ;;  %v3220_v12 = vld [vmem:[%s5278_s1 + $0xa8] ss:$16 sps:$4 sm:$0xff]  }
   0x5   :  { %v3221_v13 = vld [vmem:[%s5278_s1 + $0x84] ss:$16 sps:$4 sm:$0xff]   ;;  %v3223_v14 = vld [vmem:[%s5278_s1 + $0x8c] ss:$16 sps:$4 sm:$0xff]   ;;  %v3225_v15 = vld [vmem:[%s5278_s1 + $0x80] ss:$16 sps:$4 sm:$0xff]  }
   0x6   :  { %v3226_v16 = vld [vmem:[%s5278_s1 + $0x88] ss:$16 sps:$4 sm:$0xff]   ;;  %v3227_v17 = vld [vmem:[%s5278_s1 + $0x64] ss:$16 sps:$4 sm:$0xff]   ;;  %v3229_v18 = vld [vmem:[%s5278_s1 + $0x6c] ss:$16 sps:$4 sm:$0xff]  }
   0x7   :  { %312 = vmatpush1.bf16.msra.mxu0 %v3213_v7  ;;  %425 = vmatpush1.bf16.msra.mxu1 %v3214_v8  ;;  %v3231_v19 = vld [vmem:[%s5278_s1 + $0x60] ss:$16 sps:$4 sm:$0xff]   ;;  %v3232_v20 = vld [vmem:[%s5278_s1 + $0x68] ss:$16 sps:$4 sm:$0xff]   ;;  %v3233_v21 = vld [vmem:[%s5278_s1 + $0x44] ss:$16 sps:$4 sm:$0xff]  }
   0x8   :  { %313 = vmatprep.subr.bf16.mxu0 %v3215_v9  ;;  %426 = vmatprep.subr.bf16.mxu1 %v3217_v10  ;;  %v3235_v22 = vld [vmem:[%s5278_s1 + $0x4c] ss:$16 sps:$4 sm:$0xff]   ;;  %v3237_v23 = vld [vmem:[%s5278_s1 + $0x40] ss:$16 sps:$4 sm:$0xff]   ;;  %v3238_v24 = vld [vmem:[%s5278_s1 + $0x48] ss:$16 sps:$4 sm:$0xff]  }
   0x9   :  { %v3239_v25 = vld [vmem:[%s5278_s1 + $0x24] ss:$16 sps:$4 sm:$0xff]   ;;  %v3241_v26 = vld [vmem:[%s5278_s1 + $0x2c] ss:$16 sps:$4 sm:$0xff]   ;;  %v3243_v27 = vld [vmem:[%s5278_s1 + $0x20] ss:$16 sps:$4 sm:$0xff]  }
   0xa   :  { %v3244_v28 = vld [vmem:[%s5278_s1 + $0x28] ss:$16 sps:$4 sm:$0xff]   ;;  %v3245_v29 = vld [vmem:[%s5278_s1 + $0x4] ss:$16 sps:$4 sm:$0xff]   ;;  %v3247_v30 = vld [vmem:[%s5278_s1 + $0xc] ss:$16 sps:$4 sm:$0xff]  }
   0xb   :  { %314 = vmatpush1.bf16.msra.mxu0 %v3219_v11  ;;  %427 = vmatpush1.bf16.msra.mxu1 %v3220_v12  ;;  %v3249_v31 = vld [vmem:[%s5278_s1] ss:$16 sps:$4 sm:$0xff]   ;;  %v3250_v32 = vld [vmem:[%s5278_s1 + $0x8] ss:$16 sps:$4 sm:$0xff]   ;;  %v3816_v33 = vld [vmem:[%s5279_s2 + $0xe4] ss:$16 sps:$4 sm:$0xff]  }
   0xc   :  { %315 = vmatprep.subr.bf16.mxu0 %v3221_v13  ;;  %428 = vmatprep.subr.bf16.mxu1 %v3223_v14  ;;  %v3821_v34 = vld [vmem:[%s5279_s2 + $0xec] ss:$16 sps:$4 sm:$0xff]   ;;  %v3251_v35 = vld [vmem:[%s5277_s0] sm:$0xff]   ;;  %v3841_v38 = vld [vmem:[%s5279_s2 + $0xe8] ss:$16 sps:$4 sm:$0xff]  }
   0xd   :  { %v3829_v36 = vld [vmem:[%s5279_s2 + $0xe0] ss:$16 sps:$4 sm:$0xff]   ;;  %v3835_v37 = vld [vmem:[%s5279_s2 + $0xc4] ss:$16 sps:$4 sm:$0xff]   ;;  %v3846_v39 = vld [vmem:[%s5279_s2 + $0xcc] ss:$16 sps:$4 sm:$0xff]  }
   0xe   :  { %v3853_v40 = vld [vmem:[%s5279_s2 + $0xc0] ss:$16 sps:$4 sm:$0xff]   ;;  %v3860_v41 = vld [vmem:[%s5279_s2 + $0xa4] ss:$16 sps:$4 sm:$0xff]   ;;  %v3866_v42 = vld [vmem:[%s5279_s2 + $0xc8] ss:$16 sps:$4 sm:$0xff]  }
   0xf   :  { %316 = vmatpush1.bf16.msra.mxu0 %v3225_v15  ;;  %429 = vmatpush1.bf16.msra.mxu1 %v3226_v16  ;;  %v3255_v43 = vld [vmem:[%s5277_s0 + $0x8] sm:$0xff]   ;;  %v3876_v44 = vld [vmem:[%s5279_s2 + $0xa0] ss:$16 sps:$4 sm:$0xff]   ;;  %v3881_v45 = vld [vmem:[%s5279_s2 + $0x84] ss:$16 sps:$4 sm:$0xff]  }
  0x10   :  { %317 = vmatprep.subr.bf16.mxu0 %v3227_v17  ;;  %430 = vmatprep.subr.bf16.mxu1 %v3229_v18  ;;  %v3887_v46 = vld [vmem:[%s5279_s2 + $0xac] ss:$16 sps:$4 sm:$0xff]   ;;  %v3893_v47 = vld [vmem:[%s5279_s2 + $0xa8] ss:$16 sps:$4 sm:$0xff]   ;;  %v3906_v49 = vld [vmem:[%s5279_s2 + $0x80] ss:$16 sps:$4 sm:$0xff]  }
  0x11   :  { %v3898_v48 = vld [vmem:[%s5279_s2 + $0x8c] ss:$16 sps:$4 sm:$0xff]   ;;  %v3911_v50 = vld [vmem:[%s5279_s2 + $0x64] ss:$16 sps:$4 sm:$0xff]   ;;  %v3919_v51 = vld [vmem:[%s5279_s2 + $0x88] ss:$16 sps:$4 sm:$0xff]  }
  0x12   :  { %v3259_v52 = vld [vmem:[%s5277_s0 + $0x10] sm:$0xff]   ;;  %v3934_v54 = vld [vmem:[%s5279_s2 + $0x6c] ss:$16 sps:$4 sm:$0xff]   ;;  %v3946_v56 = vld [vmem:[%s5279_s2 + $0x68] ss:$16 sps:$4 sm:$0xff]  }
  0x13   :  { %318 = vmatpush1.bf16.msra.mxu0 %v3231_v19  ;;  %431 = vmatpush1.bf16.msra.mxu1 %v3232_v20  ;;  %v3928_v53 = vld [vmem:[%s5279_s2 + $0x60] ss:$16 sps:$4 sm:$0xff]   ;;  %v3940_v55 = vld [vmem:[%s5279_s2 + $0x44] ss:$16 sps:$4 sm:$0xff]   ;;  %v3951_v57 = vld [vmem:[%s5279_s2 + $0x4c] ss:$16 sps:$4 sm:$0xff]  }
  0x14   :  { %319 = vmatprep.subr.bf16.mxu0 %v3233_v21  ;;  %432 = vmatprep.subr.bf16.mxu1 %v3235_v22  ;;  %v3956_v58 = vld [vmem:[%s5279_s2 + $0x40] ss:$16 sps:$4 sm:$0xff]   ;;  %v3963_v59 = vld [vmem:[%s5279_s2 + $0x24] ss:$16 sps:$4 sm:$0xff]   ;;  %v3968_v60 = vld [vmem:[%s5279_s2 + $0x48] ss:$16 sps:$4 sm:$0xff]  }
  0x15   :  { %v3266_v61 = vld [vmem:[%s5277_s0 + $0x18] sm:$0xff]   ;;  %v3980_v62 = vld [vmem:[%s5279_s2 + $0x20] ss:$16 sps:$4 sm:$0xff]   ;;  %v3991_v0 = vld [vmem:[%s5279_s2 + $0x4] ss:$16 sps:$4 sm:$0xff]  }
  0x16   :  { %v3986_v63 = vld [vmem:[%s5279_s2 + $0x2c] ss:$16 sps:$4 sm:$0xff]   ;;  %v3996_v1 = vld [vmem:[%s5279_s2 + $0x28] ss:$16 sps:$4 sm:$0xff]   ;;  %v4009_v4 = vld [vmem:[%s5279_s2] ss:$16 sps:$4 sm:$0xff]  }
  0x17   :  { %320 = vmatpush1.bf16.msra.mxu0 %v3237_v23  ;;  %433 = vmatpush1.bf16.msra.mxu1 %v3238_v24  ;;  %v4002_v3 = vld [vmem:[%s5279_s2 + $0xc] ss:$16 sps:$4 sm:$0xff]  }
  0x18   :  { %321 = vmatprep.subr.bf16.mxu0 %v3239_v25  ;;  %434 = vmatprep.subr.bf16.mxu1 %v3241_v26 }
  0x1b   :  { %322 = vmatpush1.bf16.msra.mxu0 %v3243_v27  ;;  %435 = vmatpush1.bf16.msra.mxu1 %v3244_v28 }
  0x1c   :  { %323 = vmatprep.subr.bf16.mxu0 %v3245_v29  ;;  %436 = vmatprep.subr.bf16.mxu1 %v3247_v30 }
  0x1f   :  { %324 = vmatpush1.bf16.msra.mxu0 %v3249_v31  ;;  %437 = vmatpush1.bf16.msra.mxu1 %v3250_v32 }
  0x20   :  { %803 = vmatprep.subr.bf16.mxu0 %v3816_v33  ;;  %844 = vmatprep.subr.bf16.mxu1 %v3821_v34 }
  0x22   :  { %342 = vmatmul.mubr.bf16.vlgmr.msra.gmra.mxu0 %v3251_v35  ;;  %455 = vmatmul.mubr.bf16.vlgmr.msra.gmra.mxu1 %v3251_v35 }
  0x23   :  { %804 = vmatpush1.bf16.msra.mxu0 %v3829_v36  ;;  %351 = vmatprep.mubr.bf16.mxu0 %v5286_v2 }
  0x24   :  { %464 = vmatprep.mubr.bf16.mxu1 %v5286_v2  ;;  %805 = vmatprep.subr.bf16.mxu0 %v3835_v37 }
  0x25   :  { %845 = vmatpush1.bf16.msra.mxu1 %v3841_v38 }
  0x26   :  { %846 = vmatprep.subr.bf16.mxu1 %v3846_v39 }
  0x27   :  { %806 = vmatpush1.bf16.msra.mxu0 %v3853_v40 }
  0x28   :  { %807 = vmatprep.subr.bf16.mxu0 %v3860_v41 }
  0x29   :  { %847 = vmatpush1.bf16.msra.mxu1 %v3866_v42 }
  0x2a   :  { %352 = vmatmul.mubr.bf16.gmra.mxu0 %v3255_v43  ;;  %465 = vmatmul.mubr.bf16.gmra.mxu1 %v3255_v43 }
  0x2b   :  { %361 = vmatprep.mubr.bf16.mxu0 %v5286_v2  ;;  %474 = vmatprep.mubr.bf16.mxu1 %v5286_v2 }
  0x2c   :  { %808 = vmatpush1.bf16.msra.mxu0 %v3876_v44  ;;  %848 = vmatprep.subr.bf16.mxu1 %v3887_v46 }
  0x2d   :  { %809 = vmatprep.subr.bf16.mxu0 %v3881_v45  ;;  %849 = vmatpush1.bf16.msra.mxu1 %v3893_v47 }
  0x2e   :  { %850 = vmatprep.subr.bf16.mxu1 %v3898_v48 }
  0x30   :  { %810 = vmatpush1.bf16.msra.mxu0 %v3906_v49 }
  0x31   :  { %811 = vmatprep.subr.bf16.mxu0 %v3911_v50  ;;  %851 = vmatpush1.bf16.msra.mxu1 %v3919_v51 }
  0x32   :  { %362 = vmatmul.mubr.bf16.gmra.mxu0 %v3259_v52  ;;  %475 = vmatmul.mubr.bf16.gmra.mxu1 %v3259_v52 }
  0x33   :  { %371 = vmatprep.mubr.bf16.mxu0 %v5286_v2  ;;  %484 = vmatprep.mubr.bf16.mxu1 %v5286_v2 }
  0x34   :  { %812 = vmatpush1.bf16.msra.mxu0 %v3928_v53  ;;  %852 = vmatprep.subr.bf16.mxu1 %v3934_v54 }
  0x35   :  { %813 = vmatprep.subr.bf16.mxu0 %v3940_v55  ;;  %853 = vmatpush1.bf16.msra.mxu1 %v3946_v56 }
  0x36   :  { %854 = vmatprep.subr.bf16.mxu1 %v3951_v57 }
  0x38   :  { %814 = vmatpush1.bf16.msra.mxu0 %v3956_v58 }
  0x39   :  { %815 = vmatprep.subr.bf16.mxu0 %v3963_v59  ;;  %855 = vmatpush1.bf16.msra.mxu1 %v3968_v60 }
  0x3a   :  { %372 = vmatmul.mubr.bf16.gmra.mxu0 %v3266_v61  ;;  %485 = vmatmul.mubr.bf16.gmra.mxu1 %v3266_v61 }
  0x3b   :  { %381 = vmatprep.mubr.bf16.mxu0 %v5286_v2  ;;  %494 = vmatprep.mubr.bf16.mxu1 %v5286_v2 }
  0x3c   :  { %816 = vmatpush1.bf16.msra.mxu0 %v3980_v62  ;;  %856 = vmatprep.subr.bf16.mxu1 %v3986_v63 }
  0x3d   :  { %13 = vsyncpa [#allocation6], 0  ;;  %817 = vmatprep.subr.bf16.mxu0 %v3991_v0  ;;  %857 = vmatpush1.bf16.msra.mxu1 %v3996_v1  ;;  %v4020_v5 = vld [vmem:[%s5279_s2 + $0x8] ss:$16 sps:$4 sm:$0xff]   ;;  %v3273_v6 = vld [vmem:[%s5277_s0 + $0x20] sm:$0xff]   ;;  %v3666_v10 = vmov 0.0|0.0   ;;  %v81_v11 = vlaneseq }
  0x3e   :  { %858 = vmatprep.subr.bf16.mxu1 %v4002_v3  ;;  %v3280_v7 = vld [vmem:[%s5277_s0 + $0x28] sm:$0xff]   ;;  %v3287_v8 = vld [vmem:[%s5277_s0 + $0x30] sm:$0xff]   ;;  %v3297_v9 = vld [vmem:[%s5277_s0 + $0x38] sm:$0xff]   ;;  %vm3668_vm0 = vmmov 0   ;;  %s3669_s24 = smov [#allocation5]   ;;  %vm2971_vm1 = vcmask 80896  }
  0x3f   :  { %v82_v12 = vshrl.u32 %v81_v11, 7  ;;  %v79_v16 = vld [vmem:[%s5280_s3] sm:$0xf]  ;;  %s2979_s25 = sshll.u32 %s3669_s24, 4  ;;  %s2980_s25 = int_to_ptr.vmem [resolvable:$true] %s2979_s25 }
  0x40   :  { %818 = vmatpush1.bf16.msra.mxu0 %v4009_v4  ;;  %p3648_p1 = scmp.lt.s32.totalorder %s2980_s25, %s2980_s25 }
  0x41   :  { %859 = vmatpush1.bf16.msra.mxu1 %v4020_v5  ;;  %925 = vmatprep.subr.bf16.mxu0 %v3816_v33  ;;  %v91_v13 = vsub.s32 2, %v82_v12  ;;  %v83_v14 = vsub.s32 0, %v82_v12  ;;  %v95_v15 = vsub.s32 3, %v82_v12  ;;  %v87_v20 = vsub.s32 1, %v82_v12 }
  0x42   :  { %382 = vmatmul.mubr.bf16.gmra.mxu0 %v3273_v6  ;;  %495 = vmatmul.mubr.bf16.gmra.mxu1 %v3273_v6 }
  0x43   :  { %391 = vmatprep.mubr.bf16.mxu0 %v5286_v2  ;;  %504 = vmatprep.mubr.bf16.mxu1 %v5286_v2  ;;  %v4088_v19 = vrot.slane %v79_v16, %v91_v13  ;;  %v4094_v23 = vrot.slane %v79_v16, %v83_v14  ;;  %v4096_v24 = vrot.slane %v79_v16, %v95_v15 }
  0x44   :  { %966 = vmatprep.subr.bf16.mxu1 %v3821_v34  ;;  %v4098_v27 = vrot.slane %v79_v16, %v87_v20 }
  0x4a   :  { %392 = vmatmul.mubr.bf16.gmra.mxu0 %v3280_v7  ;;  %505 = vmatmul.mubr.bf16.gmra.mxu1 %v3280_v7 }
  0x4b   :  { %401 = vmatprep.mubr.bf16.mxu0 %v5286_v2  ;;  %514 = vmatprep.mubr.bf16.mxu1 %v5286_v2 }
  0x52   :  { %402 = vmatmul.mubr.bf16.gmra.mxu0 %v3287_v8  ;;  %515 = vmatmul.mubr.bf16.gmra.mxu1 %v3287_v8 }
  0x53   :  { %411 = vmatprep.mubr.bf16.mxu0 %v5286_v2  ;;  %524 = vmatprep.mubr.bf16.mxu1 %v5286_v2 }
  0x5a   :  { %412 = vmatmul.mubr.bf16.gmra.mxu0 %v3297_v9  ;;  %525 = vmatmul.mubr.bf16.gmra.mxu1 %v3297_v9 }
  0x5b   :  { %835 = vmatprep.mubr.bf16.mxu0 %v5286_v2  ;;  %876 = vmatprep.mubr.bf16.mxu1 %v5286_v2 }
  0x62   :  { %836 = vmatmul.mubr.bf16.vlgmr.msra.gmra.mxu0 %v3666_v10  ;;  %877 = vmatmul.mubr.bf16.vlgmr.msra.gmra.mxu1 %v3666_v10 }
  0x63   :  { %926 = vmatpush1.bf16.msra.mxu0 %v3829_v36  ;;  %967 = vmatpush1.bf16.msra.mxu1 %v3841_v38 }
  0x64   :  { %927 = vmatprep.subr.bf16.mxu0 %v3835_v37  ;;  %968 = vmatprep.subr.bf16.mxu1 %v3846_v39 }
  0x65   :  { %957 = vmatprep.mubr.bf16.mxu0 %v5286_v2  ;;  %998 = vmatprep.mubr.bf16.mxu1 %v5286_v2 }
  0x67   :  { %928 = vmatpush1.bf16.msra.mxu0 %v3853_v40  ;;  %969 = vmatpush1.bf16.msra.mxu1 %v3866_v42 }
  0x68   :  { %929 = vmatprep.subr.bf16.mxu0 %v3860_v41  ;;  %970 = vmatprep.subr.bf16.mxu1 %v3887_v46 }
  0x6b   :  { %930 = vmatpush1.bf16.msra.mxu0 %v3876_v44  ;;  %971 = vmatpush1.bf16.msra.mxu1 %v3893_v47 }
  0x6c   :  { %931 = vmatprep.subr.bf16.mxu0 %v3881_v45  ;;  %972 = vmatprep.subr.bf16.mxu1 %v3898_v48 }
  0x6f   :  { %932 = vmatpush1.bf16.msra.mxu0 %v3906_v49  ;;  %973 = vmatpush1.bf16.msra.mxu1 %v3919_v51 }
  0x70   :  { %933 = vmatprep.subr.bf16.mxu0 %v3911_v50  ;;  %974 = vmatprep.subr.bf16.mxu1 %v3934_v54 }
  0x73   :  { %934 = vmatpush1.bf16.msra.mxu0 %v3928_v53  ;;  %975 = vmatpush1.bf16.msra.mxu1 %v3946_v56 }
  0x74   :  { %935 = vmatprep.subr.bf16.mxu0 %v3940_v55  ;;  %976 = vmatprep.subr.bf16.mxu1 %v3951_v57 }
  0x77   :  { %936 = vmatpush1.bf16.msra.mxu0 %v3956_v58  ;;  %977 = vmatpush1.bf16.msra.mxu1 %v3968_v60 }
  0x78   :  { %937 = vmatprep.subr.bf16.mxu0 %v3963_v59  ;;  %978 = vmatprep.subr.bf16.mxu1 %v3986_v63 }
  0x7b   :  { %938 = vmatpush1.bf16.msra.mxu0 %v3980_v62  ;;  %979 = vmatpush1.bf16.msra.mxu1 %v3996_v1 }
  0x7c   :  { %939 = vmatprep.subr.bf16.mxu0 %v3991_v0  ;;  %980 = vmatprep.subr.bf16.mxu1 %v4002_v3 }
  0x7f   :  { %940 = vmatpush1.bf16.msra.mxu0 %v4009_v4  ;;  %981 = vmatpush1.bf16.msra.mxu1 %v4020_v5 }
  0x80   :  { %1047 = vmatprep.subr.bf16.mxu0 %v3816_v33  ;;  %1088 = vmatprep.subr.bf16.mxu1 %v3821_v34 }
  0xe2   :  { %v4084_v17 = vpop.f32.mrf.mxu0  ;;  %v4086_v18 = vpop.f32.mrf.mxu1 }
  0xe4   :  { %v4090_v21 = vpop.f32.mrf.mxu0  ;;  %v4092_v22 = vpop.f32.mrf.mxu1 }
  0xe6   :  { %v347_v25 = vpop.f32.mrf.mxu0  ;;  %v460_v26 = vpop.f32.mrf.mxu1 }
  0xe7   :  { %v4101_v28 = vadd.f32 %v347_v25, %v4094_v23  ;;  %v4104_v29 = vadd.f32 %v460_v26, %v4088_v19 }
  0xe8   :  { %v349_v30 = vpop.f32.mrf.mxu0  ;;  %v462_v31 = vpop.f32.mrf.mxu1 }
  0xe9   :  { %v4107_v32 = vadd.f32 %v349_v30, %v4098_v27  ;;  %v4110_v35 = vadd.f32 %v462_v31, %v4096_v24 }
  0xea   :  { %v353_v43 = vpop.f32.mrf.mxu0  ;;  %v466_v52 = vpop.f32.mrf.mxu1 }
  0xeb   :  { %v4113_v61 = vadd.f32 %v353_v43, %v4094_v23  ;;  %v4116_v6 = vadd.f32 %v466_v52, %v4088_v19 }
  0xec   :  { %v355_v7 = vpop.f32.mrf.mxu0  ;;  %v468_v8 = vpop.f32.mrf.mxu1 }
  0xed   :  { %v4119_v9 = vadd.f32 %v355_v7, %v4098_v27  ;;  %v4122_v10 = vadd.f32 %v468_v8, %v4096_v24 }
  0xee   :  { %v357_v11 = vpop.f32.mrf.mxu0  ;;  %v470_v12 = vpop.f32.mrf.mxu1 }
  0xef   :  { %v4125_v13 = vadd.f32 %v357_v11, %v4094_v23  ;;  %v4128_v14 = vadd.f32 %v470_v12, %v4088_v19 }
  0xf0   :  { %v359_v15 = vpop.f32.mrf.mxu0  ;;  %v472_v16 = vpop.f32.mrf.mxu1 }
  0xf1   :  { %5288 = vst [vmem:[#allocation8_spill] sm:$0xff] %v4128_v14  ;;  %v4131_v20 = vadd.f32 %v359_v15, %v4098_v27  ;;  %v4134_v25 = vadd.f32 %v472_v16, %v4096_v24 }
  0xf2   :  { %v363_v26 = vpop.f32.mrf.mxu0  ;;  %v476_v30 = vpop.f32.mrf.mxu1 }
  0xf3   :  { %5289 = vst [vmem:[#allocation9_spill] sm:$0xff] %v4131_v20  ;;  %5290 = vst [vmem:[#allocation10_spill] sm:$0xff] %v4134_v25  ;;  %v4137_v31 = vadd.f32 %v363_v26, %v4094_v23  ;;  %v4140_v43 = vadd.f32 %v476_v30, %v4088_v19 }
  0xf4   :  { %v365_v52 = vpop.f32.mrf.mxu0  ;;  %v478_v7 = vpop.f32.mrf.mxu1 }
  0xf5   :  { %5291 = vst [vmem:[#allocation11_spill] sm:$0xff] %v4137_v31  ;;  %5292 = vst [vmem:[#allocation12_spill] sm:$0xff] %v4140_v43  ;;  %v4143_v8 = vadd.f32 %v365_v52, %v4098_v27  ;;  %v4146_v11 = vadd.f32 %v478_v7, %v4096_v24 }
  0xf6   :  { %v367_v12 = vpop.f32.mrf.mxu0  ;;  %v480_v15 = vpop.f32.mrf.mxu1 }
  0xf7   :  { %5293 = vst [vmem:[#allocation13_spill] sm:$0xff] %v4143_v8  ;;  %5294 = vst [vmem:[#allocation14_spill] sm:$0xff] %v4146_v11  ;;  %v4149_v16 = vadd.f32 %v367_v12, %v4094_v23  ;;  %v4152_v2 = vadd.f32 %v480_v15, %v4088_v19 }
  0xf8   :  { %v369_v26 = vpop.f32.mrf.mxu0  ;;  %v482_v31 = vpop.f32.mrf.mxu1 }
  0xf9   :  { %5295 = vst [vmem:[#allocation15_spill] sm:$0xff] %v4149_v16  ;;  %5296 = vst [vmem:[#allocation16_spill] sm:$0xff] %v4152_v2  ;;  %v4155_v30 = vadd.f32 %v369_v26, %v4098_v27  ;;  %v4158_v43 = vadd.f32 %v482_v31, %v4096_v24 }
  0xfa   :  { %v373_v52 = vpop.f32.mrf.mxu0  ;;  %v486_v8 = vpop.f32.mrf.mxu1 }
  0xfb   :  { %5297 = vst [vmem:[#allocation17_spill] sm:$0xff] %v4155_v30  ;;  %5298 = vst [vmem:[#allocation18_spill] sm:$0xff] %v4158_v43  ;;  %v4161_v7 = vadd.f32 %v373_v52, %v4094_v23  ;;  %v4164_v11 = vadd.f32 %v486_v8, %v4088_v19 }
  0xfc   :  { %v375_v12 = vpop.f32.mrf.mxu0  ;;  %v488_v16 = vpop.f32.mrf.mxu1 }
  0xfd   :  { %5299 = vst [vmem:[#allocation19_spill] sm:$0xff] %v4161_v7  ;;  %5300 = vst [vmem:[#allocation20_spill] sm:$0xff] %v4164_v11  ;;  %v4167_v15 = vadd.f32 %v375_v12, %v4098_v27  ;;  %v4170_v2 = vadd.f32 %v488_v16, %v4096_v24 }
  0xfe   :  { %v377_v26 = vpop.f32.mrf.mxu0  ;;  %v490_v30 = vpop.f32.mrf.mxu1 }
  0xff   :  { %5301 = vst [vmem:[#allocation21_spill] sm:$0xff] %v4167_v15  ;;  %5302 = vst [vmem:[#allocation22_spill] sm:$0xff] %v4170_v2  ;;  %v4173_v31 = vadd.f32 %v377_v26, %v4094_v23  ;;  %v4176_v43 = vadd.f32 %v490_v30, %v4088_v19 }
 0x100   :  { %v379_v52 = vpop.f32.mrf.mxu0  ;;  %v492_v7 = vpop.f32.mrf.mxu1 }
 0x101   :  { %5303 = vst [vmem:[#allocation23_spill] sm:$0xff] %v4173_v31  ;;  %5304 = vst [vmem:[#allocation24_spill] sm:$0xff] %v4176_v43  ;;  %v4179_v8 = vadd.f32 %v379_v52, %v4098_v27  ;;  %v4182_v11 = vadd.f32 %v492_v7, %v4096_v24 }
 0x102   :  { %v383_v12 = vpop.f32.mrf.mxu0  ;;  %v496_v15 = vpop.f32.mrf.mxu1 }
 0x103   :  { %5305 = vst [vmem:[#allocation25_spill] sm:$0xff] %v4179_v8  ;;  %5306 = vst [vmem:[#allocation26_spill] sm:$0xff] %v4182_v11  ;;  %v4185_v16 = vadd.f32 %v383_v12, %v4094_v23  ;;  %v4188_v2 = vadd.f32 %v496_v15, %v4088_v19 }
 0x104   :  { %v385_v26 = vpop.f32.mrf.mxu0  ;;  %v498_v31 = vpop.f32.mrf.mxu1 }
 0x105   :  { %5307 = vst [vmem:[#allocation27_spill] sm:$0xff] %v4185_v16  ;;  %5308 = vst [vmem:[#allocation28_spill] sm:$0xff] %v4188_v2  ;;  %v4191_v30 = vadd.f32 %v385_v26, %v4098_v27  ;;  %v4194_v43 = vadd.f32 %v498_v31, %v4096_v24 }
 0x106   :  { %v387_v52 = vpop.f32.mrf.mxu0  ;;  %v500_v8 = vpop.f32.mrf.mxu1 }
 0x107   :  { %5309 = vst [vmem:[#allocation29_spill] sm:$0xff] %v4191_v30  ;;  %5310 = vst [vmem:[#allocation30_spill] sm:$0xff] %v4194_v43  ;;  %v4197_v7 = vadd.f32 %v387_v52, %v4094_v23  ;;  %v4200_v11 = vadd.f32 %v500_v8, %v4088_v19 }
 0x108   :  { %v389_v12 = vpop.f32.mrf.mxu0  ;;  %v502_v16 = vpop.f32.mrf.mxu1 }
 0x109   :  { %5311 = vst [vmem:[#allocation31_spill] sm:$0xff] %v4197_v7  ;;  %5312 = vst [vmem:[#allocation32_spill] sm:$0xff] %v4200_v11  ;;  %v4203_v15 = vadd.f32 %v389_v12, %v4098_v27  ;;  %v4206_v2 = vadd.f32 %v502_v16, %v4096_v24 }
 0x10a   :  { %v393_v26 = vpop.f32.mrf.mxu0  ;;  %v506_v30 = vpop.f32.mrf.mxu1 }
 0x10b   :  { %5313 = vst [vmem:[#allocation33_spill] sm:$0xff] %v4203_v15  ;;  %5314 = vst [vmem:[#allocation34_spill] sm:$0xff] %v4206_v2  ;;  %v4209_v31 = vadd.f32 %v393_v26, %v4094_v23  ;;  %v4212_v43 = vadd.f32 %v506_v30, %v4088_v19 }
 0x10c   :  { %v395_v52 = vpop.f32.mrf.mxu0  ;;  %v508_v7 = vpop.f32.mrf.mxu1 }
 0x10d   :  { %5315 = vst [vmem:[#allocation35_spill] sm:$0xff] %v4209_v31  ;;  %5316 = vst [vmem:[#allocation36_spill] sm:$0xff] %v4212_v43  ;;  %v4215_v8 = vadd.f32 %v395_v52, %v4098_v27  ;;  %v4218_v11 = vadd.f32 %v508_v7, %v4096_v24 }
 0x10e   :  { %v397_v12 = vpop.f32.mrf.mxu0  ;;  %v510_v15 = vpop.f32.mrf.mxu1 }
 0x10f   :  { %5317 = vst [vmem:[#allocation37_spill] sm:$0xff] %v4215_v8  ;;  %5318 = vst [vmem:[#allocation38_spill] sm:$0xff] %v4218_v11  ;;  %v4221_v16 = vadd.f32 %v397_v12, %v4094_v23  ;;  %v4224_v2 = vadd.f32 %v510_v15, %v4088_v19 }
 0x110   :  { %v399_v26 = vpop.f32.mrf.mxu0  ;;  %v512_v31 = vpop.f32.mrf.mxu1 }
 0x111   :  { %5319 = vst [vmem:[#allocation39_spill] sm:$0xff] %v4221_v16  ;;  %5320 = vst [vmem:[#allocation40_spill] sm:$0xff] %v4224_v2  ;;  %v4227_v30 = vadd.f32 %v399_v26, %v4098_v27  ;;  %v4230_v43 = vadd.f32 %v512_v31, %v4096_v24 }
 0x112   :  { %v403_v52 = vpop.f32.mrf.mxu0  ;;  %v516_v8 = vpop.f32.mrf.mxu1 }
 0x113   :  { %5321 = vst [vmem:[#allocation41_spill] sm:$0xff] %v4227_v30  ;;  %5322 = vst [vmem:[#allocation42_spill] sm:$0xff] %v4230_v43  ;;  %v4233_v7 = vadd.f32 %v403_v52, %v4094_v23  ;;  %v4236_v11 = vadd.f32 %v516_v8, %v4088_v19 }
 0x114   :  { %v405_v12 = vpop.f32.mrf.mxu0  ;;  %v518_v16 = vpop.f32.mrf.mxu1 }
 0x115   :  { %5323 = vst [vmem:[#allocation43_spill] sm:$0xff] %v4233_v7  ;;  %5324 = vst [vmem:[#allocation44_spill] sm:$0xff] %v4236_v11  ;;  %v4239_v15 = vadd.f32 %v405_v12, %v4098_v27  ;;  %v4242_v2 = vadd.f32 %v518_v16, %v4096_v24 }
 0x116   :  { %v407_v26 = vpop.f32.mrf.mxu0  ;;  %v520_v30 = vpop.f32.mrf.mxu1 }
 0x117   :  { %5325 = vst [vmem:[#allocation45_spill] sm:$0xff] %v4239_v15  ;;  %5326 = vst [vmem:[#allocation46_spill] sm:$0xff] %v4242_v2  ;;  %v4245_v31 = vadd.f32 %v407_v26, %v4094_v23  ;;  %v4248_v43 = vadd.f32 %v520_v30, %v4088_v19 }
 0x118   :  { %v409_v52 = vpop.f32.mrf.mxu0  ;;  %v522_v7 = vpop.f32.mrf.mxu1 }
 0x119   :  { %5327 = vst [vmem:[#allocation47_spill] sm:$0xff] %v4245_v31  ;;  %5328 = vst [vmem:[#allocation48_spill] sm:$0xff] %v4248_v43  ;;  %v4251_v8 = vadd.f32 %v409_v52, %v4098_v27  ;;  %v4254_v11 = vadd.f32 %v522_v7, %v4096_v24 }
 0x11a   :  { %v413_v12 = vpop.f32.mrf.mxu0  ;;  %v526_v15 = vpop.f32.mrf.mxu1 }
 0x11b   :  { %5329 = vst [vmem:[#allocation49_spill] sm:$0xff] %v4251_v8  ;;  %5330 = vst [vmem:[#allocation50_spill] sm:$0xff] %v4254_v11  ;;  %v4257_v16 = vadd.f32 %v413_v12, %v4094_v23  ;;  %v4260_v2 = vadd.f32 %v526_v15, %v4088_v19  ;;  %v344_v15 = vadd.f32 %v4084_v17, %v4094_v23 }
 0x11c   :  { %v415_v26 = vpop.f32.mrf.mxu0  ;;  %v528_v31 = vpop.f32.mrf.mxu1 }
 0x11d   :  { %5331 = vst [vmem:[#allocation51_spill] sm:$0xff] %v4257_v16  ;;  %5332 = vst [vmem:[#allocation52_spill] sm:$0xff] %v4260_v2  ;;  %v4263_v30 = vadd.f32 %v415_v26, %v4098_v27  ;;  %v4266_v43 = vadd.f32 %v528_v31, %v4096_v24 }
 0x11e   :  { %v417_v52 = vpop.f32.mrf.mxu0  ;;  %v530_v8 = vpop.f32.mrf.mxu1 }
 0x11f   :  { %5333 = vst [vmem:[#allocation53_spill] sm:$0xff] %v4263_v30  ;;  %5334 = vst [vmem:[#allocation54_spill] sm:$0xff] %v4266_v43  ;;  %v4269_v7 = vadd.f32 %v417_v52, %v4094_v23  ;;  %v4272_v11 = vadd.f32 %v530_v8, %v4088_v19  ;;  %v346_v52 = vadd.f32 %v4090_v21, %v4098_v27 }
 0x120   :  { %v419_v12 = vpop.f32.mrf.mxu0  ;;  %v532_v16 = vpop.f32.mrf.mxu1 }
 0x121   :  { %5335 = vst [vmem:[#allocation55_spill] sm:$0xff] %v4269_v7  ;;  %5336 = vst [vmem:[#allocation56_spill] sm:$0xff] %v4272_v11  ;;  %v4277_v2 = vadd.f32 %v419_v12, %v4098_v27  ;;  %v4280_v26 = vadd.f32 %v532_v16, %v4096_v24  ;;  %v459_v16 = vadd.f32 %v4092_v22, %v4096_v24 }
 0x122   :  { %v837_v31 = vpop.f32.mrf.mxu0  ;;  %v878_v43 = vpop.f32.mrf.mxu1 }
 0x123   :  { %5337 = vst [vmem:[#allocation57_spill] sm:$0xff] %v4277_v2  ;;  %5338 = vst [vmem:[#allocation58_spill] sm:$0xff] %v4280_v26  ;;  %v885_v7 = vadd.f32 %v837_v31, %v344_v15  ;;  %v457_v2 = vadd.f32 %v4086_v18, %v4088_v19 }
 0x124   :  { %v839_v30 = vpop.f32.mrf.mxu0  ;;  %v880_v8 = vpop.f32.mrf.mxu1 }
 0x125   :  { %v3074_v11 = vmul.f32 -1.442695, %v885_v7  ;;  %v886_v14 = vadd.f32 %v839_v30, %v346_v52  ;;  %v888_v26 = vadd.f32 %v880_v8, %v459_v16  ;;  %v887_v21 = vadd.f32 %v878_v43, %v457_v2 }
 0x126   :  { %v841_v25 = vpop.f32.mrf.mxu0  ;;  %v882_v20 = vpop.f32.mrf.mxu1 }
 0x127   :  { %3323 = vpow2.f32 %v3074_v11  ;;  %v3075_v17 = vmul.f32 -1.442695, %v886_v14  ;;  %v3076_v27 = vmul.f32 -1.442695, %v888_v26  ;;  %v5339_v26 = vmov 0  }
 0x128   :  { %v842_v23 = vpop.f32.mrf.mxu0  ;;  %v883_v12 = vpop.f32.mrf.mxu1 }
 0x129   :  { %3325 = vpow2.f32 %v3075_v17 }
 0x12a   :  { %3327 = vtanh.f32 %v887_v21 }
 0x12b   :  { %3329 = vpow2.f32 %v3076_v27 }
 0x134   :  { %v3324_v15 = vpop.eup %3323 }
 0x135   :  { %v892_v31 = vadd.f32 1.0, %v3324_v15 }
 0x136   :  { %v3326_v30 = vpop.eup %3325 }
 0x137   :  { %3331 = vrcp.f32 %v892_v31  ;;  %v898_v20 = vadd.f32 1.0, %v3326_v30  ;;  %v3328_v14 = vpop.eup %3327 }
 0x138   :  { %v3330_v25 = vpop.eup %3329 }
 0x139   :  { %3333 = vrcp.f32 %v898_v20  ;;  %v905_v22 = vadd.f32 1.0, %v3330_v25 }
 0x13b   :  { %3335 = vrcp.f32 %v905_v22 }
 0x144   :  { %v3332_v11 = vpop.eup %3331 }
 0x145   :  { %v909_v7 = vmul.f32 %v3332_v11, %v3328_v14 }
 0x146   :  { %v3334_v52 = vpop.eup %3333 }
 0x147   :  { %v908_v24 = vmul.f32 0.0, %v3334_v52 }
 0x148   :  { %v3336_v2 = vpop.eup %3335 }
 0x149   :  { %v4288_v8 = vadd.f32 %v909_v7, %v908_v24 }
 0x14b   :  { %3337 = vtanh.f32 %v4288_v8 }
 0x158   :  { %v3338_v18 = vpop.eup %3337 }
 0x159   :  { %v912_v19 = vmul.f32 %v3338_v18, %v3336_v2 }
 0x15b   :  { %v924_v43 = vpack.c.bf16 %v912_v19, %v912_v19 }
 0x15d   :  { %958 = vmatmul.mubr.bf16.vlgmr.msra.gmra.mxu0 %v924_v43  ;;  %999 = vmatmul.mubr.bf16.vlgmr.msra.gmra.mxu1 %v924_v43 }
 0x15e   :  { %1048 = vmatpush1.bf16.msra.mxu0 %v3829_v36  ;;  %1089 = vmatpush1.bf16.msra.mxu1 %v3841_v38 }
 0x15f   :  { %1049 = vmatprep.subr.bf16.mxu0 %v3835_v37  ;;  %1090 = vmatprep.subr.bf16.mxu1 %v3846_v39 }
 0x160   :  { %1079 = vmatprep.mubr.bf16.mxu0 %v5339_v26  ;;  %1120 = vmatprep.mubr.bf16.mxu1 %v5339_v26 }
 0x162   :  { %1050 = vmatpush1.bf16.msra.mxu0 %v3853_v40  ;;  %1091 = vmatpush1.bf16.msra.mxu1 %v3866_v42 }
 0x163   :  { %1051 = vmatprep.subr.bf16.mxu0 %v3860_v41  ;;  %1092 = vmatprep.subr.bf16.mxu1 %v3887_v46 }
 0x166   :  { %1052 = vmatpush1.bf16.msra.mxu0 %v3876_v44  ;;  %1093 = vmatpush1.bf16.msra.mxu1 %v3893_v47 }
 0x167   :  { %1053 = vmatprep.subr.bf16.mxu0 %v3881_v45  ;;  %1094 = vmatprep.subr.bf16.mxu1 %v3898_v48 }
 0x16a   :  { %1054 = vmatpush1.bf16.msra.mxu0 %v3906_v49  ;;  %1095 = vmatpush1.bf16.msra.mxu1 %v3919_v51 }
 0x16b   :  { %1055 = vmatprep.subr.bf16.mxu0 %v3911_v50  ;;  %1096 = vmatprep.subr.bf16.mxu1 %v3934_v54 }
 0x16e   :  { %1056 = vmatpush1.bf16.msra.mxu0 %v3928_v53  ;;  %1097 = vmatpush1.bf16.msra.mxu1 %v3946_v56 }
 0x16f   :  { %1057 = vmatprep.subr.bf16.mxu0 %v3940_v55  ;;  %1098 = vmatprep.subr.bf16.mxu1 %v3951_v57 }
 0x172   :  { %1058 = vmatpush1.bf16.msra.mxu0 %v3956_v58  ;;  %1099 = vmatpush1.bf16.msra.mxu1 %v3968_v60 }
 0x173   :  { %1059 = vmatprep.subr.bf16.mxu0 %v3963_v59  ;;  %1100 = vmatprep.subr.bf16.mxu1 %v3986_v63 }
 0x176   :  { %1060 = vmatpush1.bf16.msra.mxu0 %v3980_v62  ;;  %1101 = vmatpush1.bf16.msra.mxu1 %v3996_v1 }
 0x177   :  { %1061 = vmatprep.subr.bf16.mxu0 %v3991_v0  ;;  %1102 = vmatprep.subr.bf16.mxu1 %v4002_v3 }
 0x17a   :  { %1062 = vmatpush1.bf16.msra.mxu0 %v4009_v4  ;;  %1103 = vmatpush1.bf16.msra.mxu1 %v4020_v5 }
 0x17b   :  { %1169 = vmatprep.subr.bf16.mxu0 %v3816_v33  ;;  %1210 = vmatprep.subr.bf16.mxu1 %v3821_v34 }
 0x21d   :  { %v959_v17 = vpop.f32.mrf.mxu0  ;;  %v1000_v23 = vpop.f32.mrf.mxu1 }
 0x21e   :  { %v1007_v12 = vadd.f32 %v959_v17, %v4101_v28  ;;  %v1009_v7 = vadd.f32 %v1000_v23, %v4104_v29 }
 0x21f   :  { %v961_v16 = vpop.f32.mrf.mxu0  ;;  %v1002_v21 = vpop.f32.mrf.mxu1 }
 0x220   :  { %v3077_v27 = vmul.f32 -1.442695, %v1007_v12  ;;  %v1008_v15 = vadd.f32 %v961_v16, %v4107_v32  ;;  %v1010_v11 = vadd.f32 %v1002_v21, %v4110_v35 }
 0x221   :  { %v963_v31 = vpop.f32.mrf.mxu0  ;;  %v1004_v30 = vpop.f32.mrf.mxu1 }
 0x222   :  { %3339 = vpow2.f32 %v3077_v27  ;;  %v3078_v20 = vmul.f32 -1.442695, %v1008_v15  ;;  %v3079_v52 = vmul.f32 -1.442695, %v1010_v11 }
 0x223   :  { %v964_v14 = vpop.f32.mrf.mxu0  ;;  %v1005_v25 = vpop.f32.mrf.mxu1 }
 0x224   :  { %3341 = vpow2.f32 %v3078_v20 }
 0x225   :  { %3343 = vtanh.f32 %v1009_v7 }
 0x226   :  { %3345 = vpow2.f32 %v3079_v52 }
 0x22f   :  { %v3340_v22 = vpop.eup %3339 }
 0x230   :  { %v1014_v24 = vadd.f32 1.0, %v3340_v22 }
 0x231   :  { %v3342_v28 = vpop.eup %3341 }
 0x232   :  { %3347 = vrcp.f32 %v1014_v24  ;;  %v1020_v2 = vadd.f32 1.0, %v3342_v28  ;;  %v3344_v32 = vpop.eup %3343 }
 0x233   :  { %v3346_v18 = vpop.eup %3345 }
 0x234   :  { %3349 = vrcp.f32 %v1020_v2  ;;  %v1027_v12 = vadd.f32 1.0, %v3346_v18 }
 0x236   :  { %3351 = vrcp.f32 %v1027_v12  ;;  %v4384_v12 = vld [vmem:[%s5279_s2 + $0xe8] ss:$16 sps:$4 sm:$0xff]  }
 0x23f   :  { %v3348_v19 = vpop.eup %3347 }
 0x240   :  { %v1031_v43 = vmul.f32 %v3348_v19, %v3344_v32 }
 0x241   :  { %v3350_v17 = vpop.eup %3349 }
 0x242   :  { %v1030_v16 = vmul.f32 %v3350_v17, %v4288_v8  ;;  %v4378_v17 = vld [vmem:[%s5279_s2 + $0xe0] ss:$16 sps:$4 sm:$0xff]  }
 0x243   :  { %v3352_v29 = vpop.eup %3351 }
 0x244   :  { %v4330_v35 = vadd.f32 %v1031_v43, %v1030_v16  ;;  %v4390_v16 = vld [vmem:[%s5279_s2 + $0xc4] ss:$16 sps:$4 sm:$0xff]  }
 0x246   :  { %3353 = vtanh.f32 %v4330_v35 }
 0x253   :  { %v3354_v23 = vpop.eup %3353 }
 0x254   :  { %v1034_v21 = vmul.f32 %v3354_v23, %v3352_v29  ;;  %v4404_v29 = vld [vmem:[%s5279_s2 + $0xc0] ss:$16 sps:$4 sm:$0xff]   ;;  %v4410_v23 = vld [vmem:[%s5279_s2 + $0xc8] ss:$16 sps:$4 sm:$0xff]  }
 0x256   :  { %v1046_v27 = vpack.c.bf16 %v1034_v21, %v1034_v21  ;;  %v4416_v21 = vld [vmem:[%s5279_s2 + $0xa4] ss:$16 sps:$4 sm:$0xff]  }
 0x258   :  { %1080 = vmatmul.mubr.bf16.vlgmr.msra.gmra.mxu0 %v1046_v27  ;;  %1121 = vmatmul.mubr.bf16.vlgmr.msra.gmra.mxu1 %v1046_v27 }
 0x259   :  { %1170 = vmatpush1.bf16.msra.mxu0 %v3829_v36  ;;  %1211 = vmatpush1.bf16.msra.mxu1 %v3841_v38 }
 0x25a   :  { %1171 = vmatprep.subr.bf16.mxu0 %v3835_v37  ;;  %1212 = vmatprep.subr.bf16.mxu1 %v3846_v39 }
 0x25b   :  { %1201 = vmatprep.mubr.bf16.mxu0 %v5339_v26  ;;  %1242 = vmatprep.mubr.bf16.mxu1 %v5339_v26 }
 0x25d   :  { %1172 = vmatpush1.bf16.msra.mxu0 %v3853_v40  ;;  %1213 = vmatpush1.bf16.msra.mxu1 %v3866_v42 }
 0x25e   :  { %1173 = vmatprep.subr.bf16.mxu0 %v3860_v41  ;;  %1214 = vmatprep.subr.bf16.mxu1 %v3887_v46 }
 0x261   :  { %1174 = vmatpush1.bf16.msra.mxu0 %v3876_v44  ;;  %1215 = vmatpush1.bf16.msra.mxu1 %v3893_v47 }
 0x262   :  { %1175 = vmatprep.subr.bf16.mxu0 %v3881_v45  ;;  %1216 = vmatprep.subr.bf16.mxu1 %v3898_v48 }
 0x265   :  { %1176 = vmatpush1.bf16.msra.mxu0 %v3906_v49  ;;  %1217 = vmatpush1.bf16.msra.mxu1 %v3919_v51 }
 0x266   :  { %1177 = vmatprep.subr.bf16.mxu0 %v3911_v50  ;;  %1218 = vmatprep.subr.bf16.mxu1 %v3934_v54 }
 0x269   :  { %1178 = vmatpush1.bf16.msra.mxu0 %v3928_v53  ;;  %1219 = vmatpush1.bf16.msra.mxu1 %v3946_v56 }
 0x26a   :  { %1179 = vmatprep.subr.bf16.mxu0 %v3940_v55  ;;  %1220 = vmatprep.subr.bf16.mxu1 %v3951_v57 }
 0x26d   :  { %1180 = vmatpush1.bf16.msra.mxu0 %v3956_v58  ;;  %1221 = vmatpush1.bf16.msra.mxu1 %v3968_v60 }
 0x26e   :  { %1181 = vmatprep.subr.bf16.mxu0 %v3963_v59  ;;  %1222 = vmatprep.subr.bf16.mxu1 %v3986_v63 }
 0x271   :  { %1182 = vmatpush1.bf16.msra.mxu0 %v3980_v62  ;;  %1223 = vmatpush1.bf16.msra.mxu1 %v3996_v1 }
 0x272   :  { %1183 = vmatprep.subr.bf16.mxu0 %v3991_v0  ;;  %1224 = vmatprep.subr.bf16.mxu1 %v4002_v3 }
 0x275   :  { %1184 = vmatpush1.bf16.msra.mxu0 %v4009_v4  ;;  %1225 = vmatpush1.bf16.msra.mxu1 %v4020_v5 }
 0x276   :  { %1291 = vmatprep.subr.bf16.mxu0 %v3816_v33  ;;  %1332 = vmatprep.subr.bf16.mxu1 %v3821_v34 }
 0x318   :  { %v1081_v36 = vpop.f32.mrf.mxu0  ;;  %v1122_v37 = vpop.f32.mrf.mxu1 }
 0x319   :  { %v1129_v38 = vadd.f32 %v1081_v36, %v4113_v61  ;;  %v1131_v34 = vadd.f32 %v1122_v37, %v4116_v6 }
 0x31a   :  { %v1083_v39 = vpop.f32.mrf.mxu0  ;;  %v1124_v40 = vpop.f32.mrf.mxu1 }
 0x31b   :  { %v3080_v41 = vmul.f32 -1.442695, %v1129_v38  ;;  %v1130_v42 = vadd.f32 %v1083_v39, %v4119_v9  ;;  %v1132_v33 = vadd.f32 %v1124_v40, %v4122_v10 }
 0x31c   :  { %v1085_v8 = vpop.f32.mrf.mxu0  ;;  %v1126_v15 = vpop.f32.mrf.mxu1 }
 0x31d   :  { %3355 = vpow2.f32 %v3080_v41  ;;  %v3081_v31 = vmul.f32 -1.442695, %v1130_v42  ;;  %v3082_v14 = vmul.f32 -1.442695, %v1132_v33  ;;  %v4474_v33 = vld [vmem:[%s5279_s2 + $0xac] ss:$16 sps:$4 sm:$0xff]  }
 0x31e   :  { %v1086_v30 = vpop.f32.mrf.mxu0  ;;  %v1127_v20 = vpop.f32.mrf.mxu1 }
 0x31f   :  { %3357 = vpow2.f32 %v3081_v31 }
 0x320   :  { %3359 = vtanh.f32 %v1131_v34  ;;  %v4480_v34 = vld [vmem:[%s5279_s2 + $0xa0] ss:$16 sps:$4 sm:$0xff]  }
 0x321   :  { %3361 = vpow2.f32 %v3082_v14  ;;  %v4486_v14 = vld [vmem:[%s5279_s2 + $0xa8] ss:$16 sps:$4 sm:$0xff]  }
 0x32a   :  { %v3356_v25 = vpop.eup %3355 }
 0x32b   :  { %v1136_v11 = vadd.f32 1.0, %v3356_v25  ;;  %v4492_v25 = vld [vmem:[%s5279_s2 + $0x84] ss:$16 sps:$4 sm:$0xff]  }
 0x32c   :  { %v3358_v61 = vpop.eup %3357 }
 0x32d   :  { %3363 = vrcp.f32 %v1136_v11  ;;  %v1142_v7 = vadd.f32 1.0, %v3358_v61  ;;  %v3360_v9 = vpop.eup %3359  ;;  %v4498_v11 = vld [vmem:[%s5279_s2 + $0x8c] ss:$16 sps:$4 sm:$0xff]   ;;  %v4504_v61 = vld [vmem:[%s5279_s2 + $0x80] ss:$16 sps:$4 sm:$0xff]  }
 0x32e   :  { %v3362_v52 = vpop.eup %3361 }
 0x32f   :  { %3365 = vrcp.f32 %v1142_v7  ;;  %v1149_v2 = vadd.f32 1.0, %v3362_v52  ;;  %v4510_v7 = vld [vmem:[%s5279_s2 + $0x88] ss:$16 sps:$4 sm:$0xff]   ;;  %v4522_v52 = vld [vmem:[%s5279_s2 + $0x6c] ss:$16 sps:$4 sm:$0xff]  }
 0x331   :  { %3367 = vrcp.f32 %v1149_v2  ;;  %v4546_v2 = vld [vmem:[%s5279_s2 + $0x4c] ss:$16 sps:$4 sm:$0xff]  }
 0x33a   :  { %v3364_v22 = vpop.eup %3363 }
 0x33b   :  { %v1153_v24 = vmul.f32 %v3364_v22, %v3360_v9  ;;  %v4516_v9 = vld [vmem:[%s5279_s2 + $0x64] ss:$16 sps:$4 sm:$0xff]   ;;  %v4528_v22 = vld [vmem:[%s5279_s2 + $0x60] ss:$16 sps:$4 sm:$0xff]  }
 0x33c   :  { %v3366_v28 = vpop.eup %3365 }
 0x33d   :  { %v1152_v32 = vmul.f32 %v3366_v28, %v4330_v35  ;;  %v4396_v35 = vld [vmem:[%s5279_s2 + $0xcc] ss:$16 sps:$4 sm:$0xff]   ;;  %v4540_v28 = vld [vmem:[%s5279_s2 + $0x44] ss:$16 sps:$4 sm:$0xff]  }
 0x33e   :  { %v3368_v6 = vpop.eup %3367 }
 0x33f   :  { %v4372_v10 = vadd.f32 %v1153_v24, %v1152_v32  ;;  %v4534_v24 = vld [vmem:[%s5279_s2 + $0x68] ss:$16 sps:$4 sm:$0xff]   ;;  %v4552_v32 = vld [vmem:[%s5279_s2 + $0x40] ss:$16 sps:$4 sm:$0xff]  }
 0x341   :  { %3369 = vtanh.f32 %v4372_v10 }
 0x34e   :  { %v3370_v18 = vpop.eup %3369 }
 0x34f   :  { %v1156_v19 = vmul.f32 %v3370_v18, %v3368_v6  ;;  %v4564_v6 = vld [vmem:[%s5279_s2 + $0x24] ss:$16 sps:$4 sm:$0xff]   ;;  %v4570_v18 = vld [vmem:[%s5279_s2 + $0x2c] ss:$16 sps:$4 sm:$0xff]  }
 0x351   :  { %v1168_v43 = vpack.c.bf16 %v1156_v19, %v1156_v19  ;;  %v4576_v19 = vld [vmem:[%s5279_s2 + $0x20] ss:$16 sps:$4 sm:$0xff]  }
 0x353   :  { %1202 = vmatmul.mubr.bf16.vlgmr.msra.gmra.mxu0 %v1168_v43  ;;  %1243 = vmatmul.mubr.bf16.vlgmr.msra.gmra.mxu1 %v1168_v43  ;;  %v4582_v43 = vld [vmem:[%s5279_s2 + $0x28] ss:$16 sps:$4 sm:$0xff]  }
 0x354   :  { %1292 = vmatpush1.bf16.msra.mxu0 %v4378_v17  ;;  %1333 = vmatpush1.bf16.msra.mxu1 %v4384_v12 }
 0x355   :  { %1293 = vmatprep.subr.bf16.mxu0 %v4390_v16  ;;  %1334 = vmatprep.subr.bf16.mxu1 %v4396_v35 }
 0x356   :  { %1323 = vmatprep.mubr.bf16.mxu0 %v5339_v26  ;;  %1364 = vmatprep.mubr.bf16.mxu1 %v5339_v26 }
 0x358   :  { %1294 = vmatpush1.bf16.msra.mxu0 %v4404_v29  ;;  %1335 = vmatpush1.bf16.msra.mxu1 %v4410_v23 }
 0x359   :  { %1295 = vmatprep.subr.bf16.mxu0 %v4416_v21  ;;  %1336 = vmatprep.subr.bf16.mxu1 %v3887_v46 }
 0x35c   :  { %1296 = vmatpush1.bf16.msra.mxu0 %v3876_v44  ;;  %1337 = vmatpush1.bf16.msra.mxu1 %v3893_v47  ;;  %v4445_v44 = vld [vmem:[%s5279_s2 + $0xe4] ss:$16 sps:$4 sm:$0xff]  }
 0x35d   :  { %1297 = vmatprep.subr.bf16.mxu0 %v3881_v45  ;;  %1338 = vmatprep.subr.bf16.mxu1 %v3898_v48  ;;  %v4451_v45 = vld [vmem:[%s5279_s2 + $0xec] ss:$16 sps:$4 sm:$0xff]  }
 0x360   :  { %1298 = vmatpush1.bf16.msra.mxu0 %v3906_v49  ;;  %1339 = vmatpush1.bf16.msra.mxu1 %v3919_v51 }
 0x361   :  { %1299 = vmatprep.subr.bf16.mxu0 %v3911_v50  ;;  %1340 = vmatprep.subr.bf16.mxu1 %v3934_v54 }
 0x364   :  { %1300 = vmatpush1.bf16.msra.mxu0 %v3928_v53  ;;  %1341 = vmatpush1.bf16.msra.mxu1 %v3946_v56  ;;  %v5340_v53 = vld [vmem:[#allocation9_spill] sm:$0xff] }
 0x365   :  { %1301 = vmatprep.subr.bf16.mxu0 %v3940_v55  ;;  %1342 = vmatprep.subr.bf16.mxu1 %v3951_v57 }
 0x368   :  { %1302 = vmatpush1.bf16.msra.mxu0 %v3956_v58  ;;  %1343 = vmatpush1.bf16.msra.mxu1 %v3968_v60  ;;  %v5341_v60 = vld [vmem:[#allocation10_spill] sm:$0xff] }
 0x369   :  { %1303 = vmatprep.subr.bf16.mxu0 %v3963_v59  ;;  %1344 = vmatprep.subr.bf16.mxu1 %v3986_v63  ;;  %v5342_v63 = vld [vmem:[#allocation8_spill] sm:$0xff] }
 0x36c   :  { %1304 = vmatpush1.bf16.msra.mxu0 %v3980_v62  ;;  %1345 = vmatpush1.bf16.msra.mxu1 %v3996_v1 }
 0x36d   :  { %1305 = vmatprep.subr.bf16.mxu0 %v3991_v0  ;;  %1346 = vmatprep.subr.bf16.mxu1 %v4002_v3 }
 0x370   :  { %1306 = vmatpush1.bf16.msra.mxu0 %v4009_v4  ;;  %1347 = vmatpush1.bf16.msra.mxu1 %v4020_v5 }
 0x371   :  { %1413 = vmatprep.subr.bf16.mxu0 %v4445_v44  ;;  %1454 = vmatprep.subr.bf16.mxu1 %v4451_v45 }
 0x413   :  { %v1203_v46 = vpop.f32.mrf.mxu0  ;;  %v1244_v47 = vpop.f32.mrf.mxu1 }
 0x414   :  { %v1251_v48 = vadd.f32 %v1203_v46, %v4125_v13  ;;  %v1253_v0 = vadd.f32 %v1244_v47, %v5342_v63  ;;  %v4588_v46 = vld [vmem:[%s5279_s2 + $0x4] ss:$16 sps:$4 sm:$0xff]   ;;  %v4594_v47 = vld [vmem:[%s5279_s2 + $0xc] ss:$16 sps:$4 sm:$0xff]  }
 0x415   :  { %v1205_v49 = vpop.f32.mrf.mxu0  ;;  %v1246_v50 = vpop.f32.mrf.mxu1 }
 0x416   :  { %v3083_v51 = vmul.f32 -1.442695, %v1251_v48  ;;  %v1252_v54 = vadd.f32 %v1205_v49, %v5340_v53  ;;  %v1254_v62 = vadd.f32 %v1246_v50, %v5341_v60  ;;  %v4600_v48 = vld [vmem:[%s5279_s2] ss:$16 sps:$4 sm:$0xff]  }
 0x417   :  { %v1207_v55 = vpop.f32.mrf.mxu0  ;;  %v1248_v56 = vpop.f32.mrf.mxu1 }
 0x418   :  { %3371 = vpow2.f32 %v3083_v51  ;;  %v3084_v57 = vmul.f32 -1.442695, %v1252_v54  ;;  %v3085_v1 = vmul.f32 -1.442695, %v1254_v62  ;;  %v5343_v51 = vld [vmem:[#allocation11_spill] sm:$0xff] }
 0x419   :  { %v1208_v58 = vpop.f32.mrf.mxu0  ;;  %v1249_v59 = vpop.f32.mrf.mxu1 }
 0x41a   :  { %3373 = vpow2.f32 %v3084_v57  ;;  %v5344_v57 = vld [vmem:[#allocation13_spill] sm:$0xff] }
 0x41b   :  { %3375 = vtanh.f32 %v1253_v0 }
 0x41c   :  { %3377 = vpow2.f32 %v3085_v1 }
 0x425   :  { %v3372_v3 = vpop.eup %3371 }
 0x426   :  { %v1258_v4 = vadd.f32 1.0, %v3372_v3  ;;  %v5346_v3 = vld [vmem:[#allocation12_spill] sm:$0xff] }
 0x427   :  { %v3374_v13 = vpop.eup %3373 }
 0x428   :  { %3379 = vrcp.f32 %v1258_v4  ;;  %v1264_v27 = vadd.f32 1.0, %v3374_v13  ;;  %v3376_v36 = vpop.eup %3375 }
 0x429   :  { %v3378_v37 = vpop.eup %3377 }
 0x42a   :  { %3381 = vrcp.f32 %v1264_v27  ;;  %v1271_v41 = vadd.f32 1.0, %v3378_v37 }
 0x42c   :  { %3383 = vrcp.f32 %v1271_v41 }
 0x435   :  { %v3380_v38 = vpop.eup %3379 }
 0x436   :  { %v1275_v39 = vmul.f32 %v3380_v38, %v3376_v36 }
 0x437   :  { %v3382_v40 = vpop.eup %3381 }
 0x438   :  { %v1274_v42 = vmul.f32 %v3382_v40, %v4372_v10  ;;  %v4558_v10 = vld [vmem:[%s5279_s2 + $0x48] ss:$16 sps:$4 sm:$0xff]  }
 0x439   :  { %v3384_v15 = vpop.eup %3383 }
 0x43a   :  { %v4459_v8 = vadd.f32 %v1275_v39, %v1274_v42 }
 0x43c   :  { %3385 = vtanh.f32 %v4459_v8 }
 0x449   :  { %v3386_v31 = vpop.eup %3385 }
 0x44a   :  { %v1278_v30 = vmul.f32 %v3386_v31, %v3384_v15 }
 0x44c   :  { %v1290_v20 = vpack.c.bf16 %v1278_v30, %v1278_v30 }
 0x44e   :  { %1324 = vmatmul.mubr.bf16.vlgmr.msra.gmra.mxu0 %v1290_v20  ;;  %1365 = vmatmul.mubr.bf16.vlgmr.msra.gmra.mxu1 %v1290_v20 }
 0x44f   :  { %1414 = vmatpush1.bf16.msra.mxu0 %v4378_v17  ;;  %1455 = vmatpush1.bf16.msra.mxu1 %v4384_v12 }
 0x450   :  { %1415 = vmatprep.subr.bf16.mxu0 %v4390_v16  ;;  %1456 = vmatprep.subr.bf16.mxu1 %v4396_v35 }
 0x451   :  { %1445 = vmatprep.mubr.bf16.mxu0 %v5339_v26  ;;  %1486 = vmatprep.mubr.bf16.mxu1 %v5339_v26 }
 0x453   :  { %1416 = vmatpush1.bf16.msra.mxu0 %v4404_v29  ;;  %1457 = vmatpush1.bf16.msra.mxu1 %v4410_v23 }
 0x454   :  { %1417 = vmatprep.subr.bf16.mxu0 %v4416_v21  ;;  %1458 = vmatprep.subr.bf16.mxu1 %v4474_v33 }
 0x457   :  { %1418 = vmatpush1.bf16.msra.mxu0 %v4480_v34  ;;  %1459 = vmatpush1.bf16.msra.mxu1 %v4486_v14 }
 0x458   :  { %1419 = vmatprep.subr.bf16.mxu0 %v4492_v25  ;;  %1460 = vmatprep.subr.bf16.mxu1 %v4498_v11 }
 0x45b   :  { %1420 = vmatpush1.bf16.msra.mxu0 %v4504_v61  ;;  %1461 = vmatpush1.bf16.msra.mxu1 %v4510_v7 }
 0x45c   :  { %1421 = vmatprep.subr.bf16.mxu0 %v4516_v9  ;;  %1462 = vmatprep.subr.bf16.mxu1 %v4522_v52 }
 0x45f   :  { %1422 = vmatpush1.bf16.msra.mxu0 %v4528_v22  ;;  %1463 = vmatpush1.bf16.msra.mxu1 %v4534_v24 }
 0x460   :  { %1423 = vmatprep.subr.bf16.mxu0 %v4540_v28  ;;  %1464 = vmatprep.subr.bf16.mxu1 %v4546_v2 }
 0x463   :  { %1424 = vmatpush1.bf16.msra.mxu0 %v4552_v32  ;;  %1465 = vmatpush1.bf16.msra.mxu1 %v4558_v10 }
 0x464   :  { %1425 = vmatprep.subr.bf16.mxu0 %v4564_v6  ;;  %1466 = vmatprep.subr.bf16.mxu1 %v4570_v18 }
 0x467   :  { %1426 = vmatpush1.bf16.msra.mxu0 %v4576_v19  ;;  %1467 = vmatpush1.bf16.msra.mxu1 %v4582_v43 }
 0x468   :  { %1427 = vmatprep.subr.bf16.mxu0 %v4588_v46  ;;  %1468 = vmatprep.subr.bf16.mxu1 %v4594_v47 }
 0x46b   :  { %1428 = vmatpush1.bf16.msra.mxu0 %v4600_v48  ;;  %1469 = vmatpush1.bf16.msra.mxu1 %v4020_v5  ;;  %v5345_v5 = vld [vmem:[#allocation14_spill] sm:$0xff] }
 0x46c   :  { %1535 = vmatprep.subr.bf16.mxu0 %v4445_v44  ;;  %1576 = vmatprep.subr.bf16.mxu1 %v4451_v45 }
 0x50e   :  { %v1325_v49 = vpop.f32.mrf.mxu0  ;;  %v1366_v50 = vpop.f32.mrf.mxu1 }
 0x50f   :  { %v1373_v53 = vadd.f32 %v1325_v49, %v5343_v51  ;;  %v1375_v4 = vadd.f32 %v1366_v50, %v5346_v3 }
 0x510   :  { %v1327_v54 = vpop.f32.mrf.mxu0  ;;  %v1368_v55 = vpop.f32.mrf.mxu1 }
 0x511   :  { %v3086_v56 = vmul.f32 -1.442695, %v1373_v53  ;;  %v1374_v58 = vadd.f32 %v1327_v54, %v5344_v57  ;;  %v1376_v1 = vadd.f32 %v1368_v55, %v5345_v5 }
 0x512   :  { %v1329_v59 = vpop.f32.mrf.mxu0  ;;  %v1370_v60 = vpop.f32.mrf.mxu1 }
 0x513   :  { %3387 = vpow2.f32 %v3086_v56  ;;  %v3087_v62 = vmul.f32 -1.442695, %v1374_v58  ;;  %v3088_v13 = vmul.f32 -1.442695, %v1376_v1  ;;  %v5347_v56 = vld [vmem:[#allocation15_spill] sm:$0xff] }
 0x514   :  { %v1330_v63 = vpop.f32.mrf.mxu0  ;;  %v1371_v0 = vpop.f32.mrf.mxu1 }
 0x515   :  { %3389 = vpow2.f32 %v3087_v62  ;;  %v5348_v62 = vld [vmem:[#allocation17_spill] sm:$0xff] }
 0x516   :  { %3391 = vtanh.f32 %v1375_v4 }
 0x517   :  { %3393 = vpow2.f32 %v3088_v13  ;;  %v5349_v13 = vld [vmem:[#allocation18_spill] sm:$0xff] }
 0x520   :  { %v3388_v27 = vpop.eup %3387 }
 0x521   :  { %v1380_v36 = vadd.f32 1.0, %v3388_v27 }
 0x522   :  { %v3390_v37 = vpop.eup %3389 }
 0x523   :  { %3395 = vrcp.f32 %v1380_v36  ;;  %v1386_v38 = vadd.f32 1.0, %v3390_v37  ;;  %v3392_v39 = vpop.eup %3391  ;;  %v5350_v36 = vld [vmem:[#allocation16_spill] sm:$0xff] }
 0x524   :  { %v3394_v40 = vpop.eup %3393 }
 0x525   :  { %3397 = vrcp.f32 %v1386_v38  ;;  %v1393_v31 = vadd.f32 1.0, %v3394_v40 }
 0x527   :  { %3399 = vrcp.f32 %v1393_v31 }
 0x530   :  { %v3396_v41 = vpop.eup %3395 }
 0x531   :  { %v1397_v42 = vmul.f32 %v3396_v41, %v3392_v39 }
 0x532   :  { %v3398_v15 = vpop.eup %3397 }
 0x533   :  { %v1396_v30 = vmul.f32 %v3398_v15, %v4459_v8  ;;  %v4648_v8 = vld [vmem:[%s5279_s2 + $0x8] ss:$16 sps:$4 sm:$0xff]  }
 0x534   :  { %v3400_v49 = vpop.eup %3399 }
 0x535   :  { %v4611_v20 = vadd.f32 %v1397_v42, %v1396_v30 }
 0x537   :  { %3401 = vtanh.f32 %v4611_v20 }
 0x544   :  { %v3402_v50 = vpop.eup %3401 }
 0x545   :  { %v1400_v51 = vmul.f32 %v3402_v50, %v3400_v49 }
 0x547   :  { %v1412_v53 = vpack.c.bf16 %v1400_v51, %v1400_v51 }
 0x549   :  { %1446 = vmatmul.mubr.bf16.vlgmr.msra.gmra.mxu0 %v1412_v53  ;;  %1487 = vmatmul.mubr.bf16.vlgmr.msra.gmra.mxu1 %v1412_v53 }
 0x54a   :  { %1536 = vmatpush1.bf16.msra.mxu0 %v4378_v17  ;;  %1577 = vmatpush1.bf16.msra.mxu1 %v4384_v12 }
 0x54b   :  { %1537 = vmatprep.subr.bf16.mxu0 %v4390_v16  ;;  %1578 = vmatprep.subr.bf16.mxu1 %v4396_v35 }
 0x54c   :  { %1567 = vmatprep.mubr.bf16.mxu0 %v5339_v26  ;;  %1608 = vmatprep.mubr.bf16.mxu1 %v5339_v26 }
 0x54e   :  { %1538 = vmatpush1.bf16.msra.mxu0 %v4404_v29  ;;  %1579 = vmatpush1.bf16.msra.mxu1 %v4410_v23 }
 0x54f   :  { %1539 = vmatprep.subr.bf16.mxu0 %v4416_v21  ;;  %1580 = vmatprep.subr.bf16.mxu1 %v4474_v33 }
 0x552   :  { %1540 = vmatpush1.bf16.msra.mxu0 %v4480_v34  ;;  %1581 = vmatpush1.bf16.msra.mxu1 %v4486_v14 }
 0x553   :  { %1541 = vmatprep.subr.bf16.mxu0 %v4492_v25  ;;  %1582 = vmatprep.subr.bf16.mxu1 %v4498_v11 }
 0x556   :  { %1542 = vmatpush1.bf16.msra.mxu0 %v4504_v61  ;;  %1583 = vmatpush1.bf16.msra.mxu1 %v4510_v7 }
 0x557   :  { %1543 = vmatprep.subr.bf16.mxu0 %v4516_v9  ;;  %1584 = vmatprep.subr.bf16.mxu1 %v4522_v52 }
 0x55a   :  { %1544 = vmatpush1.bf16.msra.mxu0 %v4528_v22  ;;  %1585 = vmatpush1.bf16.msra.mxu1 %v4534_v24 }
 0x55b   :  { %1545 = vmatprep.subr.bf16.mxu0 %v4540_v28  ;;  %1586 = vmatprep.subr.bf16.mxu1 %v4546_v2 }
 0x55e   :  { %1546 = vmatpush1.bf16.msra.mxu0 %v4552_v32  ;;  %1587 = vmatpush1.bf16.msra.mxu1 %v4558_v10 }
 0x55f   :  { %1547 = vmatprep.subr.bf16.mxu0 %v4564_v6  ;;  %1588 = vmatprep.subr.bf16.mxu1 %v4570_v18 }
 0x562   :  { %1548 = vmatpush1.bf16.msra.mxu0 %v4576_v19  ;;  %1589 = vmatpush1.bf16.msra.mxu1 %v4582_v43 }
 0x563   :  { %1549 = vmatprep.subr.bf16.mxu0 %v4588_v46  ;;  %1590 = vmatprep.subr.bf16.mxu1 %v4594_v47 }
 0x566   :  { %1550 = vmatpush1.bf16.msra.mxu0 %v4600_v48  ;;  %1591 = vmatpush1.bf16.msra.mxu1 %v4648_v8 }
 0x567   :  { %1657 = vmatprep.subr.bf16.mxu0 %v4445_v44  ;;  %1698 = vmatprep.subr.bf16.mxu1 %v4451_v45 }
 0x609   :  { %v1447_v54 = vpop.f32.mrf.mxu0  ;;  %v1488_v55 = vpop.f32.mrf.mxu1 }
 0x60a   :  { %v1495_v57 = vadd.f32 %v1447_v54, %v5347_v56  ;;  %v1497_v37 = vadd.f32 %v1488_v55, %v5350_v36 }
 0x60b   :  { %v1449_v58 = vpop.f32.mrf.mxu0  ;;  %v1490_v59 = vpop.f32.mrf.mxu1 }
 0x60c   :  { %v3089_v60 = vmul.f32 -1.442695, %v1495_v57  ;;  %v1496_v63 = vadd.f32 %v1449_v58, %v5348_v62  ;;  %v1498_v27 = vadd.f32 %v1490_v59, %v5349_v13 }
 0x60d   :  { %v1451_v0 = vpop.f32.mrf.mxu0  ;;  %v1492_v5 = vpop.f32.mrf.mxu1 }
 0x60e   :  { %3403 = vpow2.f32 %v3089_v60  ;;  %v3090_v1 = vmul.f32 -1.442695, %v1496_v63  ;;  %v3091_v38 = vmul.f32 -1.442695, %v1498_v27  ;;  %v5351_v60 = vld [vmem:[#allocation19_spill] sm:$0xff] }
 0x60f   :  { %v1452_v3 = vpop.f32.mrf.mxu0  ;;  %v1493_v4 = vpop.f32.mrf.mxu1 }
 0x610   :  { %3405 = vpow2.f32 %v3090_v1  ;;  %v5352_v1 = vld [vmem:[#allocation21_spill] sm:$0xff] }
 0x611   :  { %3407 = vtanh.f32 %v1497_v37 }
 0x612   :  { %3409 = vpow2.f32 %v3091_v38  ;;  %v5353_v38 = vld [vmem:[#allocation22_spill] sm:$0xff] }
 0x61b   :  { %v3404_v39 = vpop.eup %3403 }
 0x61c   :  { %v1502_v40 = vadd.f32 1.0, %v3404_v39 }
 0x61d   :  { %v3406_v41 = vpop.eup %3405 }
 0x61e   :  { %3411 = vrcp.f32 %v1502_v40  ;;  %v1508_v42 = vadd.f32 1.0, %v3406_v41  ;;  %v3408_v15 = vpop.eup %3407  ;;  %v5354_v40 = vld [vmem:[#allocation20_spill] sm:$0xff] }
 0x61f   :  { %v3410_v31 = vpop.eup %3409 }
 0x620   :  { %3413 = vrcp.f32 %v1508_v42  ;;  %v1515_v51 = vadd.f32 1.0, %v3410_v31 }
 0x622   :  { %3415 = vrcp.f32 %v1515_v51 }
 0x62b   :  { %v3412_v30 = vpop.eup %3411 }
 0x62c   :  { %v1519_v49 = vmul.f32 %v3412_v30, %v3408_v15 }
 0x62d   :  { %v3414_v50 = vpop.eup %3413 }
 0x62e   :  { %v1518_v53 = vmul.f32 %v3414_v50, %v4611_v20 }
 0x62f   :  { %v3416_v55 = vpop.eup %3415 }
 0x630   :  { %v4658_v54 = vadd.f32 %v1519_v49, %v1518_v53 }
 0x632   :  { %3417 = vtanh.f32 %v4658_v54 }
 0x63f   :  { %v3418_v56 = vpop.eup %3417 }
 0x640   :  { %v1522_v57 = vmul.f32 %v3418_v56, %v3416_v55 }
 0x642   :  { %v1534_v58 = vpack.c.bf16 %v1522_v57, %v1522_v57 }
 0x644   :  { %1568 = vmatmul.mubr.bf16.vlgmr.msra.gmra.mxu0 %v1534_v58  ;;  %1609 = vmatmul.mubr.bf16.vlgmr.msra.gmra.mxu1 %v1534_v58 }
 0x645   :  { %1658 = vmatpush1.bf16.msra.mxu0 %v4378_v17  ;;  %1699 = vmatpush1.bf16.msra.mxu1 %v4384_v12 }
 0x646   :  { %1659 = vmatprep.subr.bf16.mxu0 %v4390_v16  ;;  %1700 = vmatprep.subr.bf16.mxu1 %v4396_v35 }
 0x647   :  { %1689 = vmatprep.mubr.bf16.mxu0 %v5339_v26  ;;  %1730 = vmatprep.mubr.bf16.mxu1 %v5339_v26 }
 0x649   :  { %1660 = vmatpush1.bf16.msra.mxu0 %v4404_v29  ;;  %1701 = vmatpush1.bf16.msra.mxu1 %v4410_v23 }
 0x64a   :  { %1661 = vmatprep.subr.bf16.mxu0 %v4416_v21  ;;  %1702 = vmatprep.subr.bf16.mxu1 %v4474_v33 }
 0x64d   :  { %1662 = vmatpush1.bf16.msra.mxu0 %v4480_v34  ;;  %1703 = vmatpush1.bf16.msra.mxu1 %v4486_v14 }
 0x64e   :  { %1663 = vmatprep.subr.bf16.mxu0 %v4492_v25  ;;  %1704 = vmatprep.subr.bf16.mxu1 %v4498_v11 }
 0x651   :  { %1664 = vmatpush1.bf16.msra.mxu0 %v4504_v61  ;;  %1705 = vmatpush1.bf16.msra.mxu1 %v4510_v7 }
 0x652   :  { %1665 = vmatprep.subr.bf16.mxu0 %v4516_v9  ;;  %1706 = vmatprep.subr.bf16.mxu1 %v4522_v52 }
 0x655   :  { %1666 = vmatpush1.bf16.msra.mxu0 %v4528_v22  ;;  %1707 = vmatpush1.bf16.msra.mxu1 %v4534_v24 }
 0x656   :  { %1667 = vmatprep.subr.bf16.mxu0 %v4540_v28  ;;  %1708 = vmatprep.subr.bf16.mxu1 %v4546_v2 }
 0x659   :  { %1668 = vmatpush1.bf16.msra.mxu0 %v4552_v32  ;;  %1709 = vmatpush1.bf16.msra.mxu1 %v4558_v10 }
 0x65a   :  { %1669 = vmatprep.subr.bf16.mxu0 %v4564_v6  ;;  %1710 = vmatprep.subr.bf16.mxu1 %v4570_v18 }
 0x65d   :  { %1670 = vmatpush1.bf16.msra.mxu0 %v4576_v19  ;;  %1711 = vmatpush1.bf16.msra.mxu1 %v4582_v43 }
 0x65e   :  { %1671 = vmatprep.subr.bf16.mxu0 %v4588_v46  ;;  %1712 = vmatprep.subr.bf16.mxu1 %v4594_v47 }
 0x661   :  { %1672 = vmatpush1.bf16.msra.mxu0 %v4600_v48  ;;  %1713 = vmatpush1.bf16.msra.mxu1 %v4648_v8 }
 0x662   :  { %1779 = vmatprep.subr.bf16.mxu0 %v4445_v44  ;;  %1820 = vmatprep.subr.bf16.mxu1 %v4451_v45 }
 0x704   :  { %v1569_v20 = vpop.f32.mrf.mxu0  ;;  %v1610_v59 = vpop.f32.mrf.mxu1 }
 0x705   :  { %v1617_v62 = vadd.f32 %v1569_v20, %v5351_v60  ;;  %v1619_v41 = vadd.f32 %v1610_v59, %v5354_v40 }
 0x706   :  { %v1571_v63 = vpop.f32.mrf.mxu0  ;;  %v1612_v0 = vpop.f32.mrf.mxu1 }
 0x707   :  { %v3092_v5 = vmul.f32 -1.442695, %v1617_v62  ;;  %v1618_v3 = vadd.f32 %v1571_v63, %v5352_v1  ;;  %v1620_v39 = vadd.f32 %v1612_v0, %v5353_v38 }
 0x708   :  { %v1573_v4 = vpop.f32.mrf.mxu0  ;;  %v1614_v13 = vpop.f32.mrf.mxu1 }
 0x709   :  { %3419 = vpow2.f32 %v3092_v5  ;;  %v3093_v27 = vmul.f32 -1.442695, %v1618_v3  ;;  %v3094_v42 = vmul.f32 -1.442695, %v1620_v39  ;;  %v5355_v5 = vld [vmem:[#allocation23_spill] sm:$0xff] }
 0x70a   :  { %v1574_v36 = vpop.f32.mrf.mxu0  ;;  %v1615_v37 = vpop.f32.mrf.mxu1 }
 0x70b   :  { %3421 = vpow2.f32 %v3093_v27  ;;  %v5356_v27 = vld [vmem:[#allocation25_spill] sm:$0xff] }
 0x70c   :  { %3423 = vtanh.f32 %v1619_v41 }
 0x70d   :  { %3425 = vpow2.f32 %v3094_v42  ;;  %v5357_v42 = vld [vmem:[#allocation26_spill] sm:$0xff] }
 0x716   :  { %v3420_v15 = vpop.eup %3419 }
 0x717   :  { %v1624_v31 = vadd.f32 1.0, %v3420_v15 }
 0x718   :  { %v3422_v30 = vpop.eup %3421 }
 0x719   :  { %3427 = vrcp.f32 %v1624_v31  ;;  %v1630_v49 = vadd.f32 1.0, %v3422_v30  ;;  %v3424_v50 = vpop.eup %3423  ;;  %v5358_v31 = vld [vmem:[#allocation24_spill] sm:$0xff] }
 0x71a   :  { %v3426_v51 = vpop.eup %3425 }
 0x71b   :  { %3429 = vrcp.f32 %v1630_v49  ;;  %v1637_v57 = vadd.f32 1.0, %v3426_v51 }
 0x71d   :  { %3431 = vrcp.f32 %v1637_v57 }
 0x726   :  { %v3428_v53 = vpop.eup %3427 }
 0x727   :  { %v1641_v55 = vmul.f32 %v3428_v53, %v3424_v50 }
 0x728   :  { %v3430_v56 = vpop.eup %3429 }
 0x729   :  { %v1640_v58 = vmul.f32 %v3430_v56, %v4658_v54 }
 0x72a   :  { %v3432_v59 = vpop.eup %3431 }
 0x72b   :  { %v4700_v20 = vadd.f32 %v1641_v55, %v1640_v58 }
 0x72d   :  { %3433 = vtanh.f32 %v4700_v20 }
 0x73a   :  { %v3434_v60 = vpop.eup %3433 }
 0x73b   :  { %v1644_v62 = vmul.f32 %v3434_v60, %v3432_v59 }
 0x73d   :  { %v1656_v63 = vpack.c.bf16 %v1644_v62, %v1644_v62 }
 0x73f   :  { %1690 = vmatmul.mubr.bf16.vlgmr.msra.gmra.mxu0 %v1656_v63  ;;  %1731 = vmatmul.mubr.bf16.vlgmr.msra.gmra.mxu1 %v1656_v63 }
 0x740   :  { %1780 = vmatpush1.bf16.msra.mxu0 %v4378_v17  ;;  %1821 = vmatpush1.bf16.msra.mxu1 %v4384_v12 }
 0x741   :  { %1781 = vmatprep.subr.bf16.mxu0 %v4390_v16  ;;  %1822 = vmatprep.subr.bf16.mxu1 %v4396_v35 }
 0x742   :  { %1811 = vmatprep.mubr.bf16.mxu0 %v5339_v26  ;;  %1852 = vmatprep.mubr.bf16.mxu1 %v5339_v26 }
 0x744   :  { %1782 = vmatpush1.bf16.msra.mxu0 %v4404_v29  ;;  %1823 = vmatpush1.bf16.msra.mxu1 %v4410_v23 }
 0x745   :  { %1783 = vmatprep.subr.bf16.mxu0 %v4416_v21  ;;  %1824 = vmatprep.subr.bf16.mxu1 %v4474_v33 }
 0x748   :  { %1784 = vmatpush1.bf16.msra.mxu0 %v4480_v34  ;;  %1825 = vmatpush1.bf16.msra.mxu1 %v4486_v14 }
 0x749   :  { %1785 = vmatprep.subr.bf16.mxu0 %v4492_v25  ;;  %1826 = vmatprep.subr.bf16.mxu1 %v4498_v11 }
 0x74c   :  { %1786 = vmatpush1.bf16.msra.mxu0 %v4504_v61  ;;  %1827 = vmatpush1.bf16.msra.mxu1 %v4510_v7 }
 0x74d   :  { %1787 = vmatprep.subr.bf16.mxu0 %v4516_v9  ;;  %1828 = vmatprep.subr.bf16.mxu1 %v4522_v52 }
 0x750   :  { %1788 = vmatpush1.bf16.msra.mxu0 %v4528_v22  ;;  %1829 = vmatpush1.bf16.msra.mxu1 %v4534_v24 }
 0x751   :  { %1789 = vmatprep.subr.bf16.mxu0 %v4540_v28  ;;  %1830 = vmatprep.subr.bf16.mxu1 %v4546_v2 }
 0x754   :  { %1790 = vmatpush1.bf16.msra.mxu0 %v4552_v32  ;;  %1831 = vmatpush1.bf16.msra.mxu1 %v4558_v10 }
 0x755   :  { %1791 = vmatprep.subr.bf16.mxu0 %v4564_v6  ;;  %1832 = vmatprep.subr.bf16.mxu1 %v4570_v18 }
 0x758   :  { %1792 = vmatpush1.bf16.msra.mxu0 %v4576_v19  ;;  %1833 = vmatpush1.bf16.msra.mxu1 %v4582_v43 }
 0x759   :  { %1793 = vmatprep.subr.bf16.mxu0 %v4588_v46  ;;  %1834 = vmatprep.subr.bf16.mxu1 %v4594_v47 }
 0x75c   :  { %1794 = vmatpush1.bf16.msra.mxu0 %v4600_v48  ;;  %1835 = vmatpush1.bf16.msra.mxu1 %v4648_v8 }
 0x75d   :  { %1901 = vmatprep.subr.bf16.mxu0 %v4445_v44  ;;  %1942 = vmatprep.subr.bf16.mxu1 %v4451_v45 }
 0x7ff   :  { %v1691_v54 = vpop.f32.mrf.mxu0  ;;  %v1732_v0 = vpop.f32.mrf.mxu1 }
 0x800   :  { %v1739_v1 = vadd.f32 %v1691_v54, %v5355_v5  ;;  %v1741_v30 = vadd.f32 %v1732_v0, %v5358_v31 }
 0x801   :  { %v1693_v3 = vpop.f32.mrf.mxu0  ;;  %v1734_v4 = vpop.f32.mrf.mxu1 }
 0x802   :  { %v3095_v13 = vmul.f32 -1.442695, %v1739_v1  ;;  %v1740_v36 = vadd.f32 %v1693_v3, %v5356_v27  ;;  %v1742_v15 = vadd.f32 %v1734_v4, %v5357_v42 }
 0x803   :  { %v1695_v37 = vpop.f32.mrf.mxu0  ;;  %v1736_v38 = vpop.f32.mrf.mxu1 }
 0x804   :  { %3435 = vpow2.f32 %v3095_v13  ;;  %v3096_v39 = vmul.f32 -1.442695, %v1740_v36  ;;  %v3097_v49 = vmul.f32 -1.442695, %v1742_v15  ;;  %v5359_v13 = vld [vmem:[#allocation27_spill] sm:$0xff] }
 0x805   :  { %v1696_v40 = vpop.f32.mrf.mxu0  ;;  %v1737_v41 = vpop.f32.mrf.mxu1 }
 0x806   :  { %3437 = vpow2.f32 %v3096_v39  ;;  %v5360_v39 = vld [vmem:[#allocation29_spill] sm:$0xff] }
 0x807   :  { %3439 = vtanh.f32 %v1741_v30 }
 0x808   :  { %3441 = vpow2.f32 %v3097_v49  ;;  %v5361_v49 = vld [vmem:[#allocation30_spill] sm:$0xff] }
 0x811   :  { %v3436_v50 = vpop.eup %3435 }
 0x812   :  { %v1746_v51 = vadd.f32 1.0, %v3436_v50 }
 0x813   :  { %v3438_v53 = vpop.eup %3437 }
 0x814   :  { %3443 = vrcp.f32 %v1746_v51  ;;  %v1752_v55 = vadd.f32 1.0, %v3438_v53  ;;  %v3440_v56 = vpop.eup %3439  ;;  %v5362_v51 = vld [vmem:[#allocation28_spill] sm:$0xff] }
 0x815   :  { %v3442_v57 = vpop.eup %3441 }
 0x816   :  { %3445 = vrcp.f32 %v1752_v55  ;;  %v1759_v62 = vadd.f32 1.0, %v3442_v57 }
 0x818   :  { %3447 = vrcp.f32 %v1759_v62 }
 0x821   :  { %v3444_v58 = vpop.eup %3443 }
 0x822   :  { %v1763_v59 = vmul.f32 %v3444_v58, %v3440_v56 }
 0x823   :  { %v3446_v60 = vpop.eup %3445 }
 0x824   :  { %v1762_v63 = vmul.f32 %v3446_v60, %v4700_v20 }
 0x825   :  { %v3448_v0 = vpop.eup %3447 }
 0x826   :  { %v4742_v54 = vadd.f32 %v1763_v59, %v1762_v63 }
 0x828   :  { %3449 = vtanh.f32 %v4742_v54 }
 0x835   :  { %v3450_v5 = vpop.eup %3449 }
 0x836   :  { %v1766_v1 = vmul.f32 %v3450_v5, %v3448_v0 }
 0x838   :  { %v1778_v3 = vpack.c.bf16 %v1766_v1, %v1766_v1 }
 0x83a   :  { %1812 = vmatmul.mubr.bf16.vlgmr.msra.gmra.mxu0 %v1778_v3  ;;  %1853 = vmatmul.mubr.bf16.vlgmr.msra.gmra.mxu1 %v1778_v3 }
 0x83b   :  { %1902 = vmatpush1.bf16.msra.mxu0 %v4378_v17  ;;  %1943 = vmatpush1.bf16.msra.mxu1 %v4384_v12 }
 0x83c   :  { %1903 = vmatprep.subr.bf16.mxu0 %v4390_v16  ;;  %1944 = vmatprep.subr.bf16.mxu1 %v4396_v35 }
 0x83d   :  { %1933 = vmatprep.mubr.bf16.mxu0 %v5339_v26  ;;  %1974 = vmatprep.mubr.bf16.mxu1 %v5339_v26 }
 0x83f   :  { %1904 = vmatpush1.bf16.msra.mxu0 %v4404_v29  ;;  %1945 = vmatpush1.bf16.msra.mxu1 %v4410_v23 }
 0x840   :  { %1905 = vmatprep.subr.bf16.mxu0 %v4416_v21  ;;  %1946 = vmatprep.subr.bf16.mxu1 %v4474_v33 }
 0x843   :  { %1906 = vmatpush1.bf16.msra.mxu0 %v4480_v34  ;;  %1947 = vmatpush1.bf16.msra.mxu1 %v4486_v14 }
 0x844   :  { %1907 = vmatprep.subr.bf16.mxu0 %v4492_v25  ;;  %1948 = vmatprep.subr.bf16.mxu1 %v4498_v11 }
 0x847   :  { %1908 = vmatpush1.bf16.msra.mxu0 %v4504_v61  ;;  %1949 = vmatpush1.bf16.msra.mxu1 %v4510_v7 }
 0x848   :  { %1909 = vmatprep.subr.bf16.mxu0 %v4516_v9  ;;  %1950 = vmatprep.subr.bf16.mxu1 %v4522_v52 }
 0x84b   :  { %1910 = vmatpush1.bf16.msra.mxu0 %v4528_v22  ;;  %1951 = vmatpush1.bf16.msra.mxu1 %v4534_v24 }
 0x84c   :  { %1911 = vmatprep.subr.bf16.mxu0 %v4540_v28  ;;  %1952 = vmatprep.subr.bf16.mxu1 %v4546_v2 }
 0x84f   :  { %1912 = vmatpush1.bf16.msra.mxu0 %v4552_v32  ;;  %1953 = vmatpush1.bf16.msra.mxu1 %v4558_v10 }
 0x850   :  { %1913 = vmatprep.subr.bf16.mxu0 %v4564_v6  ;;  %1954 = vmatprep.subr.bf16.mxu1 %v4570_v18 }
 0x853   :  { %1914 = vmatpush1.bf16.msra.mxu0 %v4576_v19  ;;  %1955 = vmatpush1.bf16.msra.mxu1 %v4582_v43 }
 0x854   :  { %1915 = vmatprep.subr.bf16.mxu0 %v4588_v46  ;;  %1956 = vmatprep.subr.bf16.mxu1 %v4594_v47 }
 0x857   :  { %1916 = vmatpush1.bf16.msra.mxu0 %v4600_v48  ;;  %1957 = vmatpush1.bf16.msra.mxu1 %v4648_v8 }
 0x858   :  { %2023 = vmatprep.subr.bf16.mxu0 %v4445_v44  ;;  %2064 = vmatprep.subr.bf16.mxu1 %v4451_v45 }
 0x8fa   :  { %v1813_v20 = vpop.f32.mrf.mxu0  ;;  %v1854_v4 = vpop.f32.mrf.mxu1 }
 0x8fb   :  { %v1861_v27 = vadd.f32 %v1813_v20, %v5359_v13  ;;  %v1863_v53 = vadd.f32 %v1854_v4, %v5362_v51 }
 0x8fc   :  { %v1815_v36 = vpop.f32.mrf.mxu0  ;;  %v1856_v37 = vpop.f32.mrf.mxu1 }
 0x8fd   :  { %v3098_v38 = vmul.f32 -1.442695, %v1861_v27  ;;  %v1862_v40 = vadd.f32 %v1815_v36, %v5360_v39  ;;  %v1864_v50 = vadd.f32 %v1856_v37, %v5361_v49 }
 0x8fe   :  { %v1817_v41 = vpop.f32.mrf.mxu0  ;;  %v1858_v42 = vpop.f32.mrf.mxu1 }
 0x8ff   :  { %3451 = vpow2.f32 %v3098_v38  ;;  %v3099_v15 = vmul.f32 -1.442695, %v1862_v40  ;;  %v3100_v55 = vmul.f32 -1.442695, %v1864_v50 }
 0x900   :  { %v1818_v31 = vpop.f32.mrf.mxu0  ;;  %v1859_v30 = vpop.f32.mrf.mxu1 }
 0x901   :  { %3453 = vpow2.f32 %v3099_v15  ;;  %v5365_v15 = vld [vmem:[#allocation34_spill] sm:$0xff]  ;;  %v5366_v31 = vld [vmem:[#allocation32_spill] sm:$0xff] }
 0x902   :  { %3455 = vtanh.f32 %v1863_v53 }
 0x903   :  { %3457 = vpow2.f32 %v3100_v55 }
 0x90c   :  { %v3452_v56 = vpop.eup %3451 }
 0x90d   :  { %v1868_v57 = vadd.f32 1.0, %v3452_v56 }
 0x90e   :  { %v3454_v58 = vpop.eup %3453 }
 0x90f   :  { %3459 = vrcp.f32 %v1868_v57  ;;  %v1874_v59 = vadd.f32 1.0, %v3454_v58  ;;  %v3456_v60 = vpop.eup %3455 }
 0x910   :  { %v3458_v62 = vpop.eup %3457 }
 0x911   :  { %3461 = vrcp.f32 %v1874_v59  ;;  %v1881_v1 = vadd.f32 1.0, %v3458_v62 }
 0x913   :  { %3463 = vrcp.f32 %v1881_v1 }
 0x91c   :  { %v3460_v63 = vpop.eup %3459 }
 0x91d   :  { %v1885_v0 = vmul.f32 %v3460_v63, %v3456_v60 }
 0x91e   :  { %v3462_v5 = vpop.eup %3461 }
 0x91f   :  { %v1884_v3 = vmul.f32 %v3462_v5, %v4742_v54  ;;  %v5364_v54 = vld [vmem:[#allocation33_spill] sm:$0xff] }
 0x920   :  { %v3464_v4 = vpop.eup %3463 }
 0x921   :  { %v4784_v20 = vadd.f32 %v1885_v0, %v1884_v3 }
 0x923   :  { %3465 = vtanh.f32 %v4784_v20 }
 0x930   :  { %v3466_v13 = vpop.eup %3465 }
 0x931   :  { %v1888_v27 = vmul.f32 %v3466_v13, %v3464_v4  ;;  %v4832_v4 = vld [vmem:[%s5279_s2 + $0xe0] ss:$16 sps:$4 sm:$0xff]   ;;  %v4844_v13 = vld [vmem:[%s5279_s2 + $0xc4] ss:$16 sps:$4 sm:$0xff]  }
 0x933   :  { %v1900_v36 = vpack.c.bf16 %v1888_v27, %v1888_v27  ;;  %v4850_v27 = vld [vmem:[%s5279_s2 + $0xcc] ss:$16 sps:$4 sm:$0xff]  }
 0x935   :  { %1934 = vmatmul.mubr.bf16.vlgmr.msra.gmra.mxu0 %v1900_v36  ;;  %1975 = vmatmul.mubr.bf16.vlgmr.msra.gmra.mxu1 %v1900_v36  ;;  %v4858_v36 = vld [vmem:[%s5279_s2 + $0xc0] ss:$16 sps:$4 sm:$0xff]  }
 0x936   :  { %2024 = vmatpush1.bf16.msra.mxu0 %v4378_v17  ;;  %2065 = vmatpush1.bf16.msra.mxu1 %v4384_v12 }
 0x937   :  { %2025 = vmatprep.subr.bf16.mxu0 %v4390_v16  ;;  %2066 = vmatprep.subr.bf16.mxu1 %v4396_v35  ;;  %v5363_v16 = vld [vmem:[#allocation31_spill] sm:$0xff] }
 0x938   :  { %2055 = vmatprep.mubr.bf16.mxu0 %v5339_v26  ;;  %2096 = vmatprep.mubr.bf16.mxu1 %v5339_v26 }
 0x93a   :  { %2026 = vmatpush1.bf16.msra.mxu0 %v4404_v29  ;;  %2067 = vmatpush1.bf16.msra.mxu1 %v4410_v23 }
 0x93b   :  { %2027 = vmatprep.subr.bf16.mxu0 %v4416_v21  ;;  %2068 = vmatprep.subr.bf16.mxu1 %v4474_v33 }
 0x93e   :  { %2028 = vmatpush1.bf16.msra.mxu0 %v4480_v34  ;;  %2069 = vmatpush1.bf16.msra.mxu1 %v4486_v14 }
 0x93f   :  { %2029 = vmatprep.subr.bf16.mxu0 %v4492_v25  ;;  %2070 = vmatprep.subr.bf16.mxu1 %v4498_v11 }
 0x942   :  { %2030 = vmatpush1.bf16.msra.mxu0 %v4504_v61  ;;  %2071 = vmatpush1.bf16.msra.mxu1 %v4510_v7 }
 0x943   :  { %2031 = vmatprep.subr.bf16.mxu0 %v4516_v9  ;;  %2072 = vmatprep.subr.bf16.mxu1 %v4522_v52 }
 0x946   :  { %2032 = vmatpush1.bf16.msra.mxu0 %v4528_v22  ;;  %2073 = vmatpush1.bf16.msra.mxu1 %v4534_v24 }
 0x947   :  { %2033 = vmatprep.subr.bf16.mxu0 %v4540_v28  ;;  %2074 = vmatprep.subr.bf16.mxu1 %v4546_v2 }
 0x94a   :  { %2034 = vmatpush1.bf16.msra.mxu0 %v4552_v32  ;;  %2075 = vmatpush1.bf16.msra.mxu1 %v4558_v10 }
 0x94b   :  { %2035 = vmatprep.subr.bf16.mxu0 %v4564_v6  ;;  %2076 = vmatprep.subr.bf16.mxu1 %v4570_v18 }
 0x94e   :  { %2036 = vmatpush1.bf16.msra.mxu0 %v4576_v19  ;;  %2077 = vmatpush1.bf16.msra.mxu1 %v4582_v43 }
 0x94f   :  { %2037 = vmatprep.subr.bf16.mxu0 %v4588_v46  ;;  %2078 = vmatprep.subr.bf16.mxu1 %v4594_v47 }
 0x952   :  { %2038 = vmatpush1.bf16.msra.mxu0 %v4600_v48  ;;  %2079 = vmatpush1.bf16.msra.mxu1 %v4648_v8 }
 0x953   :  { %2145 = vmatprep.subr.bf16.mxu0 %v4445_v44  ;;  %2186 = vmatprep.subr.bf16.mxu1 %v4451_v45 }
 0x9f5   :  { %v1935_v17 = vpop.f32.mrf.mxu0  ;;  %v1976_v12 = vpop.f32.mrf.mxu1 }
 0x9f6   :  { %v1983_v35 = vadd.f32 %v1935_v17, %v5363_v16  ;;  %v1985_v45 = vadd.f32 %v1976_v12, %v5366_v31  ;;  %v4864_v17 = vld [vmem:[%s5279_s2 + $0xc8] ss:$16 sps:$4 sm:$0xff]   ;;  %v4870_v12 = vld [vmem:[%s5279_s2 + $0xa4] ss:$16 sps:$4 sm:$0xff]  }
 0x9f7   :  { %v1937_v29 = vpop.f32.mrf.mxu0  ;;  %v1978_v23 = vpop.f32.mrf.mxu1 }
 0x9f8   :  { %v3101_v21 = vmul.f32 -1.442695, %v1983_v35  ;;  %v1984_v37 = vadd.f32 %v1937_v29, %v5364_v54  ;;  %v1986_v44 = vadd.f32 %v1978_v23, %v5365_v15 }
 0x9f9   :  { %v1939_v38 = vpop.f32.mrf.mxu0  ;;  %v1980_v39 = vpop.f32.mrf.mxu1 }
 0x9fa   :  { %3467 = vpow2.f32 %v3101_v21  ;;  %v3102_v40 = vmul.f32 -1.442695, %v1984_v37  ;;  %v3103_v30 = vmul.f32 -1.442695, %v1986_v44 }
 0x9fb   :  { %v1940_v41 = vpop.f32.mrf.mxu0  ;;  %v1981_v42 = vpop.f32.mrf.mxu1 }
 0x9fc   :  { %3469 = vpow2.f32 %v3102_v40 }
 0x9fd   :  { %3471 = vtanh.f32 %v1985_v45  ;;  %v4928_v45 = vld [vmem:[%s5279_s2 + $0xac] ss:$16 sps:$4 sm:$0xff]  }
 0x9fe   :  { %3473 = vpow2.f32 %v3103_v30  ;;  %v4934_v30 = vld [vmem:[%s5279_s2 + $0xa0] ss:$16 sps:$4 sm:$0xff]  }
 0xa07   :  { %v3468_v49 = vpop.eup %3467 }
 0xa08   :  { %v1990_v50 = vadd.f32 1.0, %v3468_v49  ;;  %v4940_v49 = vld [vmem:[%s5279_s2 + $0xa8] ss:$16 sps:$4 sm:$0xff]  }
 0xa09   :  { %v3470_v51 = vpop.eup %3469 }
 0xa0a   :  { %3475 = vrcp.f32 %v1990_v50  ;;  %v1996_v53 = vadd.f32 1.0, %v3470_v51  ;;  %v3472_v55 = vpop.eup %3471  ;;  %v4946_v50 = vld [vmem:[%s5279_s2 + $0x84] ss:$16 sps:$4 sm:$0xff]   ;;  %v4952_v51 = vld [vmem:[%s5279_s2 + $0x8c] ss:$16 sps:$4 sm:$0xff]  }
 0xa0b   :  { %v3474_v56 = vpop.eup %3473 }
 0xa0c   :  { %3477 = vrcp.f32 %v1996_v53  ;;  %v2003_v60 = vadd.f32 1.0, %v3474_v56  ;;  %v4958_v53 = vld [vmem:[%s5279_s2 + $0x80] ss:$16 sps:$4 sm:$0xff]   ;;  %v4970_v56 = vld [vmem:[%s5279_s2 + $0x64] ss:$16 sps:$4 sm:$0xff]  }
 0xa0e   :  { %3479 = vrcp.f32 %v2003_v60  ;;  %v4994_v60 = vld [vmem:[%s5279_s2 + $0x44] ss:$16 sps:$4 sm:$0xff]  }
 0xa17   :  { %v3476_v57 = vpop.eup %3475 }
 0xa18   :  { %v2007_v58 = vmul.f32 %v3476_v57, %v3472_v55  ;;  %v4964_v55 = vld [vmem:[%s5279_s2 + $0x88] ss:$16 sps:$4 sm:$0xff]   ;;  %v4976_v57 = vld [vmem:[%s5279_s2 + $0x6c] ss:$16 sps:$4 sm:$0xff]  }
 0xa19   :  { %v3478_v59 = vpop.eup %3477 }
 0xa1a   :  { %v2006_v62 = vmul.f32 %v3478_v59, %v4784_v20  ;;  %v4838_v20 = vld [vmem:[%s5279_s2 + $0xe8] ss:$16 sps:$4 sm:$0xff]  }
 0xa1b   :  { %v3480_v0 = vpop.eup %3479  ;;  %v4988_v59 = vld [vmem:[%s5279_s2 + $0x68] ss:$16 sps:$4 sm:$0xff]  }
 0xa1c   :  { %v4826_v63 = vadd.f32 %v2007_v58, %v2006_v62  ;;  %v4982_v58 = vld [vmem:[%s5279_s2 + $0x60] ss:$16 sps:$4 sm:$0xff]   ;;  %v5000_v62 = vld [vmem:[%s5279_s2 + $0x4c] ss:$16 sps:$4 sm:$0xff]  }
 0xa1e   :  { %3481 = vtanh.f32 %v4826_v63 }
 0xa2b   :  { %v3482_v5 = vpop.eup %3481 }
 0xa2c   :  { %v2010_v1 = vmul.f32 %v3482_v5, %v3480_v0  ;;  %v5012_v0 = vld [vmem:[%s5279_s2 + $0x48] ss:$16 sps:$4 sm:$0xff]   ;;  %v5018_v5 = vld [vmem:[%s5279_s2 + $0x24] ss:$16 sps:$4 sm:$0xff]  }
 0xa2e   :  { %v2022_v3 = vpack.c.bf16 %v2010_v1, %v2010_v1  ;;  %v5024_v1 = vld [vmem:[%s5279_s2 + $0x2c] ss:$16 sps:$4 sm:$0xff]  }
 0xa30   :  { %2056 = vmatmul.mubr.bf16.vlgmr.msra.gmra.mxu0 %v2022_v3  ;;  %2097 = vmatmul.mubr.bf16.vlgmr.msra.gmra.mxu1 %v2022_v3  ;;  %v5030_v3 = vld [vmem:[%s5279_s2 + $0x20] ss:$16 sps:$4 sm:$0xff]  }
 0xa31   :  { %2146 = vmatpush1.bf16.msra.mxu0 %v4832_v4  ;;  %2187 = vmatpush1.bf16.msra.mxu1 %v4838_v20 }
 0xa32   :  { %2147 = vmatprep.subr.bf16.mxu0 %v4844_v13  ;;  %2188 = vmatprep.subr.bf16.mxu1 %v4850_v27 }
 0xa33   :  { %2177 = vmatprep.mubr.bf16.mxu0 %v5339_v26  ;;  %2218 = vmatprep.mubr.bf16.mxu1 %v5339_v26 }
 0xa35   :  { %2148 = vmatpush1.bf16.msra.mxu0 %v4858_v36  ;;  %2189 = vmatpush1.bf16.msra.mxu1 %v4864_v17 }
 0xa36   :  { %2149 = vmatprep.subr.bf16.mxu0 %v4870_v12  ;;  %2190 = vmatprep.subr.bf16.mxu1 %v4474_v33  ;;  %v4899_v33 = vld [vmem:[%s5279_s2 + $0xe4] ss:$16 sps:$4 sm:$0xff]  }
 0xa39   :  { %2150 = vmatpush1.bf16.msra.mxu0 %v4480_v34  ;;  %2191 = vmatpush1.bf16.msra.mxu1 %v4486_v14  ;;  %v4905_v34 = vld [vmem:[%s5279_s2 + $0xec] ss:$16 sps:$4 sm:$0xff]  }
 0xa3a   :  { %2151 = vmatprep.subr.bf16.mxu0 %v4492_v25  ;;  %2192 = vmatprep.subr.bf16.mxu1 %v4498_v11  ;;  %v5367_v11 = vld [vmem:[#allocation35_spill] sm:$0xff] }
 0xa3d   :  { %2152 = vmatpush1.bf16.msra.mxu0 %v4504_v61  ;;  %2193 = vmatpush1.bf16.msra.mxu1 %v4510_v7 }
 0xa3e   :  { %2153 = vmatprep.subr.bf16.mxu0 %v4516_v9  ;;  %2194 = vmatprep.subr.bf16.mxu1 %v4522_v52 }
 0xa41   :  { %2154 = vmatpush1.bf16.msra.mxu0 %v4528_v22  ;;  %2195 = vmatpush1.bf16.msra.mxu1 %v4534_v24  ;;  %v5368_v22 = vld [vmem:[#allocation37_spill] sm:$0xff] }
 0xa42   :  { %2155 = vmatprep.subr.bf16.mxu0 %v4540_v28  ;;  %2196 = vmatprep.subr.bf16.mxu1 %v4546_v2 }
 0xa45   :  { %2156 = vmatpush1.bf16.msra.mxu0 %v4552_v32  ;;  %2197 = vmatpush1.bf16.msra.mxu1 %v4558_v10 }
 0xa46   :  { %2157 = vmatprep.subr.bf16.mxu0 %v4564_v6  ;;  %2198 = vmatprep.subr.bf16.mxu1 %v4570_v18  ;;  %v5369_v18 = vld [vmem:[#allocation38_spill] sm:$0xff] }
 0xa49   :  { %2158 = vmatpush1.bf16.msra.mxu0 %v4576_v19  ;;  %2199 = vmatpush1.bf16.msra.mxu1 %v4582_v43  ;;  %v5370_v43 = vld [vmem:[#allocation36_spill] sm:$0xff] }
 0xa4a   :  { %2159 = vmatprep.subr.bf16.mxu0 %v4588_v46  ;;  %2200 = vmatprep.subr.bf16.mxu1 %v4594_v47 }
 0xa4d   :  { %2160 = vmatpush1.bf16.msra.mxu0 %v4600_v48  ;;  %2201 = vmatpush1.bf16.msra.mxu1 %v4648_v8 }
 0xa4e   :  { %2267 = vmatprep.subr.bf16.mxu0 %v4899_v33  ;;  %2308 = vmatprep.subr.bf16.mxu1 %v4905_v34 }
 0xaf0   :  { %v2057_v14 = vpop.f32.mrf.mxu0  ;;  %v2098_v25 = vpop.f32.mrf.mxu1 }
 0xaf1   :  { %v2105_v61 = vadd.f32 %v2057_v14, %v5367_v11  ;;  %v2107_v46 = vadd.f32 %v2098_v25, %v5370_v43  ;;  %v5036_v14 = vld [vmem:[%s5279_s2 + $0x28] ss:$16 sps:$4 sm:$0xff]   ;;  %v5042_v25 = vld [vmem:[%s5279_s2 + $0x4] ss:$16 sps:$4 sm:$0xff]   ;;  %v5048_v11 = vld [vmem:[%s5279_s2 + $0xc] ss:$16 sps:$4 sm:$0xff]  }
 0xaf2   :  { %v2059_v7 = vpop.f32.mrf.mxu0  ;;  %v2100_v9 = vpop.f32.mrf.mxu1 }
 0xaf3   :  { %v3104_v52 = vmul.f32 -1.442695, %v2105_v61  ;;  %v2106_v24 = vadd.f32 %v2059_v7, %v5368_v22  ;;  %v2108_v19 = vadd.f32 %v2100_v9, %v5369_v18  ;;  %v5054_v61 = vld [vmem:[%s5279_s2] ss:$16 sps:$4 sm:$0xff]  }
 0xaf4   :  { %v2061_v28 = vpop.f32.mrf.mxu0  ;;  %v2102_v2 = vpop.f32.mrf.mxu1 }
 0xaf5   :  { %3483 = vpow2.f32 %v3104_v52  ;;  %v3105_v32 = vmul.f32 -1.442695, %v2106_v24  ;;  %v3106_v47 = vmul.f32 -1.442695, %v2108_v19  ;;  %v5371_v52 = vld [vmem:[#allocation39_spill] sm:$0xff] }
 0xaf6   :  { %v2062_v10 = vpop.f32.mrf.mxu0  ;;  %v2103_v6 = vpop.f32.mrf.mxu1 }
 0xaf7   :  { %3485 = vpow2.f32 %v3105_v32  ;;  %v5372_v32 = vld [vmem:[#allocation41_spill] sm:$0xff] }
 0xaf8   :  { %3487 = vtanh.f32 %v2107_v46 }
 0xaf9   :  { %3489 = vpow2.f32 %v3106_v47 }
 0xb02   :  { %v3484_v48 = vpop.eup %3483 }
 0xb03   :  { %v2112_v16 = vadd.f32 1.0, %v3484_v48  ;;  %v5374_v48 = vld [vmem:[#allocation40_spill] sm:$0xff] }
 0xb04   :  { %v3486_v35 = vpop.eup %3485 }
 0xb05   :  { %3491 = vrcp.f32 %v2112_v16  ;;  %v2118_v29 = vadd.f32 1.0, %v3486_v35  ;;  %v3488_v23 = vpop.eup %3487 }
 0xb06   :  { %v3490_v21 = vpop.eup %3489 }
 0xb07   :  { %3493 = vrcp.f32 %v2118_v29  ;;  %v2125_v39 = vadd.f32 1.0, %v3490_v21 }
 0xb09   :  { %3495 = vrcp.f32 %v2125_v39 }
 0xb12   :  { %v3492_v54 = vpop.eup %3491 }
 0xb13   :  { %v2129_v37 = vmul.f32 %v3492_v54, %v3488_v23 }
 0xb14   :  { %v3494_v38 = vpop.eup %3493 }
 0xb15   :  { %v2128_v40 = vmul.f32 %v3494_v38, %v4826_v63  ;;  %v5006_v63 = vld [vmem:[%s5279_s2 + $0x40] ss:$16 sps:$4 sm:$0xff]  }
 0xb16   :  { %v3496_v42 = vpop.eup %3495 }
 0xb17   :  { %v4913_v41 = vadd.f32 %v2129_v37, %v2128_v40 }
 0xb19   :  { %3497 = vtanh.f32 %v4913_v41 }
 0xb26   :  { %v3498_v15 = vpop.eup %3497 }
 0xb27   :  { %v2132_v44 = vmul.f32 %v3498_v15, %v3496_v42 }
 0xb29   :  { %v2144_v31 = vpack.c.bf16 %v2132_v44, %v2132_v44 }
 0xb2b   :  { %2178 = vmatmul.mubr.bf16.vlgmr.msra.gmra.mxu0 %v2144_v31  ;;  %2219 = vmatmul.mubr.bf16.vlgmr.msra.gmra.mxu1 %v2144_v31 }
 0xb2c   :  { %2268 = vmatpush1.bf16.msra.mxu0 %v4832_v4  ;;  %2309 = vmatpush1.bf16.msra.mxu1 %v4838_v20 }
 0xb2d   :  { %2269 = vmatprep.subr.bf16.mxu0 %v4844_v13  ;;  %2310 = vmatprep.subr.bf16.mxu1 %v4850_v27 }
 0xb2e   :  { %2299 = vmatprep.mubr.bf16.mxu0 %v5339_v26  ;;  %2340 = vmatprep.mubr.bf16.mxu1 %v5339_v26 }
 0xb30   :  { %2270 = vmatpush1.bf16.msra.mxu0 %v4858_v36  ;;  %2311 = vmatpush1.bf16.msra.mxu1 %v4864_v17 }
 0xb31   :  { %2271 = vmatprep.subr.bf16.mxu0 %v4870_v12  ;;  %2312 = vmatprep.subr.bf16.mxu1 %v4928_v45 }
 0xb34   :  { %2272 = vmatpush1.bf16.msra.mxu0 %v4934_v30  ;;  %2313 = vmatpush1.bf16.msra.mxu1 %v4940_v49 }
 0xb35   :  { %2273 = vmatprep.subr.bf16.mxu0 %v4946_v50  ;;  %2314 = vmatprep.subr.bf16.mxu1 %v4952_v51 }
 0xb38   :  { %2274 = vmatpush1.bf16.msra.mxu0 %v4958_v53  ;;  %2315 = vmatpush1.bf16.msra.mxu1 %v4964_v55 }
 0xb39   :  { %2275 = vmatprep.subr.bf16.mxu0 %v4970_v56  ;;  %2316 = vmatprep.subr.bf16.mxu1 %v4976_v57 }
 0xb3c   :  { %2276 = vmatpush1.bf16.msra.mxu0 %v4982_v58  ;;  %2317 = vmatpush1.bf16.msra.mxu1 %v4988_v59 }
 0xb3d   :  { %2277 = vmatprep.subr.bf16.mxu0 %v4994_v60  ;;  %2318 = vmatprep.subr.bf16.mxu1 %v5000_v62 }
 0xb40   :  { %2278 = vmatpush1.bf16.msra.mxu0 %v5006_v63  ;;  %2319 = vmatpush1.bf16.msra.mxu1 %v5012_v0 }
 0xb41   :  { %2279 = vmatprep.subr.bf16.mxu0 %v5018_v5  ;;  %2320 = vmatprep.subr.bf16.mxu1 %v5024_v1 }
 0xb44   :  { %2280 = vmatpush1.bf16.msra.mxu0 %v5030_v3  ;;  %2321 = vmatpush1.bf16.msra.mxu1 %v5036_v14 }
 0xb45   :  { %2281 = vmatprep.subr.bf16.mxu0 %v5042_v25  ;;  %2322 = vmatprep.subr.bf16.mxu1 %v5048_v11 }
 0xb48   :  { %2282 = vmatpush1.bf16.msra.mxu0 %v5054_v61  ;;  %2323 = vmatpush1.bf16.msra.mxu1 %v4648_v8  ;;  %v5373_v8 = vld [vmem:[#allocation42_spill] sm:$0xff] }
 0xb49   :  { %2389 = vmatprep.subr.bf16.mxu0 %v4899_v33  ;;  %2430 = vmatprep.subr.bf16.mxu1 %v4905_v34 }
 0xbeb   :  { %v2179_v7 = vpop.f32.mrf.mxu0  ;;  %v2220_v9 = vpop.f32.mrf.mxu1 }
 0xbec   :  { %v2227_v22 = vadd.f32 %v2179_v7, %v5371_v52  ;;  %v2229_v16 = vadd.f32 %v2220_v9, %v5374_v48 }
 0xbed   :  { %v2181_v24 = vpop.f32.mrf.mxu0  ;;  %v2222_v28 = vpop.f32.mrf.mxu1 }
 0xbee   :  { %v3107_v2 = vmul.f32 -1.442695, %v2227_v22  ;;  %v2228_v10 = vadd.f32 %v2181_v24, %v5372_v32  ;;  %v2230_v47 = vadd.f32 %v2222_v28, %v5373_v8 }
 0xbef   :  { %v2183_v6 = vpop.f32.mrf.mxu0  ;;  %v2224_v18 = vpop.f32.mrf.mxu1 }
 0xbf0   :  { %3499 = vpow2.f32 %v3107_v2  ;;  %v3108_v19 = vmul.f32 -1.442695, %v2228_v10  ;;  %v3109_v35 = vmul.f32 -1.442695, %v2230_v47  ;;  %v5375_v2 = vld [vmem:[#allocation43_spill] sm:$0xff] }
 0xbf1   :  { %v2184_v43 = vpop.f32.mrf.mxu0  ;;  %v2225_v46 = vpop.f32.mrf.mxu1 }
 0xbf2   :  { %3501 = vpow2.f32 %v3108_v19  ;;  %v5376_v19 = vld [vmem:[#allocation45_spill] sm:$0xff] }
 0xbf3   :  { %3503 = vtanh.f32 %v2229_v16 }
 0xbf4   :  { %3505 = vpow2.f32 %v3109_v35  ;;  %v5377_v35 = vld [vmem:[#allocation46_spill] sm:$0xff] }
 0xbfd   :  { %v3500_v29 = vpop.eup %3499 }
 0xbfe   :  { %v2234_v23 = vadd.f32 1.0, %v3500_v29 }
 0xbff   :  { %v3502_v21 = vpop.eup %3501 }
 0xc00   :  { %3507 = vrcp.f32 %v2234_v23  ;;  %v2240_v54 = vadd.f32 1.0, %v3502_v21  ;;  %v3504_v37 = vpop.eup %3503  ;;  %v5378_v23 = vld [vmem:[#allocation44_spill] sm:$0xff] }
 0xc01   :  { %v3506_v38 = vpop.eup %3505 }
 0xc02   :  { %3509 = vrcp.f32 %v2240_v54  ;;  %v2247_v15 = vadd.f32 1.0, %v3506_v38 }
 0xc04   :  { %3511 = vrcp.f32 %v2247_v15 }
 0xc0d   :  { %v3508_v39 = vpop.eup %3507 }
 0xc0e   :  { %v2251_v40 = vmul.f32 %v3508_v39, %v3504_v37 }
 0xc0f   :  { %v3510_v42 = vpop.eup %3509 }
 0xc10   :  { %v2250_v44 = vmul.f32 %v3510_v42, %v4913_v41  ;;  %v5102_v41 = vld [vmem:[%s5279_s2 + $0x8] ss:$16 sps:$4 sm:$0xff]  }
 0xc11   :  { %v3512_v7 = vpop.eup %3511 }
 0xc12   :  { %v5065_v31 = vadd.f32 %v2251_v40, %v2250_v44 }
 0xc14   :  { %3513 = vtanh.f32 %v5065_v31 }
 0xc21   :  { %v3514_v9 = vpop.eup %3513 }
 0xc22   :  { %v2254_v52 = vmul.f32 %v3514_v9, %v3512_v7 }
 0xc24   :  { %v2266_v22 = vpack.c.bf16 %v2254_v52, %v2254_v52 }
 0xc26   :  { %2300 = vmatmul.mubr.bf16.vlgmr.msra.gmra.mxu0 %v2266_v22  ;;  %2341 = vmatmul.mubr.bf16.vlgmr.msra.gmra.mxu1 %v2266_v22 }
 0xc27   :  { %2390 = vmatpush1.bf16.msra.mxu0 %v4832_v4  ;;  %2431 = vmatpush1.bf16.msra.mxu1 %v4838_v20 }
 0xc28   :  { %2391 = vmatprep.subr.bf16.mxu0 %v4844_v13  ;;  %2432 = vmatprep.subr.bf16.mxu1 %v4850_v27 }
 0xc29   :  { %2421 = vmatprep.mubr.bf16.mxu0 %v5339_v26  ;;  %2462 = vmatprep.mubr.bf16.mxu1 %v5339_v26 }
 0xc2b   :  { %2392 = vmatpush1.bf16.msra.mxu0 %v4858_v36  ;;  %2433 = vmatpush1.bf16.msra.mxu1 %v4864_v17 }
 0xc2c   :  { %2393 = vmatprep.subr.bf16.mxu0 %v4870_v12  ;;  %2434 = vmatprep.subr.bf16.mxu1 %v4928_v45 }
 0xc2f   :  { %2394 = vmatpush1.bf16.msra.mxu0 %v4934_v30  ;;  %2435 = vmatpush1.bf16.msra.mxu1 %v4940_v49 }
 0xc30   :  { %2395 = vmatprep.subr.bf16.mxu0 %v4946_v50  ;;  %2436 = vmatprep.subr.bf16.mxu1 %v4952_v51 }
 0xc33   :  { %2396 = vmatpush1.bf16.msra.mxu0 %v4958_v53  ;;  %2437 = vmatpush1.bf16.msra.mxu1 %v4964_v55 }
 0xc34   :  { %2397 = vmatprep.subr.bf16.mxu0 %v4970_v56  ;;  %2438 = vmatprep.subr.bf16.mxu1 %v4976_v57 }
 0xc37   :  { %2398 = vmatpush1.bf16.msra.mxu0 %v4982_v58  ;;  %2439 = vmatpush1.bf16.msra.mxu1 %v4988_v59 }
 0xc38   :  { %2399 = vmatprep.subr.bf16.mxu0 %v4994_v60  ;;  %2440 = vmatprep.subr.bf16.mxu1 %v5000_v62 }
 0xc3b   :  { %2400 = vmatpush1.bf16.msra.mxu0 %v5006_v63  ;;  %2441 = vmatpush1.bf16.msra.mxu1 %v5012_v0 }
 0xc3c   :  { %2401 = vmatprep.subr.bf16.mxu0 %v5018_v5  ;;  %2442 = vmatprep.subr.bf16.mxu1 %v5024_v1 }
 0xc3f   :  { %2402 = vmatpush1.bf16.msra.mxu0 %v5030_v3  ;;  %2443 = vmatpush1.bf16.msra.mxu1 %v5036_v14 }
 0xc40   :  { %2403 = vmatprep.subr.bf16.mxu0 %v5042_v25  ;;  %2444 = vmatprep.subr.bf16.mxu1 %v5048_v11 }
 0xc43   :  { %2404 = vmatpush1.bf16.msra.mxu0 %v5054_v61  ;;  %2445 = vmatpush1.bf16.msra.mxu1 %v5102_v41 }
 0xc44   :  { %2511 = vmatprep.subr.bf16.mxu0 %v4899_v33  ;;  %2552 = vmatprep.subr.bf16.mxu1 %v4905_v34 }
 0xce6   :  { %v2301_v24 = vpop.f32.mrf.mxu0  ;;  %v2342_v28 = vpop.f32.mrf.mxu1 }
 0xce7   :  { %v2349_v32 = vadd.f32 %v2301_v24, %v5375_v2  ;;  %v2351_v21 = vadd.f32 %v2342_v28, %v5378_v23 }
 0xce8   :  { %v2303_v10 = vpop.f32.mrf.mxu0  ;;  %v2344_v6 = vpop.f32.mrf.mxu1 }
 0xce9   :  { %v3110_v18 = vmul.f32 -1.442695, %v2349_v32  ;;  %v2350_v43 = vadd.f32 %v2303_v10, %v5376_v19  ;;  %v2352_v29 = vadd.f32 %v2344_v6, %v5377_v35 }
 0xcea   :  { %v2305_v46 = vpop.f32.mrf.mxu0  ;;  %v2346_v8 = vpop.f32.mrf.mxu1 }
 0xceb   :  { %3515 = vpow2.f32 %v3110_v18  ;;  %v3111_v47 = vmul.f32 -1.442695, %v2350_v43  ;;  %v3112_v54 = vmul.f32 -1.442695, %v2352_v29  ;;  %v5379_v18 = vld [vmem:[#allocation47_spill] sm:$0xff] }
 0xcec   :  { %v2306_v48 = vpop.f32.mrf.mxu0  ;;  %v2347_v16 = vpop.f32.mrf.mxu1 }
 0xced   :  { %3517 = vpow2.f32 %v3111_v47  ;;  %v5380_v47 = vld [vmem:[#allocation49_spill] sm:$0xff] }
 0xcee   :  { %3519 = vtanh.f32 %v2351_v21 }
 0xcef   :  { %3521 = vpow2.f32 %v3112_v54  ;;  %v5381_v54 = vld [vmem:[#allocation50_spill] sm:$0xff] }
 0xcf8   :  { %v3516_v37 = vpop.eup %3515 }
 0xcf9   :  { %v2356_v38 = vadd.f32 1.0, %v3516_v37  ;;  %v5382_v37 = vld [vmem:[#allocation48_spill] sm:$0xff] }
 0xcfa   :  { %v3518_v39 = vpop.eup %3517 }
 0xcfb   :  { %3523 = vrcp.f32 %v2356_v38  ;;  %v2362_v40 = vadd.f32 1.0, %v3518_v39  ;;  %v3520_v42 = vpop.eup %3519 }
 0xcfc   :  { %v3522_v15 = vpop.eup %3521 }
 0xcfd   :  { %3525 = vrcp.f32 %v2362_v40  ;;  %v2369_v52 = vadd.f32 1.0, %v3522_v15 }
 0xcff   :  { %3527 = vrcp.f32 %v2369_v52 }
 0xd08   :  { %v3524_v44 = vpop.eup %3523 }
 0xd09   :  { %v2373_v7 = vmul.f32 %v3524_v44, %v3520_v42 }
 0xd0a   :  { %v3526_v9 = vpop.eup %3525 }
 0xd0b   :  { %v2372_v22 = vmul.f32 %v3526_v9, %v5065_v31 }
 0xd0c   :  { %v3528_v28 = vpop.eup %3527 }
 0xd0d   :  { %v5112_v24 = vadd.f32 %v2373_v7, %v2372_v22 }
 0xd0f   :  { %3529 = vtanh.f32 %v5112_v24 }
 0xd1c   :  { %v3530_v2 = vpop.eup %3529 }
 0xd1d   :  { %v2376_v32 = vmul.f32 %v3530_v2, %v3528_v28 }
 0xd1f   :  { %v2388_v10 = vpack.c.bf16 %v2376_v32, %v2376_v32 }
 0xd21   :  { %2422 = vmatmul.mubr.bf16.vlgmr.msra.gmra.mxu0 %v2388_v10  ;;  %2463 = vmatmul.mubr.bf16.vlgmr.msra.gmra.mxu1 %v2388_v10 }
 0xd22   :  { %2512 = vmatpush1.bf16.msra.mxu0 %v4832_v4  ;;  %2553 = vmatpush1.bf16.msra.mxu1 %v4838_v20 }
 0xd23   :  { %2513 = vmatprep.subr.bf16.mxu0 %v4844_v13  ;;  %2554 = vmatprep.subr.bf16.mxu1 %v4850_v27 }
 0xd24   :  { %2543 = vmatprep.mubr.bf16.mxu0 %v5339_v26  ;;  %2584 = vmatprep.mubr.bf16.mxu1 %v5339_v26 }
 0xd26   :  { %2514 = vmatpush1.bf16.msra.mxu0 %v4858_v36  ;;  %2555 = vmatpush1.bf16.msra.mxu1 %v4864_v17 }
 0xd27   :  { %2515 = vmatprep.subr.bf16.mxu0 %v4870_v12  ;;  %2556 = vmatprep.subr.bf16.mxu1 %v4928_v45 }
 0xd2a   :  { %2516 = vmatpush1.bf16.msra.mxu0 %v4934_v30  ;;  %2557 = vmatpush1.bf16.msra.mxu1 %v4940_v49 }
 0xd2b   :  { %2517 = vmatprep.subr.bf16.mxu0 %v4946_v50  ;;  %2558 = vmatprep.subr.bf16.mxu1 %v4952_v51 }
 0xd2e   :  { %2518 = vmatpush1.bf16.msra.mxu0 %v4958_v53  ;;  %2559 = vmatpush1.bf16.msra.mxu1 %v4964_v55 }
 0xd2f   :  { %2519 = vmatprep.subr.bf16.mxu0 %v4970_v56  ;;  %2560 = vmatprep.subr.bf16.mxu1 %v4976_v57 }
 0xd32   :  { %2520 = vmatpush1.bf16.msra.mxu0 %v4982_v58  ;;  %2561 = vmatpush1.bf16.msra.mxu1 %v4988_v59 }
 0xd33   :  { %2521 = vmatprep.subr.bf16.mxu0 %v4994_v60  ;;  %2562 = vmatprep.subr.bf16.mxu1 %v5000_v62 }
 0xd36   :  { %2522 = vmatpush1.bf16.msra.mxu0 %v5006_v63  ;;  %2563 = vmatpush1.bf16.msra.mxu1 %v5012_v0 }
 0xd37   :  { %2523 = vmatprep.subr.bf16.mxu0 %v5018_v5  ;;  %2564 = vmatprep.subr.bf16.mxu1 %v5024_v1 }
 0xd3a   :  { %2524 = vmatpush1.bf16.msra.mxu0 %v5030_v3  ;;  %2565 = vmatpush1.bf16.msra.mxu1 %v5036_v14 }
 0xd3b   :  { %2525 = vmatprep.subr.bf16.mxu0 %v5042_v25  ;;  %2566 = vmatprep.subr.bf16.mxu1 %v5048_v11 }
 0xd3e   :  { %2526 = vmatpush1.bf16.msra.mxu0 %v5054_v61  ;;  %2567 = vmatpush1.bf16.msra.mxu1 %v5102_v41 }
 0xd3f   :  { %2633 = vmatprep.subr.bf16.mxu0 %v4899_v33  ;;  %2674 = vmatprep.subr.bf16.mxu1 %v4905_v34 }
 0xde1   :  { %v2423_v31 = vpop.f32.mrf.mxu0  ;;  %v2464_v6 = vpop.f32.mrf.mxu1 }
 0xde2   :  { %v2471_v19 = vadd.f32 %v2423_v31, %v5379_v18  ;;  %v2473_v34 = vadd.f32 %v2464_v6, %v5382_v37  ;;  %v3316_v37 = vld [vmem:[%s5283_s6 + $0x30] sm:$0xff]  }
 0xde3   :  { %v2425_v43 = vpop.f32.mrf.mxu0  ;;  %v2466_v46 = vpop.f32.mrf.mxu1 }
 0xde4   :  { %v3113_v8 = vmul.f32 -1.442695, %v2471_v19  ;;  %v2472_v48 = vadd.f32 %v2425_v43, %v5380_v47  ;;  %v2474_v33 = vadd.f32 %v2466_v46, %v5381_v54  ;;  %v3667_v47 = vmov 0.0   ;;  %v3314_v54 = vld [vmem:[%s5281_s4] sm:$0xff]  }
 0xde5   :  { %v2427_v16 = vpop.f32.mrf.mxu0  ;;  %v2468_v35 = vpop.f32.mrf.mxu1 }
 0xde6   :  { %3531 = vpow2.f32 %v3113_v8  ;;  %v3114_v29 = vmul.f32 -1.442695, %v2472_v48  ;;  %v3115_v38 = vmul.f32 -1.442695, %v2474_v33  ;;  %v3307_v8 = vld [vmem:[%s5281_s4 + $0x38] sm:$0xff]   ;;  %v3308_v48 = vld [vmem:[%s5281_s4 + $0x30] sm:$0xff]  }
 0xde7   :  { %v2428_v23 = vpop.f32.mrf.mxu0  ;;  %v2469_v21 = vpop.f32.mrf.mxu1  ;;  %v3309_v16 = vld [vmem:[%s5281_s4 + $0x28] sm:$0xff]   ;;  %v3310_v35 = vld [vmem:[%s5281_s4 + $0x20] sm:$0xff]   ;;  %v3315_v33 = vld [vmem:[%s5283_s6 + $0x38] sm:$0xff]  }
 0xde8   :  { %3533 = vpow2.f32 %v3114_v29  ;;  %v3311_v29 = vld [vmem:[%s5281_s4 + $0x18] sm:$0xff]   ;;  %v3312_v23 = vld [vmem:[%s5281_s4 + $0x10] sm:$0xff]   ;;  %v3313_v21 = vld [vmem:[%s5281_s4 + $0x8] sm:$0xff]  }
 0xde9   :  { %3535 = vtanh.f32 %v2473_v34  ;;  %v3317_v34 = vld [vmem:[%s5283_s6 + $0x28] sm:$0xff]  }
 0xdea   :  { %3537 = vpow2.f32 %v3115_v38  ;;  %v3318_v38 = vld [vmem:[%s5283_s6 + $0x20] sm:$0xff]  }
 0xdf3   :  { %v3532_v39 = vpop.eup %3531 }
 0xdf4   :  { %v2478_v40 = vadd.f32 1.0, %v3532_v39  ;;  %v3319_v39 = vld [vmem:[%s5283_s6 + $0x18] sm:$0xff]  }
 0xdf5   :  { %v3534_v42 = vpop.eup %3533 }
 0xdf6   :  { %3539 = vrcp.f32 %v2478_v40  ;;  %v2484_v15 = vadd.f32 1.0, %v3534_v42  ;;  %v3536_v44 = vpop.eup %3535  ;;  %v3320_v40 = vld [vmem:[%s5283_s6 + $0x10] sm:$0xff]  }
 0xdf7   :  { %v3538_v7 = vpop.eup %3537 }
 0xdf8   :  { %3541 = vrcp.f32 %v2484_v15  ;;  %v2491_v28 = vadd.f32 1.0, %v3538_v7 }
 0xdfa   :  { %3543 = vrcp.f32 %v2491_v28  ;;  %v5388_v28 = vld [vmem:[#allocation57_spill] sm:$0xff] }
 0xe03   :  { %v3540_v9 = vpop.eup %3539 }
 0xe04   :  { %v2495_v52 = vmul.f32 %v3540_v9, %v3536_v44  ;;  %v5387_v44 = vld [vmem:[#allocation55_spill] sm:$0xff] }
 0xe05   :  { %v3542_v22 = vpop.eup %3541 }
 0xe06   :  { %v2494_v2 = vmul.f32 %v3542_v22, %v5112_v24 }
 0xe07   :  { %v3544_v10 = vpop.eup %3543 }
 0xe08   :  { %v5154_v32 = vadd.f32 %v2495_v52, %v2494_v2 }
 0xe0a   :  { %3545 = vtanh.f32 %v5154_v32 }
 0xe17   :  { %v3546_v31 = vpop.eup %3545 }
 0xe18   :  { %v2498_v6 = vmul.f32 %v3546_v31, %v3544_v10 }
 0xe1a   :  { %v2510_v18 = vpack.c.bf16 %v2498_v6, %v2498_v6 }
 0xe1c   :  { %2544 = vmatmul.mubr.bf16.vlgmr.msra.gmra.mxu0 %v2510_v18  ;;  %2585 = vmatmul.mubr.bf16.vlgmr.msra.gmra.mxu1 %v2510_v18 }
 0xe1d   :  { %2634 = vmatpush1.bf16.msra.mxu0 %v4832_v4  ;;  %2675 = vmatpush1.bf16.msra.mxu1 %v4838_v20  ;;  %v5383_v20 = vld [vmem:[#allocation51_spill] sm:$0xff] }
 0xe1e   :  { %2635 = vmatprep.subr.bf16.mxu0 %v4844_v13  ;;  %2676 = vmatprep.subr.bf16.mxu1 %v4850_v27 }
 0xe1f   :  { %2665 = vmatprep.mubr.bf16.mxu0 %v5339_v26  ;;  %2706 = vmatprep.mubr.bf16.mxu1 %v5339_v26 }
 0xe21   :  { %2636 = vmatpush1.bf16.msra.mxu0 %v4858_v36  ;;  %2677 = vmatpush1.bf16.msra.mxu1 %v4864_v17 }
 0xe22   :  { %2637 = vmatprep.subr.bf16.mxu0 %v4870_v12  ;;  %2678 = vmatprep.subr.bf16.mxu1 %v4928_v45  ;;  %v5384_v12 = vld [vmem:[#allocation53_spill] sm:$0xff] }
 0xe25   :  { %2638 = vmatpush1.bf16.msra.mxu0 %v4934_v30  ;;  %2679 = vmatpush1.bf16.msra.mxu1 %v4940_v49 }
 0xe26   :  { %2639 = vmatprep.subr.bf16.mxu0 %v4946_v50  ;;  %2680 = vmatprep.subr.bf16.mxu1 %v4952_v51 }
 0xe29   :  { %2640 = vmatpush1.bf16.msra.mxu0 %v4958_v53  ;;  %2681 = vmatpush1.bf16.msra.mxu1 %v4964_v55  ;;  %v5385_v55 = vld [vmem:[#allocation54_spill] sm:$0xff] }
 0xe2a   :  { %2641 = vmatprep.subr.bf16.mxu0 %v4970_v56  ;;  %2682 = vmatprep.subr.bf16.mxu1 %v4976_v57  ;;  %v5386_v57 = vld [vmem:[#allocation52_spill] sm:$0xff] }
 0xe2d   :  { %2642 = vmatpush1.bf16.msra.mxu0 %v4982_v58  ;;  %2683 = vmatpush1.bf16.msra.mxu1 %v4988_v59 }
 0xe2e   :  { %2643 = vmatprep.subr.bf16.mxu0 %v4994_v60  ;;  %2684 = vmatprep.subr.bf16.mxu1 %v5000_v62 }
 0xe31   :  { %2644 = vmatpush1.bf16.msra.mxu0 %v5006_v63  ;;  %2685 = vmatpush1.bf16.msra.mxu1 %v5012_v0 }
 0xe32   :  { %2645 = vmatprep.subr.bf16.mxu0 %v5018_v5  ;;  %2686 = vmatprep.subr.bf16.mxu1 %v5024_v1 }
 0xe35   :  { %2646 = vmatpush1.bf16.msra.mxu0 %v5030_v3  ;;  %2687 = vmatpush1.bf16.msra.mxu1 %v5036_v14 }
 0xe36   :  { %2647 = vmatprep.subr.bf16.mxu0 %v5042_v25  ;;  %2688 = vmatprep.subr.bf16.mxu1 %v5048_v11 }
 0xe39   :  { %2648 = vmatpush1.bf16.msra.mxu0 %v5054_v61  ;;  %2689 = vmatpush1.bf16.msra.mxu1 %v5102_v41 }
 0xe3a   :  { %3158 = vmatprep.subr.bf16.mxu0 %v3667_v47  ;;  %3178 = vmatprep.subr.bf16.mxu1 %v3667_v47 }
 0xedc   :  { %v2545_v26 = vpop.f32.mrf.mxu0  ;;  %v2586_v4 = vpop.f32.mrf.mxu1 }
 0xedd   :  { %v2593_v13 = vadd.f32 %v2545_v26, %v5383_v20  ;;  %v2595_v58 = vadd.f32 %v2586_v4, %v5386_v57  ;;  %v5389_v26 = vld [vmem:[#allocation58_spill] sm:$0xff]  ;;  %v5390_v20 = vld [vmem:[#allocation56_spill] sm:$0xff] }
 0xede   :  { %v2547_v27 = vpop.f32.mrf.mxu0  ;;  %v2588_v36 = vpop.f32.mrf.mxu1 }
 0xedf   :  { %v3116_v17 = vmul.f32 -1.442695, %v2593_v13  ;;  %v2594_v45 = vadd.f32 %v2547_v27, %v5384_v12  ;;  %v2596_v56 = vadd.f32 %v2588_v36, %v5385_v55 }
 0xee0   :  { %v2549_v30 = vpop.f32.mrf.mxu0  ;;  %v2590_v49 = vpop.f32.mrf.mxu1 }
 0xee1   :  { %3547 = vpow2.f32 %v3116_v17  ;;  %v3117_v50 = vmul.f32 -1.442695, %v2594_v45  ;;  %v3118_v59 = vmul.f32 -1.442695, %v2596_v56 }
 0xee2   :  { %v2550_v51 = vpop.f32.mrf.mxu0  ;;  %v2591_v53 = vpop.f32.mrf.mxu1 }
 0xee3   :  { %3549 = vpow2.f32 %v3117_v50 }
 0xee4   :  { %3551 = vtanh.f32 %v2595_v58 }
 0xee5   :  { %3553 = vpow2.f32 %v3118_v59 }
 0xeee   :  { %v3548_v60 = vpop.eup %3547 }
 0xeef   :  { %v2600_v62 = vadd.f32 1.0, %v3548_v60 }
 0xef0   :  { %v3550_v63 = vpop.eup %3549 }
 0xef1   :  { %3555 = vrcp.f32 %v2600_v62  ;;  %v2606_v0 = vadd.f32 1.0, %v3550_v63  ;;  %v3552_v5 = vpop.eup %3551  ;;  %v3321_v63 = vld [vmem:[%s5283_s6 + $0x8] sm:$0xff]  }
 0xef2   :  { %v3554_v1 = vpop.eup %3553 }
 0xef3   :  { %3557 = vrcp.f32 %v2606_v0  ;;  %v2613_v11 = vadd.f32 1.0, %v3554_v1  ;;  %v3322_v0 = vld [vmem:[%s5283_s6] sm:$0xff]  }
 0xef5   :  { %3559 = vrcp.f32 %v2613_v11 }
 0xefe   :  { %v3556_v3 = vpop.eup %3555 }
 0xeff   :  { %v2617_v14 = vmul.f32 %v3556_v3, %v3552_v5  ;;  %v3122_v5 = vld [vmem:[%s5282_s5] ss:$0 sm:$0xff]  ;;  %s3643_s5 = scalar_lea.vmem %s2980_s25, 128 }
 0xf00   :  { %v3558_v25 = vpop.eup %3557  ;;  %p3644_p0 = scmp.ne.s32.totalorder %s2980_s25, %s3643_s5  ;;  %p3649_p2 = scmp.lt.s32.totalorder %s3643_s5, %s3643_s5 }
 0xf01   :  { %v2616_v61 = vmul.f32 %v3558_v25, %v5154_v32 }
 0xf02   :  { %v3560_v24 = vpop.eup %3559  ;;  %p3650_p3 = por %p3649_p2, %p3648_p1 }
 0xf03   :  { %v5194_v41 = vadd.f32 %v2617_v14, %v2616_v61 }
 0xf04   :  { %p3651_p4 = pnand %p3650_p3, %p3644_p0 }
 0xf05   :  { %3561 = vtanh.f32 %v5194_v41 }
 0xf12   :  { %v3562_v19 = vpop.eup %3561 }
 0xf13   :  { %v2620_v43 = vmul.f32 %v3562_v19, %v3560_v24  ;;  %v3131_v24 = vld [vmem:[%s5284_s7] ss:$0 sm:$0xff] }
 0xf15   :  { %v2632_v46 = vpack.c.bf16 %v2620_v43, %v2620_v43 }
 0xf17   :  { %2666 = vmatmul.mubr.bf16.vlgmr.msra.gmra.mxu0 %v2632_v46  ;;  %2707 = vmatmul.mubr.bf16.vlgmr.msra.gmra.mxu1 %v2632_v46 }
 0xf18   :  { %3159 = vmatpush3.bf16.msra.mxu0 %v3307_v8  ;;  %3174 = vmatprep.mubr.msk.bf16.mxu0 %vm3668_vm0, %v3667_v47 }
 0xf19   :  { %3160 = vmatprep.subr.bf16.mxu0 %v3667_v47  ;;  %3194 = vmatprep.mubr.msk.bf16.mxu1 %vm3668_vm0, %v3667_v47 }
 0xf1a   :  { %3179 = vmatpush3.bf16.msra.mxu1 %v3315_v33 }
 0xf1b   :  { %3180 = vmatprep.subr.bf16.mxu1 %v3667_v47 }
 0xf1c   :  { %3161 = vmatpush3.bf16.msra.mxu0 %v3308_v48 }
 0xf1d   :  { %3162 = vmatprep.subr.bf16.mxu0 %v3667_v47 }
 0xf1e   :  { %3181 = vmatpush3.bf16.msra.mxu1 %v3316_v37 }
 0xf1f   :  { %3182 = vmatprep.subr.bf16.mxu1 %v3667_v47 }
 0xf20   :  { %3163 = vmatpush3.bf16.msra.mxu0 %v3309_v16 }
 0xf21   :  { %3164 = vmatprep.subr.bf16.mxu0 %v3667_v47 }
 0xf22   :  { %3183 = vmatpush3.bf16.msra.mxu1 %v3317_v34 }
 0xf23   :  { %3184 = vmatprep.subr.bf16.mxu1 %v3667_v47 }
 0xf24   :  { %3165 = vmatpush3.bf16.msra.mxu0 %v3310_v35 }
 0xf25   :  { %3166 = vmatprep.subr.bf16.mxu0 %v3667_v47 }
 0xf26   :  { %3185 = vmatpush3.bf16.msra.mxu1 %v3318_v38 }
 0xf27   :  { %3186 = vmatprep.subr.bf16.mxu1 %v3667_v47 }
 0xf28   :  { %3167 = vmatpush3.bf16.msra.mxu0 %v3311_v29 }
 0xf29   :  { %3168 = vmatprep.subr.bf16.mxu0 %v3667_v47 }
 0xf2a   :  { %3187 = vmatpush3.bf16.msra.mxu1 %v3319_v39 }
 0xf2b   :  { %3188 = vmatprep.subr.bf16.mxu1 %v3667_v47 }
 0xf2c   :  { %3169 = vmatpush3.bf16.msra.mxu0 %v3312_v23 }
 0xf2d   :  { %3170 = vmatprep.subr.bf16.mxu0 %v3667_v47 }
 0xf2e   :  { %3189 = vmatpush3.bf16.msra.mxu1 %v3320_v40 }
 0xf2f   :  { %3190 = vmatprep.subr.bf16.mxu1 %v3667_v47 }
 0xf30   :  { %3171 = vmatpush3.bf16.msra.mxu0 %v3313_v21 }
 0xf31   :  { %3172 = vmatprep.subr.bf16.mxu0 %v3667_v47 }
 0xf32   :  { %3191 = vmatpush3.bf16.msra.mxu1 %v3321_v63 }
 0xf33   :  { %3192 = vmatprep.subr.bf16.mxu1 %v3667_v47 }
 0xf34   :  { %3173 = vmatpush3.bf16.msra.mxu0 %v3314_v54 }
 0xf36   :  { %3193 = vmatpush3.bf16.msra.mxu1 %v3322_v0 }
 0xfd7   :  { %v2667_v42 = vpop.f32.mrf.mxu0  ;;  %v2708_v15 = vpop.f32.mrf.mxu1 }
 0xfd8   :  { %v2715_v7 = vadd.f32 %v2667_v42, %v5387_v44  ;;  %v2717_v13 = vadd.f32 %v2708_v15, %v5390_v20 }
 0xfd9   :  { %v2669_v9 = vpop.f32.mrf.mxu0  ;;  %v2710_v52 = vpop.f32.mrf.mxu1 }
 0xfda   :  { %v3119_v22 = vmul.f32 -1.442695, %v2715_v7  ;;  %v2716_v2 = vadd.f32 %v2669_v9, %v5388_v28  ;;  %v2718_v4 = vadd.f32 %v2710_v52, %v5389_v26 }
 0xfdb   :  { %v2671_v32 = vpop.f32.mrf.mxu0  ;;  %v2712_v10 = vpop.f32.mrf.mxu1 }
 0xfdc   :  { %3563 = vpow2.f32 %v3119_v22  ;;  %v3120_v31 = vmul.f32 -1.442695, %v2716_v2  ;;  %v3121_v27 = vmul.f32 -1.442695, %v2718_v4 }
 0xfdd   :  { %v2672_v6 = vpop.f32.mrf.mxu0  ;;  %v2713_v18 = vpop.f32.mrf.mxu1 }
 0xfde   :  { %3565 = vpow2.f32 %v3120_v31 }
 0xfdf   :  { %3567 = vtanh.f32 %v2717_v13 }
 0xfe0   :  { %3569 = vpow2.f32 %v3121_v27 }
 0xfe9   :  { %v3564_v36 = vpop.eup %3563 }
 0xfea   :  { %v2722_v17 = vadd.f32 1.0, %v3564_v36 }
 0xfeb   :  { %v3566_v12 = vpop.eup %3565 }
 0xfec   :  { %3571 = vrcp.f32 %v2722_v17  ;;  %v2728_v45 = vadd.f32 1.0, %v3566_v12  ;;  %v3568_v30 = vpop.eup %3567 }
 0xfed   :  { %v3570_v49 = vpop.eup %3569 }
 0xfee   :  { %3573 = vrcp.f32 %v2728_v45  ;;  %v2735_v55 = vadd.f32 1.0, %v3570_v49 }
 0xff0   :  { %3575 = vrcp.f32 %v2735_v55 }
 0xff9   :  { %v3572_v50 = vpop.eup %3571 }
 0xffa   :  { %v2739_v51 = vmul.f32 %v3572_v50, %v3568_v30 }
 0xffb   :  { %v3574_v53 = vpop.eup %3573 }
 0xffc   :  { %v2738_v56 = vmul.f32 %v3574_v53, %v5194_v41 }
 0xffd   :  { %v3576_v58 = vpop.eup %3575 }
 0xffe   :  { %v2740_v57 = vadd.f32 %v2739_v51, %v2738_v56 }
0x1000   :  { %3577 = vtanh.f32 %v2740_v57 }
0x100d   :  { %v3578_v59 = vpop.eup %3577 }
0x100e   :  { %v2742_v60 = vmul.f32 %v3578_v59, %v3576_v58 }
0x1010   :  { %v2746_v62 = vpack.c.bf16 %v2742_v60, %v2742_v60 }
0x1012   :  { %3175 = vmatmul.mubr.bf16.vlgmr.msra.gmra.mxu0 %v2746_v62 }
0x10d2   :  { %v2852_v1 = vpop.f32.mrf.mxu0 }
0x10d3   :  { %v2853_v3 = vadd.f32 %v3122_v5, %v2852_v1 }
0x10d4   :  { %v3176_v14 = vpop.f32.mrf.mxu0 }
0x10d5   :  { %v2858_v25 = vmax.f32 %v2853_v3, 0.0 }
0x10d6   :  { %v2855_v11 = vpop.f32.mrf.mxu0 }
0x10d7   :  { %v2859_v61 = vpack.c.bf16 %v2858_v25, %v2858_v25 }
0x10d8   :  { %v3177_v41 = vpop.f32.mrf.mxu0 }
0x10d9   :  { %3195 = vmatmul.mubr.bf16.vlgmr.msra.gmra.mxu1 %v2859_v61 }
0x1199   :  { %v2965_v19 = vpop.f32.mrf.mxu1 }
0x119a   :  { %v2966_v43 = vadd.f32 %v3131_v24, %v2965_v19 }
0x119b   :  { %v3196_v46 = vpop.f32.mrf.mxu1 }
0x119c   :  { %2972 = vst.msk [vmem:[#allocation5] sm:$0xff] %vm2971_vm1, %v2966_v43 }
0x119d   :  { %v2968_v8 = vpop.f32.mrf.mxu1 }
0x119e   :  { %3654 = shalt.err (!%p3651_p4)
}
0x119f   :  { %2982 = dma.vmem_to_hbm [thread:$0]  %s2980_s25, 128, %s5285_s8, [#allocation6]   ;;  %v3197_v47 = vpop.f32.mrf.mxu1 }
0x11a0   :  { %3663 = dma.done.wait [#allocation6], 128  }
0x11a1   :  { %3664 = vsyncadd [#allocation6], 4294967168 }
0x11a2   :  { %2986 = vsyncpa [#allocation6], 1 }

</bundles_post_ra>
